<compile_context>
chip_gen: v7x
topology: tpu7x:2x2x1
jax: 0.10.0
libtpu: 0.0.40
codegen_flags: <defaults>
</compile_context>

<pallas_src>
import jax
import jax.numpy as jnp
from jax.experimental import pallas as pl
from jax.experimental.pallas import tpu as pltpu

T = 120        # time steps (fixed by the module: 16 * 118 vafc1 input)
NWIN = 118     # conv output windows
D_V = 1024     # video feature dim
D_H = 128      # hidden dim of vfc1 / afc1
C_OUT = 16     # conv output channels
K_WIN = 3      # conv kernel spans 3 consecutive 128-blocks
D_FC1 = 1024   # vafc1 output dim
N_CLS = 2      # vafc2 output dim


def _batch_block(bs: int, cap: int = 4) -> int:
    """Largest divisor of bs that is <= cap while leaving >= 2 grid steps
    (keeps both TensorCores busy on v7x); falls back to 1."""
    for bb in range(min(cap, bs), 0, -1):
        if bs % bb == 0 and bs // bb >= 2:
            return bb
    return 1


# ----------------------------------------------------------------------------
# Stage 1: vfc1 + afc1 + ReLU + conv1 (BB batch elements per grid step)
# ----------------------------------------------------------------------------
def _make_stage1_kernel(bb: int):
    def _stage1_kernel(vf_ref, af_ref, wv_ref, bv_ref, wa_ref, ba_ref,
                       wc_ref, bc_ref, out_ref):
        # Exact 0/1 shift matrices S_k[w, w+k] = 1; built once per grid step
        # and reused by every batch element of the tile.
        row = jax.lax.broadcasted_iota(jnp.int32, (T, T), 0)
        col = jax.lax.broadcasted_iota(jnp.int32, (T, T), 1)
        shifts = [(col == row + k).astype(jnp.float32) for k in range(1, K_WIN)]

        for b in range(bb):  # static unroll over the batch tile
            # vfc1 / afc1 + ReLU (bf16 MXU inputs, f32 accumulation)
            xv = vf_ref[b].astype(wv_ref.dtype)                     # (120, 1024)
            xa = af_ref[b].astype(wa_ref.dtype)                     # (120, 128)
            v = jnp.dot(xv, wv_ref[...],
                        preferred_element_type=jnp.float32) + bv_ref[...]
            v = jnp.maximum(v, 0.0)
            a = jnp.dot(xa, wa_ref[...],
                        preferred_element_type=jnp.float32) + ba_ref[...]
            a = jnp.maximum(a, 0.0)
            va = jnp.concatenate([v, a], axis=1).astype(wc_ref.dtype)  # (120, 256)

            # Conv2d(1,16,(2,384),stride=128) as shift-and-accumulate matmuls:
            #   conv[w, c] = sum_k P_k[w + k, c] + bias,  P_k = [v|a] @ Wc_k
            acc = jnp.zeros((T, C_OUT), jnp.float32) + bc_ref[...]
            for k in range(K_WIN):
                p = jnp.dot(va, wc_ref[k],
                            preferred_element_type=jnp.float32)     # (120, 16)
                if k == 0:
                    acc = acc + p
                else:
                    acc = acc + jnp.dot(shifts[k - 1], p,
                                        preferred_element_type=jnp.float32)
            # Rows 118/119 hold wrap-around partial sums; they hit zero rows of
            # the padded vafc1 weight in stage 2 and contribute nothing.
            out_ref[b] = acc

    return _stage1_kernel


def _stage1(prep, vfeat, afeat):
    bs = vfeat.shape[0]
    bb = _batch_block(bs)
    return pl.pallas_call(
        _make_stage1_kernel(bb),
        out_shape=jax.ShapeDtypeStruct((bs, T, C_OUT), jnp.float32),
        grid=(bs // bb,),
        in_specs=[
            pl.BlockSpec((bb, T, D_V), lambda b: (b, 0, 0)),
            pl.BlockSpec((bb, T, D_H), lambda b: (b, 0, 0)),
            pl.BlockSpec((D_V, D_H), lambda b: (0, 0)),          # resident weights
            pl.BlockSpec((1, D_H), lambda b: (0, 0)),
            pl.BlockSpec((D_H, D_H), lambda b: (0, 0)),
            pl.BlockSpec((1, D_H), lambda b: (0, 0)),
            pl.BlockSpec((K_WIN, 2 * D_H, C_OUT), lambda b: (0, 0, 0)),
            pl.BlockSpec((1, C_OUT), lambda b: (0, 0)),
        ],
        out_specs=pl.BlockSpec((bb, T, C_OUT), lambda b: (b, 0, 0)),
        compiler_params=pltpu.CompilerParams(
            dimension_semantics=("parallel",),
            vmem_limit_bytes=32 * 1024 * 1024,
        ),
    )(vfeat, afeat, prep["wv1_t"], prep["bv1"], prep["wa1_t"], prep["ba1"],
      prep["wconv"], prep["bconv"])


# ----------------------------------------------------------------------------
# Stage 2: vafc1 + ReLU + vafc2 + softmax (whole batch, weight streamed once)
# ----------------------------------------------------------------------------
def _stage2_kernel(x_ref, w1_ref, b1_ref, w2_ref, b2_ref, out_ref):
    x = x_ref[...].astype(w1_ref.dtype)                             # (bs, 1920)
    h = jnp.dot(x, w1_ref[...], preferred_element_type=jnp.float32) + b1_ref[...]
    h = jnp.maximum(h, 0.0)
    logits = jnp.dot(h.astype(w2_ref.dtype), w2_ref[...],
                     preferred_element_type=jnp.float32) + b2_ref[...]
    m = jnp.max(logits, axis=-1, keepdims=True)
    e = jnp.exp(logits - m)
    out_ref[...] = (e / jnp.sum(e, axis=-1, keepdims=True)).astype(out_ref.dtype)


def _stage2(prep, x):
    bs = x.shape[0]
    return pl.pallas_call(
        _stage2_kernel,
        out_shape=jax.ShapeDtypeStruct((bs, N_CLS), jnp.float32),
        grid=(1,),
        in_specs=[
            pl.BlockSpec((bs, T * C_OUT), lambda i: (0, 0)),
            pl.BlockSpec((T * C_OUT, D_FC1), lambda i: (0, 0)),
            pl.BlockSpec((1, D_FC1), lambda i: (0, 0)),
            pl.BlockSpec((D_FC1, N_CLS), lambda i: (0, 0)),
            pl.BlockSpec((1, N_CLS), lambda i: (0, 0)),
        ],
        out_specs=pl.BlockSpec((bs, N_CLS), lambda i: (0, 0)),
        compiler_params=pltpu.CompilerParams(
            dimension_semantics=("arbitrary",),
            vmem_limit_bytes=32 * 1024 * 1024,
        ),
    )(x, prep["w1_t"], prep["b1"], prep["w2_t"], prep["b2"])


# ----------------------------------------------------------------------------
# Offline parameter preparation (one-time: transpose / permute / pad / cast)
# ----------------------------------------------------------------------------
def prepare_params(params, compute_dtype=jnp.bfloat16):
    # vfc1 / afc1: torch Linear (out, in) -> pre-transposed (in, out)
    wv1_t = params["vfc1_w"].T.astype(compute_dtype)                # (1024, 128)
    wa1_t = params["afc1_w"].T.astype(compute_dtype)                # (128, 128)
    # conv1 weight (16,1,2,384) -> (3 shifts, 256=[v|a], 16 channels)
    cw = params["conv1_w"].reshape(C_OUT, 2, K_WIN, D_H)            # (c, row, k, d)
    wconv = jnp.transpose(cw, (2, 1, 3, 0)).reshape(K_WIN, 2 * D_H, C_OUT)
    wconv = wconv.astype(compute_dtype)
    # vafc1 weight (1024, 16*118) indexed c*118+w  ->  (120*16, 1024) indexed
    # w*16+c, zero-padded for w in {118, 119} (matches the w-major flatten of
    # the stage-1 output and absorbs its two wrap-around rows).
    w1 = params["vafc1_w"].reshape(D_FC1, C_OUT, NWIN)              # (j, c, w)
    w1 = jnp.transpose(w1, (2, 1, 0))                               # (w, c, j)
    w1 = jnp.pad(w1, ((0, T - NWIN), (0, 0), (0, 0)))               # (120, 16, j)
    w1_t = w1.reshape(T * C_OUT, D_FC1).astype(compute_dtype)       # (1920, 1024)
    w2_t = params["vafc2_w"].T.astype(compute_dtype)                # (1024, 2)
    return {
        "wv1_t": wv1_t,
        "bv1": params["vfc1_b"].reshape(1, D_H).astype(jnp.float32),
        "wa1_t": wa1_t,
        "ba1": params["afc1_b"].reshape(1, D_H).astype(jnp.float32),
        "wconv": wconv,
        "bconv": params["conv1_b"].reshape(1, C_OUT).astype(jnp.float32),
        "w1_t": w1_t,
        "b1": params["vafc1_b"].reshape(1, D_FC1).astype(jnp.float32),
        "w2_t": w2_t,
        "b2": params["vafc2_b"].reshape(1, N_CLS).astype(jnp.float32),
    }


@jax.jit
def va_lstm_forward(prep, vfeat, afeat):
    bs = vfeat.shape[0]
    assert vfeat.shape[1] == T and vfeat.shape[2] == D_V
    # Dropout(p=0.3) is identity at inference.
    # TODO(synk): training-mode dropout (random masking) not implemented.
    conv = _stage1(prep, vfeat, afeat)          # (bs, 120, 16)
    x = conv.reshape(bs, T * C_OUT)             # free row-major bitcast (w*16+c)
    return _stage2(prep, x)                     # (bs, 2)


# ----------------------------------------------------------------------------
# Pure-JAX reference of the PyTorch graph (for correctness checking only)
# ----------------------------------------------------------------------------
def reference_forward(params, vfeat, afeat):
    bs = vfeat.shape[0]
    v = jax.nn.relu(jnp.einsum("btk,ok->bto", vfeat, params["vfc1_w"]) + params["vfc1_b"])
    a = jax.nn.relu(jnp.einsum("btk,ok->bto", afeat, params["afc1_w"]) + params["afc1_b"])
    vrow = v.reshape(bs, T * D_H)
    arow = a.reshape(bs, T * D_H)
    idx = jnp.arange(NWIN)[:, None] * D_H + jnp.arange(K_WIN * D_H)[None, :]
    seg_v = vrow[:, idx]                                            # (bs, 118, 384)
    seg_a = arow[:, idx]
    wv = params["conv1_w"][:, 0, 0, :]                              # (16, 384)
    wa = params["conv1_w"][:, 0, 1, :]
    conv = (jnp.einsum("bwd,cd->bcw", seg_v, wv)
            + jnp.einsum("bwd,cd->bcw", seg_a, wa)
            + params["conv1_b"][None, :, None])                     # (bs, 16, 118)
    va = conv.reshape(bs, C_OUT * NWIN)                             # index c*118+w
    h = jax.nn.relu(jnp.einsum("bi,oi->bo", va, params["vafc1_w"]) + params["vafc1_b"])
    logits = jnp.einsum("bi,oi->bo", h, params["vafc2_w"]) + params["vafc2_b"]
    return jax.nn.softmax(logits, axis=-1)


def _xavier_normal(key, shape):
    # torch Linear weight layout: (out_features, in_features)
    fan_out, fan_in = shape
    std = (2.0 / (fan_in + fan_out)) ** 0.5
    return std * jax.random.normal(key, shape, dtype=jnp.float32)


if __name__ == "__main__":
    key = jax.random.PRNGKey(0)
    ks = jax.random.split(key, 6)

    params = {
        "vfc1_w": _xavier_normal(ks[0], (128, 1024)),
        "vfc1_b": jnp.zeros((128,), jnp.float32),
        "afc1_w": _xavier_normal(ks[1], (128, 128)),
        "afc1_b": jnp.zeros((128,), jnp.float32),
        # Conv2d(1, 16, kernel_size=(2, 384), stride=128)
        "conv1_w": 0.02 * jax.random.normal(ks[2], (16, 1, 2, 384), jnp.float32),
        "conv1_b": 0.02 * jax.random.normal(ks[3], (16,), jnp.float32),
        "vafc1_w": _xavier_normal(ks[4], (1024, 16 * 118)),
        "vafc1_b": jnp.zeros((1024,), jnp.float32),
        "vafc2_w": _xavier_normal(ks[5], (2, 1024)),
        "vafc2_b": jnp.zeros((2,), jnp.float32),
    }
    prep = prepare_params(params, jnp.bfloat16)

    # Exercise both the single-element (bs=2 -> BB=1) and batched
    # (bs=4 -> BB=2) stage-1 tiling paths.
    for bs in (2, 4):
        kin = jax.random.fold_in(key, bs)
        kv, ka = jax.random.split(kin)
        vfeat = jax.random.normal(kv, (bs, T, D_V), jnp.float32)
        afeat = jax.random.normal(ka, (bs, T, D_H), jnp.float32)

        sim = jax.block_until_ready(va_lstm_forward(prep, vfeat, afeat))

        with jax.default_matmul_precision("highest"):
            ref = jax.block_until_ready(reference_forward(params, vfeat, afeat))

        assert sim.shape == (bs, N_CLS)
        assert bool(jnp.all(jnp.isfinite(sim)))
        assert bool(jnp.allclose(jnp.sum(sim, axis=-1), 1.0, atol=1e-5))
        assert bool(jnp.allclose(sim, ref, atol=5e-2))   # bf16 matmuls vs f32 ref

    print("KERNEL_OK")
</pallas_src>

<mosaic_0001>
module attributes {stable_mosaic.version = 11 : i64} {
  func.func @_stage1_kernel(%arg0: i32, %arg1: memref<1x120x1024xf32, #tpu.memory_space<vmem>>, %arg2: memref<1x120x128xf32, #tpu.memory_space<vmem>>, %arg3: memref<1024x128xbf16, #tpu.memory_space<vmem>>, %arg4: memref<1x128xf32, #tpu.memory_space<vmem>>, %arg5: memref<128x128xbf16, #tpu.memory_space<vmem>>, %arg6: memref<1x128xf32, #tpu.memory_space<vmem>>, %arg7: memref<3x256x16xbf16, #tpu.memory_space<vmem>>, %arg8: memref<1x16xf32, #tpu.memory_space<vmem>>, %arg9: memref<1x120x16xf32, #tpu.memory_space<vmem>>) attributes {dimension_semantics = [#tpu.dimension_semantics<parallel>], iteration_bounds = array<i64: 2>, scalar_prefetch = 0 : i64, scratch_operands = 0 : i64, tpu.core_type = #tpu.core_type<tc>, window_params = [{transform_indices = @transform_0, window_bounds = array<i64: 1, 120, 1024>}, {transform_indices = @transform_1, window_bounds = array<i64: 1, 120, 128>}, {pipeline_mode = #tpu.pipeline_mode<synchronous>, transform_indices = @transform_2, window_bounds = array<i64: 1024, 128>}, {pipeline_mode = #tpu.pipeline_mode<synchronous>, transform_indices = @transform_3, window_bounds = array<i64: 1, 128>}, {pipeline_mode = #tpu.pipeline_mode<synchronous>, transform_indices = @transform_4, window_bounds = array<i64: 128, 128>}, {pipeline_mode = #tpu.pipeline_mode<synchronous>, transform_indices = @transform_5, window_bounds = array<i64: 1, 128>}, {pipeline_mode = #tpu.pipeline_mode<synchronous>, transform_indices = @transform_6, window_bounds = array<i64: 3, 256, 16>}, {pipeline_mode = #tpu.pipeline_mode<synchronous>, transform_indices = @transform_7, window_bounds = array<i64: 1, 16>}, {transform_indices = @transform_8, window_bounds = array<i64: 1, 120, 16>}]} {
    %0 = tpu.iota {dimensions = array<i32: 0>} : vector<120x120xi32>
    %1 = tpu.iota {dimensions = array<i32: 1>} : vector<120x120xi32>
    %c1_i32 = arith.constant 1 : i32
    %2 = vector.broadcast %c1_i32 : i32 to vector<120x120xi32>
    %3 = arith.addi %0, %2 : vector<120x120xi32>
    %4 = arith.cmpi eq, %1, %3 : vector<120x120xi32>
    %5 = arith.extui %4 : vector<120x120xi1> to vector<120x120xi32>
    %6 = arith.sitofp %5 : vector<120x120xi32> to vector<120x120xf32>
    %c2_i32 = arith.constant 2 : i32
    %7 = vector.broadcast %c2_i32 : i32 to vector<120x120xi32>
    %8 = arith.addi %0, %7 : vector<120x120xi32>
    %9 = arith.cmpi eq, %1, %8 : vector<120x120xi32>
    %10 = arith.extui %9 : vector<120x120xi1> to vector<120x120xi32>
    %11 = arith.sitofp %10 : vector<120x120xi32> to vector<120x120xf32>
    %c0 = arith.constant 0 : index
    %c0_0 = arith.constant 0 : index
    %c0_1 = arith.constant 0 : index
    %12 = vector.load %arg1[%c0, %c0_0, %c0_1] : memref<1x120x1024xf32, #tpu.memory_space<vmem>>, vector<1x120x1024xf32>
    %13 = vector.shape_cast %12 : vector<1x120x1024xf32> to vector<120x1024xf32>
    %14 = arith.truncf %13 : vector<120x1024xf32> to vector<120x1024xbf16>
    %c0_2 = arith.constant 0 : index
    %c0_3 = arith.constant 0 : index
    %c0_4 = arith.constant 0 : index
    %15 = vector.load %arg2[%c0_2, %c0_3, %c0_4] : memref<1x120x128xf32, #tpu.memory_space<vmem>>, vector<1x120x128xf32>
    %16 = vector.shape_cast %15 : vector<1x120x128xf32> to vector<120x128xf32>
    %17 = arith.truncf %16 : vector<120x128xf32> to vector<120x128xbf16>
    %c0_5 = arith.constant 0 : index
    %c0_6 = arith.constant 0 : index
    %18 = vector.load %arg3[%c0_5, %c0_6] : memref<1024x128xbf16, #tpu.memory_space<vmem>>, vector<1024x128xbf16>
    %cst = arith.constant dense<0.000000e+00> : vector<120x128xf32>
    %19 = tpu.matmul %14, %18, %cst {dimension_numbers = #tpu.dot_dimension_numbers<[1], [0], [0], [1], [0, 0, 1, 1], [], []>} : vector<120x1024xbf16>, vector<1024x128xbf16>, vector<120x128xf32> -> vector<120x128xf32>
    %c0_7 = arith.constant 0 : index
    %c0_8 = arith.constant 0 : index
    %20 = vector.load %arg4[%c0_7, %c0_8] : memref<1x128xf32, #tpu.memory_space<vmem>>, vector<1x128xf32>
    %21 = vector.broadcast %20 : vector<1x128xf32> to vector<120x128xf32>
    %22 = arith.addf %19, %21 : vector<120x128xf32>
    %cst_9 = arith.constant 0.000000e+00 : f32
    %23 = vector.broadcast %cst_9 : f32 to vector<120x128xf32>
    %24 = arith.maximumf %22, %23 : vector<120x128xf32>
    %c0_10 = arith.constant 0 : index
    %c0_11 = arith.constant 0 : index
    %25 = vector.load %arg5[%c0_10, %c0_11] : memref<128x128xbf16, #tpu.memory_space<vmem>>, vector<128x128xbf16>
    %cst_12 = arith.constant dense<0.000000e+00> : vector<120x128xf32>
    %26 = tpu.matmul %17, %25, %cst_12 {dimension_numbers = #tpu.dot_dimension_numbers<[1], [0], [0], [1], [0, 0, 1, 1], [], []>} : vector<120x128xbf16>, vector<128x128xbf16>, vector<120x128xf32> -> vector<120x128xf32>
    %c0_13 = arith.constant 0 : index
    %c0_14 = arith.constant 0 : index
    %27 = vector.load %arg6[%c0_13, %c0_14] : memref<1x128xf32, #tpu.memory_space<vmem>>, vector<1x128xf32>
    %28 = vector.broadcast %27 : vector<1x128xf32> to vector<120x128xf32>
    %29 = arith.addf %26, %28 : vector<120x128xf32>
    %cst_15 = arith.constant 0.000000e+00 : f32
    %30 = vector.broadcast %cst_15 : f32 to vector<120x128xf32>
    %31 = arith.maximumf %29, %30 : vector<120x128xf32>
    %32 = tpu.concatenate %24, %31 in 1 : vector<120x128xf32>, vector<120x128xf32> -> vector<120x256xf32>
    %33 = arith.truncf %32 : vector<120x256xf32> to vector<120x256xbf16>
    %cst_16 = arith.constant 0.000000e+00 : f32
    %34 = vector.broadcast %cst_16 : f32 to vector<120x16xf32>
    %c0_17 = arith.constant 0 : index
    %c0_18 = arith.constant 0 : index
    %35 = vector.load %arg8[%c0_17, %c0_18] : memref<1x16xf32, #tpu.memory_space<vmem>>, vector<1x16xf32>
    %36 = vector.broadcast %35 : vector<1x16xf32> to vector<120x16xf32>
    %37 = arith.addf %34, %36 : vector<120x16xf32>
    %c0_19 = arith.constant 0 : index
    %c0_20 = arith.constant 0 : index
    %c0_21 = arith.constant 0 : index
    %38 = vector.load %arg7[%c0_19, %c0_20, %c0_21] : memref<3x256x16xbf16, #tpu.memory_space<vmem>>, vector<1x256x16xbf16>
    %39 = vector.shape_cast %38 : vector<1x256x16xbf16> to vector<256x16xbf16>
    %cst_22 = arith.constant dense<0.000000e+00> : vector<120x16xf32>
    %40 = tpu.matmul %33, %39, %cst_22 {dimension_numbers = #tpu.dot_dimension_numbers<[1], [0], [0], [1], [0, 0, 1, 1], [], []>} : vector<120x256xbf16>, vector<256x16xbf16>, vector<120x16xf32> -> vector<120x16xf32>
    %41 = arith.addf %37, %40 : vector<120x16xf32>
    %c1 = arith.constant 1 : index
    %c0_23 = arith.constant 0 : index
    %c0_24 = arith.constant 0 : index
    %42 = vector.load %arg7[%c1, %c0_23, %c0_24] : memref<3x256x16xbf16, #tpu.memory_space<vmem>>, vector<1x256x16xbf16>
    %43 = vector.shape_cast %42 : vector<1x256x16xbf16> to vector<256x16xbf16>
    %cst_25 = arith.constant dense<0.000000e+00> : vector<120x16xf32>
    %44 = tpu.matmul %33, %43, %cst_25 {dimension_numbers = #tpu.dot_dimension_numbers<[1], [0], [0], [1], [0, 0, 1, 1], [], []>} : vector<120x256xbf16>, vector<256x16xbf16>, vector<120x16xf32> -> vector<120x16xf32>
    %cst_26 = arith.constant dense<0.000000e+00> : vector<120x16xf32>
    %45 = tpu.matmul %6, %44, %cst_26 {dimension_numbers = #tpu.dot_dimension_numbers<[1], [0], [0], [1], [0, 0, 1, 1], [], []>} : vector<120x120xf32>, vector<120x16xf32>, vector<120x16xf32> -> vector<120x16xf32>
    %46 = arith.addf %41, %45 : vector<120x16xf32>
    %c2 = arith.constant 2 : index
    %c0_27 = arith.constant 0 : index
    %c0_28 = arith.constant 0 : index
    %47 = vector.load %arg7[%c2, %c0_27, %c0_28] : memref<3x256x16xbf16, #tpu.memory_space<vmem>>, vector<1x256x16xbf16>
    %48 = vector.shape_cast %47 : vector<1x256x16xbf16> to vector<256x16xbf16>
    %cst_29 = arith.constant dense<0.000000e+00> : vector<120x16xf32>
    %49 = tpu.matmul %33, %48, %cst_29 {dimension_numbers = #tpu.dot_dimension_numbers<[1], [0], [0], [1], [0, 0, 1, 1], [], []>} : vector<120x256xbf16>, vector<256x16xbf16>, vector<120x16xf32> -> vector<120x16xf32>
    %cst_30 = arith.constant dense<0.000000e+00> : vector<120x16xf32>
    %50 = tpu.matmul %11, %49, %cst_30 {dimension_numbers = #tpu.dot_dimension_numbers<[1], [0], [0], [1], [0, 0, 1, 1], [], []>} : vector<120x120xf32>, vector<120x16xf32>, vector<120x16xf32> -> vector<120x16xf32>
    %51 = arith.addf %46, %50 : vector<120x16xf32>
    %c0_31 = arith.constant 0 : index
    %c0_32 = arith.constant 0 : index
    %c0_33 = arith.constant 0 : index
    %52 = vector.load %arg9[%c0_31, %c0_32, %c0_33] : memref<1x120x16xf32, #tpu.memory_space<vmem>>, vector<1x120x16xf32>
    %53 = vector.shape_cast %52 : vector<1x120x16xf32> to vector<120x16xf32>
    %54 = vector.shape_cast %51 : vector<120x16xf32> to vector<1x120x16xf32>
    tpu.vector_store %arg9[%c0_31, %c0_32, %c0_33], %54 {strides = array<i32>} : memref<1x120x16xf32, #tpu.memory_space<vmem>>, vector<1x120x16xf32>,
    return
  }
  func.func @transform_0(%arg0: i32) -> (i32, i32, i32) {
    %c0_i32 = arith.constant 0 : i32
    %c0_i32_0 = arith.constant 0 : i32
    %c0_i32_1 = arith.constant 0 : i32
    return %arg0, %c0_i32, %c0_i32_0 : i32, i32, i32
  }
  func.func @transform_1(%arg0: i32) -> (i32, i32, i32) {
    %c0_i32 = arith.constant 0 : i32
    %c0_i32_0 = arith.constant 0 : i32
    %c0_i32_1 = arith.constant 0 : i32
    return %arg0, %c0_i32, %c0_i32_0 : i32, i32, i32
  }
  func.func @transform_2(%arg0: i32) -> (i32, i32) {
    %c0_i32 = arith.constant 0 : i32
    %c0_i32_0 = arith.constant 0 : i32
    %c0_i32_1 = arith.constant 0 : i32
    return %c0_i32, %c0_i32_0 : i32, i32
  }
  func.func @transform_3(%arg0: i32) -> (i32, i32) {
    %c0_i32 = arith.constant 0 : i32
    %c0_i32_0 = arith.constant 0 : i32
    %c0_i32_1 = arith.constant 0 : i32
    return %c0_i32, %c0_i32_0 : i32, i32
  }
  func.func @transform_4(%arg0: i32) -> (i32, i32) {
    %c0_i32 = arith.constant 0 : i32
    %c0_i32_0 = arith.constant 0 : i32
    %c0_i32_1 = arith.constant 0 : i32
    return %c0_i32, %c0_i32_0 : i32, i32
  }
  func.func @transform_5(%arg0: i32) -> (i32, i32) {
    %c0_i32 = arith.constant 0 : i32
    %c0_i32_0 = arith.constant 0 : i32
    %c0_i32_1 = arith.constant 0 : i32
    return %c0_i32, %c0_i32_0 : i32, i32
  }
  func.func @transform_6(%arg0: i32) -> (i32, i32, i32) {
    %c0_i32 = arith.constant 0 : i32
    %c0_i32_0 = arith.constant 0 : i32
    %c0_i32_1 = arith.constant 0 : i32
    %c0_i32_2 = arith.constant 0 : i32
    return %c0_i32, %c0_i32_0, %c0_i32_1 : i32, i32, i32
  }
  func.func @transform_7(%arg0: i32) -> (i32, i32) {
    %c0_i32 = arith.constant 0 : i32
    %c0_i32_0 = arith.constant 0 : i32
    %c0_i32_1 = arith.constant 0 : i32
    return %c0_i32, %c0_i32_0 : i32, i32
  }
  func.func @transform_8(%arg0: i32) -> (i32, i32, i32) {
    %c0_i32 = arith.constant 0 : i32
    %c0_i32_0 = arith.constant 0 : i32
    %c0_i32_1 = arith.constant 0 : i32
    return %arg0, %c0_i32, %c0_i32_0 : i32, i32, i32
  }
}

module attributes {stable_mosaic.version = 11 : i64} {
  func.func @_stage2_kernel(%arg0: i32, %arg1: memref<2x1920xf32, #tpu.memory_space<vmem>>, %arg2: memref<1920x1024xbf16, #tpu.memory_space<vmem>>, %arg3: memref<1x1024xf32, #tpu.memory_space<vmem>>, %arg4: memref<1024x2xbf16, #tpu.memory_space<vmem>>, %arg5: memref<1x2xf32, #tpu.memory_space<vmem>>, %arg6: memref<2x2xf32, #tpu.memory_space<vmem>>) attributes {dimension_semantics = [#tpu.dimension_semantics<arbitrary>], iteration_bounds = array<i64: 1>, scalar_prefetch = 0 : i64, scratch_operands = 0 : i64, tpu.core_type = #tpu.core_type<tc>, window_params = [{pipeline_mode = #tpu.pipeline_mode<synchronous>, transform_indices = @transform_0, window_bounds = array<i64: 2, 1920>}, {pipeline_mode = #tpu.pipeline_mode<synchronous>, transform_indices = @transform_1, window_bounds = array<i64: 1920, 1024>}, {pipeline_mode = #tpu.pipeline_mode<synchronous>, transform_indices = @transform_2, window_bounds = array<i64: 1, 1024>}, {pipeline_mode = #tpu.pipeline_mode<synchronous>, transform_indices = @transform_3, window_bounds = array<i64: 1024, 2>}, {pipeline_mode = #tpu.pipeline_mode<synchronous>, transform_indices = @transform_4, window_bounds = array<i64: 1, 2>}, {pipeline_mode = #tpu.pipeline_mode<synchronous>, transform_indices = @transform_5, window_bounds = array<i64: 2, 2>}]} {
    %c0 = arith.constant 0 : index
    %c0_0 = arith.constant 0 : index
    %0 = vector.load %arg1[%c0, %c0_0] : memref<2x1920xf32, #tpu.memory_space<vmem>>, vector<2x1920xf32>
    %1 = arith.truncf %0 : vector<2x1920xf32> to vector<2x1920xbf16>
    %c0_1 = arith.constant 0 : index
    %c0_2 = arith.constant 0 : index
    %2 = vector.load %arg2[%c0_1, %c0_2] : memref<1920x1024xbf16, #tpu.memory_space<vmem>>, vector<1920x1024xbf16>
    %cst = arith.constant dense<0.000000e+00> : vector<2x1024xf32>
    %3 = tpu.matmul %1, %2, %cst {dimension_numbers = #tpu.dot_dimension_numbers<[1], [0], [0], [1], [0, 0, 1, 1], [], []>} : vector<2x1920xbf16>, vector<1920x1024xbf16>, vector<2x1024xf32> -> vector<2x1024xf32>
    %c0_3 = arith.constant 0 : index
    %c0_4 = arith.constant 0 : index
    %4 = vector.load %arg3[%c0_3, %c0_4] : memref<1x1024xf32, #tpu.memory_space<vmem>>, vector<1x1024xf32>
    %5 = vector.broadcast %4 : vector<1x1024xf32> to vector<2x1024xf32>
    %6 = arith.addf %3, %5 : vector<2x1024xf32>
    %cst_5 = arith.constant 0.000000e+00 : f32
    %7 = vector.broadcast %cst_5 : f32 to vector<2x1024xf32>
    %8 = arith.maximumf %6, %7 : vector<2x1024xf32>
    %9 = arith.truncf %8 : vector<2x1024xf32> to vector<2x1024xbf16>
    %c0_6 = arith.constant 0 : index
    %c0_7 = arith.constant 0 : index
    %10 = vector.load %arg4[%c0_6, %c0_7] : memref<1024x2xbf16, #tpu.memory_space<vmem>>, vector<1024x2xbf16>
    %cst_8 = arith.constant dense<0.000000e+00> : vector<2x2xf32>
    %11 = tpu.matmul %9, %10, %cst_8 {dimension_numbers = #tpu.dot_dimension_numbers<[1], [0], [0], [1], [0, 0, 1, 1], [], []>} : vector<2x1024xbf16>, vector<1024x2xbf16>, vector<2x2xf32> -> vector<2x2xf32>
    %c0_9 = arith.constant 0 : index
    %c0_10 = arith.constant 0 : index
    %12 = vector.load %arg5[%c0_9, %c0_10] : memref<1x2xf32, #tpu.memory_space<vmem>>, vector<1x2xf32>
    %13 = vector.broadcast %12 : vector<1x2xf32> to vector<2x2xf32>
    %14 = arith.addf %11, %13 : vector<2x2xf32>
    %cst_11 = arith.constant dense<0xFF800000> : vector<2xf32>
    %15 = vector.multi_reduction <maximumf>, %14, %cst_11 [1] : vector<2x2xf32> to vector<2xf32>
    %16 = vector.shape_cast %15 : vector<2xf32> to vector<2x1xf32>
    %17 = vector.broadcast %16 : vector<2x1xf32> to vector<2x2xf32>
    %18 = arith.subf %14, %17 : vector<2x2xf32>
    %19 = math.exp %18 : vector<2x2xf32>
    %cst_12 = arith.constant dense<0.000000e+00> : vector<2xf32>
    %20 = vector.multi_reduction <add>, %19, %cst_12 [1] : vector<2x2xf32> to vector<2xf32>
    %21 = vector.shape_cast %20 : vector<2xf32> to vector<2x1xf32>
    %22 = vector.broadcast %21 : vector<2x1xf32> to vector<2x2xf32>
    %23 = arith.divf %19, %22 : vector<2x2xf32>
    %c0_13 = arith.constant 0 : index
    %c0_14 = arith.constant 0 : index
    %24 = vector.load %arg6[%c0_13, %c0_14] : memref<2x2xf32, #tpu.memory_space<vmem>>, vector<2x2xf32>
    tpu.vector_store %arg6[%c0_13, %c0_14], %23 {strides = array<i32>} : memref<2x2xf32, #tpu.memory_space<vmem>>, vector<2x2xf32>,
    return
  }
  func.func @transform_0(%arg0: i32) -> (i32, i32) {
    %c0_i32 = arith.constant 0 : i32
    %c0_i32_0 = arith.constant 0 : i32
    %c0_i32_1 = arith.constant 0 : i32
    return %c0_i32, %c0_i32_0 : i32, i32
  }
  func.func @transform_1(%arg0: i32) -> (i32, i32) {
    %c0_i32 = arith.constant 0 : i32
    %c0_i32_0 = arith.constant 0 : i32
    %c0_i32_1 = arith.constant 0 : i32
    return %c0_i32, %c0_i32_0 : i32, i32
  }
  func.func @transform_2(%arg0: i32) -> (i32, i32) {
    %c0_i32 = arith.constant 0 : i32
    %c0_i32_0 = arith.constant 0 : i32
    %c0_i32_1 = arith.constant 0 : i32
    return %c0_i32, %c0_i32_0 : i32, i32
  }
  func.func @transform_3(%arg0: i32) -> (i32, i32) {
    %c0_i32 = arith.constant 0 : i32
    %c0_i32_0 = arith.constant 0 : i32
    %c0_i32_1 = arith.constant 0 : i32
    return %c0_i32, %c0_i32_0 : i32, i32
  }
  func.func @transform_4(%arg0: i32) -> (i32, i32) {
    %c0_i32 = arith.constant 0 : i32
    %c0_i32_0 = arith.constant 0 : i32
    %c0_i32_1 = arith.constant 0 : i32
    return %c0_i32, %c0_i32_0 : i32, i32
  }
  func.func @transform_5(%arg0: i32) -> (i32, i32) {
    %c0_i32 = arith.constant 0 : i32
    %c0_i32_0 = arith.constant 0 : i32
    %c0_i32_1 = arith.constant 0 : i32
    return %c0_i32, %c0_i32_0 : i32, i32
  }
}

</mosaic_0001>

<bundles_post_ra>
// kernel: va_lstm_forward.2
= control target key start
LH: loop header
LB: loop body
LE: loop exit
PB: predicated region body
PF: predicated region fallthrough
CT: control target
= control target key end

     0   :  { %s5835_s0 = inlined_call_operand.hbm [shape: f32[2,120,1024], index: 0, kind: input, shape index: {}]   ;;  %s5836_s1 = inlined_call_operand.hbm [shape: f32[2,120,128], index: 1, kind: input, shape index: {}]   ;;  %s5837_s2 = inlined_call_operand.hbm [shape: bf16[1024,128], index: 2, kind: input, shape index: {}]   ;;  %s5838_s3 = inlined_call_operand.hbm [shape: f32[1,128], index: 3, kind: input, shape index: {}]   ;;  %s5839_s4 = inlined_call_operand.hbm [shape: bf16[128,128], index: 4, kind: input, shape index: {}]   ;;  %s5840_s5 = inlined_call_operand.hbm [shape: f32[1,128], index: 5, kind: input, shape index: {}]   ;;  %s5841_s6 = inlined_call_operand.vmem [shape: bf16[3,256,16], index: 6, kind: input, shape index: {}]   ;;  %s5842_s7 = inlined_call_operand.hbm [shape: f32[1,16], index: 7, kind: input, shape index: {}]   ;;  %s5843_s8 = inlined_call_operand.vmem [shape: f32[2,120,16], index: 8, kind: output, shape index: {}]  }
   0x1   :  { %5848 = sst [smem:[#allocation18_spill]] %s5835_s0 }
   0x2   :  { %5849 = sst [smem:[#allocation19_spill]] %s5837_s2 }
   0x3   :  { %5850 = sst [smem:[#allocation20_spill]] %s5838_s3 }
   0x4   :  { %13 = vsyncpa [#allocation3], 0 }
   0x5   :  { %15 = vsyncpa [#allocation3 + $0x1], 0 }
   0x6   :  { %16 = vsyncpa [#allocation5], 0 }
   0x7   :  { %18 = vsyncpa [#allocation5 + $0x1], 0 }
   0x8   :  { %19 = vsyncpa [#allocation8], 0 }
   0x9   :  { %20 = vsyncpa [#allocation11], 0  ;;  %s4759_s27 = smov 0   ;;  %s4761_s28 = smov 0  }
   0xa   :  { %s4763_s29 = smov 0   ;;  %s4765_s30 = smov 0  }
   0xb LB: > { %s4699_s9 = smov [#allocation6]   ;;  %s4780_s11 = sadd.s32 4294967295, %s4697_s30   ;;  %s4697_s30 = sphi %s4765_s30, %s5871_s30   ;;  %s4693_s29 = sphi %s4763_s29, %s5870_s29   ;;  %s4689_s28 = sphi %s4761_s28, %s5869_s28   ;;  %s4685_s27 = sphi %s4759_s27, %s5868_s27  }
   0xc   : > { %s247_s10 = sshll.u32 %s4699_s9, 4  ;;  %p3146_p0 = scmp.ge.s32.totalorder %s4697_s30, 1  ;;  %s4785_s10 = int_to_ptr.vmem [resolvable:$true] %s247_s10 }
   0xd   : > { %p5846_p1 = scmp.eq.s32.totalorder %s4780_s11, 0  ;;  %p235_p2 = scmp.lt.s32.totalorder %s4697_s30, 3 }
   0xe   : > { %s4700_s13 = smov [#allocation7]   ;;  %s4701_s16 = smov [#allocation10]  }
   0xf   : > { %p4787_p3 = pnand %p3146_p0, %p235_p2  ;;  %s261_s14 = sshll.u32 %s4700_s13, 4  ;;  %s4799_s14 = int_to_ptr.vmem [resolvable:$true] %s261_s14 }
  0x10   : > { %s285_s17 = sshll.u32 %s4701_s16, 4  ;;  %s5853_s2 = sld [smem:[#allocation19_spill]]  ;;  %s4801_s17 = int_to_ptr.vmem [resolvable:$true] %s285_s17 }
  0x11   : > { %s5851_s12 = scalar_select %p4787_p3, 1, 0 }
  0x12   : > { %p4248_p4 = pneg %p4787_p3 }
  0x14   : > { %p4795_p5 = pnand %p4248_p4, %p5846_p1 }
  0x16   : > { %s4447_s20 = scalar_lea.hbm %s5853_s2, 8192  ;;  %p4811_p7 = pneg %p4795_p5 }
  0x17   : > { %p4448_p6 = scmp.ne.s32.totalorder %s5853_s2, %s4447_s20  ;;  %p4454_p10 = scmp.lt.u32.totalorder %s4447_s20, %s5853_s2 }
  0x19   : > { %p4450_p8 = pnand %p4811_p7, %p4448_p6 }
  0x1b   : > { %p4451_p9 = pneg %p4450_p8 }
  0x1d   : > { %p4456_p11 = pnand %p4454_p10, %p4451_p9 }
  0x1f   : > { %4459 = shalt.err (!%p4456_p11)
}
  0x20   : > { %s4460_s26 = scalar_lea.vmem %s4785_s10, 8192  ;;  %p4468_p2 = scmp.lt.s32.totalorder %s4785_s10, %s4785_s10 }
  0x21   : > { %p4461_p12 = scmp.ne.s32.totalorder %s4785_s10, %s4460_s26  ;;  %p4469_p4 = scmp.lt.s32.totalorder %s4460_s26, %s4460_s26 }
  0x23   : > { %p4463_p13 = pnand %p4461_p12, %p4811_p7  ;;  %p4470_p6 = por %p4469_p4, %p4468_p2 }
  0x25   : > { %p4464_p0 = pneg %p4463_p13 }
  0x27   : > { %p4471_p8 = pnand %p4470_p6, %p4464_p0 }
  0x29   : > { %4474 = shalt.err (!%p4471_p8)
}
  0x2a   : > { %s5844_s9 = smov 64   ;;  %s4703_s13 = smov 4  }
  0x2b   : > { %4251 = dma.hbm_to_vmem [thread:$0]  (!%p4795_p5), %s5853_s2, 8192, %s4785_s10, [#allocation5], %s5844_s9, %s5844_s9, %s4703_s13  }
  0x2c   : > { %s5855_s3 = sld [smem:[#allocation20_spill]] }
  0x32   : > { %s4475_s21 = scalar_lea.hbm %s5855_s3, 16 }
  0x33   : > { %p4476_p9 = scmp.ne.s32.totalorder %s5855_s3, %s4475_s21  ;;  %p4482_p12 = scmp.lt.u32.totalorder %s4475_s21, %s5855_s3 }
  0x35   : > { %p4478_p10 = pnand %p4476_p9, %p4811_p7 }
  0x37   : > { %p4479_p11 = pneg %p4478_p10 }
  0x39   : > { %p4484_p13 = pnand %p4482_p12, %p4479_p11 }
  0x3b   : > { %4487 = shalt.err (!%p4484_p13)
}
  0x3c   : > { %s4488_s10 = scalar_lea.vmem %s4799_s14, 16  ;;  %s4495_s16 = scalar_lea.vmem %s4799_s14, 32 }
  0x3d   : > { %p4489_p0 = scmp.ne.s32.totalorder %s4799_s14, %s4488_s10  ;;  %p4496_p6 = scmp.lt.s32.totalorder %s4799_s14, %s4799_s14 }
  0x3e   : > { %p4497_p8 = scmp.lt.s32.totalorder %s4495_s16, %s4488_s10 }
  0x3f   : > { %p4491_p2 = pnand %p4489_p0, %p4811_p7 }
  0x40   : > { %p4498_p9 = por %p4497_p8, %p4496_p6 }
  0x41   : > { %p4492_p4 = pneg %p4491_p2 }
  0x43   : > { %p4499_p10 = pnand %p4498_p9, %p4492_p4 }
  0x45   : > { %4502 = shalt.err (!%p4499_p10)
}
  0x46   : > { %4254 = dma.hbm_to_vmem [thread:$0]  (!%p4795_p5), %s5855_s3, 16, %s4799_s14, [#allocation8]  }
  0x47   : > { %s4503_s22 = scalar_lea.hbm %s5840_s5, 16 }
  0x48   : > { %p4504_p11 = scmp.ne.s32.totalorder %s5840_s5, %s4503_s22  ;;  %p4510_p0 = scmp.lt.u32.totalorder %s4503_s22, %s5840_s5 }
  0x4a   : > { %p4506_p12 = pnand %p4504_p11, %p4811_p7 }
  0x4c   : > { %p4507_p13 = pneg %p4506_p12 }
  0x4e   : > { %p4512_p2 = pnand %p4510_p0, %p4507_p13 }
  0x50   : > { %4515 = shalt.err (!%p4512_p2)
}
  0x51   : > { %s4516_s14 = scalar_lea.vmem %s4801_s17, 16  ;;  %s4523_s16 = scalar_lea.vmem %s4801_s17, 32 }
  0x52   : > { %p4517_p4 = scmp.ne.s32.totalorder %s4801_s17, %s4516_s14  ;;  %p4524_p9 = scmp.lt.s32.totalorder %s4801_s17, %s4801_s17 }
  0x53   : > { %p4525_p10 = scmp.lt.s32.totalorder %s4523_s16, %s4516_s14 }
  0x54   : > { %p4519_p6 = pnand %p4517_p4, %p4811_p7 }
  0x55   : > { %p4526_p11 = por %p4525_p10, %p4524_p9 }
  0x56   : > { %p4520_p8 = pneg %p4519_p6 }
  0x58   : > { %p4527_p12 = pnand %p4526_p11, %p4520_p8 }
  0x5a   : > { %4530 = shalt.err (!%p4527_p12)
}
  0x5b   : > { %4260 = dma.hbm_to_vmem [thread:$0]  (!%p4795_p5), %s5840_s5, 16, %s4801_s17, [#allocation11]  }
  0x5c   : > { %s4704_s20 = smov [#allocation9]   ;;  %s4705_s22 = smov [#allocation12]  }
  0x5d   : > { %s271_s21 = sshll.u32 %s4704_s20, 4  ;;  %s299_s24 = sshll.u32 %s4705_s22, 4  ;;  %s272_s21 = int_to_ptr.vmem [resolvable:$true] %s271_s21  ;;  %s300_s24 = int_to_ptr.vmem [resolvable:$true] %s299_s24 }
  0x5e   : > { %s4531_s10 = scalar_lea.hbm %s5839_s4, 1024 }
  0x5f   : > { %p4532_p13 = scmp.ne.s32.totalorder %s5839_s4, %s4531_s10  ;;  %p4538_p4 = scmp.lt.u32.totalorder %s4531_s10, %s5839_s4 }
  0x61   : > { %p4534_p0 = pnand %p4532_p13, %p4811_p7 }
  0x63   : > { %p4535_p2 = pneg %p4534_p0 }
  0x65   : > { %p4540_p6 = pnand %p4538_p4, %p4535_p2 }
  0x67   : > { %4543 = shalt.err (!%p4540_p6)
}
  0x68   : > { %s4544_s17 = scalar_lea.vmem %s272_s21, 1024  ;;  %p4552_p11 = scmp.lt.s32.totalorder %s272_s21, %s272_s21 }
  0x69   : > { %p4545_p8 = scmp.ne.s32.totalorder %s272_s21, %s4544_s17  ;;  %p4553_p12 = scmp.lt.s32.totalorder %s4544_s17, %s4544_s17 }
  0x6b   : > { %p4547_p9 = pnand %p4545_p8, %p4811_p7  ;;  %p4554_p1 = por %p4553_p12, %p4552_p11 }
  0x6d   : > { %p4548_p10 = pneg %p4547_p9 }
  0x6f   : > { %p4555_p3 = pnand %p4554_p1, %p4548_p10 }
  0x71   : > { %4558 = shalt.err (!%p4555_p3)
}
  0x72   : > { %s5856_s19 = smov 64   ;;  %s4559_s26 = scalar_lea.hbm %s5842_s7, 16 }
  0x73   : > { %4257 = dma.hbm_to_vmem [thread:$0]  (!%p4795_p5), %s5839_s4, 1024, %s272_s21, [#allocation8], %s5856_s19, %s5856_s19, %s4703_s13  }
  0x74   : > { %p4560_p1 = scmp.ne.s32.totalorder %s5842_s7, %s4559_s26  ;;  %p4566_p0 = scmp.lt.u32.totalorder %s4559_s26, %s5842_s7 }
  0x76   : > { %p4562_p3 = pnand %p4560_p1, %p4811_p7 }
  0x78   : > { %p4563_p13 = pneg %p4562_p3 }
  0x7a   : > { %p4568_p2 = pnand %p4566_p0, %p4563_p13 }
  0x7c   : > { %4571 = shalt.err (!%p4568_p2)
}
  0x7d   : > { %s4572_s17 = scalar_lea.vmem %s300_s24, 16  ;;  %s4579_s13 = scalar_lea.vmem %s300_s24, 32 }
  0x7e   : > { %p4573_p4 = scmp.ne.s32.totalorder %s300_s24, %s4572_s17  ;;  %p4580_p9 = scmp.lt.s32.totalorder %s300_s24, %s300_s24 }
  0x7f   : > { %p4581_p10 = scmp.lt.s32.totalorder %s4579_s13, %s4572_s17 }
  0x80   : > { %p4575_p6 = pnand %p4573_p4, %p4811_p7 }
  0x81   : > { %p4582_p11 = por %p4581_p10, %p4580_p9 }
  0x82   : > { %p4576_p8 = pneg %p4575_p6 }
  0x84   : > { %p4583_p12 = pnand %p4582_p11, %p4576_p8 }
  0x86   : > { %4586 = shalt.err (!%p4583_p12)
}
  0x87   : > { %4263 = dma.hbm_to_vmem [thread:$0]  (!%p4795_p5), %s5842_s7, 16, %s300_s24, [#allocation11]  }
  0x88   : > { %s4923_s23 = sadd.s32 1, %s4697_s30   ;;  %s33_s20 = sadd.s32 1, %s4693_s29 }
  0x89   : > { %s30_s15 = ssub.s32 %s4697_s30, %s4923_s23  ;;  %p40_p1 = scmp.ne.s32.totalorder %s4693_s29, %s4689_s28 }
  0x8a   : > { %p31_p7 = scmp.eq.s32.totalorder %s30_s15, 0  ;;  %p41_p3 = scmp.eq.s32.totalorder %s4697_s30, 0 }
  0x8b   : > { %p46_p13 = scmp.ne.s32.totalorder %s4689_s28, %s4685_s27  ;;  %p5857_p2 = scmp.eq.s32.totalorder %s4780_s11, 0 }
  0x8c   : > { %s4934_s22 = scalar_select %p31_p7, %s4693_s29, %s33_s20  }
  0x8d   : > { %p42_p0 = por %p41_p3, %p40_p1  ;;  %p4938_p4 = por %p5857_p2, %p46_p13 }
  0x8e   : > { %p4276_p6 = scmp.lt.s32.totalorder %s4697_s30, 2  ;;  %s4944_s26 = sand.u32 1, %s4693_s29  }
  0x8f   : > { %s4217_s24 = smul.u32 960, %s4944_s26  ;;  %s5860_s0 = sld [smem:[#allocation18_spill]] }
  0x90   : > { %s4218_s10 = smul.u32 15360, %s4697_s30  ;;  %p4948_p5 = pnand %p4276_p6, %p42_p0 }
  0x91   : > { %s314_s17 = scalar_lea.vmem [#allocation2], %s4217_s24  ;;  %s311_s21 = scalar_lea.sflag [#allocation3], %s4944_s26 }
  0x92   : > { %s321_s13 = sshll.u32 %s314_s17, 4  ;;  %p4589_p9 = pneg %p4948_p5  ;;  %s4957_s13 = int_to_ptr.vmem [resolvable:$true] %s321_s13 }
  0x95   : > { %s4955_s18 = scalar_lea.hbm %s5860_s0, %s4218_s10  ;;  %s4592_s10 = scalar_lea.hbm %s5860_s0, 30720 }
  0x96   : > { %s4587_s9 = scalar_lea.hbm %s4955_s18, 15360  ;;  %p4593_p12 = scmp.lt.u32.totalorder %s4955_s18, %s5860_s0 }
  0x97   : > { %p4588_p8 = scmp.ne.s32.totalorder %s4955_s18, %s4587_s9  ;;  %p4594_p7 = scmp.lt.u32.totalorder %s4592_s10, %s4587_s9 }
  0x98   : > { %p4596_p3 = scmp.lt.u32.totalorder %s4587_s9, %s4955_s18 }
  0x99   : > { %p4590_p10 = pnand %p4589_p9, %p4588_p8  ;;  %p4595_p1 = por %p4594_p7, %p4593_p12 }
  0x9b   : > { %p4591_p11 = pneg %p4590_p10  ;;  %p4597_p13 = por %p4596_p3, %p4595_p1 }
  0x9d   : > { %p4598_p0 = pnand %p4597_p13, %p4591_p11 }
  0x9f   : > { %4601 = shalt.err (!%p4598_p0)
}
  0xa0   : > { %s4602_s24 = scalar_lea.vmem %s4957_s13, 15360  ;;  %s4706_s17 = smov [#allocation2]  }
  0xa1   : > { %p4603_p2 = scmp.ne.s32.totalorder %s4957_s13, %s4602_s24  ;;  %s4607_s15 = sshll.u32 %s4706_s17, 4  ;;  %s4608_s15 = int_to_ptr.vmem [resolvable:$false] %s4607_s15 }
  0xa2   : > { %s4609_s20 = scalar_lea.vmem %s4608_s15, 30720  ;;  %p4610_p10 = scmp.lt.s32.totalorder %s4957_s13, %s4608_s15 }
  0xa3   : > { %p4605_p6 = pnand %p4603_p2, %p4589_p9  ;;  %p4611_p12 = scmp.lt.s32.totalorder %s4609_s20, %s4602_s24 }
  0xa5   : > { %p4606_p8 = pneg %p4605_p6  ;;  %p4612_p7 = por %p4611_p12, %p4610_p10 }
  0xa7   : > { %p4613_p1 = pnand %p4612_p7, %p4606_p8 }
  0xa9   : > { %4616 = shalt.err (!%p4613_p1)
}
  0xaa   : > { %s4707_s9 = smov 1024   ;;  %s331_s10 = sand.u32 1, %s4697_s30  }
  0xab   : > { %4267 = dma.hbm_to_vmem [thread:$0]  (!%p4948_p5), %s4955_s18, 15360, %s4957_s13, %s311_s21, %s4707_s9, %s4707_s9, %s5856_s19  }
  0xac   : > { %s4219_s27 = smul.u32 120, %s4944_s26  ;;  %s4998_s2 = scalar_lea.sflag [#allocation5], %s331_s10 }
  0xad   : > { %s4220_s16 = smul.u32 1920, %s4697_s30  ;;  %s4622_s26 = scalar_lea.hbm %s5836_s1, 3840 }
  0xae   : > { %s335_s20 = scalar_lea.vmem [#allocation4], %s4219_s27 }
  0xaf   : > { %s4994_s15 = scalar_lea.hbm %s5836_s1, %s4220_s16  ;;  %s342_s0 = sshll.u32 %s335_s20, 4  ;;  %s4996_s0 = int_to_ptr.vmem [resolvable:$true] %s342_s0 }
  0xb0   : > { %s4617_s3 = scalar_lea.hbm %s4994_s15, 1920  ;;  %p4623_p0 = scmp.lt.u32.totalorder %s4994_s15, %s5836_s1 }
  0xb1   : > { %p4618_p11 = scmp.ne.s32.totalorder %s4994_s15, %s4617_s3  ;;  %p4624_p2 = scmp.lt.u32.totalorder %s4622_s26, %s4617_s3 }
  0xb2   : > { %p4626_p8 = scmp.lt.u32.totalorder %s4617_s3, %s4994_s15 }
  0xb3   : > { %p4620_p3 = pnand %p4618_p11, %p4589_p9  ;;  %p4625_p6 = por %p4624_p2, %p4623_p0 }
  0xb5   : > { %p4621_p13 = pneg %p4620_p3  ;;  %p4627_p10 = por %p4626_p8, %p4625_p6 }
  0xb7   : > { %p4628_p12 = pnand %p4627_p10, %p4621_p13 }
  0xb9   : > { %4631 = shalt.err (!%p4628_p12)
}
  0xba   : > { %s4632_s21 = scalar_lea.vmem %s4996_s0, 1920  ;;  %s4708_s9 = smov [#allocation4]  }
  0xbb   : > { %p4633_p7 = scmp.ne.s32.totalorder %s4996_s0, %s4632_s21  ;;  %s4637_s10 = sshll.u32 %s4708_s9, 4  ;;  %s4638_s10 = int_to_ptr.vmem [resolvable:$false] %s4637_s10 }
  0xbc   : > { %s4639_s27 = scalar_lea.vmem %s4638_s10, 3840  ;;  %p4640_p3 = scmp.lt.s32.totalorder %s4996_s0, %s4638_s10 }
  0xbd   : > { %p4635_p1 = pnand %p4633_p7, %p4589_p9  ;;  %p4641_p0 = scmp.lt.s32.totalorder %s4639_s27, %s4632_s21 }
  0xbf   : > { %p4636_p11 = pneg %p4635_p1  ;;  %p4642_p2 = por %p4641_p0, %p4640_p3 }
  0xc1   : > { %p4643_p6 = pnand %p4642_p2, %p4636_p11 }
  0xc3   : > { %4646 = shalt.err (!%p4643_p6)
}
  0xc4   : > { %s4709_s3 = smov 128   ;;  %s4710_s16 = smov 8  }
  0xc5   : > { %4270 = dma.hbm_to_vmem [thread:$0]  (!%p4948_p5), %s4994_s15, 1920, %s4996_s0, %s4998_s2, %s4709_s3, %s4709_s3, %s4710_s16  }
  0xc6   : > { %p5861_p9 = scmp.ne.s32.totalorder %s5851_s12, 0 }
  0xc7   : > { %s356_s24 = sand.u32 (!%p5861_p9), 1, %s4689_s28  }
  0xc8   : > { %354 = sbr.rel (%p5861_p9) target bundleno = 1199 (0x4af), region = 52  ;;  %s357_s20 = scalar_lea.sflag (!%p5861_p9), [#allocation3], %s356_s24 }
  0xc9   : > { %s4221_s17 = smul.u32 (!%p5861_p9), 960, %s356_s24 }
  0xcb   : > { %s5027_s30 = scalar_lea.vmem (!%p5861_p9), [#allocation2], %s4221_s17 }
  0xcf   : > { %4664 = dma.done.wait (%p4938_p4), %s357_s20, 15360  }
  0xd0   : > { %4666 = vsyncadd (%p4938_p4), %s357_s20, 4294951936  ;;  %s365_s19 = sand.u32 1, %s4780_s11   ;;  %s4222_s14 = smul.u32 120, %s356_s24 }
  0xd1   : > { %s366_s0 = scalar_lea.sflag [#allocation5], %s365_s19 }
  0xd2   : > { %s5034_s2 = scalar_lea.vmem [#allocation4], %s4222_s14 }
  0xd3   : > { %4668 = dma.done.wait (%p4938_p4), %s366_s0, 1920  }
  0xd4   : > { %4670 = vsyncadd (%p4938_p4), %s366_s0, 4294965376  ;;  %p5862_p5 = scmp.eq.s32.totalorder %s4780_s11, 0 }
  0xd6   : > { %4672 = dma.done.wait (%p5862_p5), [#allocation5], 8192   ;;  %p5863_p13 = pmov %p5862_p5 }
  0xd7   : > { %p5864_p8 = pmov %p5862_p5 }
  0xd8   : > { %4674 = vsyncadd (%p5863_p13), [#allocation5], 4294959104 }
  0xd9   : > { %4676 = dma.done.wait (%p5864_p8), [#allocation8], 1040   ;;  %p5865_p10 = pmov %p5862_p5 }
  0xda   : > { %p5866_p12 = pmov %p5862_p5 }
  0xdb   : > { %4678 = vsyncadd (%p5865_p10), [#allocation8], 4294966256 }
  0xdc   : > { %4680 = dma.done.wait (%p5866_p12), [#allocation11], 32   ;;  %p5867_p7 = pmov %p5862_p5 }
  0xdd   : > { %v4327_v0 = vld [vmem:[#allocation6 + $0x40] sm:$0xff]   ;;  %v4331_v4 = vld [vmem:[#allocation6 + $0x48] sm:$0xff]   ;;  %v4335_v8 = vld [vmem:[#allocation6 + $0x50] sm:$0xff]   ;;  %vm4712_vm0 = vmmov 0   ;;  %vm2366_vm2 = vcmask 982016   ;;  %p427_p4 = scmp.lt.s32.totalorder %s4780_s11, 1 }
  0xde   : > { %4682 = vsyncadd (%p5867_p7), [#allocation11], 4294967264  ;;  %v4328_v1 = vld [vmem:[#allocation6] sm:$0xff]   ;;  %3411 = vmatprep.subr.bf16.mxu0 %v4327_v0  ;;  %v4332_v5 = vld [vmem:[#allocation6 + $0x8] sm:$0xff]  }
  0xdf   : > { %v4329_v2 = vld [vmem:[#allocation6 + $0xc0] sm:$0xff]   ;;  %3412 = vmatpush3.bf16.msra.mxu0 %v4328_v1  ;;  %v4333_v6 = vld [vmem:[#allocation6 + $0xc8] sm:$0xff]   ;;  %v4336_v9 = vld [vmem:[#allocation6 + $0x10] sm:$0xff]   ;;  %s5873_s11 = smov (!%p427_p4, %s4780_s11), 1 }
  0xe0   : > { %v4330_v3 = vld [vmem:[#allocation6 + $0x80] sm:$0xff]   ;;  %3475 = vmatprep.subr.bf16.mxu1 %v4329_v2  ;;  %3413 = vmatprep.subr.bf16.mxu0 %v4331_v4  ;;  %v4334_v7 = vld [vmem:[#allocation6 + $0x88] sm:$0xff]   ;;  %v4337_v10 = vld [vmem:[#allocation6 + $0xd0] sm:$0xff]   ;;  %s4223_s19 = smul.u32 120, %s5873_s11 }
  0xe1   : > { %3476 = vmatpush3.bf16.msra.mxu1 %v4330_v3  ;;  %v4338_v11 = vld [vmem:[#allocation6 + $0x90] sm:$0xff]   ;;  %v4339_v12 = vld [vmem:[#allocation6 + $0x58] sm:$0xff]   ;;  %v4343_v16 = vld [vmem:[#allocation6 + $0x60] sm:$0xff]  }
  0xe2   : > { %3477 = vmatprep.subr.bf16.mxu1 %v4333_v6  ;;  %v4340_v13 = vld [vmem:[#allocation6 + $0x18] sm:$0xff]   ;;  %v4344_v17 = vld [vmem:[#allocation6 + $0x20] sm:$0xff]   ;;  %v4347_v20 = vld [vmem:[#allocation6 + $0x68] sm:$0xff]  }
  0xe3   : > { %3414 = vmatpush3.bf16.msra.mxu0 %v4332_v5  ;;  %v4341_v14 = vld [vmem:[#allocation6 + $0xd8] sm:$0xff]   ;;  %v4345_v18 = vld [vmem:[#allocation6 + $0xe0] sm:$0xff]   ;;  %v4348_v21 = vld [vmem:[#allocation6 + $0x28] sm:$0xff]  }
  0xe4   : > { %3415 = vmatprep.subr.bf16.mxu0 %v4335_v8  ;;  %v4342_v15 = vld [vmem:[#allocation6 + $0x98] sm:$0xff]   ;;  %v4346_v19 = vld [vmem:[#allocation6 + $0xa0] sm:$0xff]   ;;  %v4349_v22 = vld [vmem:[#allocation6 + $0xe8] sm:$0xff]  }
  0xe5   : > { %3478 = vmatpush3.bf16.msra.mxu1 %v4334_v7  ;;  %v4350_v23 = vld [vmem:[#allocation6 + $0xa8] sm:$0xff]   ;;  %v4351_v24 = vld [vmem:[#allocation6 + $0x70] sm:$0xff]   ;;  %v4355_v28 = vld [vmem:[#allocation6 + $0x78] sm:$0xff]  }
  0xe6   : > { %3479 = vmatprep.subr.bf16.mxu1 %v4337_v10  ;;  %v4352_v25 = vld [vmem:[#allocation6 + $0x30] sm:$0xff]   ;;  %v4356_v29 = vld [vmem:[#allocation6 + $0x38] sm:$0xff]   ;;  %v574_v37 = vld [vmem:[%s5027_s30 + $0x18] sm:$0xff] }
  0xe7   : > { %3416 = vmatpush3.bf16.msra.mxu0 %v4336_v9  ;;  %v4353_v26 = vld [vmem:[#allocation6 + $0xf0] sm:$0xff]   ;;  %v4357_v30 = vld [vmem:[#allocation6 + $0xf8] sm:$0xff]   ;;  %v582_v38 = vld [vmem:[%s5027_s30 + $0x58] sm:$0xff] }
  0xe8   : > { %3417 = vmatprep.subr.bf16.mxu0 %v4339_v12  ;;  %v4354_v27 = vld [vmem:[#allocation6 + $0xb0] sm:$0xff]   ;;  %v572_v31 = vld [vmem:[%s5027_s30 + $0x8] sm:$0xff]  ;;  %v694_v40 = vpack.c.bf16 %v582_v38, %v574_v37  ;;  %v573_v41 = vld [vmem:[%s5027_s30 + $0x10] sm:$0xff] }
  0xe9   : > { %3480 = vmatpush3.bf16.msra.mxu1 %v4338_v11  ;;  %v580_v32 = vld [vmem:[%s5027_s30 + $0x48] sm:$0xff]  ;;  %v571_v35 = vld [vmem:[%s5027_s30] sm:$0xff]  ;;  %v581_v42 = vld [vmem:[%s5027_s30 + $0x50] sm:$0xff] }
  0xea   : > { %3481 = vmatprep.subr.bf16.mxu1 %v4341_v14  ;;  %v692_v33 = vpack.c.bf16 %v580_v32, %v572_v31  ;;  %v4358_v34 = vld [vmem:[#allocation6 + $0xb8] sm:$0xff]   ;;  %v579_v36 = vld [vmem:[%s5027_s30 + $0x40] sm:$0xff]  ;;  %v693_v44 = vpack.c.bf16 %v581_v42, %v573_v41  ;;  %1425 = vmatprep.mubr.bf16.mxu1 %v694_v40  ;;  %v590_v49 = vld [vmem:[%s5027_s30 + $0x98] sm:$0xff] }
  0xeb   : > { %3418 = vmatpush3.bf16.msra.mxu0 %v4340_v13  ;;  %v691_v39 = vpack.c.bf16 %v579_v36, %v571_v35  ;;  %v588_v43 = vld [vmem:[%s5027_s30 + $0x88] sm:$0xff]  ;;  %v587_v46 = vld [vmem:[%s5027_s30 + $0x80] sm:$0xff]  ;;  %v598_v50 = vld [vmem:[%s5027_s30 + $0xd8] sm:$0xff] }
  0xec   : > { %3419 = vmatprep.subr.bf16.mxu0 %v4343_v16  ;;  %1329 = vmatprep.mubr.bf16.mxu0 %v692_v33  ;;  %v596_v45 = vld [vmem:[%s5027_s30 + $0xc8] sm:$0xff]  ;;  %v595_v47 = vld [vmem:[%s5027_s30 + $0xc0] sm:$0xff]  ;;  %v702_v51 = vpack.c.bf16 %v598_v50, %v590_v49  ;;  %v4359_v52 = vld [vmem:[#allocation6 + $0x140] sm:$0xff]  }
  0xed   : > { %3482 = vmatpush3.bf16.msra.mxu1 %v4342_v15  ;;  %v700_v48 = vpack.c.bf16 %v596_v45, %v588_v43  ;;  %v589_v53 = vld [vmem:[%s5027_s30 + $0x90] sm:$0xff]  ;;  %v604_v56 = vld [vmem:[%s5027_s30 + $0x108] sm:$0xff]  ;;  %v699_v58 = vpack.c.bf16 %v595_v47, %v587_v46  ;;  %v606_v59 = vld [vmem:[%s5027_s30 + $0x118] sm:$0xff] }
  0xee   : > { %3483 = vmatprep.subr.bf16.mxu1 %v4345_v18  ;;  %v597_v54 = vld [vmem:[%s5027_s30 + $0xd0] sm:$0xff]  ;;  %v612_v57 = vld [vmem:[%s5027_s30 + $0x148] sm:$0xff]  ;;  %v614_v62 = vld [vmem:[%s5027_s30 + $0x158] sm:$0xff] }
  0xef   : > { %3420 = vmatpush3.bf16.msra.mxu0 %v4344_v17  ;;  %v4360_v55 = vld [vmem:[#allocation6 + $0x100] sm:$0xff]   ;;  %v701_v60 = vpack.c.bf16 %v597_v54, %v589_v53  ;;  %v708_v61 = vpack.c.bf16 %v612_v57, %v604_v56  ;;  %v710_v63 = vpack.c.bf16 %v614_v62, %v606_v59  ;;  %v4361_v0 = vld [vmem:[#allocation6 + $0x148] sm:$0xff]   ;;  %v603_v2 = vld [vmem:[%s5027_s30 + $0x100] sm:$0xff] }
  0xf0   : > { %3421 = vmatprep.subr.bf16.mxu0 %v4347_v20  ;;  %v4362_v1 = vld [vmem:[#allocation6 + $0x108] sm:$0xff]   ;;  %v611_v3 = vld [vmem:[%s5027_s30 + $0x140] sm:$0xff]  ;;  %v605_v4 = vld [vmem:[%s5027_s30 + $0x110] sm:$0xff] }
  0xf1   : > { %3484 = vmatpush3.bf16.msra.mxu1 %v4346_v19  ;;  %v613_v5 = vld [vmem:[%s5027_s30 + $0x150] sm:$0xff]  ;;  %v620_v6 = vld [vmem:[%s5027_s30 + $0x188] sm:$0xff]  ;;  %v4363_v8 = vld [vmem:[#allocation6 + $0x150] sm:$0xff]   ;;  %v707_v11 = vpack.c.bf16 %v611_v3, %v603_v2 }
  0xf2   : > { %3485 = vmatprep.subr.bf16.mxu1 %v4349_v22  ;;  %v628_v7 = vld [vmem:[%s5027_s30 + $0x1c8] sm:$0xff]  ;;  %v622_v9 = vld [vmem:[%s5027_s30 + $0x198] sm:$0xff]  ;;  %v4364_v12 = vld [vmem:[#allocation6 + $0x110] sm:$0xff]   ;;  %v709_v13 = vpack.c.bf16 %v613_v5, %v605_v4 }
  0xf3   : > { %3422 = vmatpush3.bf16.msra.mxu0 %v4348_v21  ;;  %v630_v10 = vld [vmem:[%s5027_s30 + $0x1d8] sm:$0xff]  ;;  %v716_v14 = vpack.c.bf16 %v628_v7, %v620_v6  ;;  %v619_v16 = vld [vmem:[%s5027_s30 + $0x180] sm:$0xff]  ;;  %v4365_v18 = vld [vmem:[#allocation6 + $0x158] sm:$0xff]  }
  0xf4   : > { %3423 = vmatprep.subr.bf16.mxu0 %v4351_v24  ;;  %v718_v15 = vpack.c.bf16 %v630_v10, %v622_v9  ;;  %v627_v17 = vld [vmem:[%s5027_s30 + $0x1c0] sm:$0xff]  ;;  %v621_v19 = vld [vmem:[%s5027_s30 + $0x190] sm:$0xff]  ;;  %v636_v21 = vld [vmem:[%s5027_s30 + $0x208] sm:$0xff] }
  0xf5   : > { %3486 = vmatpush3.bf16.msra.mxu1 %v4350_v23  ;;  %v629_v20 = vld [vmem:[%s5027_s30 + $0x1d0] sm:$0xff]  ;;  %v644_v22 = vld [vmem:[%s5027_s30 + $0x248] sm:$0xff]  ;;  %v638_v23 = vld [vmem:[%s5027_s30 + $0x218] sm:$0xff] }
  0xf6   : > { %3487 = vmatprep.subr.bf16.mxu1 %v4353_v26  ;;  %v646_v24 = vld [vmem:[%s5027_s30 + $0x258] sm:$0xff]  ;;  %v4367_v26 = vld [vmem:[#allocation6 + $0x1c0] sm:$0xff]   ;;  %v724_v31 = vpack.c.bf16 %v644_v22, %v636_v21  ;;  %v643_v35 = vld [vmem:[%s5027_s30 + $0x240] sm:$0xff] }
  0xf7   : > { %3424 = vmatpush3.bf16.msra.mxu0 %v4352_v25  ;;  %v4366_v25 = vld [vmem:[#allocation6 + $0x118] sm:$0xff]   ;;  %v726_v32 = vpack.c.bf16 %v646_v24, %v638_v23  ;;  %v4370_v33 = vld [vmem:[#allocation6 + $0x188] sm:$0xff]   ;;  %v637_v36 = vld [vmem:[%s5027_s30 + $0x210] sm:$0xff] }
  0xf8   : > { %3425 = vmatprep.subr.bf16.mxu0 %v4355_v28  ;;  %v715_v28 = vpack.c.bf16 %v627_v17, %v619_v16  ;;  %v645_v37 = vld [vmem:[%s5027_s30 + $0x250] sm:$0xff]  ;;  %v652_v38 = vld [vmem:[%s5027_s30 + $0x288] sm:$0xff]  ;;  %v654_v41 = vld [vmem:[%s5027_s30 + $0x298] sm:$0xff] }
  0xf9   : > { %3488 = vmatpush3.bf16.msra.mxu1 %v4354_v27  ;;  %v4368_v27 = vld [vmem:[#allocation6 + $0x180] sm:$0xff]   ;;  %v662_v42 = vld [vmem:[%s5027_s30 + $0x2d8] sm:$0xff]  ;;  %v4374_v45 = vld [vmem:[#allocation6 + $0x190] sm:$0xff]  }
  0xfa   : > { %3489 = vmatprep.subr.bf16.mxu1 %v4357_v30  ;;  %v717_v30 = vpack.c.bf16 %v629_v20, %v621_v19  ;;  %v4371_v40 = vld [vmem:[#allocation6 + $0x160] sm:$0xff]   ;;  %v4375_v47 = vld [vmem:[#allocation6 + $0x1d8] sm:$0xff]   ;;  %v734_v50 = vpack.c.bf16 %v662_v42, %v654_v41  ;;  %v659_v53 = vld [vmem:[%s5027_s30 + $0x2c0] sm:$0xff] }
  0xfb   : > { %3426 = vmatpush3.bf16.msra.mxu0 %v4356_v29  ;;  %v4369_v29 = vld [vmem:[#allocation6 + $0x1c8] sm:$0xff]   ;;  %v4372_v43 = vld [vmem:[#allocation6 + $0x120] sm:$0xff]   ;;  %v668_v56 = vld [vmem:[%s5027_s30 + $0x308] sm:$0xff] }
  0xfc   : > { %3539 = vmatprep.subr.bf16.mxu0 %v4359_v52  ;;  %v651_v52 = vld [vmem:[%s5027_s30 + $0x280] sm:$0xff]  ;;  %v653_v54 = vld [vmem:[%s5027_s30 + $0x290] sm:$0xff]  ;;  %v676_v57 = vld [vmem:[%s5027_s30 + $0x348] sm:$0xff] }
  0xfd   : > { %3490 = vmatpush3.bf16.msra.mxu1 %v4358_v34  ;;  %v635_v34 = vld [vmem:[%s5027_s30 + $0x200] sm:$0xff]  ;;  %v670_v59 = vld [vmem:[%s5027_s30 + $0x318] sm:$0xff]  ;;  %v4379_v62 = vld [vmem:[#allocation6 + $0x1e0] sm:$0xff]   ;;  %v740_v2 = vpack.c.bf16 %v676_v57, %v668_v56 }
  0xfe   : > { %1330 = vmatmul.mubr.bf16.vlgmr.msra.gmra.mrb[0].mxu0 %v691_v39  ;;  %3603 = vmatprep.subr.bf16.mxu1 %v4367_v26  ;;  %v660_v39 = vld [vmem:[%s5027_s30 + $0x2c8] sm:$0xff]  ;;  %v723_v46 = vpack.c.bf16 %v643_v35, %v635_v34  ;;  %v4381_v3 = vld [vmem:[#allocation6 + $0x1e8] sm:$0xff]   ;;  %v667_v6 = vld [vmem:[%s5027_s30 + $0x300] sm:$0xff] }
  0xff   : > { %1337 = vmatprep.mubr.bf16.mxu0 %v700_v48  ;;  %3540 = vmatpush3.bf16.msra.mxu0 %v4360_v55  ;;  %v725_v48 = vpack.c.bf16 %v645_v37, %v637_v36  ;;  %v732_v49 = vpack.c.bf16 %v660_v39, %v652_v38  ;;  %v661_v55 = vld [vmem:[%s5027_s30 + $0x2d0] sm:$0xff]  ;;  %v4382_v5 = vld [vmem:[#allocation6 + $0x1a8] sm:$0xff]   ;;  %v675_v7 = vld [vmem:[%s5027_s30 + $0x340] sm:$0xff] }
 0x100   : > { %1426 = vmatmul.mubr.bf16.vlgmr.msra.gmra.mrb[0].mxu1 %v693_v44  ;;  %3541 = vmatprep.subr.bf16.mxu0 %v4361_v0  ;;  %v4373_v44 = vld [vmem:[#allocation6 + $0x1d0] sm:$0xff]   ;;  %v4380_v0 = vld [vmem:[#allocation6 + $0x1a0] sm:$0xff]   ;;  %v684_v10 = vld [vmem:[%s5027_s30 + $0x388] sm:$0xff]  ;;  %v739_v16 = vpack.c.bf16 %v675_v7, %v667_v6 }
 0x101   : > { %1433 = vmatprep.mubr.bf16.mxu1 %v702_v51  ;;  %3604 = vmatpush3.bf16.msra.mxu1 %v4368_v27  ;;  %v4376_v51 = vld [vmem:[#allocation6 + $0x198] sm:$0xff]   ;;  %v677_v9 = vld [vmem:[%s5027_s30 + $0x350] sm:$0xff]  ;;  %v748_v19 = vpack.c.bf16 %v684_v10, %v684_v10  ;;  %v683_v24 = vld [vmem:[%s5027_s30 + $0x380] sm:$0xff] }
 0x102   : > { %3605 = vmatprep.subr.bf16.mxu1 %v4369_v29  ;;  %v4387_v17 = vld [vmem:[#allocation6 + $0x178] sm:$0xff]   ;;  %v586_v29 = vld [vmem:[%s5027_s30 + $0x78] sm:$0xff]  ;;  %v575_v35 = vld [vmem:[%s5027_s30 + $0x20] sm:$0xff] }
 0x103   : > { %3542 = vmatpush3.bf16.msra.mxu0 %v4362_v1  ;;  %v733_v1 = vpack.c.bf16 %v661_v55, %v653_v54  ;;  %v4388_v20 = vld [vmem:[#allocation6 + $0x138] sm:$0xff]   ;;  %v583_v36 = vld [vmem:[%s5027_s30 + $0x60] sm:$0xff]  ;;  %v577_v37 = vld [vmem:[%s5027_s30 + $0x30] sm:$0xff] }
 0x104   : > { %3543 = vmatprep.subr.bf16.mxu0 %v4363_v8  ;;  %v669_v8 = vld [vmem:[%s5027_s30 + $0x310] sm:$0xff]  ;;  %v4389_v22 = vld [vmem:[#allocation6 + $0x1f8] sm:$0xff]   ;;  %v594_v41 = vld [vmem:[%s5027_s30 + $0xb8] sm:$0xff] }
 0x105   : > { %3606 = vmatpush3.bf16.msra.mxu1 %v4370_v33  ;;  %v4390_v23 = vld [vmem:[#allocation6 + $0x1b8] sm:$0xff]   ;;  %v4391_v33 = vld [vmem:[#allocation9] sm:$0xff]  }
 0x106   : > { %1338 = vmatmul.mubr.bf16.gmra.mrb[4].mxu0 %v699_v58  ;;  %3607 = vmatprep.subr.bf16.mxu1 %v4373_v44  ;;  %v4377_v58 = vld [vmem:[#allocation6 + $0x168] sm:$0xff]   ;;  %v576_v26 = vld [vmem:[%s5027_s30 + $0x28] sm:$0xff]  ;;  %v585_v38 = vld [vmem:[%s5027_s30 + $0x70] sm:$0xff] }
 0x107   : > { %1345 = vmatprep.mubr.bf16.mxu0 %v708_v61  ;;  %3544 = vmatpush3.bf16.msra.mxu0 %v4364_v12  ;;  %v4378_v61 = vld [vmem:[#allocation6 + $0x128] sm:$0xff]   ;;  %v584_v27 = vld [vmem:[%s5027_s30 + $0x68] sm:$0xff]  ;;  %v697_v44 = vpack.c.bf16 %v585_v38, %v577_v37  ;;  %v655_v38 = vld [vmem:[%s5027_s30 + $0x2a0] sm:$0xff] }
 0x108   : > { %1434 = vmatmul.mubr.bf16.gmra.mrb[4].mxu1 %v701_v60  ;;  %3545 = vmatprep.subr.bf16.mxu0 %v4365_v18  ;;  %v678_v60 = vld [vmem:[%s5027_s30 + $0x358] sm:$0xff]  ;;  %v741_v18 = vpack.c.bf16 %v677_v9, %v669_v8  ;;  %v592_v39 = vld [vmem:[%s5027_s30 + $0xa8] sm:$0xff] }
 0x109   : > { %1441 = vmatprep.mubr.bf16.mxu1 %v710_v63  ;;  %3608 = vmatpush3.bf16.msra.mxu1 %v4374_v45  ;;  %v731_v63 = vpack.c.bf16 %v659_v53, %v651_v52  ;;  %v742_v4 = vpack.c.bf16 %v678_v60, %v670_v59  ;;  %v686_v12 = vld [vmem:[%s5027_s30 + $0x398] sm:$0xff]  ;;  %v608_v52 = vld [vmem:[%s5027_s30 + $0x128] sm:$0xff] }
 0x10a   : > { %3609 = vmatprep.subr.bf16.mxu1 %v4375_v47  ;;  %v750_v21 = vpack.c.bf16 %v686_v12, %v686_v12  ;;  %v602_v42 = vld [vmem:[%s5027_s30 + $0xf8] sm:$0xff]  ;;  %v616_v53 = vld [vmem:[%s5027_s30 + $0x168] sm:$0xff]  ;;  %v631_v12 = vld [vmem:[%s5027_s30 + $0x1e0] sm:$0xff] }
 0x10b   : > { %3546 = vmatpush3.bf16.msra.mxu0 %v4366_v25  ;;  %v685_v25 = vld [vmem:[%s5027_s30 + $0x390] sm:$0xff]  ;;  %v4392_v47 = vld [vmem:[#allocation9 + $0x8] sm:$0xff]   ;;  %v4393_v56 = vld [vmem:[#allocation9 + $0x10] sm:$0xff]   ;;  %v712_v59 = vpack.c.bf16 %v616_v53, %v608_v52 }
 0x10c   : > { %3547 = vmatprep.subr.bf16.mxu0 %v4371_v40  ;;  %v600_v40 = vld [vmem:[%s5027_s30 + $0xe8] sm:$0xff]  ;;  %v610_v54 = vld [vmem:[%s5027_s30 + $0x138] sm:$0xff]  ;;  %v673_v52 = vld [vmem:[%s5027_s30 + $0x330] sm:$0xff] }
 0x10d   : > { %3610 = vmatpush3.bf16.msra.mxu1 %v4376_v51  ;;  %v704_v45 = vpack.c.bf16 %v600_v40, %v592_v39  ;;  %v601_v51 = vld [vmem:[%s5027_s30 + $0xf0] sm:$0xff]  ;;  %v618_v55 = vld [vmem:[%s5027_s30 + $0x178] sm:$0xff]  ;;  %v663_v39 = vld [vmem:[%s5027_s30 + $0x2e0] sm:$0xff] }
 0x10e   : > { %1346 = vmatmul.mubr.bf16.gmra.mrb[8].mxu0 %v707_v11  ;;  %3611 = vmatprep.subr.bf16.mxu1 %v4379_v62  ;;  %v4383_v11 = vld [vmem:[#allocation6 + $0x170] sm:$0xff]   ;;  %v714_v60 = vpack.c.bf16 %v618_v55, %v610_v54  ;;  %v4394_v62 = vld [vmem:[#allocation9 + $0x18] sm:$0xff]   ;;  %v4395_v6 = vld [vmem:[#allocation9 + $0x20] sm:$0xff]  }
 0x10f   : > { %1353 = vmatprep.mubr.bf16.mxu0 %v716_v14  ;;  %3548 = vmatpush3.bf16.msra.mxu0 %v4372_v43  ;;  %v4385_v14 = vld [vmem:[#allocation6 + $0x1f0] sm:$0xff]   ;;  %v695_v43 = vpack.c.bf16 %v583_v36, %v575_v35  ;;  %v657_v40 = vld [vmem:[%s5027_s30 + $0x2b0] sm:$0xff]  ;;  %v688_v54 = vld [vmem:[%s5027_s30 + $0x3a8] sm:$0xff] }
 0x110   : > { %1442 = vmatmul.mubr.bf16.gmra.mrb[8].mxu1 %v709_v13  ;;  %3549 = vmatprep.subr.bf16.mxu0 %v4377_v58  ;;  %v4384_v13 = vld [vmem:[#allocation6 + $0x130] sm:$0xff]   ;;  %v681_v53 = vld [vmem:[%s5027_s30 + $0x370] sm:$0xff]  ;;  %v690_v55 = vld [vmem:[%s5027_s30 + $0x3b8] sm:$0xff] }
 0x111   : > { %1449 = vmatprep.mubr.bf16.mxu1 %v718_v15  ;;  %3612 = vmatpush3.bf16.msra.mxu1 %v4380_v0  ;;  %v4386_v15 = vld [vmem:[#allocation6 + $0x1b0] sm:$0xff]   ;;  %v609_v0 = vld [vmem:[%s5027_s30 + $0x130] sm:$0xff] }
 0x112   : > { %3613 = vmatprep.subr.bf16.mxu1 %v4381_v3  ;;  %v632_v3 = vld [vmem:[%s5027_s30 + $0x1e8] sm:$0xff] }
 0x113   : > { %3550 = vmatpush3.bf16.msra.mxu0 %v4378_v61  ;;  %v607_v61 = vld [vmem:[%s5027_s30 + $0x120] sm:$0xff] }
 0x114   : > { %3551 = vmatprep.subr.bf16.mxu0 %v4383_v11  ;;  %v623_v11 = vld [vmem:[%s5027_s30 + $0x1a0] sm:$0xff] }
 0x115   : > { %3614 = vmatpush3.bf16.msra.mxu1 %v4382_v5  ;;  %v634_v5 = vld [vmem:[%s5027_s30 + $0x1f8] sm:$0xff] }
 0x116   : > { %1354 = vmatmul.mubr.bf16.gmra.mrb[12].mxu0 %v715_v28  ;;  %3615 = vmatprep.subr.bf16.mxu1 %v4385_v14  ;;  %v578_v28 = vld [vmem:[%s5027_s30 + $0x38] sm:$0xff]  ;;  %v625_v14 = vld [vmem:[%s5027_s30 + $0x1b0] sm:$0xff] }
 0x117   : > { %1361 = vmatprep.mubr.bf16.mxu0 %v724_v31  ;;  %3552 = vmatpush3.bf16.msra.mxu0 %v4384_v13  ;;  %v749_v31 = vpack.c.bf16 %v685_v25, %v685_v25  ;;  %v698_v34 = vpack.c.bf16 %v586_v29, %v578_v28  ;;  %v4396_v13 = vld [vmem:[#allocation9 + $0x28] sm:$0xff]   ;;  %v641_v28 = vld [vmem:[%s5027_s30 + $0x230] sm:$0xff] }
 0x118   : > { %1450 = vmatmul.mubr.bf16.gmra.mrb[12].mxu1 %v717_v30  ;;  %3553 = vmatprep.subr.bf16.mxu0 %v4387_v17  ;;  %v747_v30 = vpack.c.bf16 %v683_v24, %v683_v24  ;;  %v648_v17 = vld [vmem:[%s5027_s30 + $0x268] sm:$0xff]  ;;  %v649_v29 = vld [vmem:[%s5027_s30 + $0x270] sm:$0xff] }
 0x119   : > { %1457 = vmatprep.mubr.bf16.mxu1 %v726_v32  ;;  %3616 = vmatpush3.bf16.msra.mxu1 %v4386_v15  ;;  %v696_v32 = vpack.c.bf16 %v584_v27, %v576_v26  ;;  %v633_v15 = vld [vmem:[%s5027_s30 + $0x1f0] sm:$0xff]  ;;  %v639_v26 = vld [vmem:[%s5027_s30 + $0x220] sm:$0xff]  ;;  %v729_v35 = vpack.c.bf16 %v649_v29, %v641_v28  ;;  %v4404_v28 = vld [vmem:[%s5841_s6 + $0xc8] sm:$0xff]  }
 0x11a   : > { %3617 = vmatprep.subr.bf16.mxu1 %v4389_v22  ;;  %v721_v22 = vpack.c.bf16 %v633_v15, %v625_v14  ;;  %v4398_v24 = vld [vmem:[#allocation9 + $0x38] sm:$0xff]   ;;  %v647_v27 = vld [vmem:[%s5027_s30 + $0x260] sm:$0xff] }
 0x11b   : > { %3554 = vmatpush3.bf16.msra.mxu0 %v4388_v20  ;;  %v4397_v20 = vld [vmem:[#allocation9 + $0x30] sm:$0xff]  }
 0x11c   : > { %3935 = vmatprep.subr.bf16.mxu0 %v4391_v33  ;;  %v765_v15 = vld [vmem:[%s5034_s2 + $0x50] sm:$0xff] }
 0x11d   : > { %3618 = vmatpush3.bf16.msra.mxu1 %v4390_v23  ;;  %v4405_v29 = vld [vmem:[%s5841_s6 + $0x8] sm:$0xff]  }
 0x11e   : > { %1362 = vmatmul.mubr.bf16.gmra.mrb[16].mxu0 %v723_v46  ;;  %v706_v46 = vpack.c.bf16 %v602_v42, %v594_v41  ;;  %v665_v41 = vld [vmem:[%s5027_s30 + $0x2f0] sm:$0xff]  ;;  %v672_v42 = vld [vmem:[%s5027_s30 + $0x328] sm:$0xff] }
 0x11f   : > { %1369 = vmatprep.mubr.bf16.mxu0 %v732_v49  ;;  %v599_v49 = vld [vmem:[%s5027_s30 + $0xe0] sm:$0xff] }
 0x120   : > { %1458 = vmatmul.mubr.bf16.gmra.mrb[16].mxu1 %v725_v48  ;;  %v591_v48 = vld [vmem:[%s5027_s30 + $0xa0] sm:$0xff] }
 0x121   : > { %1465 = vmatprep.mubr.bf16.mxu1 %v734_v50  ;;  %v593_v50 = vld [vmem:[%s5027_s30 + $0xb0] sm:$0xff]  ;;  %v703_v57 = vpack.c.bf16 %v599_v49, %v591_v48 }
 0x122   : > { %v705_v58 = vpack.c.bf16 %v601_v51, %v593_v50  ;;  %v671_v50 = vld [vmem:[%s5027_s30 + $0x320] sm:$0xff] }
 0x123   : > { %v679_v51 = vld [vmem:[%s5027_s30 + $0x360] sm:$0xff] }
 0x126   : > { %1370 = vmatmul.mubr.bf16.gmra.mrb[20].mxu0 %v731_v63  ;;  %v615_v63 = vld [vmem:[%s5027_s30 + $0x160] sm:$0xff] }
 0x127   : > { %1377 = vmatprep.mubr.bf16.mxu0 %v740_v2  ;;  %v624_v2 = vld [vmem:[%s5027_s30 + $0x1a8] sm:$0xff]  ;;  %v711_v7 = vpack.c.bf16 %v615_v63, %v607_v61  ;;  %v689_v61 = vld [vmem:[%s5027_s30 + $0x3b0] sm:$0xff] }
 0x128   : > { %1466 = vmatmul.mubr.bf16.gmra.mrb[20].mxu1 %v733_v1  ;;  %v617_v1 = vld [vmem:[%s5027_s30 + $0x170] sm:$0xff]  ;;  %v720_v9 = vpack.c.bf16 %v632_v3, %v624_v2  ;;  %v756_v63 = vld [vmem:[%s5034_s2 + $0x8] sm:$0xff] }
 0x129   : > { %1473 = vmatprep.mubr.bf16.mxu1 %v742_v4  ;;  %v626_v4 = vld [vmem:[%s5027_s30 + $0x1b8] sm:$0xff]  ;;  %v713_v8 = vpack.c.bf16 %v617_v1, %v609_v0  ;;  %v753_v1 = vpack.c.bf16 %v689_v61, %v689_v61  ;;  %v757_v3 = vld [vmem:[%s5034_s2 + $0x10] sm:$0xff] }
 0x12a   : > { %v722_v10 = vpack.c.bf16 %v634_v5, %v626_v4  ;;  %v758_v4 = vld [vmem:[%s5034_s2 + $0x18] sm:$0xff]  ;;  %v759_v5 = vld [vmem:[%s5034_s2 + $0x20] sm:$0xff] }
 0x12e   : > { %1378 = vmatmul.mubr.bf16.gmra.mrb[24].mxu0 %v739_v16  ;;  %v640_v16 = vld [vmem:[%s5027_s30 + $0x228] sm:$0xff] }
 0x12f   : > { %1385 = vmatprep.mubr.bf16.mxu0 %v748_v19  ;;  %v650_v19 = vld [vmem:[%s5027_s30 + $0x278] sm:$0xff]  ;;  %v728_v23 = vpack.c.bf16 %v648_v17, %v640_v16 }
 0x130   : > { %1474 = vmatmul.mubr.bf16.gmra.mrb[24].mxu1 %v741_v18  ;;  %v642_v18 = vld [vmem:[%s5027_s30 + $0x238] sm:$0xff] }
 0x131   : > { %1481 = vmatprep.mubr.bf16.mxu1 %v750_v21  ;;  %v719_v21 = vpack.c.bf16 %v631_v12, %v623_v11  ;;  %v730_v25 = vpack.c.bf16 %v650_v19, %v642_v18  ;;  %v763_v11 = vld [vmem:[%s5034_s2 + $0x40] sm:$0xff]  ;;  %v764_v12 = vld [vmem:[%s5034_s2 + $0x48] sm:$0xff]  ;;  %v766_v16 = vld [vmem:[%s5034_s2 + $0x58] sm:$0xff] }
 0x132   : > { %v774_v14 = vpack.c.bf16 %v764_v12, %v763_v11  ;;  %v767_v17 = vld [vmem:[%s5034_s2 + $0x60] sm:$0xff]  ;;  %v768_v18 = vld [vmem:[%s5034_s2 + $0x68] sm:$0xff]  ;;  %v775_v19 = vpack.c.bf16 %v766_v16, %v765_v15 }
 0x136   : > { %1386 = vmatmul.mubr.bf16.gmra.mrb[28].mxu0 %v747_v30  ;;  %v656_v30 = vld [vmem:[%s5027_s30 + $0x2a8] sm:$0xff] }
 0x137   : > { %1521 = vmatprep.mubr.bf16.mxu0 %v696_v32  ;;  %v658_v32 = vld [vmem:[%s5027_s30 + $0x2b8] sm:$0xff] }
 0x138   : > { %1482 = vmatmul.mubr.bf16.gmra.mrb[28].mxu1 %v749_v31  ;;  %v664_v31 = vld [vmem:[%s5027_s30 + $0x2e8] sm:$0xff] }
 0x139   : > { %1617 = vmatprep.mubr.bf16.mxu1 %v698_v34  ;;  %v727_v34 = vpack.c.bf16 %v647_v27, %v639_v26  ;;  %v736_v36 = vpack.c.bf16 %v664_v31, %v656_v30  ;;  %v4402_v26 = vld [vmem:[%s5841_s6 + $0x80] sm:$0xff]   ;;  %v4403_v27 = vld [vmem:[%s5841_s6 + $0x48] sm:$0xff]   ;;  %v4407_v31 = vld [vmem:[%s5841_s6 + $0x50] sm:$0xff]  }
 0x13a   : > { %v4406_v30 = vld [vmem:[%s5841_s6 + $0x88] sm:$0xff]  }
 0x13e   : > { %1522 = vmatmul.mubr.bf16.vlgmr.msra.gmra.mrb[32].mxu0 %v695_v43  ;;  %v680_v43 = vld [vmem:[%s5027_s30 + $0x368] sm:$0xff] }
 0x13f   : > { %1529 = vmatprep.mubr.bf16.mxu0 %v704_v45  ;;  %3936 = vmatpush3.bf16.msra.mxu0 %v4391_v33  ;;  %v666_v33 = vld [vmem:[%s5027_s30 + $0x2f8] sm:$0xff]  ;;  %v744_v48 = vpack.c.bf16 %v680_v43, %v672_v42  ;;  %v4418_v42 = vld [vmem:[%s5841_s6 + $0xa0] sm:$0xff]   ;;  %v4419_v43 = vld [vmem:[%s5841_s6 + $0x68] sm:$0xff]  }
 0x140   : > { %1618 = vmatmul.mubr.bf16.vlgmr.msra.gmra.mrb[32].mxu1 %v697_v44  ;;  %3937 = vmatprep.subr.bf16.mxu0 %v4392_v47  ;;  %v738_v37 = vpack.c.bf16 %v666_v33, %v658_v32  ;;  %v674_v44 = vld [vmem:[%s5027_s30 + $0x338] sm:$0xff]  ;;  %v4408_v32 = vld [vmem:[%s5841_s6 + $0xd0] sm:$0xff]  }
 0x141   : > { %1625 = vmatprep.mubr.bf16.mxu1 %v706_v46  ;;  %v682_v45 = vld [vmem:[%s5027_s30 + $0x378] sm:$0xff]  ;;  %v735_v46 = vpack.c.bf16 %v663_v39, %v655_v38  ;;  %v4409_v33 = vld [vmem:[%s5841_s6 + $0x10] sm:$0xff]   ;;  %v4415_v39 = vld [vmem:[%s5841_s6 + $0x60] sm:$0xff]  }
 0x142   : > { %v746_v49 = vpack.c.bf16 %v682_v45, %v674_v44  ;;  %v4414_v38 = vld [vmem:[%s5841_s6 + $0x98] sm:$0xff]   ;;  %v4420_v44 = vld [vmem:[%s5841_s6 + $0xe8] sm:$0xff]  }
 0x143   : > { %3938 = vmatpush3.bf16.msra.mxu0 %v4392_v47  ;;  %v737_v47 = vpack.c.bf16 %v665_v41, %v657_v40  ;;  %v4416_v40 = vld [vmem:[%s5841_s6 + $0xe0] sm:$0xff]   ;;  %v4421_v45 = vld [vmem:[%s5841_s6 + $0x28] sm:$0xff]  }
 0x144   : > { %3939 = vmatprep.subr.bf16.mxu0 %v4393_v56  ;;  %v4417_v41 = vld [vmem:[%s5841_s6 + $0x20] sm:$0xff]  }
 0x146   : > { %1530 = vmatmul.mubr.bf16.gmra.mrb[36].mxu0 %v703_v57  ;;  %v745_v57 = vpack.c.bf16 %v681_v53, %v673_v52  ;;  %v4424_v52 = vld [vmem:[%s5841_s6 + $0xf0] sm:$0xff]  }
 0x147   : > { %1537 = vmatprep.mubr.bf16.mxu0 %v712_v59  ;;  %3940 = vmatpush3.bf16.msra.mxu0 %v4393_v56  ;;  %v743_v56 = vpack.c.bf16 %v679_v51, %v671_v50  ;;  %v754_v59 = vpack.c.bf16 %v690_v55, %v690_v55  ;;  %v4423_v51 = vld [vmem:[%s5841_s6 + $0x70] sm:$0xff]  }
 0x148   : > { %1626 = vmatmul.mubr.bf16.gmra.mrb[36].mxu1 %v705_v58  ;;  %3941 = vmatprep.subr.bf16.mxu0 %v4394_v62  ;;  %v752_v58 = vpack.c.bf16 %v688_v54, %v688_v54 }
 0x149   : > { %1633 = vmatprep.mubr.bf16.mxu1 %v714_v60  ;;  %v687_v60 = vld [vmem:[%s5027_s30 + $0x3a0] sm:$0xff] }
 0x14a   : > { %v751_v0 = vpack.c.bf16 %v687_v60, %v687_v60 }
 0x14b   : > { %3942 = vmatpush3.bf16.msra.mxu0 %v4394_v62  ;;  %v755_v62 = vld [vmem:[%s5034_s2] sm:$0xff] }
 0x14c   : > { %3943 = vmatprep.subr.bf16.mxu0 %v4395_v6  ;;  %v770_v2 = vpack.c.bf16 %v756_v63, %v755_v62 }
 0x14e   : > { %1538 = vmatmul.mubr.bf16.gmra.mrb[40].mxu0 %v711_v7  ;;  %v771_v7 = vpack.c.bf16 %v758_v4, %v757_v3 }
 0x14f   : > { %1545 = vmatprep.mubr.bf16.mxu0 %v720_v9  ;;  %3944 = vmatpush3.bf16.msra.mxu0 %v4395_v6  ;;  %v760_v6 = vld [vmem:[%s5034_s2 + $0x28] sm:$0xff]  ;;  %v761_v9 = vld [vmem:[%s5034_s2 + $0x30] sm:$0xff] }
 0x150   : > { %1634 = vmatmul.mubr.bf16.gmra.mrb[40].mxu1 %v713_v8  ;;  %3945 = vmatprep.subr.bf16.mxu0 %v4396_v13  ;;  %v772_v8 = vpack.c.bf16 %v760_v6, %v759_v5  ;;  %v4429_v5 = vld [vmem:[%s5841_s6 + $0x38] sm:$0xff]  }
 0x151   : > { %1641 = vmatprep.mubr.bf16.mxu1 %v722_v10  ;;  %v762_v10 = vld [vmem:[%s5034_s2 + $0x38] sm:$0xff] }
 0x152   : > { %v4430_v6 = vld [vmem:[%s5841_s6 + $0xb8] sm:$0xff]  }
 0x153   : > { %3946 = vmatpush3.bf16.msra.mxu0 %v4396_v13  ;;  %v773_v13 = vpack.c.bf16 %v762_v10, %v761_v9 }
 0x154   : > { %3947 = vmatprep.subr.bf16.mxu0 %v4397_v20 }
 0x156   : > { %1546 = vmatmul.mubr.bf16.gmra.mrb[44].mxu0 %v719_v21  ;;  %v769_v21 = vld [vmem:[%s5034_s2 + $0x70] sm:$0xff]  ;;  %s5768_s2 = scalar_lea.vmem %s5843_s8, %s4223_s19 }
 0x157   : > { %1553 = vmatprep.mubr.bf16.mxu0 %v728_v23  ;;  %3948 = vmatpush3.bf16.msra.mxu0 %v4397_v20  ;;  %v776_v20 = vpack.c.bf16 %v768_v18, %v767_v17  ;;  %v4399_v23 = vld [vmem:[%s5841_s6 + $0x40] sm:$0xff]  }
 0x158   : > { %1642 = vmatmul.mubr.bf16.gmra.mrb[44].mxu1 %v721_v22  ;;  %3949 = vmatprep.subr.bf16.mxu0 %v4398_v24  ;;  %v777_v22 = vpack.c.bf16 %v769_v21, %v769_v21 }
 0x159   : > { %1649 = vmatprep.mubr.bf16.mxu1 %v730_v25  ;;  %v4401_v25 = vld [vmem:[%s5841_s6] sm:$0xff]   ;;  %3683 = vmatprep.subr.bf16.mxu1 %v4399_v23 }
 0x15a   : > { %3684 = vmatpush3.bf16.msra.mxu1 %v4401_v25 }
 0x15b   : > { %3950 = vmatpush3.bf16.msra.mxu0 %v4398_v24  ;;  %v4400_v24 = vld [vmem:[%s5841_s6 + $0xc0] sm:$0xff]   ;;  %3685 = vmatprep.subr.bf16.mxu1 %v4403_v27 }
 0x15c   : > { %3747 = vmatprep.subr.bf16.mxu0 %v4400_v24 }
 0x15e   : > { %1554 = vmatmul.mubr.bf16.gmra.mrb[48].mxu0 %v727_v34  ;;  %3686 = vmatpush3.bf16.msra.mxu1 %v4405_v29  ;;  %v4410_v34 = vld [vmem:[%s5841_s6 + $0x90] sm:$0xff]  }
 0x15f   : > { %1561 = vmatprep.mubr.bf16.mxu0 %v736_v36  ;;  %3687 = vmatprep.subr.bf16.mxu1 %v4407_v31  ;;  %v4412_v36 = vld [vmem:[%s5841_s6 + $0xd8] sm:$0xff]  }
 0x160   : > { %1650 = vmatmul.mubr.bf16.gmra.mrb[48].mxu1 %v729_v35  ;;  %v4411_v35 = vld [vmem:[%s5841_s6 + $0x58] sm:$0xff]  }
 0x161   : > { %1657 = vmatprep.mubr.bf16.mxu1 %v738_v37  ;;  %v4413_v37 = vld [vmem:[%s5841_s6 + $0x18] sm:$0xff]  }
 0x162   : > { %3688 = vmatpush3.bf16.msra.mxu1 %v4409_v33  ;;  %v4431_v33 = vld [vmem:[%s5841_s6 + $0x140] sm:$0xff]  }
 0x163   : > { %3689 = vmatprep.subr.bf16.mxu1 %v4411_v35 }
 0x166   : > { %1562 = vmatmul.mubr.bf16.gmra.mrb[52].mxu0 %v735_v46  ;;  %3690 = vmatpush3.bf16.msra.mxu1 %v4413_v37  ;;  %v4422_v46 = vld [vmem:[%s5841_s6 + $0xa8] sm:$0xff]  }
 0x167   : > { %1569 = vmatprep.mubr.bf16.mxu0 %v744_v48  ;;  %3691 = vmatprep.subr.bf16.mxu1 %v4415_v39  ;;  %v5259_v48 = vld [vmem:[#allocation7] ss:$0 sm:$0xff] }
 0x168   : > { %1658 = vmatmul.mubr.bf16.gmra.mrb[52].mxu1 %v737_v47 }
 0x169   : > { %1665 = vmatprep.mubr.bf16.mxu1 %v746_v49 }
 0x16a   : > { %3692 = vmatpush3.bf16.msra.mxu1 %v4417_v41 }
 0x16b   : > { %3693 = vmatprep.subr.bf16.mxu1 %v4419_v43 }
 0x16e   : > { %1570 = vmatmul.mubr.bf16.gmra.mrb[56].mxu0 %v743_v56  ;;  %3694 = vmatpush3.bf16.msra.mxu1 %v4421_v45  ;;  %v4425_v56 = vld [vmem:[%s5841_s6 + $0x30] sm:$0xff]  }
 0x16f   : > { %1577 = vmatprep.mubr.bf16.mxu0 %v752_v58  ;;  %3695 = vmatprep.subr.bf16.mxu1 %v4423_v51 }
 0x170   : > { %1666 = vmatmul.mubr.bf16.gmra.mrb[56].mxu1 %v745_v57  ;;  %v4426_v57 = vld [vmem:[%s5841_s6 + $0xb0] sm:$0xff]  }
 0x171   : > { %1673 = vmatprep.mubr.bf16.mxu1 %v754_v59 }
 0x172   : > { %3696 = vmatpush3.bf16.msra.mxu1 %v4425_v56 }
 0x176   : > { %1578 = vmatmul.mubr.bf16.gmra.mrb[60].mxu0 %v751_v0 }
 0x177   : > { %3951 = vmatprep.mubr.bf16.mxu0 %v770_v2  ;;  %v4428_v2 = vld [vmem:[%s5841_s6 + $0xf8] sm:$0xff]  }
 0x178   : > { %1674 = vmatmul.mubr.bf16.gmra.mrb[60].mxu1 %v753_v1  ;;  %v4427_v1 = vld [vmem:[%s5841_s6 + $0x78] sm:$0xff]  }
 0x179   : > { %3697 = vmatprep.subr.bf16.mxu1 %v4427_v1 }
 0x17a   : > { %3698 = vmatpush3.bf16.msra.mxu1 %v4429_v5 }
 0x17e   : > { %3952 = vmatmul.mubr.bf16.vlgmr.msra.gmra.mrb[64].mxu0 %v771_v7 }
 0x17f   : > { %3955 = vmatprep.mubr.bf16.mxu0 %v772_v8  ;;  %3748 = vmatpush3.bf16.msra.mxu0 %v4402_v26 }
 0x180   : > { %3749 = vmatprep.subr.bf16.mxu0 %v4404_v28 }
 0x183   : > { %3750 = vmatpush3.bf16.msra.mxu0 %v4406_v30 }
 0x184   : > { %3751 = vmatprep.subr.bf16.mxu0 %v4408_v32 }
 0x186   : > { %3956 = vmatmul.mubr.bf16.gmra.mrb[68].mxu0 %v773_v13 }
 0x187   : > { %3959 = vmatprep.mubr.bf16.mxu0 %v774_v14  ;;  %3752 = vmatpush3.bf16.msra.mxu0 %v4410_v34 }
 0x188   : > { %3753 = vmatprep.subr.bf16.mxu0 %v4412_v36 }
 0x18b   : > { %3754 = vmatpush3.bf16.msra.mxu0 %v4414_v38 }
 0x18c   : > { %3755 = vmatprep.subr.bf16.mxu0 %v4416_v40 }
 0x18e   : > { %3960 = vmatmul.mubr.bf16.gmra.mrb[72].mxu0 %v775_v19 }
 0x18f   : > { %3963 = vmatprep.mubr.bf16.mxu0 %v776_v20  ;;  %3756 = vmatpush3.bf16.msra.mxu0 %v4418_v42 }
 0x190   : > { %3757 = vmatprep.subr.bf16.mxu0 %v4420_v44 }
 0x193   : > { %3758 = vmatpush3.bf16.msra.mxu0 %v4422_v46 }
 0x194   : > { %3759 = vmatprep.subr.bf16.mxu0 %v4424_v52 }
 0x196   : > { %3964 = vmatmul.mubr.bf16.gmra.mrb[76].mxu0 %v777_v22 }
 0x197   : > { %3760 = vmatpush3.bf16.msra.mxu0 %v4426_v57 }
 0x198   : > { %3761 = vmatprep.subr.bf16.mxu0 %v4428_v2 }
 0x19b   : > { %3762 = vmatpush3.bf16.msra.mxu0 %v4430_v6 }
 0x19c   : > { %3841 = vmatprep.subr.bf16.mxu0 %v4431_v33 }
 0x1d1   : > { %v3427_v47 = vpop.f32.mrb[0].mxu0 }
 0x1d2   : > { %v3428_v49 = vpop.f32.mrb[1].mxu0 }
 0x1d3   : > { %v3491_v50 = vpop.f32.mrb[0].mxu1  ;;  %v3429_v53 = vadd.f32 %v3428_v49, %v3427_v47  ;;  %v3430_v54 = vpop.f32.mrb[2].mxu0 }
 0x1d4   : > { %v3492_v55 = vpop.f32.mrb[1].mxu1  ;;  %v3431_v58 = vpop.f32.mrb[3].mxu0 }
 0x1d5   : > { %v3493_v59 = vadd.f32 %v3492_v55, %v3491_v50  ;;  %v3494_v60 = vpop.f32.mrb[2].mxu1  ;;  %v1332_v61 = vadd.f32 %v3429_v53, %v5259_v48  ;;  %v3432_v62 = vadd.f32 %v3431_v58, %v3430_v54 }
 0x1d6   : > { %v3495_v63 = vpop.f32.mrb[3].mxu1 }
 0x1d7   : > { %v3496_v0 = vadd.f32 %v3495_v63, %v3494_v60  ;;  %v1335_v3 = vadd.f32 %v3432_v62, %v5259_v48  ;;  %v5281_v4 = vadd.f32 %v3493_v59, %v1332_v61 }
 0x1d9   : > { %v5289_v7 = vadd.f32 %v3496_v0, %v1335_v3  ;;  %v3433_v8 = vpop.f32.mrb[4].mxu0 }
 0x1da   : > { %v3434_v9 = vpop.f32.mrb[5].mxu0 }
 0x1db   : > { %v3497_v10 = vpop.f32.mrb[4].mxu1  ;;  %v3435_v11 = vadd.f32 %v3434_v9, %v3433_v8  ;;  %v3436_v12 = vpop.f32.mrb[6].mxu0 }
 0x1dc   : > { %v3498_v13 = vpop.f32.mrb[5].mxu1  ;;  %v3437_v14 = vpop.f32.mrb[7].mxu0 }
 0x1dd   : > { %v3499_v15 = vadd.f32 %v3498_v13, %v3497_v10  ;;  %v3500_v16 = vpop.f32.mrb[6].mxu1  ;;  %v1340_v17 = vadd.f32 %v3435_v11, %v5259_v48  ;;  %v3438_v18 = vadd.f32 %v3437_v14, %v3436_v12 }
 0x1de   : > { %v3501_v19 = vpop.f32.mrb[7].mxu1 }
 0x1df   : > { %v3502_v20 = vadd.f32 %v3501_v19, %v3500_v16  ;;  %v1343_v21 = vadd.f32 %v3438_v18, %v5259_v48  ;;  %v5293_v22 = vadd.f32 %v3499_v15, %v1340_v17 }
 0x1e1   : > { %v5295_v23 = vadd.f32 %v3502_v20, %v1343_v21  ;;  %v3439_v24 = vpop.f32.mrb[8].mxu0 }
 0x1e2   : > { %v3440_v25 = vpop.f32.mrb[9].mxu0 }
 0x1e3   : > { %v3503_v26 = vpop.f32.mrb[8].mxu1  ;;  %v3441_v27 = vadd.f32 %v3440_v25, %v3439_v24  ;;  %v3442_v28 = vpop.f32.mrb[10].mxu0 }
 0x1e4   : > { %v3504_v29 = vpop.f32.mrb[9].mxu1  ;;  %v3443_v30 = vpop.f32.mrb[11].mxu0 }
 0x1e5   : > { %v3505_v31 = vadd.f32 %v3504_v29, %v3503_v26  ;;  %v3506_v32 = vpop.f32.mrb[10].mxu1  ;;  %v1348_v34 = vadd.f32 %v3441_v27, %v5259_v48  ;;  %v3444_v35 = vadd.f32 %v3443_v30, %v3442_v28 }
 0x1e6   : > { %v3507_v36 = vpop.f32.mrb[11].mxu1 }
 0x1e7   : > { %v3508_v37 = vadd.f32 %v3507_v36, %v3506_v32  ;;  %v1351_v38 = vadd.f32 %v3444_v35, %v5259_v48  ;;  %v5302_v39 = vadd.f32 %v3505_v31, %v1348_v34 }
 0x1e9   : > { %v5304_v40 = vadd.f32 %v3508_v37, %v1351_v38  ;;  %v3445_v41 = vpop.f32.mrb[12].mxu0 }
 0x1ea   : > { %v3446_v42 = vpop.f32.mrb[13].mxu0 }
 0x1eb   : > { %v3509_v43 = vpop.f32.mrb[12].mxu1  ;;  %v3447_v44 = vadd.f32 %v3446_v42, %v3445_v41  ;;  %v3448_v45 = vpop.f32.mrb[14].mxu0 }
 0x1ec   : > { %v3510_v46 = vpop.f32.mrb[13].mxu1  ;;  %v3449_v47 = vpop.f32.mrb[15].mxu0 }
 0x1ed   : > { %v3511_v49 = vadd.f32 %v3510_v46, %v3509_v43  ;;  %v3512_v50 = vpop.f32.mrb[14].mxu1  ;;  %v1356_v51 = vadd.f32 %v3447_v44, %v5259_v48  ;;  %v3450_v52 = vadd.f32 %v3449_v47, %v3448_v45 }
 0x1ee   : > { %v3513_v53 = vpop.f32.mrb[15].mxu1 }
 0x1ef   : > { %v3514_v54 = vadd.f32 %v3513_v53, %v3512_v50  ;;  %v1359_v55 = vadd.f32 %v3450_v52, %v5259_v48  ;;  %v5308_v56 = vadd.f32 %v3511_v49, %v1356_v51 }
 0x1f1   : > { %v5310_v57 = vadd.f32 %v3514_v54, %v1359_v55  ;;  %v3451_v58 = vpop.f32.mrb[16].mxu0 }
 0x1f2   : > { %v3452_v59 = vpop.f32.mrb[17].mxu0 }
 0x1f3   : > { %v3515_v60 = vpop.f32.mrb[16].mxu1  ;;  %v3453_v61 = vadd.f32 %v3452_v59, %v3451_v58  ;;  %v3454_v62 = vpop.f32.mrb[18].mxu0 }
 0x1f4   : > { %v3516_v63 = vpop.f32.mrb[17].mxu1  ;;  %v3455_v0 = vpop.f32.mrb[19].mxu0 }
 0x1f5   : > { %v3517_v1 = vadd.f32 %v3516_v63, %v3515_v60  ;;  %v3518_v2 = vpop.f32.mrb[18].mxu1  ;;  %v1364_v3 = vadd.f32 %v3453_v61, %v5259_v48  ;;  %v3456_v5 = vadd.f32 %v3455_v0, %v3454_v62 }
 0x1f6   : > { %v3519_v6 = vpop.f32.mrb[19].mxu1 }
 0x1f7   : > { %v3520_v8 = vadd.f32 %v3519_v6, %v3518_v2  ;;  %v1367_v9 = vadd.f32 %v3456_v5, %v5259_v48  ;;  %v5314_v10 = vadd.f32 %v3517_v1, %v1364_v3 }
 0x1f9   : > { %v5316_v11 = vadd.f32 %v3520_v8, %v1367_v9  ;;  %v3457_v12 = vpop.f32.mrb[20].mxu0 }
 0x1fa   : > { %v3458_v13 = vpop.f32.mrb[21].mxu0 }
 0x1fb   : > { %v3521_v14 = vpop.f32.mrb[20].mxu1  ;;  %v3459_v15 = vadd.f32 %v3458_v13, %v3457_v12  ;;  %v3460_v16 = vpop.f32.mrb[22].mxu0 }
 0x1fc   : > { %v3522_v17 = vpop.f32.mrb[21].mxu1  ;;  %v3461_v18 = vpop.f32.mrb[23].mxu0 }
 0x1fd   : > { %v3523_v19 = vadd.f32 %v3522_v17, %v3521_v14  ;;  %v3524_v20 = vpop.f32.mrb[22].mxu1  ;;  %v1372_v21 = vadd.f32 %v3459_v15, %v5259_v48  ;;  %v3462_v24 = vadd.f32 %v3461_v18, %v3460_v16 }
 0x1fe   : > { %v3525_v25 = vpop.f32.mrb[23].mxu1 }
 0x1ff   : > { %v3526_v26 = vadd.f32 %v3525_v25, %v3524_v20  ;;  %v1375_v27 = vadd.f32 %v3462_v24, %v5259_v48  ;;  %v5320_v28 = vadd.f32 %v3523_v19, %v1372_v21 }
 0x201   : > { %v5322_v29 = vadd.f32 %v3526_v26, %v1375_v27  ;;  %v3463_v30 = vpop.f32.mrb[24].mxu0 }
 0x202   : > { %v3464_v31 = vpop.f32.mrb[25].mxu0 }
 0x203   : > { %v3527_v32 = vpop.f32.mrb[24].mxu1  ;;  %v3465_v33 = vadd.f32 %v3464_v31, %v3463_v30  ;;  %v3466_v34 = vpop.f32.mrb[26].mxu0 }
 0x204   : > { %v3528_v35 = vpop.f32.mrb[25].mxu1  ;;  %v3467_v36 = vpop.f32.mrb[27].mxu0 }
 0x205   : > { %v3529_v37 = vadd.f32 %v3528_v35, %v3527_v32  ;;  %v3530_v38 = vpop.f32.mrb[26].mxu1  ;;  %v1380_v41 = vadd.f32 %v3465_v33, %v5259_v48  ;;  %v3468_v42 = vadd.f32 %v3467_v36, %v3466_v34 }
 0x206   : > { %v3531_v43 = vpop.f32.mrb[27].mxu1 }
 0x207   : > { %v3532_v44 = vadd.f32 %v3531_v43, %v3530_v38  ;;  %v1383_v45 = vadd.f32 %v3468_v42, %v5259_v48  ;;  %v5326_v46 = vadd.f32 %v3529_v37, %v1380_v41 }
 0x209   : > { %v5328_v47 = vadd.f32 %v3532_v44, %v1383_v45  ;;  %v3469_v49 = vpop.f32.mrb[28].mxu0 }
 0x20a   : > { %v3470_v50 = vpop.f32.mrb[29].mxu0 }
 0x20b   : > { %v3533_v51 = vpop.f32.mrb[28].mxu1  ;;  %v3471_v52 = vadd.f32 %v3470_v50, %v3469_v49  ;;  %v3472_v53 = vpop.f32.mrb[30].mxu0 }
 0x20c   : > { %v3534_v54 = vpop.f32.mrb[29].mxu1  ;;  %v3473_v55 = vpop.f32.mrb[31].mxu0 }
 0x20d   : > { %v3535_v58 = vadd.f32 %v3534_v54, %v3533_v51  ;;  %v3536_v59 = vpop.f32.mrb[30].mxu1  ;;  %v1388_v60 = vadd.f32 %v3471_v52, %v5259_v48 }
 0x20e   : > { %v3537_v61 = vpop.f32.mrb[31].mxu1 }
 0x20f   : > { %v5331_v62 = vadd.f32 %v3535_v58, %v1388_v60 }
 0x211   : > { %v3555_v63 = vpop.f32.mrb[32].mxu0 }
 0x212   : > { %v3556_v0 = vpop.f32.mrb[33].mxu0 }
 0x213   : > { %v3619_v1 = vpop.f32.mrb[32].mxu1  ;;  %v3557_v2 = vadd.f32 %v3556_v0, %v3555_v63  ;;  %v3558_v3 = vpop.f32.mrb[34].mxu0 }
 0x214   : > { %v3620_v5 = vpop.f32.mrb[33].mxu1  ;;  %v3559_v6 = vpop.f32.mrb[35].mxu0 }
 0x215   : > { %v3621_v8 = vadd.f32 %v3620_v5, %v3619_v1  ;;  %v3622_v9 = vpop.f32.mrb[34].mxu1  ;;  %v1524_v12 = vadd.f32 %v3557_v2, %v5281_v4  ;;  %v3560_v13 = vadd.f32 %v3559_v6, %v3558_v3 }
 0x216   : > { %v3623_v14 = vpop.f32.mrb[35].mxu1 }
 0x217   : > { %v3624_v15 = vadd.f32 %v3623_v14, %v3622_v9  ;;  %v1527_v16 = vadd.f32 %v3560_v13, %v5289_v7  ;;  %v1620_v48 = vadd.f32 %v3621_v8, %v1524_v12 }
 0x219   : > { %v1623_v17 = vadd.f32 %v3624_v15, %v1527_v16  ;;  %v3561_v18 = vpop.f32.mrb[36].mxu0  ;;  %v1681_v21 = vmax.f32 %v1620_v48, 0.0 }
 0x21a   : > { %v3562_v19 = vpop.f32.mrb[37].mxu0 }
 0x21b   : > { %v3625_v20 = vpop.f32.mrb[36].mxu1  ;;  %v1682_v24 = vmax.f32 %v1623_v17, 0.0  ;;  %v3563_v25 = vadd.f32 %v3562_v19, %v3561_v18  ;;  %v3564_v26 = vpop.f32.mrb[38].mxu0 }
 0x21c   : > { %v3626_v27 = vpop.f32.mrb[37].mxu1  ;;  %v3565_v30 = vpop.f32.mrb[39].mxu0 }
 0x21d   : > { %v3627_v31 = vadd.f32 %v3626_v27, %v3625_v20  ;;  %v3628_v32 = vpop.f32.mrb[38].mxu1  ;;  %v5335_v33 = vpack.c.bf16 %v1682_v24, %v1681_v21  ;;  %v1532_v4 = vadd.f32 %v3563_v25, %v5293_v22  ;;  %v3566_v34 = vadd.f32 %v3565_v30, %v3564_v26 }
 0x21e   : > { %v3629_v35 = vpop.f32.mrb[39].mxu1 }
 0x21f   : > { %v3630_v7 = vadd.f32 %v3629_v35, %v3628_v32  ;;  %v1535_v36 = vadd.f32 %v3566_v34, %v5295_v23  ;;  %v1628_v37 = vadd.f32 %v3627_v31, %v1532_v4 }
 0x221   : > { %v1631_v38 = vadd.f32 %v3630_v7, %v1535_v36  ;;  %v3567_v41 = vpop.f32.mrb[40].mxu0  ;;  %v1683_v44 = vmax.f32 %v1628_v37, 0.0 }
 0x222   : > { %v3568_v42 = vpop.f32.mrb[41].mxu0 }
 0x223   : > { %v3631_v43 = vpop.f32.mrb[40].mxu1  ;;  %v1684_v45 = vmax.f32 %v1631_v38, 0.0  ;;  %v3569_v49 = vadd.f32 %v3568_v42, %v3567_v41  ;;  %v3570_v50 = vpop.f32.mrb[42].mxu0 }
 0x224   : > { %v3632_v51 = vpop.f32.mrb[41].mxu1  ;;  %v3571_v52 = vpop.f32.mrb[43].mxu0 }
 0x225   : > { %v3633_v53 = vadd.f32 %v3632_v51, %v3631_v43  ;;  %v3634_v54 = vpop.f32.mrb[42].mxu1  ;;  %v1540_v22 = vadd.f32 %v3569_v49, %v5302_v39  ;;  %v3572_v55 = vadd.f32 %v3571_v52, %v3570_v50  ;;  %v5340_v59 = vpack.c.bf16 %v1684_v45, %v1683_v44 }
 0x226   : > { %v3635_v58 = vpop.f32.mrb[43].mxu1 }
 0x227   : > { %v3636_v23 = vadd.f32 %v3635_v58, %v3634_v54  ;;  %v1543_v60 = vadd.f32 %v3572_v55, %v5304_v40  ;;  %v1636_v61 = vadd.f32 %v3633_v53, %v1540_v22 }
 0x229   : > { %v1639_v63 = vadd.f32 %v3636_v23, %v1543_v60  ;;  %v3573_v0 = vpop.f32.mrb[44].mxu0  ;;  %v1685_v3 = vmax.f32 %v1636_v61, 0.0 }
 0x22a   : > { %v3574_v1 = vpop.f32.mrb[45].mxu0 }
 0x22b   : > { %v3637_v2 = vpop.f32.mrb[44].mxu1  ;;  %v1686_v5 = vmax.f32 %v1639_v63, 0.0  ;;  %v3575_v6 = vadd.f32 %v3574_v1, %v3573_v0  ;;  %v3576_v8 = vpop.f32.mrb[46].mxu0 }
 0x22c   : > { %v3638_v9 = vpop.f32.mrb[45].mxu1  ;;  %v3577_v12 = vpop.f32.mrb[47].mxu0 }
 0x22d   : > { %v3639_v13 = vadd.f32 %v3638_v9, %v3637_v2  ;;  %v3640_v39 = vpop.f32.mrb[46].mxu1  ;;  %v1548_v14 = vadd.f32 %v3575_v6, %v5308_v56  ;;  %v3578_v15 = vadd.f32 %v3577_v12, %v3576_v8  ;;  %v5344_v48 = vpack.c.bf16 %v1686_v5, %v1685_v3 }
 0x22e   : > { %v3641_v16 = vpop.f32.mrb[47].mxu1 }
 0x22f   : > { %v3642_v40 = vadd.f32 %v3641_v16, %v3640_v39  ;;  %v1551_v17 = vadd.f32 %v3578_v15, %v5310_v57  ;;  %v1644_v18 = vadd.f32 %v3639_v13, %v1548_v14 }
 0x231   : > { %v1647_v19 = vadd.f32 %v3642_v40, %v1551_v17  ;;  %v3579_v20 = vpop.f32.mrb[48].mxu0  ;;  %v1687_v25 = vmax.f32 %v1644_v18, 0.0 }
 0x232   : > { %v3580_v21 = vpop.f32.mrb[49].mxu0 }
 0x233   : > { %v3643_v24 = vpop.f32.mrb[48].mxu1  ;;  %v1688_v26 = vmax.f32 %v1647_v19, 0.0  ;;  %v3581_v27 = vadd.f32 %v3580_v21, %v3579_v20  ;;  %v3582_v30 = vpop.f32.mrb[50].mxu0 }
 0x234   : > { %v3644_v31 = vpop.f32.mrb[49].mxu1  ;;  %v3583_v32 = vpop.f32.mrb[51].mxu0 }
 0x235   : > { %v3645_v4 = vadd.f32 %v3644_v31, %v3643_v24  ;;  %v3646_v56 = vpop.f32.mrb[50].mxu1  ;;  %v1556_v34 = vadd.f32 %v3581_v27, %v5314_v10  ;;  %v3584_v35 = vadd.f32 %v3583_v32, %v3582_v30  ;;  %v5348_v36 = vpack.c.bf16 %v1688_v26, %v1687_v25 }
 0x236   : > { %v3647_v7 = vpop.f32.mrb[51].mxu1 }
 0x237   : > { %v3648_v57 = vadd.f32 %v3647_v7, %v3646_v56  ;;  %v1559_v37 = vadd.f32 %v3584_v35, %v5316_v11  ;;  %v1652_v38 = vadd.f32 %v3645_v4, %v1556_v34 }
 0x239   : > { %v1655_v41 = vadd.f32 %v3648_v57, %v1559_v37  ;;  %v3585_v42 = vpop.f32.mrb[52].mxu0  ;;  %v1689_v45 = vmax.f32 %v1652_v38, 0.0 }
 0x23a   : > { %v3586_v43 = vpop.f32.mrb[53].mxu0 }
 0x23b   : > { %v3649_v44 = vpop.f32.mrb[52].mxu1  ;;  %v1690_v49 = vmax.f32 %v1655_v41, 0.0  ;;  %v3587_v50 = vadd.f32 %v3586_v43, %v3585_v42  ;;  %v3588_v51 = vpop.f32.mrb[54].mxu0 }
 0x23c   : > { %v3650_v52 = vpop.f32.mrb[53].mxu1  ;;  %v3589_v53 = vpop.f32.mrb[55].mxu0 }
 0x23d   : > { %v3651_v54 = vadd.f32 %v3650_v52, %v3649_v44  ;;  %v3652_v10 = vpop.f32.mrb[54].mxu1  ;;  %v1564_v22 = vadd.f32 %v3587_v50, %v5320_v28  ;;  %v3590_v55 = vadd.f32 %v3589_v53, %v3588_v51  ;;  %v5352_v23 = vpack.c.bf16 %v1690_v49, %v1689_v45 }
 0x23e   : > { %v3653_v58 = vpop.f32.mrb[55].mxu1 }
 0x23f   : > { %v3654_v11 = vadd.f32 %v3653_v58, %v3652_v10  ;;  %v1567_v60 = vadd.f32 %v3590_v55, %v5322_v29  ;;  %v1660_v61 = vadd.f32 %v3651_v54, %v1564_v22  ;;  %v4432_v22 = vld [vmem:[%s5841_s6 + $0x100] sm:$0xff]  }
 0x241   : > { %v1663_v63 = vadd.f32 %v3654_v11, %v1567_v60  ;;  %v3591_v0 = vpop.f32.mrb[56].mxu0  ;;  %v1691_v3 = vmax.f32 %v1660_v61, 0.0  ;;  %v4433_v11 = vld [vmem:[%s5841_s6 + $0x148] sm:$0xff]  }
 0x242   : > { %v3592_v1 = vpop.f32.mrb[57].mxu0 }
 0x243   : > { %v3655_v2 = vpop.f32.mrb[56].mxu1  ;;  %v1692_v5 = vmax.f32 %v1663_v63, 0.0  ;;  %v3593_v6 = vadd.f32 %v3592_v1, %v3591_v0  ;;  %v3594_v8 = vpop.f32.mrb[58].mxu0 }
 0x244   : > { %v3656_v9 = vpop.f32.mrb[57].mxu1  ;;  %v3595_v12 = vpop.f32.mrb[59].mxu0 }
 0x245   : > { %v3657_v13 = vadd.f32 %v3656_v9, %v3655_v2  ;;  %v3658_v28 = vpop.f32.mrb[58].mxu1  ;;  %v1572_v39 = vadd.f32 %v3593_v6, %v5326_v46  ;;  %v3596_v14 = vadd.f32 %v3595_v12, %v3594_v8  ;;  %v5356_v16 = vpack.c.bf16 %v1692_v5, %v1691_v3  ;;  %v4434_v3 = vld [vmem:[%s5841_s6 + $0x108] sm:$0xff]   ;;  %v4435_v6 = vld [vmem:[%s5841_s6 + $0x150] sm:$0xff]  }
 0x246   : > { %v3659_v15 = vpop.f32.mrb[59].mxu1 }
 0x247   : > { %v3660_v29 = vadd.f32 %v3659_v15, %v3658_v28  ;;  %v1575_v40 = vadd.f32 %v3596_v14, %v5328_v47  ;;  %v1668_v17 = vadd.f32 %v3657_v13, %v1572_v39  ;;  %v5364_v47 = vld [vmem:[#allocation10] ss:$0 sm:$0xff] }
 0x248   : > { %v4436_v39 = vld [vmem:[%s5841_s6 + $0x110] sm:$0xff]  }
 0x249   : > { %v1671_v18 = vadd.f32 %v3660_v29, %v1575_v40  ;;  %v3597_v19 = vpop.f32.mrb[60].mxu0  ;;  %v1693_v24 = vmax.f32 %v1668_v17, 0.0  ;;  %v4437_v29 = vld [vmem:[%s5841_s6 + $0x158] sm:$0xff]  }
 0x24a   : > { %v3598_v20 = vpop.f32.mrb[61].mxu0 }
 0x24b   : > { %v3661_v21 = vpop.f32.mrb[60].mxu1  ;;  %v1694_v25 = vmax.f32 %v1671_v18, 0.0  ;;  %v3599_v26 = vadd.f32 %v3598_v20, %v3597_v19  ;;  %v3600_v27 = vpop.f32.mrb[62].mxu0 }
 0x24c   : > { %v3662_v30 = vpop.f32.mrb[61].mxu1  ;;  %v3601_v31 = vpop.f32.mrb[63].mxu0 }
 0x24d   : > { %v3663_v32 = vadd.f32 %v3662_v30, %v3661_v21  ;;  %v3664_v46 = vpop.f32.mrb[62].mxu1  ;;  %v1580_v4 = vadd.f32 %v3599_v26, %v5331_v62  ;;  %v5360_v34 = vpack.c.bf16 %v1694_v25, %v1693_v24  ;;  %v4438_v24 = vld [vmem:[%s5841_s6 + $0x118] sm:$0xff]   ;;  %v4439_v26 = vld [vmem:[%s5841_s6 + $0x160] sm:$0xff]  }
 0x24e   : > { %v3665_v56 = vpop.f32.mrb[63].mxu1  ;;  %v4440_v46 = vld [vmem:[%s5841_s6 + $0x120] sm:$0xff]  }
 0x24f   : > { %v5362_v35 = vadd.f32 %v3663_v32, %v1580_v4 }
 0x251   : > { %v3953_v7 = vpop.f32.mrb[64].mxu0 }
 0x252   : > { %v1810_v57 = vadd.f32 %v3953_v7, %v5364_v47  ;;  %v1801_v37 = vpop.f32.mrb[65].mxu0  ;;  %v4441_v7 = vld [vmem:[%s5841_s6 + $0x168] sm:$0xff]  }
 0x253   : > { %v1802_v38 = vadd.f32 %v5364_v47, %v1801_v37  ;;  %v3954_v41 = vpop.f32.mrb[66].mxu0 }
 0x254   : > { %v1813_v42 = vadd.f32 %v3954_v41, %v5364_v47  ;;  %v1804_v43 = vpop.f32.mrb[67].mxu0  ;;  %v1865_v62 = vmax.f32 %v1810_v57, 0.0  ;;  %v4442_v41 = vld [vmem:[%s5841_s6 + $0x128] sm:$0xff]  }
 0x255   : > { %v1805_v44 = vadd.f32 %v5364_v47, %v1804_v43  ;;  %v1863_v49 = vmax.f32 %v1802_v38, 0.0  ;;  %v4443_v43 = vld [vmem:[%s5841_s6 + $0x170] sm:$0xff]  }
 0x256   : > { %v1866_v45 = vmax.f32 %v1813_v42, 0.0 }
 0x257   : > { %v1864_v50 = vmax.f32 %v1805_v44, 0.0 }
 0x258   : > { %v5370_v51 = vpack.c.bf16 %v1866_v45, %v1865_v62  ;;  %v4444_v62 = vld [vmem:[%s5841_s6 + $0x130] sm:$0xff]   ;;  %v4445_v45 = vld [vmem:[%s5841_s6 + $0x178] sm:$0xff]  }
 0x259   : > { %v5372_v52 = vpack.c.bf16 %v1864_v50, %v1863_v49  ;;  %v3957_v53 = vpop.f32.mrb[68].mxu0  ;;  %v4446_v49 = vld [vmem:[%s5841_s6 + $0x138] sm:$0xff]  }
 0x25a   : > { %v1826_v54 = vadd.f32 %v3957_v53, %v5364_v47  ;;  %v1817_v10 = vpop.f32.mrb[69].mxu0 }
 0x25b   : > { %2062 = vmatprep.mubr.bf16.mxu1 %v5372_v52  ;;  %2302 = vmatprep.mubr.bf16.mxu0 %v5372_v52  ;;  %v1818_v55 = vadd.f32 %v5364_v47, %v1817_v10  ;;  %v3958_v58 = vpop.f32.mrb[70].mxu0  ;;  %v1695_v10 = vmax.f32 %v5362_v35, 0.0  ;;  %v4711_v35 = vmov 0.0|0.0  }
 0x25c   : > { %2063 = vmatmul.mubr.bf16.vlgmr.msra.gmra.mrb[64].mxu1 %v5335_v33  ;;  %2303 = vmatmul.mubr.bf16.vlgmr.msra.gmra.mrb[80].mxu0 %v5335_v33  ;;  %v1869_v60 = vmax.f32 %v1826_v54, 0.0  ;;  %v1829_v61 = vadd.f32 %v3958_v58, %v5364_v47  ;;  %v1820_v63 = vpop.f32.mrb[71].mxu0 }
 0x25d   : > { %2070 = vmatprep.mubr.bf16.mxu1 %v5370_v51  ;;  %2310 = vmatprep.mubr.bf16.mxu0 %v5370_v51  ;;  %v1867_v0 = vmax.f32 %v1818_v55, 0.0  ;;  %v1821_v1 = vadd.f32 %v5364_v47, %v1820_v63 }
 0x25e   : > { %v1870_v2 = vmax.f32 %v1829_v61, 0.0  ;;  %3842 = vmatpush3.bf16.msra.mxu0 %v4432_v22  ;;  %v1892_v22 = vpack.c.bf16 %v1695_v10, %v1695_v10  ;;  %4117 = vmatprep.subr.bf16.mxu1 %v4711_v35 }
 0x25f   : > { %v1868_v5 = vmax.f32 %v1821_v1, 0.0  ;;  %3843 = vmatprep.subr.bf16.mxu0 %v4433_v11 }
 0x260   : > { %v5396_v8 = vpack.c.bf16 %v1870_v2, %v1869_v60 }
 0x261   : > { %v5398_v9 = vpack.c.bf16 %v1868_v5, %v1867_v0  ;;  %v3961_v12 = vpop.f32.mrb[72].mxu0 }
 0x262   : > { %v1842_v13 = vadd.f32 %v3961_v12, %v5364_v47  ;;  %3844 = vmatpush3.bf16.msra.mxu0 %v4434_v3  ;;  %v1833_v28 = vpop.f32.mrb[73].mxu0 }
 0x263   : > { %v1834_v14 = vadd.f32 %v5364_v47, %v1833_v28  ;;  %v3962_v15 = vpop.f32.mrb[74].mxu0  ;;  %3845 = vmatprep.subr.bf16.mxu0 %v4435_v6 }
 0x264   : > { %2071 = vmatmul.mubr.bf16.gmra.mrb[68].mxu1 %v5340_v59  ;;  %2311 = vmatmul.mubr.bf16.gmra.mrb[84].mxu0 %v5340_v59  ;;  %v1873_v40 = vmax.f32 %v1842_v13, 0.0  ;;  %v1845_v17 = vadd.f32 %v3962_v15, %v5364_v47  ;;  %v1836_v18 = vpop.f32.mrb[75].mxu0 }
 0x265   : > { %2078 = vmatprep.mubr.bf16.mxu1 %v5398_v9  ;;  %2318 = vmatprep.mubr.bf16.mxu0 %v5398_v9  ;;  %v1871_v19 = vmax.f32 %v1834_v14, 0.0  ;;  %v1837_v20 = vadd.f32 %v5364_v47, %v1836_v18 }
 0x266   : > { %v1874_v21 = vmax.f32 %v1845_v17, 0.0  ;;  %3846 = vmatpush3.bf16.msra.mxu0 %v4436_v39 }
 0x267   : > { %v1872_v25 = vmax.f32 %v1837_v20, 0.0  ;;  %3847 = vmatprep.subr.bf16.mxu0 %v4437_v29 }
 0x268   : > { %v5420_v27 = vpack.c.bf16 %v1874_v21, %v1873_v40 }
 0x269   : > { %v1887_v30 = vpack.c.bf16 %v1872_v25, %v1871_v19  ;;  %v3965_v31 = vpop.f32.mrb[76].mxu0 }
 0x26a   : > { %3848 = vmatpush3.bf16.msra.mxu0 %v4438_v24  ;;  %v1849_v32 = vpop.f32.mrb[77].mxu0  ;;  %v1858_v50 = vadd.f32 %v3965_v31, %v5364_v47 }
 0x26b   : > { %v1850_v4 = vadd.f32 %v5364_v47, %v1849_v32  ;;  %v3966_v56 = vpop.f32.mrb[78].mxu0  ;;  %3849 = vmatprep.subr.bf16.mxu0 %v4439_v26 }
 0x26c   : > { %2079 = vmatmul.mubr.bf16.gmra.mrb[72].mxu1 %v5344_v48  ;;  %2319 = vmatmul.mubr.bf16.gmra.mrb[88].mxu0 %v5344_v48  ;;  %v1852_v57 = vpop.f32.mrb[79].mxu0  ;;  %v1877_v53 = vmax.f32 %v1858_v50, 0.0 }
 0x26d   : > { %2086 = vmatprep.mubr.bf16.mxu1 %v5396_v8  ;;  %2326 = vmatprep.mubr.bf16.mxu0 %v5396_v8  ;;  %v1875_v37 = vmax.f32 %v1850_v4, 0.0  ;;  %v1853_v38 = vadd.f32 %v5364_v47, %v1852_v57 }
 0x26e   : > { %3850 = vmatpush3.bf16.msra.mxu0 %v4440_v46  ;;  %v1893_v54 = vpack.c.bf16 %v1877_v53, %v1877_v53 }
 0x26f   : > { %v1876_v42 = vmax.f32 %v1853_v38, 0.0  ;;  %3851 = vmatprep.subr.bf16.mxu0 %v4441_v7 }
 0x271   : > { %v1891_v44 = vpack.c.bf16 %v1876_v42, %v1875_v37 }
 0x272   : > { %3852 = vmatpush3.bf16.msra.mxu0 %v4442_v41 }
 0x273   : > { %3853 = vmatprep.subr.bf16.mxu0 %v4443_v43 }
 0x274   : > { %2087 = vmatmul.mubr.bf16.gmra.mrb[76].mxu1 %v5348_v36  ;;  %2327 = vmatmul.mubr.bf16.gmra.mrb[92].mxu0 %v5348_v36 }
 0x275   : > { %2094 = vmatprep.mubr.bf16.mxu1 %v1887_v30  ;;  %2334 = vmatprep.mubr.bf16.mxu0 %v1887_v30 }
 0x276   : > { %3854 = vmatpush3.bf16.msra.mxu0 %v4444_v62 }
 0x277   : > { %3855 = vmatprep.subr.bf16.mxu0 %v4445_v45 }
 0x27a   : > { %3856 = vmatpush3.bf16.msra.mxu0 %v4446_v49 }
 0x27b   : > { %4138 = vmatprep.subr.bf16.mxu0 %v4711_v35 }
 0x27c   : > { %2095 = vmatmul.mubr.bf16.gmra.mrb[80].mxu1 %v5352_v23  ;;  %2335 = vmatmul.mubr.bf16.gmra.mrb[96].mxu0 %v5352_v23 }
 0x27d   : > { %2102 = vmatprep.mubr.bf16.mxu1 %v5420_v27  ;;  %2342 = vmatprep.mubr.bf16.mxu0 %v5420_v27 }
 0x284   : > { %2103 = vmatmul.mubr.bf16.gmra.mrb[84].mxu1 %v5356_v16  ;;  %2343 = vmatmul.mubr.bf16.gmra.mrb[100].mxu0 %v5356_v16 }
 0x285   : > { %2110 = vmatprep.mubr.bf16.mxu1 %v1891_v44  ;;  %2350 = vmatprep.mubr.bf16.mxu0 %v1891_v44 }
 0x28c   : > { %2111 = vmatmul.mubr.bf16.gmra.mrb[88].mxu1 %v5360_v34  ;;  %2351 = vmatmul.mubr.bf16.gmra.mrb[104].mxu0 %v5360_v34 }
 0x28d   : > { %2118 = vmatprep.mubr.bf16.mxu1 %v1893_v54  ;;  %2358 = vmatprep.mubr.bf16.mxu0 %v1893_v54 }
 0x294   : > { %2119 = vmatmul.mubr.bf16.gmra.mrb[92].mxu1 %v1892_v22  ;;  %2359 = vmatmul.mubr.bf16.gmra.mrb[108].mxu0 %v1892_v22 }
 0x295   : > { %2728 = vmatprep.mubr.bf16.mxu0 %v5372_v52 }
 0x29c   : > { %2729 = vmatmul.mubr.bf16.vlgmr.msra.gmra.mrb[112].mxu0 %v5335_v33  ;;  %v4713_v33 = vmov 0.0  }
 0x29d   : > { %2736 = vmatprep.mubr.bf16.mxu0 %v5370_v51  ;;  %3997 = vmatprep.mubr.msk.f32.mxu1 %vm4712_vm0, %v4713_v33 }
 0x2a4   : > { %2737 = vmatmul.mubr.bf16.gmra.mrb[116].mxu0 %v5340_v59 }
 0x2a5   : > { %2744 = vmatprep.mubr.bf16.mxu0 %v5398_v9 }
 0x2ac   : > { %2745 = vmatmul.mubr.bf16.gmra.mrb[120].mxu0 %v5344_v48 }
 0x2ad   : > { %2752 = vmatprep.mubr.bf16.mxu0 %v5396_v8 }
 0x2b4   : > { %2753 = vmatmul.mubr.bf16.gmra.mrb[124].mxu0 %v5348_v36 }
 0x2b5   : > { %2760 = vmatprep.mubr.bf16.mxu0 %v1887_v30 }
 0x2bc   : > { %2761 = vmatmul.mubr.bf16.gmra.mrb[128].mxu0 %v5352_v23 }
 0x2bd   : > { %2768 = vmatprep.mubr.bf16.mxu0 %v5420_v27 }
 0x2c4   : > { %2769 = vmatmul.mubr.bf16.gmra.mrb[132].mxu0 %v5356_v16 }
 0x2c5   : > { %2776 = vmatprep.mubr.bf16.mxu0 %v1891_v44 }
 0x2cc   : > { %2777 = vmatmul.mubr.bf16.gmra.mrb[136].mxu0 %v5360_v34 }
 0x2cd   : > { %2784 = vmatprep.mubr.bf16.mxu0 %v1893_v54 }
 0x2d4   : > { %2785 = vmatmul.mubr.bf16.gmra.mrb[140].mxu0 %v1892_v22 }
 0x2d5   : > { %4072 = vmatprep.mubr.msk.f32.mxu0 %vm4712_vm0, %v4713_v33 }
 0x32f   : > { %v3699_v59 = vpop.f32.mrb[64].mxu1  ;;  %v3763_v48 = vpop.f32.mrb[80].mxu0 }
 0x330   : > { %v3700_v36 = vpop.f32.mrb[65].mxu1  ;;  %v3764_v23 = vpop.f32.mrb[81].mxu0 }
 0x331   : > { %v5479_v47 = vadd.f32 %v3700_v36, %v3699_v59  ;;  %v3765_v16 = vadd.f32 %v3764_v23, %v3763_v48  ;;  %v3702_v51 = vpop.f32.mrb[66].mxu1  ;;  %v3766_v52 = vpop.f32.mrb[82].mxu0 }
 0x332   : > { %v3703_v34 = vpop.f32.mrb[67].mxu1  ;;  %v3767_v55 = vpop.f32.mrb[83].mxu0 }
 0x333   : > { %v5481_v58 = vadd.f32 %v3703_v34, %v3702_v51  ;;  %v3768_v11 = vadd.f32 %v3767_v55, %v3766_v52 }
 0x335   : > { %v4118_v60 = vpack.c.bf16 %v3768_v11, %v3765_v16 }
 0x337   : > { %v3705_v61 = vpop.f32.mrb[68].mxu1  ;;  %v3769_v63 = vpop.f32.mrb[84].mxu0  ;;  %4119 = vmatpush3.bf16.msra.mxu1 %v4118_v60 }
 0x338   : > { %v3706_v0 = vpop.f32.mrb[69].mxu1  ;;  %v3770_v1 = vpop.f32.mrb[85].mxu0  ;;  %4120 = vmatprep.subr.bf16.mxu1 %v4711_v35 }
 0x339   : > { %v5484_v2 = vadd.f32 %v3706_v0, %v3705_v61  ;;  %v3771_v3 = vadd.f32 %v3770_v1, %v3769_v63  ;;  %v3708_v5 = vpop.f32.mrb[70].mxu1  ;;  %v3772_v6 = vpop.f32.mrb[86].mxu0  ;;  %v433_v0 = vlaneseq }
 0x33a   : > { %v3709_v8 = vpop.f32.mrb[71].mxu1  ;;  %v3773_v9 = vpop.f32.mrb[87].mxu0 }
 0x33b   : > { %v5486_v12 = vadd.f32 %v3709_v8, %v3708_v5  ;;  %v3774_v13 = vadd.f32 %v3773_v9, %v3772_v6  ;;  %v5508_v6 = vshrl.u32 %v433_v0, 7 }
 0x33d   : > { %v4121_v28 = vpack.c.bf16 %v3774_v13, %v3771_v3 }
 0x33f   : > { %v3711_v39 = vpop.f32.mrb[72].mxu1  ;;  %v3775_v14 = vpop.f32.mrb[88].mxu0  ;;  %4122 = vmatpush3.bf16.msra.mxu1 %v4121_v28 }
 0x340   : > { %v3712_v15 = vpop.f32.mrb[73].mxu1  ;;  %v3776_v29 = vpop.f32.mrb[89].mxu0  ;;  %4123 = vmatprep.subr.bf16.mxu1 %v4711_v35 }
 0x341   : > { %v5489_v40 = vadd.f32 %v3712_v15, %v3711_v39  ;;  %v3777_v17 = vadd.f32 %v3776_v29, %v3775_v14  ;;  %v3714_v18 = vpop.f32.mrb[74].mxu1  ;;  %v3778_v19 = vpop.f32.mrb[90].mxu0 }
 0x342   : > { %v3715_v20 = vpop.f32.mrb[75].mxu1  ;;  %v3779_v21 = vpop.f32.mrb[91].mxu0 }
 0x343   : > { %v5491_v24 = vadd.f32 %v3715_v20, %v3714_v18  ;;  %v3780_v25 = vadd.f32 %v3779_v21, %v3778_v19  ;;  %v5513_v19 = vand.u32 127, %v433_v0  ;;  %v451_v20 = vadd.s32 1, %v5508_v6 }
 0x344   : > { %v5517_v21 = vadd.s32 8, %v5508_v6  ;;  %v5561_v0 = vadd.s32 48, %v5508_v6 }
 0x345   : > { %v4124_v26 = vpack.c.bf16 %v3780_v25, %v3777_v17  ;;  %vm466_vm1 = vcmp.eq.s32.totalorder %v5513_v19, %v451_v20 }
 0x347   : > { %v3717_v27 = vpop.f32.mrb[76].mxu1  ;;  %v3781_v30 = vpop.f32.mrb[92].mxu0  ;;  %4125 = vmatpush3.bf16.msra.mxu1 %v4124_v26 }
 0x348   : > { %v3718_v31 = vpop.f32.mrb[77].mxu1  ;;  %v3782_v32 = vpop.f32.mrb[93].mxu0  ;;  %4126 = vmatprep.subr.bf16.mxu1 %v4711_v35 }
 0x349   : > { %v5494_v46 = vadd.f32 %v3718_v31, %v3717_v27  ;;  %v3783_v4 = vadd.f32 %v3782_v32, %v3781_v30  ;;  %v3720_v56 = vpop.f32.mrb[78].mxu1  ;;  %v3784_v7 = vpop.f32.mrb[94].mxu0  ;;  %v452_v30 = vadd.s32 1, %v5517_v21  ;;  %v5524_v31 = vadd.s32 16, %v5508_v6 }
 0x34a   : > { %v3721_v57 = vpop.f32.mrb[79].mxu1  ;;  %v3785_v37 = vpop.f32.mrb[95].mxu0 }
 0x34b   : > { %v5496_v38 = vadd.f32 %v3721_v57, %v3720_v56  ;;  %v3786_v41 = vadd.f32 %v3785_v37, %v3784_v7  ;;  %vm467_vm3 = vcmp.eq.s32.totalorder %v5513_v19, %v452_v30 }
 0x34d   : > { %v4127_v42 = vpack.c.bf16 %v3786_v41, %v3783_v4 }
 0x34f   : > { %v3723_v43 = vpop.f32.mrb[80].mxu1  ;;  %v3787_v44 = vpop.f32.mrb[96].mxu0  ;;  %4128 = vmatpush3.bf16.msra.mxu1 %v4127_v42 }
 0x350   : > { %v3724_v62 = vpop.f32.mrb[81].mxu1  ;;  %v3788_v45 = vpop.f32.mrb[97].mxu0  ;;  %4129 = vmatprep.subr.bf16.mxu1 %v4711_v35 }
 0x351   : > { %v5499_v49 = vadd.f32 %v3724_v62, %v3723_v43  ;;  %v3789_v50 = vadd.f32 %v3788_v45, %v3787_v44  ;;  %v3726_v53 = vpop.f32.mrb[82].mxu1  ;;  %v3790_v54 = vpop.f32.mrb[98].mxu0  ;;  %v3162_v43 = vsel %vm466_vm1, 1.0, %v4713_v33  ;;  %v453_v45 = vadd.s32 1, %v5524_v31 }
 0x352   : > { %v3727_v10 = vpop.f32.mrb[83].mxu1  ;;  %v3791_v22 = vpop.f32.mrb[99].mxu0 }
 0x353   : > { %v5501_v59 = vadd.f32 %v3727_v10, %v3726_v53  ;;  %v3792_v48 = vadd.f32 %v3791_v22, %v3790_v54  ;;  %v3163_v53 = vsel %vm467_vm3, 1.0, %v4713_v33  ;;  %vm468_vm4 = vcmp.eq.s32.totalorder %v5513_v19, %v453_v45 }
 0x354   : > { %v5543_v10 = vadd.s32 32, %v5508_v6  ;;  %v5601_v45 = vadd.s32 80, %v5508_v6 }
 0x355   : > { %v4130_v36 = vpack.c.bf16 %v3792_v48, %v3789_v50  ;;  %v5533_v50 = vadd.s32 24, %v5508_v6 }
 0x357   : > { %v3729_v23 = vpop.f32.mrb[84].mxu1  ;;  %v3793_v16 = vpop.f32.mrb[100].mxu0  ;;  %4131 = vmatpush3.bf16.msra.mxu1 %v4130_v36  ;;  %v454_v54 = vadd.s32 1, %v5533_v50 }
 0x358   : > { %v3730_v51 = vpop.f32.mrb[85].mxu1  ;;  %v3794_v52 = vpop.f32.mrb[101].mxu0  ;;  %4132 = vmatprep.subr.bf16.mxu1 %v4711_v35 }
 0x359   : > { %v5504_v34 = vadd.f32 %v3730_v51, %v3729_v23  ;;  %v3795_v55 = vadd.f32 %v3794_v52, %v3793_v16  ;;  %v3732_v11 = vpop.f32.mrb[86].mxu1  ;;  %v3796_v60 = vpop.f32.mrb[102].mxu0  ;;  %v3164_v16 = vsel %vm468_vm4, 1.0, %v4713_v33  ;;  %vm469_vm5 = vcmp.eq.s32.totalorder %v5513_v19, %v454_v54 }
 0x35a   : > { %v3733_v61 = vpop.f32.mrb[87].mxu1  ;;  %v3797_v63 = vpop.f32.mrb[103].mxu0  ;;  %v455_v52 = vadd.s32 1, %v5543_v10 }
 0x35b   : > { %v5506_v1 = vadd.f32 %v3733_v61, %v3732_v11  ;;  %v3798_v3 = vadd.f32 %v3797_v63, %v3796_v60  ;;  %v3165_v61 = vsel %vm469_vm5, 1.0, %v4713_v33 }
 0x35c   : > { %vm470_vm6 = vcmp.eq.s32.totalorder %v5513_v19, %v455_v52 }
 0x35d   : > { %v4133_v5 = vpack.c.bf16 %v3798_v3, %v3795_v55  ;;  %v5552_v55 = vadd.s32 40, %v5508_v6 }
 0x35f   : > { %v3735_v8 = vpop.f32.mrb[88].mxu1  ;;  %v3799_v9 = vpop.f32.mrb[104].mxu0  ;;  %4134 = vmatpush3.bf16.msra.mxu1 %v4133_v5  ;;  %v456_v63 = vadd.s32 1, %v5552_v55 }
 0x360   : > { %v3736_v13 = vpop.f32.mrb[89].mxu1  ;;  %v3800_v28 = vpop.f32.mrb[105].mxu0  ;;  %4135 = vmatprep.subr.bf16.mxu1 %v4711_v35 }
 0x361   : > { %v5511_v39 = vadd.f32 %v3736_v13, %v3735_v8  ;;  %v3801_v14 = vadd.f32 %v3800_v28, %v3799_v9  ;;  %v3738_v15 = vpop.f32.mrb[90].mxu1  ;;  %v3802_v29 = vpop.f32.mrb[106].mxu0  ;;  %v3166_v13 = vsel %vm470_vm6, 1.0, %v4713_v33  ;;  %vm471_vm7 = vcmp.eq.s32.totalorder %v5513_v19, %v456_v63 }
 0x362   : > { %v3739_v17 = vpop.f32.mrb[91].mxu1  ;;  %v3803_v18 = vpop.f32.mrb[107].mxu0  ;;  %v5621_v63 = vadd.s32 96, %v5508_v6 }
 0x363   : > { %v5519_v25 = vadd.f32 %v3739_v17, %v3738_v15  ;;  %v3804_v26 = vadd.f32 %v3803_v18, %v3802_v29  ;;  %v5572_v15 = vadd.s32 56, %v5508_v6  ;;  %v3167_v18 = vsel %vm471_vm7, 1.0, %v4713_v33 }
 0x365   : > { %v4136_v27 = vpack.c.bf16 %v3804_v26, %v3801_v14  ;;  %v457_v14 = vadd.s32 1, %v5561_v0  ;;  %v458_v20 = vadd.s32 1, %v5572_v15  ;;  %v5581_v26 = vadd.s32 64, %v5508_v6 }
 0x367   : > { %v3741_v32 = vpop.f32.mrb[92].mxu1  ;;  %v3805_v4 = vpop.f32.mrb[108].mxu0  ;;  %4137 = vmatpush3.bf16.msra.mxu1 %v4136_v27  ;;  %vm472_vm8 = vcmp.eq.s32.totalorder %v5513_v19, %v457_v14  ;;  %vm473_vm9 = vcmp.eq.s32.totalorder %v5513_v19, %v458_v20  ;;  %v463_v14 = vadd.s32 1, %v5621_v63 }
 0x368   : > { %v3742_v56 = vpop.f32.mrb[93].mxu1  ;;  %v3806_v7 = vpop.f32.mrb[109].mxu0  ;;  %3995 = vmatprep.subr.mxu1 %v4713_v33 }
 0x369   : > { %v5527_v57 = vadd.f32 %v3742_v56, %v3741_v32  ;;  %v3807_v37 = vadd.f32 %v3806_v7, %v3805_v4  ;;  %v3744_v41 = vpop.f32.mrb[94].mxu1  ;;  %v3808_v42 = vpop.f32.mrb[110].mxu0  ;;  %v3168_v56 = vsel %vm472_vm8, 1.0, %v4713_v33  ;;  %vm478_vm14 = vcmp.eq.s32.totalorder %v5513_v19, %v463_v14 }
 0x36a   : > { %v3745_v44 = vpop.f32.mrb[95].mxu1  ;;  %v3809_v62 = vpop.f32.mrb[111].mxu0  ;;  %v5592_v41 = vadd.s32 72, %v5508_v6 }
 0x36b   : > { %3996 = vmatpush3.msra.mxu1 %v3807_v37  ;;  %v459_v37 = vadd.s32 1, %v5581_v26  ;;  %v3169_v44 = vsel %vm473_vm9, 1.0, %v4713_v33 }
 0x36c   : > { %3998 = vmatmul.mubr.msk.f32.vlgmr.msra.gmra.mrb[96].mxu1 %vm2366_vm2, %v3162_v43  ;;  %4159 = vmatprep.subr.bf16.mxu1 %v4711_v35  ;;  %v460_v62 = vadd.s32 1, %v5592_v41 }
 0x36d   : > { %4000 = vmatprep.mubr.msk.f32.mxu1 %vm4712_vm0, %v4713_v33  ;;  %vm474_vm10 = vcmp.eq.s32.totalorder %v5513_v19, %v459_v37  ;;  %v3174_v37 = vsel %vm478_vm14, 1.0, %v4713_v33 }
 0x36e   : > { %vm475_vm11 = vcmp.eq.s32.totalorder %v5513_v19, %v460_v62 }
 0x36f   : > { %v3857_v22 = vpop.f32.mrb[112].mxu0 }
 0x370   : > { %4001 = vmatmul.mubr.msk.f32.gmra.mrb[98].mxu1 %vm2366_vm2, %v3163_v53  ;;  %v3858_v48 = vpop.f32.mrb[113].mxu0 }
 0x371   : > { %v3859_v36 = vadd.f32 %v3858_v48, %v3857_v22  ;;  %v3860_v23 = vpop.f32.mrb[114].mxu0  ;;  %4003 = vmatprep.mubr.msk.f32.mxu1 %vm4712_vm0, %v4713_v33 }
 0x372   : > { %v3861_v51 = vpop.f32.mrb[115].mxu0 }
 0x373   : > { %v3862_v11 = vadd.f32 %v3861_v51, %v3860_v23  ;;  %v5612_v51 = vadd.s32 88, %v5508_v6 }
 0x374   : > { %4004 = vmatmul.mubr.msk.f32.gmra.mrb[100].mxu1 %vm2366_vm2, %v3164_v16  ;;  %v461_v16 = vadd.s32 1, %v5601_v45 }
 0x375   : > { %v4139_v60 = vpack.c.bf16 %v3862_v11, %v3859_v36  ;;  %4006 = vmatprep.mubr.msk.f32.mxu1 %vm4712_vm0, %v4713_v33  ;;  %v3170_v36 = vsel %vm474_vm10, 1.0, %v4713_v33 }
 0x376   : > { %vm476_vm12 = vcmp.eq.s32.totalorder %v5513_v19, %v461_v16  ;;  %v514_v16 = vadd.s32 2, %v5533_v50 }
 0x377   : > { %v3863_v3 = vpop.f32.mrb[116].mxu0  ;;  %4140 = vmatpush3.bf16.msra.mxu0 %v4139_v60  ;;  %4167 = vmatpush3.bf16.msra.mxu1 %v4139_v60  ;;  %v3171_v60 = vsel %vm475_vm11, 1.0, %v4713_v33 }
 0x378   : > { %v3864_v5 = vpop.f32.mrb[117].mxu0  ;;  %4007 = vmatmul.mubr.msk.f32.gmra.mrb[102].mxu1 %vm2366_vm2, %v3165_v61  ;;  %4141 = vmatprep.subr.bf16.mxu0 %v4711_v35  ;;  %v462_v61 = vadd.s32 1, %v5612_v51  ;;  %vm529_vm4 = vcmp.eq.s32.totalorder %v5513_v19, %v514_v16 }
 0x379   : > { %v3865_v8 = vadd.f32 %v3864_v5, %v3863_v3  ;;  %v3866_v9 = vpop.f32.mrb[118].mxu0  ;;  %4160 = vmatprep.subr.bf16.mxu1 %v4711_v35  ;;  %4009 = vmatprep.mubr.msk.f32.mxu1 %vm4712_vm0, %v4713_v33 }
 0x37a   : > { %v3867_v28 = vpop.f32.mrb[119].mxu0  ;;  %vm477_vm13 = vcmp.eq.s32.totalorder %v5513_v19, %v462_v61 }
 0x37b   : > { %v3868_v29 = vadd.f32 %v3867_v28, %v3866_v9  ;;  %v3173_v20 = vsel %vm477_vm13, 1.0, %v4713_v33 }
 0x37c   : > { %4010 = vmatmul.mubr.msk.f32.gmra.mrb[104].mxu1 %vm2366_vm2, %v3166_v13  ;;  %v3172_v13 = vsel %vm476_vm12, 1.0, %v4713_v33 }
 0x37d   : > { %v4142_v17 = vpack.c.bf16 %v3868_v29, %v3865_v8  ;;  %4012 = vmatprep.mubr.msk.f32.mxu1 %vm4712_vm0, %v4713_v33  ;;  %v5632_v29 = vadd.s32 104, %v5508_v6 }
 0x37f   : > { %v3869_v27 = vpop.f32.mrb[120].mxu0  ;;  %4143 = vmatpush3.bf16.msra.mxu0 %v4142_v17  ;;  %4168 = vmatpush3.bf16.msra.mxu1 %v4142_v17 }
 0x380   : > { %v3870_v30 = vpop.f32.mrb[121].mxu0  ;;  %4013 = vmatmul.mubr.msk.f32.gmra.mrb[106].mxu1 %vm2366_vm2, %v3167_v18  ;;  %4144 = vmatprep.subr.bf16.mxu0 %v4711_v35 }
 0x381   : > { %v3871_v32 = vadd.f32 %v3870_v30, %v3869_v27  ;;  %v3872_v4 = vpop.f32.mrb[122].mxu0  ;;  %4161 = vmatprep.subr.bf16.mxu1 %v4711_v35  ;;  %4015 = vmatprep.mubr.msk.f32.mxu1 %vm4712_vm0, %v4713_v33  ;;  %v464_v27 = vadd.s32 1, %v5632_v29  ;;  %v5641_v30 = vadd.s32 112, %v5508_v6 }
 0x382   : > { %v3873_v7 = vpop.f32.mrb[123].mxu0 }
 0x383   : > { %v3874_v42 = vadd.f32 %v3873_v7, %v3872_v4  ;;  %vm479_vm15 = vcmp.eq.s32.totalorder %v5513_v19, %v464_v27  ;;  %v519_v27 = vadd.s32 2, %v5581_v26  ;;  %v521_v26 = vadd.s32 2, %v5601_v45 }
 0x384   : > { %4016 = vmatmul.mubr.msk.f32.gmra.mrb[108].mxu1 %vm2366_vm2, %v3168_v56  ;;  %v523_v45 = vadd.s32 2, %v5621_v63  ;;  %v525_v63 = vadd.s32 2, %v5641_v30 }
 0x385   : > { %v4145_v43 = vpack.c.bf16 %v3874_v42, %v3871_v32  ;;  %4018 = vmatprep.mubr.msk.f32.mxu1 %vm4712_vm0, %v4713_v33  ;;  %vm534_vm11 = vcmp.eq.s32.totalorder %v5513_v19, %v519_v27  ;;  %vm536_vm13 = vcmp.eq.s32.totalorder %v5513_v19, %v521_v26 }
 0x387   : > { %v3875_v53 = vpop.f32.mrb[124].mxu0  ;;  %4146 = vmatpush3.bf16.msra.mxu0 %v4145_v43  ;;  %4169 = vmatpush3.bf16.msra.mxu1 %v4145_v43  ;;  %v465_v43 = vadd.s32 1, %v5641_v30  ;;  %v5753_v30 = vld [vmem:[#allocation12] ss:$0 sm:$0xff] }
 0x388   : > { %v3876_v54 = vpop.f32.mrb[125].mxu0  ;;  %4019 = vmatmul.mubr.msk.f32.gmra.mrb[110].mxu1 %vm2366_vm2, %v3169_v44  ;;  %4147 = vmatprep.subr.bf16.mxu0 %v4711_v35 }
 0x389   : > { %v3877_v22 = vadd.f32 %v3876_v54, %v3875_v53  ;;  %v3878_v48 = vpop.f32.mrb[126].mxu0  ;;  %4162 = vmatprep.subr.bf16.mxu1 %v4711_v35  ;;  %4021 = vmatprep.mubr.msk.f32.mxu1 %vm4712_vm0, %v4713_v33  ;;  %v3175_v53 = vsel %vm479_vm15, 1.0, %v4713_v33  ;;  %vm480_vm1 = vcmp.eq.s32.totalorder %v5513_v19, %v465_v43  ;;  %vm538_vm15 = vcmp.eq.s32.totalorder %v5513_v19, %v523_v45 }
 0x38a   : > { %v3879_v23 = vpop.f32.mrb[127].mxu0  ;;  %v2136_v45 = vadd.f32 %v5504_v34, %v5753_v30 }
 0x38b   : > { %v3880_v52 = vadd.f32 %v3879_v23, %v3878_v48  ;;  %v3176_v23 = vsel %vm480_vm1, 1.0, %v4713_v33 }
 0x38c   : > { %4022 = vmatmul.mubr.msk.f32.gmra.mrb[112].mxu1 %vm2366_vm2, %v3170_v36 }
 0x38d   : > { %v4148_v11 = vpack.c.bf16 %v3880_v52, %v3877_v22  ;;  %4024 = vmatprep.mubr.msk.f32.mxu1 %vm4712_vm0, %v4713_v33 }
 0x38f   : > { %v3881_v3 = vpop.f32.mrb[128].mxu0  ;;  %4149 = vmatpush3.bf16.msra.mxu0 %v4148_v11  ;;  %4170 = vmatpush3.bf16.msra.mxu1 %v4148_v11  ;;  %v511_v11 = vadd.s32 2, %v5508_v6 }
 0x390   : > { %v3882_v5 = vpop.f32.mrb[129].mxu0  ;;  %4025 = vmatmul.mubr.msk.f32.gmra.mrb[114].mxu1 %vm2366_vm2, %v3171_v60  ;;  %4150 = vmatprep.subr.bf16.mxu0 %v4711_v35 }
 0x391   : > { %v3883_v8 = vadd.f32 %v3882_v5, %v3881_v3  ;;  %v3884_v9 = vpop.f32.mrb[130].mxu0  ;;  %4163 = vmatprep.subr.bf16.mxu1 %v4711_v35  ;;  %4027 = vmatprep.mubr.msk.f32.mxu1 %vm4712_vm0, %v4713_v33  ;;  %vm526_vm3 = vcmp.eq.s32.totalorder %v5513_v19, %v511_v11  ;;  %v515_v3 = vadd.s32 2, %v5543_v10  ;;  %v516_v10 = vadd.s32 2, %v5552_v55 }
 0x392   : > { %v3885_v28 = vpop.f32.mrb[131].mxu0 }
 0x393   : > { %v3886_v17 = vadd.f32 %v3885_v28, %v3884_v9  ;;  %v3177_v9 = vsel %vm526_vm3, 1.0, %v4713_v33  ;;  %vm530_vm6 = vcmp.eq.s32.totalorder %v5513_v19, %v515_v3  ;;  %vm531_vm8 = vcmp.eq.s32.totalorder %v5513_v19, %v516_v10 }
 0x394   : > { %4028 = vmatmul.mubr.msk.f32.gmra.mrb[116].mxu1 %vm2366_vm2, %v3172_v13  ;;  %v3180_v13 = vsel %vm529_vm4, 1.0, %v4713_v33  ;;  %vm540_vm3 = vcmp.eq.s32.totalorder %v5513_v19, %v525_v63 }
 0x395   : > { %v4151_v18 = vpack.c.bf16 %v3886_v17, %v3883_v8  ;;  %4030 = vmatprep.mubr.msk.f32.mxu1 %vm4712_vm0, %v4713_v33  ;;  %v3181_v17 = vsel %vm530_vm6, 1.0, %v4713_v33 }
 0x397   : > { %v3887_v32 = vpop.f32.mrb[132].mxu0  ;;  %4152 = vmatpush3.bf16.msra.mxu0 %v4151_v18  ;;  %4171 = vmatpush3.bf16.msra.mxu1 %v4151_v18  ;;  %v3182_v18 = vsel %vm531_vm8, 1.0, %v4713_v33 }
 0x398   : > { %v3888_v4 = vpop.f32.mrb[133].mxu0  ;;  %4031 = vmatmul.mubr.msk.f32.gmra.mrb[118].mxu1 %vm2366_vm2, %v3173_v20  ;;  %4153 = vmatprep.subr.bf16.mxu0 %v4711_v35  ;;  %v518_v20 = vadd.s32 2, %v5572_v15 }
 0x399   : > { %v3889_v56 = vadd.f32 %v3888_v4, %v3887_v32  ;;  %v3890_v7 = vpop.f32.mrb[134].mxu0  ;;  %4164 = vmatprep.subr.bf16.mxu1 %v4711_v35  ;;  %4033 = vmatprep.mubr.msk.f32.mxu1 %vm4712_vm0, %v4713_v33  ;;  %v520_v32 = vadd.s32 2, %v5592_v41  ;;  %v3185_v4 = vsel %vm534_vm11, 1.0, %v4713_v33  ;;  %v522_v41 = vadd.s32 2, %v5612_v51 }
 0x39a   : > { %v3891_v42 = vpop.f32.mrb[135].mxu0  ;;  %vm533_vm10 = vcmp.eq.s32.totalorder %v5513_v19, %v518_v20  ;;  %v524_v51 = vadd.s32 2, %v5632_v29  ;;  %v3191_v29 = vsel %vm540_vm3, 1.0, %v4713_v33 }
 0x39b   : > { %v3892_v44 = vadd.f32 %v3891_v42, %v3890_v7  ;;  %v3184_v15 = vsel %vm533_vm10, 1.0, %v4713_v33  ;;  %vm535_vm12 = vcmp.eq.s32.totalorder %v5513_v19, %v520_v32  ;;  %v3187_v7 = vsel %vm536_vm13, 1.0, %v4713_v33 }
 0x39c   : > { %4034 = vmatmul.mubr.msk.f32.gmra.mrb[120].mxu1 %vm2366_vm2, %v3174_v37  ;;  %vm537_vm14 = vcmp.eq.s32.totalorder %v5513_v19, %v522_v41  ;;  %v3189_v42 = vsel %vm538_vm15, 1.0, %v4713_v33  ;;  %vm539_vm1 = vcmp.eq.s32.totalorder %v5513_v19, %v524_v51  ;;  %v2134_v32 = vadd.f32 %v5499_v49, %v5753_v30 }
 0x39d   : > { %v4154_v62 = vpack.c.bf16 %v3892_v44, %v3889_v56  ;;  %4036 = vmatprep.mubr.msk.f32.mxu1 %vm4712_vm0, %v4713_v33  ;;  %v3186_v56 = vsel %vm535_vm12, 1.0, %v4713_v33  ;;  %v3188_v37 = vsel %vm537_vm14, 1.0, %v4713_v33  ;;  %v3190_v43 = vsel %vm539_vm1, 1.0, %v4713_v33 }
 0x39e   : > { %v2126_v44 = vadd.f32 %v5479_v47, %v5753_v30  ;;  %v2129_v47 = vadd.f32 %v5486_v12, %v5753_v30  ;;  %v2130_v12 = vadd.f32 %v5489_v40, %v5753_v30 }
 0x39f   : > { %v3893_v54 = vpop.f32.mrb[136].mxu0  ;;  %4155 = vmatpush3.bf16.msra.mxu0 %v4154_v62  ;;  %4172 = vmatpush3.bf16.msra.mxu1 %v4154_v62 }
 0x3a0   : > { %v3894_v22 = vpop.f32.mrb[137].mxu0  ;;  %4037 = vmatmul.mubr.msk.f32.gmra.mrb[122].mxu1 %vm2366_vm2, %v3175_v53  ;;  %4156 = vmatprep.subr.bf16.mxu0 %v4711_v35 }
 0x3a1   : > { %v3895_v48 = vadd.f32 %v3894_v22, %v3893_v54  ;;  %v3896_v36 = vpop.f32.mrb[138].mxu0  ;;  %4165 = vmatprep.subr.bf16.mxu1 %v4711_v35  ;;  %4039 = vmatprep.mubr.msk.f32.mxu1 %vm4712_vm0, %v4713_v33  ;;  %v512_v35 = vadd.s32 2, %v5517_v21  ;;  %v513_v21 = vadd.s32 2, %v5524_v31  ;;  %v517_v31 = vadd.s32 2, %v5561_v0 }
 0x3a2   : > { %v3897_v52 = vpop.f32.mrb[139].mxu0 }
 0x3a3   : > { %v3898_v60 = vadd.f32 %v3897_v52, %v3896_v36  ;;  %vm527_vm5 = vcmp.eq.s32.totalorder %v5513_v19, %v512_v35  ;;  %vm528_vm7 = vcmp.eq.s32.totalorder %v5513_v19, %v513_v21  ;;  %vm532_vm9 = vcmp.eq.s32.totalorder %v5513_v19, %v517_v31 }
 0x3a4   : > { %4040 = vmatmul.mubr.msk.f32.gmra.mrb[124].mxu1 %vm2366_vm2, %v3176_v23  ;;  %v3178_v14 = vsel %vm527_vm5, 1.0, %v4713_v33  ;;  %v3179_v55 = vsel %vm528_vm7, 1.0, %v4713_v33  ;;  %v3183_v0 = vsel %vm532_vm9, 1.0, %v4713_v33  ;;  %v2127_v19 = vadd.f32 %v5481_v58, %v5753_v30 }
 0x3a5   : > { %v4157_v61 = vpack.c.bf16 %v3898_v60, %v3895_v48  ;;  %4081 = vmatprep.mubr.msk.f32.mxu1 %vm4712_vm0, %v4713_v33  ;;  %v2132_v31 = vadd.f32 %v5494_v46, %v5753_v30 }
 0x3a7   : > { %v3899_v5 = vpop.f32.mrb[140].mxu0  ;;  %4158 = vmatpush3.bf16.msra.mxu0 %v4157_v61  ;;  %4173 = vmatpush3.bf16.msra.mxu1 %v4157_v61 }
 0x3a8   : > { %v3900_v50 = vpop.f32.mrb[141].mxu0  ;;  %4070 = vmatprep.subr.mxu0 %v4713_v33  ;;  %4166 = vmatprep.subr.mxu1 %v4713_v33 }
 0x3a9   : > { %v3901_v6 = vadd.f32 %v3900_v50, %v3899_v5  ;;  %v3902_v8 = vpop.f32.mrb[142].mxu0 }
 0x3aa   : > { %v3903_v28 = vpop.f32.mrb[143].mxu0 }
 0x3ab   : > { %4071 = vmatpush3.msra.mxu0 %v3901_v6  ;;  %4174 = vmatpush3.msra.mxu1 %v3901_v6 }
 0x3ac   : > { %4073 = vmatmul.mubr.msk.f32.vlgmr.msra.gmra.mrb[144].mxu0 %vm2366_vm2, %v3177_v9  ;;  %4082 = vmatmul.mubr.msk.f32.vlgmr.msra.gmra.mrb[102].mxu1 %vm2366_vm2, %v3180_v13  ;;  %v2131_v13 = vadd.f32 %v5491_v24, %v5753_v30  ;;  %v2133_v24 = vadd.f32 %v5496_v38, %v5753_v30 }
 0x3ad   : > { %4075 = vmatprep.mubr.msk.f32.mxu0 %vm4712_vm0, %v4713_v33  ;;  %4084 = vmatprep.mubr.msk.f32.mxu1 %vm4712_vm0, %v4713_v33 }
 0x3b0   : > { %4076 = vmatmul.mubr.msk.f32.gmra.mrb[146].mxu0 %vm2366_vm2, %v3178_v14  ;;  %4085 = vmatmul.mubr.msk.f32.gmra.mrb[104].mxu1 %vm2366_vm2, %v3181_v17 }
 0x3b1   : > { %4078 = vmatprep.mubr.msk.f32.mxu0 %vm4712_vm0, %v4713_v33  ;;  %4087 = vmatprep.mubr.msk.f32.mxu1 %vm4712_vm0, %v4713_v33 }
 0x3b4   : > { %4079 = vmatmul.mubr.msk.f32.gmra.mrb[148].mxu0 %vm2366_vm2, %v3179_v55  ;;  %4088 = vmatmul.mubr.msk.f32.gmra.mrb[106].mxu1 %vm2366_vm2, %v3182_v18 }
 0x3b5   : > { %4090 = vmatprep.mubr.msk.f32.mxu1 %vm4712_vm0, %v4713_v33 }
 0x3b8   : > { %4091 = vmatmul.mubr.msk.f32.gmra.mrb[108].mxu1 %vm2366_vm2, %v3183_v0 }
 0x3b9   : > { %4093 = vmatprep.mubr.msk.f32.mxu1 %vm4712_vm0, %v4713_v33 }
 0x3bc   : > { %4094 = vmatmul.mubr.msk.f32.gmra.mrb[110].mxu1 %vm2366_vm2, %v3184_v15 }
 0x3bd   : > { %4096 = vmatprep.mubr.msk.f32.mxu1 %vm4712_vm0, %v4713_v33 }
 0x3c0   : > { %4097 = vmatmul.mubr.msk.f32.gmra.mrb[112].mxu1 %vm2366_vm2, %v3185_v4 }
 0x3c1   : > { %4099 = vmatprep.mubr.msk.f32.mxu1 %vm4712_vm0, %v4713_v33 }
 0x3c4   : > { %4100 = vmatmul.mubr.msk.f32.gmra.mrb[114].mxu1 %vm2366_vm2, %v3186_v56  ;;  %v2135_v56 = vadd.f32 %v5501_v59, %v5753_v30 }
 0x3c5   : > { %4102 = vmatprep.mubr.msk.f32.mxu1 %vm4712_vm0, %v4713_v33 }
 0x3c8   : > { %4103 = vmatmul.mubr.msk.f32.gmra.mrb[116].mxu1 %vm2366_vm2, %v3187_v7 }
 0x3c9   : > { %4105 = vmatprep.mubr.msk.f32.mxu1 %vm4712_vm0, %v4713_v33 }
 0x3cc   : > { %4106 = vmatmul.mubr.msk.f32.gmra.mrb[118].mxu1 %vm2366_vm2, %v3188_v37 }
 0x3cd   : > { %4108 = vmatprep.mubr.msk.f32.mxu1 %vm4712_vm0, %v4713_v33 }
 0x3d0   : > { %4109 = vmatmul.mubr.msk.f32.gmra.mrb[120].mxu1 %vm2366_vm2, %v3189_v42  ;;  %v2137_v42 = vadd.f32 %v5506_v1, %v5753_v30 }
 0x3d1   : > { %4111 = vmatprep.mubr.msk.f32.mxu1 %vm4712_vm0, %v4713_v33 }
 0x3d4   : > { %4112 = vmatmul.mubr.msk.f32.gmra.mrb[122].mxu1 %vm2366_vm2, %v3190_v43 }
 0x3d5   : > { %4114 = vmatprep.mubr.msk.f32.mxu1 %vm4712_vm0, %v4713_v33  ;;  %v2128_v33 = vadd.f32 %v5484_v2, %v5753_v30  ;;  %vm2992_vm0 = vcmask 130048  }
 0x3d8   : > { %4115 = vmatmul.mubr.msk.f32.gmra.mrb[124].mxu1 %vm2366_vm2, %v3191_v29  ;;  %v2138_v29 = vadd.f32 %v5511_v39, %v5753_v30 }
 0x43f   : > { %v2478_v62 = vpop.f32.mrb[96].mxu1 }
 0x440   : > { %v2552_v53 = vadd.f32 %v2478_v62, %v2126_v44  ;;  %v3999_v54 = vpop.f32.mrb[97].mxu1 }
 0x443   : > { %v2483_v22 = vpop.f32.mrb[98].mxu1 }
 0x444   : > { %v2553_v48 = vadd.f32 %v2483_v22, %v2127_v19  ;;  %v4002_v36 = vpop.f32.mrb[99].mxu1  ;;  %v2140_v22 = vadd.f32 %v5527_v57, %v5753_v30 }
 0x447   : > { %v2488_v23 = vpop.f32.mrb[100].mxu1 }
 0x448   : > { %v2554_v16 = vadd.f32 %v2488_v23, %v2128_v33  ;;  %v4005_v52 = vpop.f32.mrb[101].mxu1 }
 0x47f   : > { %v2903_v58 = vpop.f32.mrb[144].mxu0  ;;  %v2918_v2 = vpop.f32.mrb[102].mxu1 }
 0x480   : > { %v2977_v11 = vadd.f32 %v2903_v58, %v2552_v53  ;;  %v4181_v60 = vadd.f32 %v2918_v2, %v2129_v47  ;;  %v4083_v61 = vpop.f32.mrb[103].mxu1  ;;  %v4074_v35 = vpop.f32.mrb[145].mxu0  ;;  %v2139_v53 = vadd.f32 %v5519_v25, %v5753_v30 }
 0x482   : > { %2993 = vst.msk [vmem:[%s5768_s2] sm:$0xff] %vm2992_vm0, %v2977_v11  ;;  %2996 = vst.msk [vmem:[%s5768_s2 + $0x18] sm:$0xff] %vm2992_vm0, %v4181_v60 }
 0x483   : > { %v2908_v3 = vpop.f32.mrb[146].mxu0  ;;  %v2923_v5 = vpop.f32.mrb[104].mxu1 }
 0x484   : > { %v2978_v50 = vadd.f32 %v2908_v3, %v2553_v48  ;;  %v4182_v6 = vadd.f32 %v2923_v5, %v2130_v12  ;;  %v4086_v8 = vpop.f32.mrb[105].mxu1  ;;  %v4077_v9 = vpop.f32.mrb[147].mxu0 }
 0x486   : > { %2994 = vst.msk [vmem:[%s5768_s2 + $0x8] sm:$0xff] %vm2992_vm0, %v2978_v50  ;;  %2997 = vst.msk [vmem:[%s5768_s2 + $0x20] sm:$0xff] %vm2992_vm0, %v4182_v6 }
 0x487   : > { %v2913_v28 = vpop.f32.mrb[148].mxu0  ;;  %v2928_v21 = vpop.f32.mrb[106].mxu1 }
 0x488   : > { %v2979_v40 = vadd.f32 %v2913_v28, %v2554_v16  ;;  %v4183_v10 = vadd.f32 %v2928_v21, %v2131_v13  ;;  %v4089_v14 = vpop.f32.mrb[107].mxu1  ;;  %v4080_v17 = vpop.f32.mrb[149].mxu0 }
 0x48a   : > { %2995 = vst.msk [vmem:[%s5768_s2 + $0x10] sm:$0xff] %vm2992_vm0, %v2979_v40  ;;  %2998 = vst.msk [vmem:[%s5768_s2 + $0x28] sm:$0xff] %vm2992_vm0, %v4183_v10 }
 0x48b   : > { %v2933_v55 = vpop.f32.mrb[108].mxu1 }
 0x48c   : > { %v4184_v18 = vadd.f32 %v2933_v55, %v2132_v31  ;;  %v4092_v20 = vpop.f32.mrb[109].mxu1 }
 0x48e   : > { %2999 = vst.msk [vmem:[%s5768_s2 + $0x30] sm:$0xff] %vm2992_vm0, %v4184_v18 }
 0x48f   : > { %v2938_v0 = vpop.f32.mrb[110].mxu1 }
 0x490   : > { %v4185_v27 = vadd.f32 %v2938_v0, %v2133_v24  ;;  %v4095_v15 = vpop.f32.mrb[111].mxu1 }
 0x492   : > { %3000 = vst.msk [vmem:[%s5768_s2 + $0x38] sm:$0xff] %vm2992_vm0, %v4185_v27 }
 0x493   : > { %v2943_v4 = vpop.f32.mrb[112].mxu1 }
 0x494   : > { %v4186_v46 = vadd.f32 %v2943_v4, %v2134_v32  ;;  %v4098_v26 = vpop.f32.mrb[113].mxu1 }
 0x496   : > { %3001 = vst.msk [vmem:[%s5768_s2 + $0x40] sm:$0xff] %vm2992_vm0, %v4186_v46 }
 0x497   : > { %v2948_v41 = vpop.f32.mrb[114].mxu1 }
 0x498   : > { %v4187_v38 = vadd.f32 %v2948_v41, %v2135_v56  ;;  %v4101_v7 = vpop.f32.mrb[115].mxu1 }
 0x49a   : > { %3002 = vst.msk [vmem:[%s5768_s2 + $0x48] sm:$0xff] %vm2992_vm0, %v4187_v38 }
 0x49b   : > { %v2953_v37 = vpop.f32.mrb[116].mxu1 }
 0x49c   : > { %v4188_v49 = vadd.f32 %v2953_v37, %v2136_v45  ;;  %v4104_v51 = vpop.f32.mrb[117].mxu1 }
 0x49e   : > { %3003 = vst.msk [vmem:[%s5768_s2 + $0x50] sm:$0xff] %vm2992_vm0, %v4188_v49 }
 0x49f   : > { %v2958_v63 = vpop.f32.mrb[118].mxu1 }
 0x4a0   : > { %v4189_v59 = vadd.f32 %v2958_v63, %v2137_v42  ;;  %v4107_v43 = vpop.f32.mrb[119].mxu1 }
 0x4a2   : > { %3004 = vst.msk [vmem:[%s5768_s2 + $0x58] sm:$0xff] %vm2992_vm0, %v4189_v59 }
 0x4a3   : > { %v2963_v44 = vpop.f32.mrb[120].mxu1 }
 0x4a4   : > { %v4190_v34 = vadd.f32 %v2963_v44, %v2138_v29  ;;  %v4110_v62 = vpop.f32.mrb[121].mxu1 }
 0x4a6   : > { %3005 = vst.msk [vmem:[%s5768_s2 + $0x60] sm:$0xff] %vm2992_vm0, %v4190_v34 }
 0x4a7   : > { %v2968_v54 = vpop.f32.mrb[122].mxu1 }
 0x4a8   : > { %v4191_v19 = vadd.f32 %v2968_v54, %v2139_v53  ;;  %v4113_v1 = vpop.f32.mrb[123].mxu1 }
 0x4aa   : > { %3006 = vst.msk [vmem:[%s5768_s2 + $0x68] sm:$0xff] %vm2992_vm0, %v4191_v19 }
 0x4ab   : > { %v2973_v48 = vpop.f32.mrb[124].mxu1 }
 0x4ac   : > { %v4192_v36 = vadd.f32 %v2973_v48, %v2140_v22  ;;  %v4116_v33 = vpop.f32.mrb[125].mxu1 }
 0x4ae   : > { %3007 = vst.msk [vmem:[%s5768_s2 + $0x70] sm:$0xff] %vm2992_vm0, %v4192_v36 }
 0x4af PF: > { %p23_p1 = scmp.ge.s32.totalorder %s4923_s23, 4   ;;  %s5868_s27 = smov %s4689_s28 }
 0x4b0   : > { %s5869_s28 = smov %s4693_s29  ;;  %s5870_s29 = smov %s4934_s22 }
 0x4b1   : > { %s5871_s30 = smov %s4923_s23  ;;  %25 = sbr.rel (!%p23_p1) target bundleno = 11 (0xb), region = 127 }
 0x4b8   :  { %3029 = vsyncpa [#allocation3], 1 }
 0x4b9   :  { %3031 = vsyncpa [#allocation3 + $0x1], 1 }
 0x4ba   :  { %3032 = vsyncpa [#allocation5], 1 }
 0x4bb   :  { %3034 = vsyncpa [#allocation5 + $0x1], 1 }
 0x4bc   :  { %3035 = vsyncpa [#allocation8], 1 }
 0x4bd   :  { %3036 = vsyncpa [#allocation11], 1 }

// kernel: va_lstm_forward.3
= control target key start
LH: loop header
LB: loop body
LE: loop exit
PB: predicated region body
PF: predicated region fallthrough
CT: control target
= control target key end

     0   :  { %10 = vsyncpa [#allocation3], 0  ;;  %s9908_s0 = inlined_call_operand.vmem [shape: f32[2,1920], index: 0, kind: input, shape index: {}]   ;;  %s9909_s1 = inlined_call_operand.hbm [shape: bf16[1920,1024], index: 1, kind: input, shape index: {}]   ;;  %s9910_s2 = inlined_call_operand.hbm [shape: f32[1,1024], index: 2, kind: input, shape index: {}]   ;;  %s9911_s3 = inlined_call_operand.vmem [shape: bf16[1024,2], index: 3, kind: input, shape index: {}]   ;;  %s9912_s4 = inlined_call_operand.hbm [shape: f32[1,2], index: 4, kind: input, shape index: {}]   ;;  %s9913_s5 = inlined_call_operand.hbm [shape: f32[2,2], index: 5, kind: output, shape index: {}]  }
   0x1   :  { %11 = vsyncpa [#allocation6], 0 }
   0x2   :  { %12 = vsyncpa [#allocation4], 0  ;;  %s9409_s18 = smov [#allocation5]   ;;  %s9410_s20 = smov [#allocation2]  }
   0x3   :  { %s33_s19 = sshll.u32 %s9409_s18, 4  ;;  %s20_s21 = sshll.u32 %s9410_s20, 4  ;;  %s34_s19 = int_to_ptr.vmem [resolvable:$true] %s33_s19  ;;  %s9447_s21 = int_to_ptr.vmem [resolvable:$true] %s20_s21 }
   0x4   :  { %s9315_s24 = scalar_lea.hbm %s9910_s2, 128 }
   0x5   :  { %p9316_p0 = scmp.ne.s32.totalorder %s9910_s2, %s9315_s24  ;;  %p9319_p1 = scmp.lt.u32.totalorder %s9315_s24, %s9910_s2 }
   0x7   :  { %p9321_p2 = pnand %p9319_p1, %p9316_p0 }
   0x9   :  { %9324 = shalt.err (!%p9321_p2)
}
   0xa   :  { %s9325_s29 = scalar_lea.vmem %s34_s19, 128  ;;  %p9330_p4 = scmp.lt.s32.totalorder %s34_s19, %s34_s19 }
   0xb   :  { %p9326_p3 = scmp.ne.s32.totalorder %s34_s19, %s9325_s29  ;;  %p9331_p5 = scmp.lt.s32.totalorder %s9325_s29, %s9325_s29 }
   0xd   :  { %p9332_p6 = por %p9331_p5, %p9330_p4 }
   0xf   :  { %p9333_p7 = pnand %p9332_p6, %p9326_p3 }
  0x11   :  { %9336 = shalt.err (!%p9333_p7)
}
  0x12   :  { %36 = dma.hbm_to_vmem [thread:$0]  %s9910_s2, 128, %s34_s19, [#allocation6]  }
  0x13   :  { %s9337_s9 = scalar_lea.hbm %s9909_s1, 122880 }
  0x14   :  { %p9338_p8 = scmp.ne.s32.totalorder %s9909_s1, %s9337_s9  ;;  %p9341_p9 = scmp.lt.u32.totalorder %s9337_s9, %s9909_s1 }
  0x16   :  { %p9343_p10 = pnand %p9341_p9, %p9338_p8 }
  0x18   :  { %9346 = shalt.err (!%p9343_p10)
}
  0x19   :  { %s9347_s14 = scalar_lea.vmem %s9447_s21, 122880  ;;  %p9352_p12 = scmp.lt.s32.totalorder %s9447_s21, %s9447_s21 }
  0x1a   :  { %p9348_p11 = scmp.ne.s32.totalorder %s9447_s21, %s9347_s14  ;;  %p9353_p13 = scmp.lt.s32.totalorder %s9347_s14, %s9347_s14 }
  0x1c   :  { %p9354_p0 = por %p9353_p13, %p9352_p12 }
  0x1e   :  { %p9355_p1 = pnand %p9354_p0, %p9348_p11 }
  0x20   :  { %9358 = shalt.err (!%p9355_p1)
}
  0x21   :  { %s9411_s2 = smov 512   ;;  %s9412_s15 = smov 32  }
  0x22   :  { %26 = dma.hbm_to_vmem [thread:$0]  %s9909_s1, 122880, %s9447_s21, [#allocation3], %s9411_s2, %s9411_s2, %s9412_s15  }
  0x23   :  { %s9413_s18 = smov [#allocation7]   ;;  %s9359_s23 = scalar_lea.hbm %s9912_s4, 16 }
  0x24   :  { %s45_s19 = sshll.u32 %s9413_s18, 4  ;;  %p9360_p2 = scmp.ne.s32.totalorder %s9912_s4, %s9359_s23  ;;  %s46_s19 = int_to_ptr.vmem [resolvable:$true] %s45_s19 }
  0x25   :  { %p9363_p3 = scmp.lt.u32.totalorder %s9359_s23, %s9912_s4 }
  0x27   :  { %p9365_p4 = pnand %p9363_p3, %p9360_p2 }
  0x29   :  { %9368 = shalt.err (!%p9365_p4)
}
  0x2a   :  { %s9369_s28 = scalar_lea.vmem %s46_s19, 16  ;;  %s9373_s1 = scalar_lea.vmem %s46_s19, 32 }
  0x2b   :  { %p9370_p5 = scmp.ne.s32.totalorder %s46_s19, %s9369_s28  ;;  %p9374_p6 = scmp.lt.s32.totalorder %s46_s19, %s46_s19 }
  0x2c   :  { %p9375_p7 = scmp.lt.s32.totalorder %s9373_s1, %s9369_s28 }
  0x2e   :  { %p9376_p8 = por %p9375_p7, %p9374_p6 }
  0x30   :  { %p9377_p9 = pnand %p9376_p8, %p9370_p5 }
  0x32   :  { %9380 = shalt.err (!%p9377_p9)
}
  0x33   :  { %48 = dma.hbm_to_vmem [thread:$0]  %s9912_s4, 16, %s46_s19, [#allocation6]  }
  0x34   :  { %9403 = dma.done.wait [#allocation3], 122880  }
  0x35   :  { %9404 = vsyncadd [#allocation3], 4294844416 }
  0x36   :  { %9405 = dma.done.wait [#allocation6], 144  }
  0x37   :  { %9406 = vsyncadd [#allocation6], 4294967152  ;;  %v164_v0 = vld [vmem:[#allocation2] sm:$0xff]  ;;  %v165_v2 = vld [vmem:[#allocation2 + $0x8] sm:$0xff]  ;;  %v9414_v32 = vmov 1983009808   ;;  %v71_v34 = vlaneseq }
  0x38   :  { %v168_v1 = vld [vmem:[#allocation2 + $0x20] sm:$0xff]  ;;  %v169_v4 = vld [vmem:[#allocation2 + $0x28] sm:$0xff]  ;;  %v69_v33 = vunpack.c.l.s4 %v9414_v32  ;;  %vm7973_vm0 = vcmask 9216  }
  0x39   :  { %v8003_v3 = vcombine.high %v164_v0, %v168_v1  ;;  %v8002_v5 = vcombine.low %v164_v0, %v168_v1  ;;  %v172_v6 = vld [vmem:[#allocation2 + $0x40] sm:$0xff]  ;;  %v8005_v8 = vcombine.high %v165_v2, %v169_v4  ;;  %v8004_v9 = vcombine.low %v165_v2, %v169_v4  ;;  %v173_v11 = vld [vmem:[#allocation2 + $0x48] sm:$0xff] }
  0x3a   :  { %v176_v7 = vld [vmem:[#allocation2 + $0x60] sm:$0xff]  ;;  %v177_v12 = vld [vmem:[#allocation2 + $0x68] sm:$0xff]  ;;  %v70_v43 = vunpack.c.0.s8 %v69_v33  ;;  %v9490_v44 = vshrl.u32 %v71_v34, 7 }
  0x3b   :  { %v8011_v10 = vcombine.high %v172_v6, %v176_v7  ;;  %v180_v13 = vld [vmem:[#allocation2 + $0x80] sm:$0xff]  ;;  %5966 = vmatprep.subr.bf16.mxu0 %v8003_v3  ;;  %v8013_v14 = vcombine.high %v173_v11, %v177_v12  ;;  %v181_v16 = vld [vmem:[#allocation2 + $0x88] sm:$0xff]  ;;  %6294 = vmatprep.subr.bf16.mxu1 %v8005_v8  ;;  %v8010_v18 = vcombine.low %v172_v6, %v176_v7 }
  0x3c   :  { %v184_v15 = vld [vmem:[#allocation2 + $0xa0] sm:$0xff]  ;;  %v185_v17 = vld [vmem:[#allocation2 + $0xa8] sm:$0xff]  ;;  %5967 = vmatpush1.bf16.msra.mxu0 %v8002_v5  ;;  %6295 = vmatpush1.bf16.msra.mxu1 %v8004_v9  ;;  %v8012_v19 = vcombine.low %v173_v11, %v177_v12  ;;  %v9493_v53 = vsub.s32 %v70_v43, %v9490_v44 }
  0x3d   :  { %5968 = vmatprep.subr.bf16.mxu0 %v8011_v10  ;;  %v8019_v20 = vcombine.high %v180_v13, %v184_v15  ;;  %6296 = vmatprep.subr.bf16.mxu1 %v8013_v14  ;;  %v8021_v21 = vcombine.high %v181_v16, %v185_v17  ;;  %v188_v22 = vld [vmem:[#allocation2 + $0xc0] sm:$0xff]  ;;  %v189_v24 = vld [vmem:[#allocation2 + $0xc8] sm:$0xff]  ;;  %v8018_v26 = vcombine.low %v180_v13, %v184_v15 }
  0x3e   :  { %v192_v23 = vld [vmem:[#allocation2 + $0xe0] sm:$0xff]  ;;  %v193_v25 = vld [vmem:[#allocation2 + $0xe8] sm:$0xff]  ;;  %v8020_v27 = vcombine.low %v181_v16, %v185_v17 }
  0x3f   :  { %v8027_v28 = vcombine.high %v188_v22, %v192_v23  ;;  %v8029_v29 = vcombine.high %v189_v24, %v193_v25  ;;  %v196_v30 = vld [vmem:[#allocation2 + $0x100] sm:$0xff]  ;;  %v197_v35 = vld [vmem:[#allocation2 + $0x108] sm:$0xff]  ;;  %v8026_v37 = vcombine.low %v188_v22, %v192_v23  ;;  %v8028_v38 = vcombine.low %v189_v24, %v193_v25 }
  0x40   :  { %5969 = vmatpush1.bf16.msra.mxu0 %v8010_v18  ;;  %6297 = vmatpush1.bf16.msra.mxu1 %v8012_v19  ;;  %v200_v31 = vld [vmem:[#allocation2 + $0x120] sm:$0xff]  ;;  %v201_v36 = vld [vmem:[#allocation2 + $0x128] sm:$0xff] }
  0x41   :  { %5970 = vmatprep.subr.bf16.mxu0 %v8019_v20  ;;  %6298 = vmatprep.subr.bf16.mxu1 %v8021_v21  ;;  %v8035_v39 = vcombine.high %v196_v30, %v200_v31  ;;  %v8037_v40 = vcombine.high %v197_v35, %v201_v36  ;;  %v204_v41 = vld [vmem:[#allocation2 + $0x140] sm:$0xff]  ;;  %v205_v45 = vld [vmem:[#allocation2 + $0x148] sm:$0xff]  ;;  %v8034_v47 = vcombine.low %v196_v30, %v200_v31 }
  0x42   :  { %v208_v42 = vld [vmem:[#allocation2 + $0x160] sm:$0xff]  ;;  %v209_v46 = vld [vmem:[#allocation2 + $0x168] sm:$0xff]  ;;  %v8036_v48 = vcombine.low %v197_v35, %v201_v36 }
  0x43   :  { %v8043_v49 = vcombine.high %v204_v41, %v208_v42  ;;  %v8045_v50 = vcombine.high %v205_v45, %v209_v46  ;;  %v212_v51 = vld [vmem:[#allocation2 + $0x180] sm:$0xff]  ;;  %v213_v54 = vld [vmem:[#allocation2 + $0x188] sm:$0xff]  ;;  %v8042_v56 = vcombine.low %v204_v41, %v208_v42  ;;  %v8044_v57 = vcombine.low %v205_v45, %v209_v46 }
  0x44   :  { %5971 = vmatpush1.bf16.msra.mxu0 %v8018_v26  ;;  %6299 = vmatpush1.bf16.msra.mxu1 %v8020_v27  ;;  %v216_v52 = vld [vmem:[#allocation2 + $0x1a0] sm:$0xff]  ;;  %v217_v55 = vld [vmem:[#allocation2 + $0x1a8] sm:$0xff] }
  0x45   :  { %5972 = vmatprep.subr.bf16.mxu0 %v8027_v28  ;;  %6300 = vmatprep.subr.bf16.mxu1 %v8029_v29  ;;  %v8051_v58 = vcombine.high %v212_v51, %v216_v52  ;;  %v9498_v59 = vld [vmem:[%s9908_s0] sm:$0xff]  ;;  %v8053_v60 = vcombine.high %v213_v54, %v217_v55  ;;  %v221_v0 = vld [vmem:[#allocation2 + $0x1c8] sm:$0xff]  ;;  %v8050_v2 = vcombine.low %v212_v51, %v216_v52 }
  0x46   :  { %v220_v61 = vld [vmem:[#allocation2 + $0x1c0] sm:$0xff]  ;;  %v9502_v63 = vrot.slane %v9498_v59, %v9493_v53  ;;  %v225_v1 = vld [vmem:[#allocation2 + $0x1e8] sm:$0xff]  ;;  %v8052_v4 = vcombine.low %v213_v54, %v217_v55 }
  0x47   :  { %v224_v62 = vld [vmem:[#allocation2 + $0x1e0] sm:$0xff]  ;;  %v8061_v6 = vcombine.high %v221_v0, %v225_v1  ;;  %v229_v10 = vld [vmem:[#allocation2 + $0x208] sm:$0xff]  ;;  %v8060_v13 = vcombine.low %v221_v0, %v225_v1 }
  0x48   :  { %5973 = vmatpush1.bf16.msra.mxu0 %v8026_v37  ;;  %6301 = vmatpush1.bf16.msra.mxu1 %v8028_v38  ;;  %v82_v3 = vcombine.high %v9502_v63, %v9502_v63  ;;  %v8059_v5 = vcombine.high %v220_v61, %v224_v62  ;;  %v228_v7 = vld [vmem:[#allocation2 + $0x200] sm:$0xff]  ;;  %v233_v11 = vld [vmem:[#allocation2 + $0x228] sm:$0xff]  ;;  %v8058_v12 = vcombine.low %v220_v61, %v224_v62 }
  0x49   :  { %5974 = vmatprep.subr.bf16.mxu0 %v8035_v39  ;;  %6302 = vmatprep.subr.bf16.mxu1 %v8037_v40  ;;  %v232_v8 = vld [vmem:[#allocation2 + $0x220] sm:$0xff]  ;;  %v8069_v15 = vcombine.high %v229_v10, %v233_v11  ;;  %v237_v18 = vld [vmem:[#allocation2 + $0x248] sm:$0xff]  ;;  %v8068_v21 = vcombine.low %v229_v10, %v233_v11 }
  0x4a   :  { %v9506_v9 = vpack.c.bf16 %v82_v3, %v82_v3  ;;  %v8067_v14 = vcombine.high %v228_v7, %v232_v8  ;;  %v236_v16 = vld [vmem:[#allocation2 + $0x240] sm:$0xff]  ;;  %v241_v19 = vld [vmem:[#allocation2 + $0x268] sm:$0xff]  ;;  %v8066_v20 = vcombine.low %v228_v7, %v232_v8 }
  0x4b   :  { %v240_v17 = vld [vmem:[#allocation2 + $0x260] sm:$0xff]  ;;  %v8077_v23 = vcombine.high %v237_v18, %v241_v19  ;;  %v245_v26 = vld [vmem:[#allocation2 + $0x288] sm:$0xff]  ;;  %v8076_v29 = vcombine.low %v237_v18, %v241_v19 }
  0x4c   :  { %5975 = vmatpush1.bf16.msra.mxu0 %v8034_v47  ;;  %6303 = vmatpush1.bf16.msra.mxu1 %v8036_v48  ;;  %v8075_v22 = vcombine.high %v236_v16, %v240_v17  ;;  %v244_v24 = vld [vmem:[#allocation2 + $0x280] sm:$0xff]  ;;  %v249_v27 = vld [vmem:[#allocation2 + $0x2a8] sm:$0xff]  ;;  %v8074_v28 = vcombine.low %v236_v16, %v240_v17 }
  0x4d   :  { %5976 = vmatprep.subr.bf16.mxu0 %v8043_v49  ;;  %6304 = vmatprep.subr.bf16.mxu1 %v8045_v50  ;;  %v248_v25 = vld [vmem:[#allocation2 + $0x2a0] sm:$0xff]  ;;  %v8085_v31 = vcombine.high %v245_v26, %v249_v27  ;;  %v253_v34 = vld [vmem:[#allocation2 + $0x2c8] sm:$0xff]  ;;  %v8084_v37 = vcombine.low %v245_v26, %v249_v27 }
  0x4e   :  { %5998 = vmatprep.mubr.bf16.mxu0 %v9506_v9  ;;  %6326 = vmatprep.mubr.bf16.mxu1 %v9506_v9  ;;  %v8083_v30 = vcombine.high %v244_v24, %v248_v25  ;;  %v252_v32 = vld [vmem:[#allocation2 + $0x2c0] sm:$0xff]  ;;  %v257_v35 = vld [vmem:[#allocation2 + $0x2e8] sm:$0xff]  ;;  %v8082_v36 = vcombine.low %v244_v24, %v248_v25  ;;  %v9519_v25 = vpack.c.bf16 %v9502_v63, %v9502_v63 }
  0x4f   :  { %v256_v33 = vld [vmem:[#allocation2 + $0x2e0] sm:$0xff]  ;;  %v8093_v39 = vcombine.high %v253_v34, %v257_v35  ;;  %v261_v42 = vld [vmem:[#allocation2 + $0x308] sm:$0xff]  ;;  %v8092_v46 = vcombine.low %v253_v34, %v257_v35 }
  0x50   :  { %5977 = vmatpush1.bf16.msra.mxu0 %v8042_v56  ;;  %6305 = vmatpush1.bf16.msra.mxu1 %v8044_v57  ;;  %v8091_v38 = vcombine.high %v252_v32, %v256_v33  ;;  %v260_v40 = vld [vmem:[#allocation2 + $0x300] sm:$0xff]  ;;  %v265_v43 = vld [vmem:[#allocation2 + $0x328] sm:$0xff]  ;;  %v8090_v45 = vcombine.low %v252_v32, %v256_v33 }
  0x51   :  { %5978 = vmatprep.subr.bf16.mxu0 %v8051_v58  ;;  %6306 = vmatprep.subr.bf16.mxu1 %v8053_v60  ;;  %v264_v41 = vld [vmem:[#allocation2 + $0x320] sm:$0xff]  ;;  %v8101_v48 = vcombine.high %v261_v42, %v265_v43  ;;  %v269_v51 = vld [vmem:[#allocation2 + $0x348] sm:$0xff]  ;;  %v8100_v55 = vcombine.low %v261_v42, %v265_v43 }
  0x52   :  { %v8099_v47 = vcombine.high %v260_v40, %v264_v41  ;;  %v268_v49 = vld [vmem:[#allocation2 + $0x340] sm:$0xff]  ;;  %v273_v52 = vld [vmem:[#allocation2 + $0x368] sm:$0xff]  ;;  %v8098_v54 = vcombine.low %v260_v40, %v264_v41 }
  0x53   :  { %v272_v50 = vld [vmem:[#allocation2 + $0x360] sm:$0xff]  ;;  %v8109_v57 = vcombine.high %v269_v51, %v273_v52  ;;  %v277_v61 = vld [vmem:[#allocation2 + $0x388] sm:$0xff]  ;;  %v8108_v1 = vcombine.low %v269_v51, %v273_v52 }
  0x54   :  { %5979 = vmatpush1.bf16.msra.mxu0 %v8050_v2  ;;  %6307 = vmatpush1.bf16.msra.mxu1 %v8052_v4  ;;  %v8107_v56 = vcombine.high %v268_v49, %v272_v50  ;;  %v276_v58 = vld [vmem:[#allocation2 + $0x380] sm:$0xff]  ;;  %v281_v62 = vld [vmem:[#allocation2 + $0x3a8] sm:$0xff]  ;;  %v8106_v0 = vcombine.low %v268_v49, %v272_v50 }
  0x55   :  { %5980 = vmatprep.subr.bf16.mxu0 %v8059_v5  ;;  %6308 = vmatprep.subr.bf16.mxu1 %v8061_v6  ;;  %v280_v60 = vld [vmem:[#allocation2 + $0x3a0] sm:$0xff]  ;;  %v8117_v3 = vcombine.high %v277_v61, %v281_v62  ;;  %v67_v6 = vcombine.high %v9498_v59, %v9498_v59  ;;  %v285_v7 = vld [vmem:[#allocation2 + $0x3c8] sm:$0xff]  ;;  %v8116_v11 = vcombine.low %v277_v61, %v281_v62 }
  0x56   :  { %v8115_v2 = vcombine.high %v276_v58, %v280_v60  ;;  %v284_v4 = vld [vmem:[#allocation2 + $0x3c0] sm:$0xff]  ;;  %v289_v8 = vld [vmem:[#allocation2 + $0x3e8] sm:$0xff]  ;;  %v8114_v10 = vcombine.low %v276_v58, %v280_v60 }
  0x57   :  { %v288_v5 = vld [vmem:[#allocation2 + $0x3e0] sm:$0xff]  ;;  %v9513_v16 = vrot.slane %v67_v6, %v9493_v53  ;;  %v293_v17 = vld [vmem:[#allocation2 + $0x408] sm:$0xff]  ;;  %v8124_v59 = vcombine.low %v285_v7, %v289_v8 }
  0x58   :  { %5981 = vmatpush1.bf16.msra.mxu0 %v8058_v12  ;;  %6309 = vmatpush1.bf16.msra.mxu1 %v8060_v13  ;;  %v8123_v12 = vcombine.high %v284_v4, %v288_v5  ;;  %v8125_v13 = vcombine.high %v285_v7, %v289_v8  ;;  %v297_v18 = vld [vmem:[#allocation2 + $0x428] sm:$0xff]  ;;  %v8122_v19 = vcombine.low %v284_v4, %v288_v5  ;;  %v312_v32 = vld [vmem:[#allocation2 + $0x4a0] sm:$0xff] }
  0x59   :  { %5982 = vmatprep.subr.bf16.mxu0 %v8067_v14  ;;  %6310 = vmatprep.subr.bf16.mxu1 %v8069_v15  ;;  %v292_v14 = vld [vmem:[#allocation2 + $0x400] sm:$0xff]  ;;  %v83_v24 = vcombine.high %v9513_v16, %v9513_v16  ;;  %v301_v26 = vld [vmem:[#allocation2 + $0x448] sm:$0xff] }
  0x5a   :  { %v296_v15 = vld [vmem:[#allocation2 + $0x420] sm:$0xff]  ;;  %v305_v27 = vld [vmem:[#allocation2 + $0x468] sm:$0xff] }
  0x5b   :  { %v309_v33 = vld [vmem:[#allocation2 + $0x488] sm:$0xff]  ;;  %v8141_v34 = vcombine.high %v301_v26, %v305_v27  ;;  %v320_v40 = vld [vmem:[#allocation2 + $0x4e0] sm:$0xff] }
  0x5c   :  { %5983 = vmatpush1.bf16.msra.mxu0 %v8066_v20  ;;  %6311 = vmatpush1.bf16.msra.mxu1 %v8068_v21  ;;  %v8131_v20 = vcombine.high %v292_v14, %v296_v15  ;;  %v8133_v21 = vcombine.high %v293_v17, %v297_v18  ;;  %v313_v35 = vld [vmem:[#allocation2 + $0x4a8] sm:$0xff]  ;;  %v328_v49 = vld [vmem:[#allocation2 + $0x520] sm:$0xff] }
  0x5d   :  { %5984 = vmatprep.subr.bf16.mxu0 %v8075_v22  ;;  %6312 = vmatprep.subr.bf16.mxu1 %v8077_v23  ;;  %v300_v22 = vld [vmem:[#allocation2 + $0x440] sm:$0xff]  ;;  %v317_v41 = vld [vmem:[#allocation2 + $0x4c8] sm:$0xff]  ;;  %v8149_v42 = vcombine.high %v309_v33, %v313_v35 }
  0x5e   :  { %v304_v23 = vld [vmem:[#allocation2 + $0x460] sm:$0xff]  ;;  %v321_v43 = vld [vmem:[#allocation2 + $0x4e8] sm:$0xff] }
  0x5f   :  { %v8138_v63 = vcombine.low %v300_v22, %v304_v23  ;;  %v325_v50 = vld [vmem:[#allocation2 + $0x508] sm:$0xff]  ;;  %v8157_v51 = vcombine.high %v317_v41, %v321_v43  ;;  %v336_v58 = vld [vmem:[#allocation2 + $0x560] sm:$0xff] }
  0x60   :  { %5985 = vmatpush1.bf16.msra.mxu0 %v8074_v28  ;;  %6313 = vmatpush1.bf16.msra.mxu1 %v8076_v29  ;;  %v8130_v28 = vcombine.low %v292_v14, %v296_v15  ;;  %v8132_v29 = vcombine.low %v293_v17, %v297_v18  ;;  %v329_v52 = vld [vmem:[#allocation2 + $0x528] sm:$0xff]  ;;  %v344_v4 = vld [vmem:[#allocation2 + $0x5a0] sm:$0xff] }
  0x61   :  { %5986 = vmatprep.subr.bf16.mxu0 %v8083_v30  ;;  %6314 = vmatprep.subr.bf16.mxu1 %v8085_v31  ;;  %v8139_v30 = vcombine.high %v300_v22, %v304_v23  ;;  %v308_v31 = vld [vmem:[#allocation2 + $0x480] sm:$0xff]  ;;  %v333_v60 = vld [vmem:[#allocation2 + $0x548] sm:$0xff]  ;;  %v8165_v61 = vcombine.high %v325_v50, %v329_v52 }
  0x62   :  { %v337_v62 = vld [vmem:[#allocation2 + $0x568] sm:$0xff] }
  0x63   :  { %v341_v5 = vld [vmem:[#allocation2 + $0x588] sm:$0xff]  ;;  %v8173_v6 = vcombine.high %v333_v60, %v337_v62 }
  0x64   :  { %5987 = vmatpush1.bf16.msra.mxu0 %v8082_v36  ;;  %6315 = vmatpush1.bf16.msra.mxu1 %v8084_v37  ;;  %v9521_v36 = vpack.c.bf16 %v83_v24, %v83_v24  ;;  %v8140_v37 = vcombine.low %v301_v26, %v305_v27  ;;  %v345_v7 = vld [vmem:[#allocation2 + $0x5a8] sm:$0xff] }
  0x65   :  { %5988 = vmatprep.subr.bf16.mxu0 %v8091_v38  ;;  %6316 = vmatprep.subr.bf16.mxu1 %v8093_v39  ;;  %v8147_v38 = vcombine.high %v308_v31, %v312_v32  ;;  %v316_v39 = vld [vmem:[#allocation2 + $0x4c0] sm:$0xff]  ;;  %v349_v14 = vld [vmem:[#allocation2 + $0x5c8] sm:$0xff]  ;;  %v8181_v15 = vcombine.high %v341_v5, %v345_v7 }
  0x66   :  { %v353_v17 = vld [vmem:[#allocation2 + $0x5e8] sm:$0xff] }
  0x67   :  { %v357_v22 = vld [vmem:[#allocation2 + $0x608] sm:$0xff]  ;;  %v8189_v23 = vcombine.high %v349_v14, %v353_v17  ;;  %v8188_v27 = vcombine.low %v349_v14, %v353_v17  ;;  %v412_v17 = vld [vmem:[#allocation2 + $0x7c0] sm:$0xff] }
  0x68   :  { %5989 = vmatpush1.bf16.msra.mxu0 %v8090_v45  ;;  %6317 = vmatpush1.bf16.msra.mxu1 %v8092_v46  ;;  %v8146_v45 = vcombine.low %v308_v31, %v312_v32  ;;  %v8148_v46 = vcombine.low %v309_v33, %v313_v35  ;;  %v361_v24 = vld [vmem:[#allocation2 + $0x628] sm:$0xff] }
  0x69   :  { %5990 = vmatprep.subr.bf16.mxu0 %v8099_v47  ;;  %6318 = vmatprep.subr.bf16.mxu1 %v8101_v48  ;;  %v8155_v47 = vcombine.high %v316_v39, %v320_v40  ;;  %v324_v48 = vld [vmem:[#allocation2 + $0x500] sm:$0xff]  ;;  %v365_v31 = vld [vmem:[#allocation2 + $0x648] sm:$0xff]  ;;  %v8197_v32 = vcombine.high %v357_v22, %v361_v24  ;;  %v8196_v35 = vcombine.low %v357_v22, %v361_v24 }
  0x6a   :  { %v369_v33 = vld [vmem:[#allocation2 + $0x668] sm:$0xff] }
  0x6b   :  { %v409_v14 = vld [vmem:[#allocation2 + $0x7a8] sm:$0xff] }
  0x6c   :  { %5991 = vmatpush1.bf16.msra.mxu0 %v8098_v54  ;;  %6319 = vmatpush1.bf16.msra.mxu1 %v8100_v55  ;;  %v8154_v54 = vcombine.low %v316_v39, %v320_v40  ;;  %v8156_v55 = vcombine.low %v317_v41, %v321_v43  ;;  %v373_v39 = vld [vmem:[#allocation2 + $0x688] sm:$0xff]  ;;  %v8205_v40 = vcombine.high %v365_v31, %v369_v33 }
  0x6d   :  { %5992 = vmatprep.subr.bf16.mxu0 %v8107_v56  ;;  %6320 = vmatprep.subr.bf16.mxu1 %v8109_v57  ;;  %v8163_v56 = vcombine.high %v324_v48, %v328_v49  ;;  %v332_v57 = vld [vmem:[#allocation2 + $0x540] sm:$0xff]  ;;  %v377_v41 = vld [vmem:[#allocation2 + $0x6a8] sm:$0xff]  ;;  %v8204_v43 = vcombine.low %v365_v31, %v369_v33 }
  0x6e   :  { %v8170_v8 = vcombine.low %v332_v57, %v336_v58 }
  0x70   :  { %5993 = vmatpush1.bf16.msra.mxu0 %v8106_v0  ;;  %6321 = vmatpush1.bf16.msra.mxu1 %v8108_v1  ;;  %v8162_v0 = vcombine.low %v324_v48, %v328_v49  ;;  %v8164_v1 = vcombine.low %v325_v50, %v329_v52  ;;  %v381_v48 = vld [vmem:[#allocation2 + $0x6c8] sm:$0xff]  ;;  %v8213_v49 = vcombine.high %v373_v39, %v377_v41 }
  0x71   :  { %5994 = vmatprep.subr.bf16.mxu0 %v8115_v2  ;;  %6322 = vmatprep.subr.bf16.mxu1 %v8117_v3  ;;  %v8171_v2 = vcombine.high %v332_v57, %v336_v58  ;;  %v340_v3 = vld [vmem:[#allocation2 + $0x580] sm:$0xff]  ;;  %v385_v50 = vld [vmem:[#allocation2 + $0x6e8] sm:$0xff]  ;;  %v8212_v52 = vcombine.low %v373_v39, %v377_v41 }
  0x72   :  { %v8178_v18 = vcombine.low %v340_v3, %v344_v4  ;;  %v389_v57 = vld [vmem:[#allocation2 + $0x708] sm:$0xff]  ;;  %v8221_v58 = vcombine.high %v381_v48, %v385_v50 }
  0x73   :  { %v429_v39 = vld [vmem:[#allocation2 + $0x848] sm:$0xff] }
  0x74   :  { %5995 = vmatpush1.bf16.msra.mxu0 %v8114_v10  ;;  %6323 = vmatpush1.bf16.msra.mxu1 %v8116_v11  ;;  %v8172_v10 = vcombine.low %v333_v60, %v337_v62  ;;  %v8179_v11 = vcombine.high %v340_v3, %v344_v4  ;;  %v393_v60 = vld [vmem:[#allocation2 + $0x728] sm:$0xff]  ;;  %v8220_v62 = vcombine.low %v381_v48, %v385_v50  ;;  %v440_v50 = vld [vmem:[#allocation2 + $0x8a0] sm:$0xff] }
  0x75   :  { %5996 = vmatprep.subr.bf16.mxu0 %v8123_v12  ;;  %6324 = vmatprep.subr.bf16.mxu1 %v8125_v13  ;;  %v348_v12 = vld [vmem:[#allocation2 + $0x5c0] sm:$0xff]  ;;  %v397_v3 = vld [vmem:[#allocation2 + $0x748] sm:$0xff]  ;;  %v8229_v4 = vcombine.high %v389_v57, %v393_v60 }
  0x76   :  { %v352_v13 = vld [vmem:[#allocation2 + $0x5e0] sm:$0xff]  ;;  %v433_v41 = vld [vmem:[#allocation2 + $0x868] sm:$0xff] }
  0x77   :  { %v8186_v26 = vcombine.low %v348_v12, %v352_v13  ;;  %v8269_v48 = vcombine.high %v429_v39, %v433_v41 }
  0x78   :  { %5997 = vmatpush1.bf16.msra.mxu0 %v8122_v19  ;;  %6325 = vmatpush1.bf16.msra.mxu1 %v8124_v59  ;;  %v8180_v19 = vcombine.low %v341_v5, %v345_v7  ;;  %v8187_v59 = vcombine.high %v348_v12, %v352_v13  ;;  %v401_v5 = vld [vmem:[#allocation2 + $0x768] sm:$0xff]  ;;  %v8228_v7 = vcombine.low %v389_v57, %v393_v60  ;;  %v448_v60 = vld [vmem:[#allocation2 + $0x8e0] sm:$0xff] }
  0x79   :  { %6007 = vmatprep.subr.bf16.mxu0 %v8131_v20  ;;  %6335 = vmatprep.subr.bf16.mxu1 %v8133_v21  ;;  %v356_v20 = vld [vmem:[#allocation2 + $0x600] sm:$0xff]  ;;  %v405_v12 = vld [vmem:[#allocation2 + $0x788] sm:$0xff]  ;;  %v8237_v13 = vcombine.high %v397_v3, %v401_v5 }
  0x7a   :  { %v360_v21 = vld [vmem:[#allocation2 + $0x620] sm:$0xff]  ;;  %v8245_v22 = vcombine.high %v405_v12, %v409_v14 }
  0x7b   :  { %5999 = vmatmul.mubr.bf16.vlgmr.msra.gmra.mrb[0].mxu0 %v9519_v25  ;;  %6327 = vmatmul.mubr.bf16.vlgmr.msra.gmra.mrb[0].mxu1 %v9519_v25 }
  0x7c   :  { %6008 = vmatpush1.bf16.msra.mxu0 %v8130_v28  ;;  %6336 = vmatpush1.bf16.msra.mxu1 %v8132_v29  ;;  %v8195_v28 = vcombine.high %v356_v20, %v360_v21  ;;  %v364_v29 = vld [vmem:[#allocation2 + $0x640] sm:$0xff] }
  0x7d   :  { %6009 = vmatprep.subr.bf16.mxu0 %v8139_v30  ;;  %6337 = vmatprep.subr.bf16.mxu1 %v8141_v34  ;;  %v368_v30 = vld [vmem:[#allocation2 + $0x660] sm:$0xff]  ;;  %v8194_v34 = vcombine.low %v356_v20, %v360_v21  ;;  %v413_v20 = vld [vmem:[#allocation2 + $0x7c8] sm:$0xff] }
  0x7e   :  { %6039 = vmatprep.mubr.bf16.mxu0 %v9521_v36  ;;  %6367 = vmatprep.mubr.bf16.mxu1 %v9521_v36  ;;  %v417_v21 = vld [vmem:[#allocation2 + $0x7e8] sm:$0xff] }
  0x7f   :  { %v8253_v31 = vcombine.high %v413_v20, %v417_v21 }
  0x80   :  { %6010 = vmatpush1.bf16.msra.mxu0 %v8138_v63  ;;  %6338 = vmatpush1.bf16.msra.mxu1 %v8140_v37  ;;  %v8203_v63 = vcombine.high %v364_v29, %v368_v30  ;;  %v372_v37 = vld [vmem:[#allocation2 + $0x680] sm:$0xff] }
  0x81   :  { %6011 = vmatprep.subr.bf16.mxu0 %v8147_v38  ;;  %6339 = vmatprep.subr.bf16.mxu1 %v8149_v42  ;;  %v376_v38 = vld [vmem:[#allocation2 + $0x6a0] sm:$0xff]  ;;  %v8202_v42 = vcombine.low %v364_v29, %v368_v30  ;;  %v421_v30 = vld [vmem:[#allocation2 + $0x808] sm:$0xff] }
  0x82   :  { %v424_v29 = vld [vmem:[#allocation2 + $0x820] sm:$0xff] }
  0x84   :  { %6012 = vmatpush1.bf16.msra.mxu0 %v8146_v45  ;;  %6340 = vmatpush1.bf16.msra.mxu1 %v8148_v46  ;;  %v8211_v45 = vcombine.high %v372_v37, %v376_v38  ;;  %v380_v46 = vld [vmem:[#allocation2 + $0x6c0] sm:$0xff] }
  0x85   :  { %6013 = vmatprep.subr.bf16.mxu0 %v8155_v47  ;;  %6341 = vmatprep.subr.bf16.mxu1 %v8157_v51  ;;  %v384_v47 = vld [vmem:[#allocation2 + $0x6e0] sm:$0xff]  ;;  %v8210_v51 = vcombine.low %v372_v37, %v376_v38 }
  0x86   :  { %v428_v37 = vld [vmem:[#allocation2 + $0x840] sm:$0xff] }
  0x87   :  { %v432_v38 = vld [vmem:[#allocation2 + $0x860] sm:$0xff] }
  0x88   :  { %6014 = vmatpush1.bf16.msra.mxu0 %v8154_v54  ;;  %6342 = vmatpush1.bf16.msra.mxu1 %v8156_v55  ;;  %v8219_v54 = vcombine.high %v380_v46, %v384_v47  ;;  %v388_v55 = vld [vmem:[#allocation2 + $0x700] sm:$0xff] }
  0x89   :  { %6015 = vmatprep.subr.bf16.mxu0 %v8163_v56  ;;  %6343 = vmatprep.subr.bf16.mxu1 %v8165_v61  ;;  %v392_v56 = vld [vmem:[#allocation2 + $0x720] sm:$0xff]  ;;  %v8218_v61 = vcombine.low %v380_v46, %v384_v47  ;;  %v8267_v47 = vcombine.high %v428_v37, %v432_v38 }
  0x8c   :  { %6016 = vmatpush1.bf16.msra.mxu0 %v8162_v0  ;;  %6344 = vmatpush1.bf16.msra.mxu1 %v8164_v1  ;;  %v8227_v0 = vcombine.high %v388_v55, %v392_v56  ;;  %v396_v1 = vld [vmem:[#allocation2 + $0x740] sm:$0xff] }
  0x8d   :  { %6017 = vmatprep.subr.bf16.mxu0 %v8171_v2  ;;  %6345 = vmatprep.subr.bf16.mxu1 %v8173_v6  ;;  %v400_v2 = vld [vmem:[#allocation2 + $0x760] sm:$0xff]  ;;  %v8226_v6 = vcombine.low %v388_v55, %v392_v56  ;;  %v8268_v55 = vcombine.low %v429_v39, %v433_v41 }
  0x8e   :  { %v488_v41 = vld [vmem:[#allocation2 + $0xa20] sm:$0xff] }
  0x90   :  { %6018 = vmatpush1.bf16.msra.mxu0 %v8170_v8  ;;  %6346 = vmatpush1.bf16.msra.mxu1 %v8172_v10  ;;  %v8235_v8 = vcombine.high %v396_v1, %v400_v2  ;;  %v404_v10 = vld [vmem:[#allocation2 + $0x780] sm:$0xff] }
  0x91   :  { %6019 = vmatprep.subr.bf16.mxu0 %v8179_v11  ;;  %6347 = vmatprep.subr.bf16.mxu1 %v8181_v15  ;;  %v408_v11 = vld [vmem:[#allocation2 + $0x7a0] sm:$0xff]  ;;  %v8234_v15 = vcombine.low %v396_v1, %v400_v2 }
  0x92   :  { %v8242_v24 = vcombine.low %v404_v10, %v408_v11 }
  0x94   :  { %6020 = vmatpush1.bf16.msra.mxu0 %v8178_v18  ;;  %6348 = vmatpush1.bf16.msra.mxu1 %v8180_v19  ;;  %v8236_v18 = vcombine.low %v397_v3, %v401_v5  ;;  %v8243_v19 = vcombine.high %v404_v10, %v408_v11  ;;  %v456_v5 = vld [vmem:[#allocation2 + $0x920] sm:$0xff] }
  0x95   :  { %6021 = vmatprep.subr.bf16.mxu0 %v8187_v59  ;;  %6349 = vmatprep.subr.bf16.mxu1 %v8189_v23  ;;  %v416_v59 = vld [vmem:[#allocation2 + $0x7e0] sm:$0xff]  ;;  %v9530_v23 = vld [vmem:[%s9908_s0 + $0x8] sm:$0xff] }
  0x96   :  { %v9534_v33 = vrot.slane %v9530_v23, %v9493_v53 }
  0x98   :  { %6022 = vmatpush1.bf16.msra.mxu0 %v8186_v26  ;;  %6350 = vmatpush1.bf16.msra.mxu1 %v8188_v27  ;;  %v8244_v26 = vcombine.low %v405_v12, %v409_v14  ;;  %v8251_v27 = vcombine.high %v412_v17, %v416_v59  ;;  %v464_v14 = vld [vmem:[#allocation2 + $0x960] sm:$0xff] }
  0x99   :  { %6023 = vmatprep.subr.bf16.mxu0 %v8195_v28  ;;  %6351 = vmatprep.subr.bf16.mxu1 %v8197_v32  ;;  %v420_v28 = vld [vmem:[#allocation2 + $0x800] sm:$0xff]  ;;  %v425_v32 = vld [vmem:[#allocation2 + $0x828] sm:$0xff] }
  0x9a   :  { %v8260_v46 = vcombine.low %v421_v30, %v425_v32 }
  0x9c   :  { %6024 = vmatpush1.bf16.msra.mxu0 %v8194_v34  ;;  %6352 = vmatpush1.bf16.msra.mxu1 %v8196_v35  ;;  %v8250_v34 = vcombine.low %v412_v17, %v416_v59  ;;  %v8252_v35 = vcombine.low %v413_v20, %v417_v21  ;;  %v465_v17 = vld [vmem:[#allocation2 + $0x968] sm:$0xff]  ;;  %v468_v21 = vld [vmem:[#allocation2 + $0x980] sm:$0xff] }
  0x9d   :  { %6025 = vmatprep.subr.bf16.mxu0 %v8203_v63  ;;  %6353 = vmatprep.subr.bf16.mxu1 %v8205_v40  ;;  %v8259_v63 = vcombine.high %v420_v28, %v424_v29  ;;  %v8261_v40 = vcombine.high %v421_v30, %v425_v32  ;;  %v480_v32 = vld [vmem:[#allocation2 + $0x9e0] sm:$0xff] }
  0xa0   :  { %6026 = vmatpush1.bf16.msra.mxu0 %v8202_v42  ;;  %6354 = vmatpush1.bf16.msra.mxu1 %v8204_v43  ;;  %v99_v42 = vcombine.high %v9534_v33, %v9534_v33  ;;  %v9540_v43 = vpack.c.bf16 %v9513_v16, %v9513_v16  ;;  %v8266_v16 = vcombine.low %v428_v37, %v432_v38 }
  0xa1   :  { %6027 = vmatprep.subr.bf16.mxu0 %v8211_v45  ;;  %6355 = vmatprep.subr.bf16.mxu1 %v8213_v49  ;;  %v8258_v45 = vcombine.low %v420_v28, %v424_v29  ;;  %v436_v49 = vld [vmem:[#allocation2 + $0x880] sm:$0xff] }
  0xa2   :  { %v8275_v56 = vcombine.high %v436_v49, %v440_v50 }
  0xa4   :  { %6028 = vmatpush1.bf16.msra.mxu0 %v8210_v51  ;;  %6356 = vmatpush1.bf16.msra.mxu1 %v8212_v52  ;;  %v9542_v51 = vpack.c.bf16 %v99_v42, %v99_v42  ;;  %v437_v52 = vld [vmem:[#allocation2 + $0x888] sm:$0xff] }
  0xa5   :  { %6029 = vmatprep.subr.bf16.mxu0 %v8219_v54  ;;  %6357 = vmatprep.subr.bf16.mxu1 %v8221_v58  ;;  %v441_v54 = vld [vmem:[#allocation2 + $0x8a8] sm:$0xff]  ;;  %v444_v58 = vld [vmem:[#allocation2 + $0x8c0] sm:$0xff] }
  0xa6   :  { %v8277_v57 = vcombine.high %v437_v52, %v441_v54  ;;  %v8276_v1 = vcombine.low %v437_v52, %v441_v54  ;;  %v8283_v2 = vcombine.high %v444_v58, %v448_v60  ;;  %v485_v42 = vld [vmem:[#allocation2 + $0xa08] sm:$0xff]  ;;  %v496_v52 = vld [vmem:[#allocation2 + $0xa60] sm:$0xff] }
  0xa7   :  { %v493_v54 = vld [vmem:[#allocation2 + $0xa48] sm:$0xff] }
  0xa8   :  { %6030 = vmatpush1.bf16.msra.mxu0 %v8218_v61  ;;  %6358 = vmatpush1.bf16.msra.mxu1 %v8220_v62  ;;  %v445_v61 = vld [vmem:[#allocation2 + $0x8c8] sm:$0xff] }
  0xa9   :  { %6031 = vmatprep.subr.bf16.mxu0 %v8227_v0  ;;  %6359 = vmatprep.subr.bf16.mxu1 %v8229_v4  ;;  %v449_v62 = vld [vmem:[#allocation2 + $0x8e8] sm:$0xff]  ;;  %v8274_v0 = vcombine.low %v436_v49, %v440_v50  ;;  %v452_v4 = vld [vmem:[#allocation2 + $0x900] sm:$0xff] }
  0xaa   :  { %v8285_v3 = vcombine.high %v445_v61, %v449_v62  ;;  %v8284_v10 = vcombine.low %v445_v61, %v449_v62  ;;  %v8291_v11 = vcombine.high %v452_v4, %v456_v5  ;;  %v492_v50 = vld [vmem:[#allocation2 + $0xa40] sm:$0xff]  ;;  %v501_v62 = vld [vmem:[#allocation2 + $0xa88] sm:$0xff] }
  0xab   :  { %v504_v61 = vld [vmem:[#allocation2 + $0xaa0] sm:$0xff] }
  0xac   :  { %6032 = vmatpush1.bf16.msra.mxu0 %v8226_v6  ;;  %6360 = vmatpush1.bf16.msra.mxu1 %v8228_v7  ;;  %v453_v6 = vld [vmem:[#allocation2 + $0x908] sm:$0xff] }
  0xad   :  { %6033 = vmatprep.subr.bf16.mxu0 %v8235_v8  ;;  %6361 = vmatprep.subr.bf16.mxu1 %v8237_v13  ;;  %v457_v7 = vld [vmem:[#allocation2 + $0x928] sm:$0xff]  ;;  %v8282_v8 = vcombine.low %v444_v58, %v448_v60  ;;  %v460_v13 = vld [vmem:[#allocation2 + $0x940] sm:$0xff] }
  0xae   :  { %v8293_v12 = vcombine.high %v453_v6, %v457_v7  ;;  %v8299_v59 = vcombine.high %v460_v13, %v464_v14  ;;  %v500_v60 = vld [vmem:[#allocation2 + $0xa80] sm:$0xff] }
  0xb0   :  { %6034 = vmatpush1.bf16.msra.mxu0 %v8234_v15  ;;  %6362 = vmatpush1.bf16.msra.mxu1 %v8236_v18  ;;  %v461_v15 = vld [vmem:[#allocation2 + $0x948] sm:$0xff]  ;;  %v8290_v18 = vcombine.low %v452_v4, %v456_v5  ;;  %v508_v5 = vld [vmem:[#allocation2 + $0xac0] sm:$0xff] }
  0xb1   :  { %6035 = vmatprep.subr.bf16.mxu0 %v8243_v19  ;;  %6363 = vmatprep.subr.bf16.mxu1 %v8245_v22  ;;  %v8292_v19 = vcombine.low %v453_v6, %v457_v7  ;;  %v8301_v20 = vcombine.high %v461_v15, %v465_v17  ;;  %v472_v22 = vld [vmem:[#allocation2 + $0x9a0] sm:$0xff]  ;;  %v8300_v28 = vcombine.low %v461_v15, %v465_v17  ;;  %v509_v7 = vld [vmem:[#allocation2 + $0xac8] sm:$0xff] }
  0xb2   :  { %v8307_v29 = vcombine.high %v468_v21, %v472_v22  ;;  %v512_v6 = vld [vmem:[#allocation2 + $0xae0] sm:$0xff]  ;;  %v517_v17 = vld [vmem:[#allocation2 + $0xb08] sm:$0xff] }
  0xb3   :  { %v520_v15 = vld [vmem:[#allocation2 + $0xb20] sm:$0xff] }
  0xb4   :  { %6036 = vmatpush1.bf16.msra.mxu0 %v8242_v24  ;;  %6364 = vmatpush1.bf16.msra.mxu1 %v8244_v26  ;;  %v469_v24 = vld [vmem:[#allocation2 + $0x988] sm:$0xff] }
  0xb5   :  { %6037 = vmatprep.subr.bf16.mxu0 %v8251_v27  ;;  %6365 = vmatprep.subr.bf16.mxu1 %v8253_v31  ;;  %v473_v26 = vld [vmem:[#allocation2 + $0x9a8] sm:$0xff]  ;;  %v8298_v27 = vcombine.low %v460_v13, %v464_v14  ;;  %v476_v31 = vld [vmem:[#allocation2 + $0x9c0] sm:$0xff] }
  0xb6   :  { %v8309_v30 = vcombine.high %v469_v24, %v473_v26  ;;  %v8308_v37 = vcombine.low %v469_v24, %v473_v26  ;;  %v8315_v38 = vcombine.high %v476_v31, %v480_v32  ;;  %v516_v14 = vld [vmem:[#allocation2 + $0xb00] sm:$0xff]  ;;  %v525_v26 = vld [vmem:[#allocation2 + $0xb48] sm:$0xff] }
  0xb7   :  { %v528_v24 = vld [vmem:[#allocation2 + $0xb60] sm:$0xff] }
  0xb8   :  { %6038 = vmatpush1.bf16.msra.mxu0 %v8250_v34  ;;  %6366 = vmatpush1.bf16.msra.mxu1 %v8252_v35  ;;  %v477_v34 = vld [vmem:[#allocation2 + $0x9c8] sm:$0xff] }
  0xb9   :  { %6048 = vmatprep.subr.bf16.mxu0 %v8259_v63  ;;  %6376 = vmatprep.subr.bf16.mxu1 %v8261_v40  ;;  %v481_v35 = vld [vmem:[#allocation2 + $0x9e8] sm:$0xff]  ;;  %v8306_v63 = vcombine.low %v468_v21, %v472_v22  ;;  %v484_v40 = vld [vmem:[#allocation2 + $0xa00] sm:$0xff] }
  0xba   :  { %v8317_v39 = vcombine.high %v477_v34, %v481_v35  ;;  %v524_v22 = vld [vmem:[#allocation2 + $0xb40] sm:$0xff] }
  0xbb   :  { %6040 = vmatmul.mubr.bf16.vlgmr.msra.gmra.mrb[0].mxu0 %v9540_v43  ;;  %6368 = vmatmul.mubr.bf16.vlgmr.msra.gmra.mrb[0].mxu1 %v9540_v43 }
  0xbc   :  { %6049 = vmatpush1.bf16.msra.mxu0 %v8258_v45  ;;  %6377 = vmatpush1.bf16.msra.mxu1 %v8260_v46  ;;  %v489_v45 = vld [vmem:[#allocation2 + $0xa28] sm:$0xff]  ;;  %v8314_v46 = vcombine.low %v476_v31, %v480_v32  ;;  %v532_v32 = vld [vmem:[#allocation2 + $0xb80] sm:$0xff] }
  0xbd   :  { %6050 = vmatprep.subr.bf16.mxu0 %v8267_v47  ;;  %6378 = vmatprep.subr.bf16.mxu1 %v8269_v48  ;;  %v8316_v47 = vcombine.low %v477_v34, %v481_v35  ;;  %v8323_v48 = vcombine.high %v484_v40, %v488_v41  ;;  %v8325_v49 = vcombine.high %v485_v42, %v489_v45  ;;  %v536_v34 = vld [vmem:[#allocation2 + $0xba0] sm:$0xff]  ;;  %v533_v35 = vld [vmem:[#allocation2 + $0xb88] sm:$0xff] }
  0xbe   :  { %6080 = vmatprep.mubr.bf16.mxu0 %v9542_v51  ;;  %6408 = vmatprep.mubr.bf16.mxu1 %v9542_v51 }
  0xc0   :  { %6051 = vmatpush1.bf16.msra.mxu0 %v8266_v16  ;;  %6379 = vmatpush1.bf16.msra.mxu1 %v8268_v55  ;;  %v497_v16 = vld [vmem:[#allocation2 + $0xa68] sm:$0xff]  ;;  %v8322_v55 = vcombine.low %v484_v40, %v488_v41  ;;  %v540_v41 = vld [vmem:[#allocation2 + $0xbc0] sm:$0xff] }
  0xc1   :  { %6052 = vmatprep.subr.bf16.mxu0 %v8275_v56  ;;  %6380 = vmatprep.subr.bf16.mxu1 %v8277_v57  ;;  %v8324_v56 = vcombine.low %v485_v42, %v489_v45  ;;  %v8331_v57 = vcombine.high %v492_v50, %v496_v52  ;;  %v8333_v58 = vcombine.high %v493_v54, %v497_v16  ;;  %v544_v42 = vld [vmem:[#allocation2 + $0xbe0] sm:$0xff] }
  0xc2   :  { %v84_v45 = vcombine.high %v9530_v23, %v9530_v23 }
  0xc4   :  { %6053 = vmatpush1.bf16.msra.mxu0 %v8274_v0  ;;  %6381 = vmatpush1.bf16.msra.mxu1 %v8276_v1  ;;  %v505_v0 = vld [vmem:[#allocation2 + $0xaa8] sm:$0xff]  ;;  %v8330_v1 = vcombine.low %v492_v50, %v496_v52  ;;  %v8379_v50 = vcombine.high %v540_v41, %v544_v42 }
  0xc5   :  { %6054 = vmatprep.subr.bf16.mxu0 %v8283_v2  ;;  %6382 = vmatprep.subr.bf16.mxu1 %v8285_v3  ;;  %v8332_v2 = vcombine.low %v493_v54, %v497_v16  ;;  %v8339_v3 = vcombine.high %v500_v60, %v504_v61  ;;  %v8341_v4 = vcombine.high %v501_v62, %v505_v0  ;;  %v548_v54 = vld [vmem:[#allocation2 + $0xc00] sm:$0xff] }
  0xc6   :  { %v552_v16 = vld [vmem:[#allocation2 + $0xc20] sm:$0xff] }
  0xc8   :  { %6055 = vmatpush1.bf16.msra.mxu0 %v8282_v8  ;;  %6383 = vmatpush1.bf16.msra.mxu1 %v8284_v10  ;;  %v513_v8 = vld [vmem:[#allocation2 + $0xae8] sm:$0xff]  ;;  %v8338_v10 = vcombine.low %v500_v60, %v504_v61  ;;  %v8387_v60 = vcombine.high %v548_v54, %v552_v16 }
  0xc9   :  { %6056 = vmatprep.subr.bf16.mxu0 %v8291_v11  ;;  %6384 = vmatprep.subr.bf16.mxu1 %v8293_v12  ;;  %v8340_v11 = vcombine.low %v501_v62, %v505_v0  ;;  %v8347_v12 = vcombine.high %v508_v5, %v512_v6  ;;  %v8349_v13 = vcombine.high %v509_v7, %v513_v8  ;;  %v556_v62 = vld [vmem:[#allocation2 + $0xc40] sm:$0xff] }
  0xca   :  { %v560_v0 = vld [vmem:[#allocation2 + $0xc60] sm:$0xff] }
  0xcc   :  { %6057 = vmatpush1.bf16.msra.mxu0 %v8290_v18  ;;  %6385 = vmatpush1.bf16.msra.mxu1 %v8292_v19  ;;  %v521_v18 = vld [vmem:[#allocation2 + $0xb28] sm:$0xff]  ;;  %v8346_v19 = vcombine.low %v508_v5, %v512_v6  ;;  %v8386_v5 = vcombine.low %v548_v54, %v552_v16 }
  0xcd   :  { %6058 = vmatprep.subr.bf16.mxu0 %v8299_v59  ;;  %6386 = vmatprep.subr.bf16.mxu1 %v8301_v20  ;;  %v8348_v59 = vcombine.low %v509_v7, %v513_v8  ;;  %v8355_v20 = vcombine.high %v516_v14, %v520_v15  ;;  %v8357_v21 = vcombine.high %v517_v17, %v521_v18 }
  0xce   :  { %v8395_v7 = vcombine.high %v556_v62, %v560_v0 }
  0xd0   :  { %6059 = vmatpush1.bf16.msra.mxu0 %v8298_v27  ;;  %6387 = vmatpush1.bf16.msra.mxu1 %v8300_v28  ;;  %v529_v27 = vld [vmem:[#allocation2 + $0xb68] sm:$0xff]  ;;  %v8354_v28 = vcombine.low %v516_v14, %v520_v15 }
  0xd1   :  { %6060 = vmatprep.subr.bf16.mxu0 %v8307_v29  ;;  %6388 = vmatprep.subr.bf16.mxu1 %v8309_v30  ;;  %v8356_v29 = vcombine.low %v517_v17, %v521_v18  ;;  %v8363_v30 = vcombine.high %v524_v22, %v528_v24  ;;  %v8365_v31 = vcombine.high %v525_v26, %v529_v27  ;;  %v569_v14 = vld [vmem:[#allocation2 + $0xca8] sm:$0xff] }
  0xd4   :  { %6061 = vmatpush1.bf16.msra.mxu0 %v8306_v63  ;;  %6389 = vmatpush1.bf16.msra.mxu1 %v8308_v37  ;;  %v537_v63 = vld [vmem:[#allocation2 + $0xba8] sm:$0xff]  ;;  %v8362_v37 = vcombine.low %v524_v22, %v528_v24 }
  0xd5   :  { %6062 = vmatprep.subr.bf16.mxu0 %v8315_v38  ;;  %6390 = vmatprep.subr.bf16.mxu1 %v8317_v39  ;;  %v8364_v38 = vcombine.low %v525_v26, %v529_v27  ;;  %v8371_v39 = vcombine.high %v532_v32, %v536_v34  ;;  %v8373_v40 = vcombine.high %v533_v35, %v537_v63 }
  0xd8   :  { %6063 = vmatpush1.bf16.msra.mxu0 %v8314_v46  ;;  %6391 = vmatpush1.bf16.msra.mxu1 %v8316_v47  ;;  %v541_v46 = vld [vmem:[#allocation2 + $0xbc8] sm:$0xff] }
  0xd9   :  { %6064 = vmatprep.subr.bf16.mxu0 %v8323_v48  ;;  %6392 = vmatprep.subr.bf16.mxu1 %v8325_v49  ;;  %v545_v47 = vld [vmem:[#allocation2 + $0xbe8] sm:$0xff]  ;;  %v8370_v48 = vcombine.low %v532_v32, %v536_v34  ;;  %v8372_v49 = vcombine.low %v533_v35, %v537_v63 }
  0xda   :  { %v8381_v52 = vcombine.high %v541_v46, %v545_v47  ;;  %v8380_v23 = vcombine.low %v541_v46, %v545_v47  ;;  %v596_v47 = vld [vmem:[#allocation2 + $0xd80] sm:$0xff] }
  0xdc   :  { %6065 = vmatpush1.bf16.msra.mxu0 %v8322_v55  ;;  %6393 = vmatpush1.bf16.msra.mxu1 %v8324_v56  ;;  %v9551_v55 = vrot.slane %v84_v45, %v9493_v53  ;;  %v549_v56 = vld [vmem:[#allocation2 + $0xc08] sm:$0xff] }
  0xdd   :  { %6066 = vmatprep.subr.bf16.mxu0 %v8331_v57  ;;  %6394 = vmatprep.subr.bf16.mxu1 %v8333_v58  ;;  %v553_v57 = vld [vmem:[#allocation2 + $0xc28] sm:$0xff]  ;;  %v8378_v58 = vcombine.low %v540_v41, %v544_v42 }
  0xde   :  { %v8389_v61 = vcombine.high %v549_v56, %v553_v57  ;;  %v8388_v6 = vcombine.low %v549_v56, %v553_v57  ;;  %v604_v57 = vld [vmem:[#allocation2 + $0xdc0] sm:$0xff] }
  0xe0   :  { %6067 = vmatpush1.bf16.msra.mxu0 %v8330_v1  ;;  %6395 = vmatpush1.bf16.msra.mxu1 %v8332_v2  ;;  %v100_v1 = vcombine.high %v9551_v55, %v9551_v55  ;;  %v9557_v2 = vpack.c.bf16 %v9534_v33, %v9534_v33  ;;  %v8394_v33 = vcombine.low %v556_v62, %v560_v0 }
  0xe1   :  { %6068 = vmatprep.subr.bf16.mxu0 %v8339_v3  ;;  %6396 = vmatprep.subr.bf16.mxu1 %v8341_v4  ;;  %v557_v3 = vld [vmem:[#allocation2 + $0xc48] sm:$0xff] }
  0xe2   :  { %v561_v4 = vld [vmem:[#allocation2 + $0xc68] sm:$0xff] }
  0xe3   :  { %v8397_v8 = vcombine.high %v557_v3, %v561_v4  ;;  %v8396_v15 = vcombine.low %v557_v3, %v561_v4  ;;  %v612_v3 = vld [vmem:[#allocation2 + $0xe00] sm:$0xff] }
  0xe4   :  { %6069 = vmatpush1.bf16.msra.mxu0 %v8338_v10  ;;  %6397 = vmatpush1.bf16.msra.mxu1 %v8340_v11  ;;  %v564_v10 = vld [vmem:[#allocation2 + $0xc80] sm:$0xff] }
  0xe5   :  { %6070 = vmatprep.subr.bf16.mxu0 %v8347_v12  ;;  %6398 = vmatprep.subr.bf16.mxu1 %v8349_v13  ;;  %v568_v11 = vld [vmem:[#allocation2 + $0xca0] sm:$0xff]  ;;  %v9559_v12 = vpack.c.bf16 %v100_v1, %v100_v1  ;;  %v565_v13 = vld [vmem:[#allocation2 + $0xc88] sm:$0xff] }
  0xe6   :  { %v8403_v17 = vcombine.high %v564_v10, %v568_v11  ;;  %v8405_v18 = vcombine.high %v565_v13, %v569_v14  ;;  %v8402_v22 = vcombine.low %v564_v10, %v568_v11  ;;  %v8404_v24 = vcombine.low %v565_v13, %v569_v14  ;;  %v616_v4 = vld [vmem:[#allocation2 + $0xe20] sm:$0xff] }
  0xe7   :  { %v8451_v10 = vcombine.high %v612_v3, %v616_v4  ;;  %v620_v13 = vld [vmem:[#allocation2 + $0xe40] sm:$0xff] }
  0xe8   :  { %6071 = vmatpush1.bf16.msra.mxu0 %v8346_v19  ;;  %6399 = vmatpush1.bf16.msra.mxu1 %v8348_v59  ;;  %v572_v19 = vld [vmem:[#allocation2 + $0xcc0] sm:$0xff] }
  0xe9   :  { %6072 = vmatprep.subr.bf16.mxu0 %v8355_v20  ;;  %6400 = vmatprep.subr.bf16.mxu1 %v8357_v21  ;;  %v576_v59 = vld [vmem:[#allocation2 + $0xce0] sm:$0xff]  ;;  %v573_v20 = vld [vmem:[#allocation2 + $0xcc8] sm:$0xff] }
  0xea   :  { %v577_v21 = vld [vmem:[#allocation2 + $0xce8] sm:$0xff]  ;;  %v8411_v26 = vcombine.high %v572_v19, %v576_v59  ;;  %v8410_v32 = vcombine.low %v572_v19, %v576_v59  ;;  %v624_v14 = vld [vmem:[#allocation2 + $0xe60] sm:$0xff] }
  0xeb   :  { %v8413_v27 = vcombine.high %v573_v20, %v577_v21  ;;  %v8412_v34 = vcombine.low %v573_v20, %v577_v21  ;;  %v8459_v19 = vcombine.high %v620_v13, %v624_v14  ;;  %v628_v20 = vld [vmem:[#allocation2 + $0xe80] sm:$0xff] }
  0xec   :  { %6073 = vmatpush1.bf16.msra.mxu0 %v8354_v28  ;;  %6401 = vmatpush1.bf16.msra.mxu1 %v8356_v29  ;;  %v580_v28 = vld [vmem:[#allocation2 + $0xd00] sm:$0xff] }
  0xed   :  { %6074 = vmatprep.subr.bf16.mxu0 %v8363_v30  ;;  %6402 = vmatprep.subr.bf16.mxu1 %v8365_v31  ;;  %v584_v29 = vld [vmem:[#allocation2 + $0xd20] sm:$0xff]  ;;  %v581_v30 = vld [vmem:[#allocation2 + $0xd08] sm:$0xff] }
  0xee   :  { %v585_v31 = vld [vmem:[#allocation2 + $0xd28] sm:$0xff]  ;;  %v8419_v35 = vcombine.high %v580_v28, %v584_v29  ;;  %v8418_v41 = vcombine.low %v580_v28, %v584_v29  ;;  %v632_v21 = vld [vmem:[#allocation2 + $0xea0] sm:$0xff] }
  0xef   :  { %v8421_v63 = vcombine.high %v581_v30, %v585_v31  ;;  %v8420_v42 = vcombine.low %v581_v30, %v585_v31  ;;  %v8467_v28 = vcombine.high %v628_v20, %v632_v21  ;;  %v636_v30 = vld [vmem:[#allocation2 + $0xec0] sm:$0xff] }
  0xf0   :  { %6075 = vmatpush1.bf16.msra.mxu0 %v8362_v37  ;;  %6403 = vmatpush1.bf16.msra.mxu1 %v8364_v38  ;;  %v588_v37 = vld [vmem:[#allocation2 + $0xd40] sm:$0xff] }
  0xf1   :  { %6076 = vmatprep.subr.bf16.mxu0 %v8371_v39  ;;  %6404 = vmatprep.subr.bf16.mxu1 %v8373_v40  ;;  %v592_v38 = vld [vmem:[#allocation2 + $0xd60] sm:$0xff]  ;;  %v589_v39 = vld [vmem:[#allocation2 + $0xd48] sm:$0xff] }
  0xf2   :  { %v593_v40 = vld [vmem:[#allocation2 + $0xd68] sm:$0xff]  ;;  %v8427_v45 = vcombine.high %v588_v37, %v592_v38  ;;  %v640_v31 = vld [vmem:[#allocation2 + $0xee0] sm:$0xff] }
  0xf3   :  { %v8429_v46 = vcombine.high %v589_v39, %v593_v40  ;;  %v8428_v54 = vcombine.low %v589_v39, %v593_v40  ;;  %v644_v39 = vld [vmem:[#allocation2 + $0xf00] sm:$0xff] }
  0xf4   :  { %6077 = vmatpush1.bf16.msra.mxu0 %v8370_v48  ;;  %6405 = vmatpush1.bf16.msra.mxu1 %v8372_v49  ;;  %v600_v48 = vld [vmem:[#allocation2 + $0xda0] sm:$0xff]  ;;  %v597_v49 = vld [vmem:[#allocation2 + $0xd88] sm:$0xff] }
  0xf5   :  { %6078 = vmatprep.subr.bf16.mxu0 %v8379_v50  ;;  %6406 = vmatprep.subr.bf16.mxu1 %v8381_v52  ;;  %v601_v50 = vld [vmem:[#allocation2 + $0xda8] sm:$0xff]  ;;  %v8426_v52 = vcombine.low %v588_v37, %v592_v38  ;;  %v8435_v16 = vcombine.high %v596_v47, %v600_v48  ;;  %v8475_v37 = vcombine.high %v636_v30, %v640_v31  ;;  %v648_v40 = vld [vmem:[#allocation2 + $0xf20] sm:$0xff] }
  0xf6   :  { %v8437_v56 = vcombine.high %v597_v49, %v601_v50  ;;  %v8436_v62 = vcombine.low %v597_v49, %v601_v50  ;;  %v652_v49 = vld [vmem:[#allocation2 + $0xf40] sm:$0xff] }
  0xf7   :  { %v656_v50 = vld [vmem:[#allocation2 + $0xf60] sm:$0xff] }
  0xf8   :  { %6079 = vmatpush1.bf16.msra.mxu0 %v8378_v58  ;;  %6407 = vmatpush1.bf16.msra.mxu1 %v8380_v23  ;;  %v608_v58 = vld [vmem:[#allocation2 + $0xde0] sm:$0xff]  ;;  %v605_v23 = vld [vmem:[#allocation2 + $0xdc8] sm:$0xff] }
  0xf9   :  { %6089 = vmatprep.subr.bf16.mxu0 %v8387_v60  ;;  %6417 = vmatprep.subr.bf16.mxu1 %v8389_v61  ;;  %v609_v60 = vld [vmem:[#allocation2 + $0xde8] sm:$0xff]  ;;  %v8434_v61 = vcombine.low %v596_v47, %v600_v48  ;;  %v8443_v0 = vcombine.high %v604_v57, %v608_v58  ;;  %v8483_v47 = vcombine.high %v644_v39, %v648_v40 }
  0xfa   :  { %v8445_v1 = vcombine.high %v605_v23, %v609_v60 }
  0xfb   :  { %6081 = vmatmul.mubr.bf16.vlgmr.msra.gmra.mrb[0].mxu0 %v9557_v2  ;;  %6409 = vmatmul.mubr.bf16.vlgmr.msra.gmra.mrb[0].mxu1 %v9557_v2 }
  0xfc   :  { %6090 = vmatpush1.bf16.msra.mxu0 %v8386_v5  ;;  %6418 = vmatpush1.bf16.msra.mxu1 %v8388_v6  ;;  %v613_v5 = vld [vmem:[#allocation2 + $0xe08] sm:$0xff] }
  0xfd   :  { %6091 = vmatprep.subr.bf16.mxu0 %v8395_v7  ;;  %6419 = vmatprep.subr.bf16.mxu1 %v8397_v8  ;;  %v617_v6 = vld [vmem:[#allocation2 + $0xe28] sm:$0xff]  ;;  %v8442_v7 = vcombine.low %v604_v57, %v608_v58  ;;  %v8444_v8 = vcombine.low %v605_v23, %v609_v60  ;;  %v8491_v57 = vcombine.high %v652_v49, %v656_v50  ;;  %v660_v23 = vld [vmem:[#allocation2 + $0xf80] sm:$0xff] }
  0xfe   :  { %6121 = vmatprep.mubr.bf16.mxu0 %v9559_v12  ;;  %6449 = vmatprep.mubr.bf16.mxu1 %v9559_v12  ;;  %v8453_v11 = vcombine.high %v613_v5, %v617_v6  ;;  %v664_v60 = vld [vmem:[#allocation2 + $0xfa0] sm:$0xff] }
 0x100   :  { %6092 = vmatpush1.bf16.msra.mxu0 %v8394_v33  ;;  %6420 = vmatpush1.bf16.msra.mxu1 %v8396_v15  ;;  %v621_v33 = vld [vmem:[#allocation2 + $0xe48] sm:$0xff] }
 0x101   :  { %6093 = vmatprep.subr.bf16.mxu0 %v8403_v17  ;;  %6421 = vmatprep.subr.bf16.mxu1 %v8405_v18  ;;  %v625_v15 = vld [vmem:[#allocation2 + $0xe68] sm:$0xff]  ;;  %v8450_v17 = vcombine.low %v612_v3, %v616_v4  ;;  %v8452_v18 = vcombine.low %v613_v5, %v617_v6  ;;  %v8499_v3 = vcombine.high %v660_v23, %v664_v60  ;;  %v668_v5 = vld [vmem:[#allocation2 + $0xfc0] sm:$0xff] }
 0x102   :  { %v8461_v59 = vcombine.high %v621_v33, %v625_v15  ;;  %v672_v6 = vld [vmem:[#allocation2 + $0xfe0] sm:$0xff] }
 0x104   :  { %6094 = vmatpush1.bf16.msra.mxu0 %v8402_v22  ;;  %6422 = vmatpush1.bf16.msra.mxu1 %v8404_v24  ;;  %v629_v22 = vld [vmem:[#allocation2 + $0xe88] sm:$0xff] }
 0x105   :  { %6095 = vmatprep.subr.bf16.mxu0 %v8411_v26  ;;  %6423 = vmatprep.subr.bf16.mxu1 %v8413_v27  ;;  %v633_v24 = vld [vmem:[#allocation2 + $0xea8] sm:$0xff]  ;;  %v8458_v26 = vcombine.low %v620_v13, %v624_v14  ;;  %v8460_v27 = vcombine.low %v621_v33, %v625_v15  ;;  %v8507_v14 = vcombine.high %v668_v5, %v672_v6  ;;  %v676_v15 = vld [vmem:[#allocation2 + $0x1000] sm:$0xff] }
 0x106   :  { %v8469_v29 = vcombine.high %v629_v22, %v633_v24 }
 0x108   :  { %6096 = vmatpush1.bf16.msra.mxu0 %v8410_v32  ;;  %6424 = vmatpush1.bf16.msra.mxu1 %v8412_v34  ;;  %v637_v32 = vld [vmem:[#allocation2 + $0xec8] sm:$0xff] }
 0x109   :  { %6097 = vmatprep.subr.bf16.mxu0 %v8419_v35  ;;  %6425 = vmatprep.subr.bf16.mxu1 %v8421_v63  ;;  %v641_v34 = vld [vmem:[#allocation2 + $0xee8] sm:$0xff]  ;;  %v8466_v35 = vcombine.low %v628_v20, %v632_v21  ;;  %v8468_v63 = vcombine.low %v629_v22, %v633_v24  ;;  %v8506_v20 = vcombine.low %v668_v5, %v672_v6 }
 0x10a   :  { %v8477_v38 = vcombine.high %v637_v32, %v641_v34  ;;  %v717_v5 = vld [vmem:[#allocation2 + $0x1148] sm:$0xff] }
 0x10b   :  { %v721_v6 = vld [vmem:[#allocation2 + $0x1168] sm:$0xff] }
 0x10c   :  { %6098 = vmatpush1.bf16.msra.mxu0 %v8418_v41  ;;  %6426 = vmatpush1.bf16.msra.mxu1 %v8420_v42  ;;  %v645_v41 = vld [vmem:[#allocation2 + $0xf08] sm:$0xff] }
 0x10d   :  { %6099 = vmatprep.subr.bf16.mxu0 %v8427_v45  ;;  %6427 = vmatprep.subr.bf16.mxu1 %v8429_v46  ;;  %v649_v42 = vld [vmem:[#allocation2 + $0xf28] sm:$0xff]  ;;  %v8474_v45 = vcombine.low %v636_v30, %v640_v31  ;;  %v8476_v46 = vcombine.low %v637_v32, %v641_v34 }
 0x10e   :  { %v8485_v48 = vcombine.high %v645_v41, %v649_v42  ;;  %v685_v30 = vld [vmem:[#allocation2 + $0x1048] sm:$0xff] }
 0x10f   :  { %v689_v31 = vld [vmem:[#allocation2 + $0x1068] sm:$0xff] }
 0x110   :  { %6100 = vmatpush1.bf16.msra.mxu0 %v8426_v52  ;;  %6428 = vmatpush1.bf16.msra.mxu1 %v8428_v54  ;;  %v653_v52 = vld [vmem:[#allocation2 + $0xf48] sm:$0xff] }
 0x111   :  { %6101 = vmatprep.subr.bf16.mxu0 %v8435_v16  ;;  %6429 = vmatprep.subr.bf16.mxu1 %v8437_v56  ;;  %v657_v54 = vld [vmem:[#allocation2 + $0xf68] sm:$0xff]  ;;  %v8482_v16 = vcombine.low %v644_v39, %v648_v40  ;;  %v8484_v56 = vcombine.low %v645_v41, %v649_v42  ;;  %v8524_v42 = vcombine.low %v685_v30, %v689_v31 }
 0x112   :  { %v8493_v58 = vcombine.high %v653_v52, %v657_v54  ;;  %v693_v40 = vld [vmem:[#allocation2 + $0x1088] sm:$0xff] }
 0x113   :  { %v697_v41 = vld [vmem:[#allocation2 + $0x10a8] sm:$0xff] }
 0x114   :  { %6102 = vmatpush1.bf16.msra.mxu0 %v8434_v61  ;;  %6430 = vmatpush1.bf16.msra.mxu1 %v8436_v62  ;;  %v661_v61 = vld [vmem:[#allocation2 + $0xf88] sm:$0xff] }
 0x115   :  { %6103 = vmatprep.subr.bf16.mxu0 %v8443_v0  ;;  %6431 = vmatprep.subr.bf16.mxu1 %v8445_v1  ;;  %v665_v62 = vld [vmem:[#allocation2 + $0xfa8] sm:$0xff]  ;;  %v8490_v0 = vcombine.low %v652_v49, %v656_v50  ;;  %v8492_v1 = vcombine.low %v653_v52, %v657_v54  ;;  %v8532_v54 = vcombine.low %v693_v40, %v697_v41 }
 0x116   :  { %v8501_v4 = vcombine.high %v661_v61, %v665_v62  ;;  %v8500_v13 = vcombine.low %v661_v61, %v665_v62  ;;  %v701_v49 = vld [vmem:[#allocation2 + $0x10c8] sm:$0xff] }
 0x117   :  { %v705_v50 = vld [vmem:[#allocation2 + $0x10e8] sm:$0xff] }
 0x118   :  { %6104 = vmatpush1.bf16.msra.mxu0 %v8442_v7  ;;  %6432 = vmatpush1.bf16.msra.mxu1 %v8444_v8  ;;  %v669_v7 = vld [vmem:[#allocation2 + $0xfc8] sm:$0xff]  ;;  %v8540_v62 = vcombine.low %v701_v49, %v705_v50 }
 0x119   :  { %6105 = vmatprep.subr.bf16.mxu0 %v8451_v10  ;;  %6433 = vmatprep.subr.bf16.mxu1 %v8453_v11  ;;  %v673_v8 = vld [vmem:[#allocation2 + $0xfe8] sm:$0xff]  ;;  %v9568_v10 = vld [vmem:[%s9908_s0 + $0x10] sm:$0xff]  ;;  %v8498_v11 = vcombine.low %v660_v23, %v664_v60 }
 0x11a   :  { %v8509_v33 = vcombine.high %v669_v7, %v673_v8  ;;  %v8508_v21 = vcombine.low %v669_v7, %v673_v8  ;;  %v709_v23 = vld [vmem:[#allocation2 + $0x1108] sm:$0xff] }
 0x11b   :  { %v713_v60 = vld [vmem:[#allocation2 + $0x1128] sm:$0xff] }
 0x11c   :  { %6106 = vmatpush1.bf16.msra.mxu0 %v8450_v17  ;;  %6434 = vmatpush1.bf16.msra.mxu1 %v8452_v18  ;;  %v680_v17 = vld [vmem:[#allocation2 + $0x1020] sm:$0xff]  ;;  %v9572_v18 = vrot.slane %v9568_v10, %v9493_v53  ;;  %v8548_v8 = vcombine.low %v709_v23, %v713_v60 }
 0x11d   :  { %6107 = vmatprep.subr.bf16.mxu0 %v8459_v19  ;;  %6435 = vmatprep.subr.bf16.mxu1 %v8461_v59  ;;  %v677_v19 = vld [vmem:[#allocation2 + $0x1008] sm:$0xff]  ;;  %v8515_v22 = vcombine.high %v676_v15, %v680_v17  ;;  %v8514_v32 = vcombine.low %v676_v15, %v680_v17 }
 0x11e   :  { %v681_v59 = vld [vmem:[#allocation2 + $0x1028] sm:$0xff] }
 0x11f   :  { %v8517_v24 = vcombine.high %v677_v19, %v681_v59  ;;  %v8516_v34 = vcombine.low %v677_v19, %v681_v59  ;;  %v725_v15 = vld [vmem:[#allocation2 + $0x1188] sm:$0xff]  ;;  %v8556_v59 = vcombine.low %v717_v5, %v721_v6 }
 0x120   :  { %6108 = vmatpush1.bf16.msra.mxu0 %v8458_v26  ;;  %6436 = vmatpush1.bf16.msra.mxu1 %v8460_v27  ;;  %v684_v26 = vld [vmem:[#allocation2 + $0x1040] sm:$0xff]  ;;  %v729_v17 = vld [vmem:[#allocation2 + $0x11a8] sm:$0xff] }
 0x121   :  { %6109 = vmatprep.subr.bf16.mxu0 %v8467_v28  ;;  %6437 = vmatprep.subr.bf16.mxu1 %v8469_v29  ;;  %v688_v27 = vld [vmem:[#allocation2 + $0x1060] sm:$0xff]  ;;  %v116_v28 = vcombine.high %v9572_v18, %v9572_v18  ;;  %v9578_v29 = vpack.c.bf16 %v9551_v55, %v9551_v55 }
 0x122   :  { %v8522_v55 = vcombine.low %v684_v26, %v688_v27 }
 0x123   :  { %v9580_v39 = vpack.c.bf16 %v116_v28, %v116_v28 }
 0x124   :  { %6110 = vmatpush1.bf16.msra.mxu0 %v8466_v35  ;;  %6438 = vmatpush1.bf16.msra.mxu1 %v8468_v63  ;;  %v8523_v35 = vcombine.high %v684_v26, %v688_v27  ;;  %v8525_v63 = vcombine.high %v685_v30, %v689_v31  ;;  %v733_v26 = vld [vmem:[#allocation2 + $0x11c8] sm:$0xff]  ;;  %v8564_v30 = vcombine.low %v725_v15, %v729_v17 }
 0x125   :  { %6111 = vmatprep.subr.bf16.mxu0 %v8475_v37  ;;  %6439 = vmatprep.subr.bf16.mxu1 %v8477_v38  ;;  %v692_v37 = vld [vmem:[#allocation2 + $0x1080] sm:$0xff]  ;;  %v737_v27 = vld [vmem:[#allocation2 + $0x11e8] sm:$0xff] }
 0x126   :  { %v696_v38 = vld [vmem:[#allocation2 + $0x10a0] sm:$0xff] }
 0x127   :  { %v8530_v52 = vcombine.low %v692_v37, %v696_v38 }
 0x128   :  { %6112 = vmatpush1.bf16.msra.mxu0 %v8474_v45  ;;  %6440 = vmatpush1.bf16.msra.mxu1 %v8476_v46  ;;  %v8531_v45 = vcombine.high %v692_v37, %v696_v38  ;;  %v8533_v46 = vcombine.high %v693_v40, %v697_v41  ;;  %v745_v37 = vld [vmem:[#allocation2 + $0x1228] sm:$0xff]  ;;  %v8572_v40 = vcombine.low %v733_v26, %v737_v27 }
 0x129   :  { %6113 = vmatprep.subr.bf16.mxu0 %v8483_v47  ;;  %6441 = vmatprep.subr.bf16.mxu1 %v8485_v48  ;;  %v700_v47 = vld [vmem:[#allocation2 + $0x10c0] sm:$0xff] }
 0x12a   :  { %v704_v48 = vld [vmem:[#allocation2 + $0x10e0] sm:$0xff] }
 0x12b   :  { %v8538_v61 = vcombine.low %v700_v47, %v704_v48 }
 0x12c   :  { %6114 = vmatpush1.bf16.msra.mxu0 %v8482_v16  ;;  %6442 = vmatpush1.bf16.msra.mxu1 %v8484_v56  ;;  %v8539_v16 = vcombine.high %v700_v47, %v704_v48  ;;  %v8541_v56 = vcombine.high %v701_v49, %v705_v50  ;;  %v753_v47 = vld [vmem:[#allocation2 + $0x1268] sm:$0xff] }
 0x12d   :  { %6115 = vmatprep.subr.bf16.mxu0 %v8491_v57  ;;  %6443 = vmatprep.subr.bf16.mxu1 %v8493_v58  ;;  %v708_v57 = vld [vmem:[#allocation2 + $0x1100] sm:$0xff] }
 0x12e   :  { %v712_v58 = vld [vmem:[#allocation2 + $0x1120] sm:$0xff] }
 0x12f   :  { %v8546_v7 = vcombine.low %v708_v57, %v712_v58 }
 0x130   :  { %6116 = vmatpush1.bf16.msra.mxu0 %v8490_v0  ;;  %6444 = vmatpush1.bf16.msra.mxu1 %v8492_v1  ;;  %v8547_v0 = vcombine.high %v708_v57, %v712_v58  ;;  %v8549_v1 = vcombine.high %v709_v23, %v713_v60  ;;  %v761_v57 = vld [vmem:[#allocation2 + $0x12a8] sm:$0xff] }
 0x131   :  { %6117 = vmatprep.subr.bf16.mxu0 %v8499_v3  ;;  %6445 = vmatprep.subr.bf16.mxu1 %v8501_v4  ;;  %v716_v3 = vld [vmem:[#allocation2 + $0x1140] sm:$0xff] }
 0x132   :  { %v720_v4 = vld [vmem:[#allocation2 + $0x1160] sm:$0xff] }
 0x133   :  { %v8554_v19 = vcombine.low %v716_v3, %v720_v4 }
 0x134   :  { %6118 = vmatpush1.bf16.msra.mxu0 %v8498_v11  ;;  %6446 = vmatpush1.bf16.msra.mxu1 %v8500_v13  ;;  %v8555_v11 = vcombine.high %v716_v3, %v720_v4  ;;  %v8557_v13 = vcombine.high %v717_v5, %v721_v6  ;;  %v769_v3 = vld [vmem:[#allocation2 + $0x12e8] sm:$0xff] }
 0x135   :  { %6119 = vmatprep.subr.bf16.mxu0 %v8507_v14  ;;  %6447 = vmatprep.subr.bf16.mxu1 %v8509_v33  ;;  %v724_v14 = vld [vmem:[#allocation2 + $0x1180] sm:$0xff] }
 0x136   :  { %v728_v33 = vld [vmem:[#allocation2 + $0x11a0] sm:$0xff] }
 0x137   :  { %v8562_v28 = vcombine.low %v724_v14, %v728_v33 }
 0x138   :  { %6120 = vmatpush1.bf16.msra.mxu0 %v8506_v20  ;;  %6448 = vmatpush1.bf16.msra.mxu1 %v8508_v21  ;;  %v8563_v20 = vcombine.high %v724_v14, %v728_v33  ;;  %v8565_v21 = vcombine.high %v725_v15, %v729_v17  ;;  %v777_v14 = vld [vmem:[#allocation2 + $0x1328] sm:$0xff] }
 0x139   :  { %6130 = vmatprep.subr.bf16.mxu0 %v8515_v22  ;;  %6458 = vmatprep.subr.bf16.mxu1 %v8517_v24  ;;  %v732_v22 = vld [vmem:[#allocation2 + $0x11c0] sm:$0xff] }
 0x13a   :  { %v736_v24 = vld [vmem:[#allocation2 + $0x11e0] sm:$0xff] }
 0x13b   :  { %6122 = vmatmul.mubr.bf16.vlgmr.msra.gmra.mrb[0].mxu0 %v9578_v29  ;;  %6450 = vmatmul.mubr.bf16.vlgmr.msra.gmra.mrb[0].mxu1 %v9578_v29  ;;  %v8571_v31 = vcombine.high %v732_v22, %v736_v24  ;;  %v8570_v38 = vcombine.low %v732_v22, %v736_v24  ;;  %v785_v22 = vld [vmem:[#allocation2 + $0x1368] sm:$0xff] }
 0x13c   :  { %6131 = vmatpush1.bf16.msra.mxu0 %v8514_v32  ;;  %6459 = vmatpush1.bf16.msra.mxu1 %v8516_v34  ;;  %v8573_v32 = vcombine.high %v733_v26, %v737_v27  ;;  %v740_v34 = vld [vmem:[#allocation2 + $0x1200] sm:$0xff] }
 0x13d   :  { %6132 = vmatprep.subr.bf16.mxu0 %v8523_v35  ;;  %6460 = vmatprep.subr.bf16.mxu1 %v8525_v63  ;;  %v744_v35 = vld [vmem:[#allocation2 + $0x1220] sm:$0xff]  ;;  %v741_v63 = vld [vmem:[#allocation2 + $0x1208] sm:$0xff] }
 0x13e   :  { %6162 = vmatprep.mubr.bf16.mxu0 %v9580_v39  ;;  %6490 = vmatprep.mubr.bf16.mxu1 %v9580_v39  ;;  %v8579_v41 = vcombine.high %v740_v34, %v744_v35  ;;  %v8578_v48 = vcombine.low %v740_v34, %v744_v35  ;;  %v8580_v49 = vcombine.low %v741_v63, %v745_v37  ;;  %v793_v34 = vld [vmem:[#allocation2 + $0x13a8] sm:$0xff] }
 0x140   :  { %6133 = vmatpush1.bf16.msra.mxu0 %v8522_v55  ;;  %6461 = vmatpush1.bf16.msra.mxu1 %v8524_v42  ;;  %v8581_v55 = vcombine.high %v741_v63, %v745_v37  ;;  %v748_v42 = vld [vmem:[#allocation2 + $0x1240] sm:$0xff] }
 0x141   :  { %6134 = vmatprep.subr.bf16.mxu0 %v8531_v45  ;;  %6462 = vmatprep.subr.bf16.mxu1 %v8533_v46  ;;  %v752_v45 = vld [vmem:[#allocation2 + $0x1260] sm:$0xff]  ;;  %v749_v46 = vld [vmem:[#allocation2 + $0x1248] sm:$0xff] }
 0x142   :  { %v8587_v50 = vcombine.high %v748_v42, %v752_v45  ;;  %v8586_v58 = vcombine.low %v748_v42, %v752_v45  ;;  %v8588_v23 = vcombine.low %v749_v46, %v753_v47  ;;  %v797_v42 = vld [vmem:[#allocation2 + $0x13c8] sm:$0xff] }
 0x143   :  { %v801_v45 = vld [vmem:[#allocation2 + $0x13e8] sm:$0xff] }
 0x144   :  { %6135 = vmatpush1.bf16.msra.mxu0 %v8530_v52  ;;  %6463 = vmatpush1.bf16.msra.mxu1 %v8532_v54  ;;  %v8589_v52 = vcombine.high %v749_v46, %v753_v47  ;;  %v756_v54 = vld [vmem:[#allocation2 + $0x1280] sm:$0xff] }
 0x145   :  { %6136 = vmatprep.subr.bf16.mxu0 %v8539_v16  ;;  %6464 = vmatprep.subr.bf16.mxu1 %v8541_v56  ;;  %v760_v16 = vld [vmem:[#allocation2 + $0x12a0] sm:$0xff]  ;;  %v757_v56 = vld [vmem:[#allocation2 + $0x1288] sm:$0xff] }
 0x146   :  { %v8595_v60 = vcombine.high %v756_v54, %v760_v16  ;;  %v8594_v4 = vcombine.low %v756_v54, %v760_v16  ;;  %v8596_v5 = vcombine.low %v757_v56, %v761_v57  ;;  %v805_v16 = vld [vmem:[#allocation2 + $0x1408] sm:$0xff] }
 0x148   :  { %6137 = vmatpush1.bf16.msra.mxu0 %v8538_v61  ;;  %6465 = vmatpush1.bf16.msra.mxu1 %v8540_v62  ;;  %v8597_v61 = vcombine.high %v757_v56, %v761_v57  ;;  %v764_v62 = vld [vmem:[#allocation2 + $0x12c0] sm:$0xff]  ;;  %v809_v56 = vld [vmem:[#allocation2 + $0x1428] sm:$0xff] }
 0x149   :  { %6138 = vmatprep.subr.bf16.mxu0 %v8547_v0  ;;  %6466 = vmatprep.subr.bf16.mxu1 %v8549_v1  ;;  %v768_v0 = vld [vmem:[#allocation2 + $0x12e0] sm:$0xff]  ;;  %v765_v1 = vld [vmem:[#allocation2 + $0x12c8] sm:$0xff] }
 0x14a   :  { %v8603_v6 = vcombine.high %v764_v62, %v768_v0  ;;  %v8602_v33 = vcombine.low %v764_v62, %v768_v0  ;;  %v8604_v15 = vcombine.low %v765_v1, %v769_v3  ;;  %v9595_v0 = vpack.c.bf16 %v9572_v18, %v9572_v18 }
 0x14c   :  { %6139 = vmatpush1.bf16.msra.mxu0 %v8546_v7  ;;  %6467 = vmatpush1.bf16.msra.mxu1 %v8548_v8  ;;  %v8605_v7 = vcombine.high %v765_v1, %v769_v3  ;;  %v772_v8 = vld [vmem:[#allocation2 + $0x1300] sm:$0xff]  ;;  %v813_v1 = vld [vmem:[#allocation2 + $0x1448] sm:$0xff] }
 0x14d   :  { %6140 = vmatprep.subr.bf16.mxu0 %v8555_v11  ;;  %6468 = vmatprep.subr.bf16.mxu1 %v8557_v13  ;;  %v776_v11 = vld [vmem:[#allocation2 + $0x1320] sm:$0xff]  ;;  %v773_v13 = vld [vmem:[#allocation2 + $0x1308] sm:$0xff] }
 0x14e   :  { %v8611_v17 = vcombine.high %v772_v8, %v776_v11  ;;  %v8610_v24 = vcombine.low %v772_v8, %v776_v11  ;;  %v8612_v26 = vcombine.low %v773_v13, %v777_v14  ;;  %v817_v3 = vld [vmem:[#allocation2 + $0x1468] sm:$0xff]  ;;  %v820_v8 = vld [vmem:[#allocation2 + $0x1480] sm:$0xff] }
 0x14f   :  { %v824_v11 = vld [vmem:[#allocation2 + $0x14a0] sm:$0xff] }
 0x150   :  { %6141 = vmatpush1.bf16.msra.mxu0 %v8554_v19  ;;  %6469 = vmatpush1.bf16.msra.mxu1 %v8556_v59  ;;  %v8613_v19 = vcombine.high %v773_v13, %v777_v14  ;;  %v780_v59 = vld [vmem:[#allocation2 + $0x1340] sm:$0xff]  ;;  %v821_v14 = vld [vmem:[#allocation2 + $0x1488] sm:$0xff] }
 0x151   :  { %6142 = vmatprep.subr.bf16.mxu0 %v8563_v20  ;;  %6470 = vmatprep.subr.bf16.mxu1 %v8565_v21  ;;  %v784_v20 = vld [vmem:[#allocation2 + $0x1360] sm:$0xff]  ;;  %v781_v21 = vld [vmem:[#allocation2 + $0x1348] sm:$0xff] }
 0x152   :  { %v8619_v27 = vcombine.high %v780_v59, %v784_v20  ;;  %v8618_v35 = vcombine.low %v780_v59, %v784_v20  ;;  %v8620_v63 = vcombine.low %v781_v21, %v785_v22  ;;  %v828_v59 = vld [vmem:[#allocation2 + $0x14c0] sm:$0xff] }
 0x153   :  { %v832_v20 = vld [vmem:[#allocation2 + $0x14e0] sm:$0xff] }
 0x154   :  { %6143 = vmatpush1.bf16.msra.mxu0 %v8562_v28  ;;  %6471 = vmatpush1.bf16.msra.mxu1 %v8564_v30  ;;  %v8621_v28 = vcombine.high %v781_v21, %v785_v22  ;;  %v788_v30 = vld [vmem:[#allocation2 + $0x1380] sm:$0xff]  ;;  %v829_v21 = vld [vmem:[#allocation2 + $0x14c8] sm:$0xff] }
 0x155   :  { %6144 = vmatprep.subr.bf16.mxu0 %v8571_v31  ;;  %6472 = vmatprep.subr.bf16.mxu1 %v8573_v32  ;;  %v792_v31 = vld [vmem:[#allocation2 + $0x13a0] sm:$0xff]  ;;  %v789_v32 = vld [vmem:[#allocation2 + $0x1388] sm:$0xff] }
 0x156   :  { %v8627_v37 = vcombine.high %v788_v30, %v792_v31  ;;  %v8626_v46 = vcombine.low %v788_v30, %v792_v31  ;;  %v8628_v47 = vcombine.low %v789_v32, %v793_v34  ;;  %v833_v22 = vld [vmem:[#allocation2 + $0x14e8] sm:$0xff]  ;;  %v836_v30 = vld [vmem:[#allocation2 + $0x1500] sm:$0xff] }
 0x157   :  { %v840_v31 = vld [vmem:[#allocation2 + $0x1520] sm:$0xff] }
 0x158   :  { %6145 = vmatpush1.bf16.msra.mxu0 %v8570_v38  ;;  %6473 = vmatpush1.bf16.msra.mxu1 %v8572_v40  ;;  %v8629_v38 = vcombine.high %v789_v32, %v793_v34  ;;  %v796_v40 = vld [vmem:[#allocation2 + $0x13c0] sm:$0xff]  ;;  %v837_v32 = vld [vmem:[#allocation2 + $0x1508] sm:$0xff] }
 0x159   :  { %6146 = vmatprep.subr.bf16.mxu0 %v8579_v41  ;;  %6474 = vmatprep.subr.bf16.mxu1 %v8581_v55  ;;  %v800_v41 = vld [vmem:[#allocation2 + $0x13e0] sm:$0xff]  ;;  %v101_v55 = vcombine.high %v9568_v10, %v9568_v10  ;;  %v8636_v10 = vcombine.low %v797_v42, %v801_v45  ;;  %v841_v34 = vld [vmem:[#allocation2 + $0x1528] sm:$0xff] }
 0x15a   :  { %v8634_v57 = vcombine.low %v796_v40, %v800_v41 }
 0x15b   :  { %v9589_v54 = vrot.slane %v101_v55, %v9493_v53  ;;  %v845_v55 = vld [vmem:[#allocation2 + $0x1548] sm:$0xff] }
 0x15c   :  { %6147 = vmatpush1.bf16.msra.mxu0 %v8578_v48  ;;  %6475 = vmatpush1.bf16.msra.mxu1 %v8580_v49  ;;  %v8635_v48 = vcombine.high %v796_v40, %v800_v41  ;;  %v8637_v49 = vcombine.high %v797_v42, %v801_v45  ;;  %v844_v40 = vld [vmem:[#allocation2 + $0x1540] sm:$0xff]  ;;  %v849_v42 = vld [vmem:[#allocation2 + $0x1568] sm:$0xff]  ;;  %v8674_v45 = vcombine.low %v836_v30, %v840_v31 }
 0x15d   :  { %6148 = vmatprep.subr.bf16.mxu0 %v8587_v50  ;;  %6476 = vmatprep.subr.bf16.mxu1 %v8589_v52  ;;  %v804_v50 = vld [vmem:[#allocation2 + $0x1400] sm:$0xff]  ;;  %v117_v62 = vcombine.high %v9589_v54, %v9589_v54 }
 0x15e   :  { %v808_v52 = vld [vmem:[#allocation2 + $0x1420] sm:$0xff] }
 0x15f   :  { %v9597_v13 = vpack.c.bf16 %v117_v62, %v117_v62  ;;  %v848_v41 = vld [vmem:[#allocation2 + $0x1560] sm:$0xff]  ;;  %v865_v62 = vld [vmem:[#allocation2 + $0x15e8] sm:$0xff] }
 0x160   :  { %6149 = vmatpush1.bf16.msra.mxu0 %v8586_v58  ;;  %6477 = vmatpush1.bf16.msra.mxu1 %v8588_v23  ;;  %v8643_v58 = vcombine.high %v804_v50, %v808_v52  ;;  %v8645_v23 = vcombine.high %v805_v16, %v809_v56 }
 0x161   :  { %6150 = vmatprep.subr.bf16.mxu0 %v8595_v60  ;;  %6478 = vmatprep.subr.bf16.mxu1 %v8597_v61  ;;  %v812_v60 = vld [vmem:[#allocation2 + $0x1440] sm:$0xff] }
 0x162   :  { %v816_v61 = vld [vmem:[#allocation2 + $0x1460] sm:$0xff] }
 0x163   :  { %v8650_v18 = vcombine.low %v812_v60, %v816_v61 }
 0x164   :  { %6151 = vmatpush1.bf16.msra.mxu0 %v8594_v4  ;;  %6479 = vmatpush1.bf16.msra.mxu1 %v8596_v5  ;;  %v8642_v4 = vcombine.low %v804_v50, %v808_v52  ;;  %v8644_v5 = vcombine.low %v805_v16, %v809_v56  ;;  %v856_v50 = vld [vmem:[#allocation2 + $0x15a0] sm:$0xff]  ;;  %v853_v52 = vld [vmem:[#allocation2 + $0x1588] sm:$0xff]  ;;  %v8682_v56 = vcombine.low %v844_v40, %v848_v41 }
 0x165   :  { %6152 = vmatprep.subr.bf16.mxu0 %v8603_v6  ;;  %6480 = vmatprep.subr.bf16.mxu1 %v8605_v7  ;;  %v8651_v6 = vcombine.high %v812_v60, %v816_v61  ;;  %v8653_v7 = vcombine.high %v813_v1, %v817_v3  ;;  %v857_v16 = vld [vmem:[#allocation2 + $0x15a8] sm:$0xff]  ;;  %v864_v60 = vld [vmem:[#allocation2 + $0x15e0] sm:$0xff] }
 0x166   :  { %v861_v61 = vld [vmem:[#allocation2 + $0x15c8] sm:$0xff] }
 0x168   :  { %6153 = vmatpush1.bf16.msra.mxu0 %v8602_v33  ;;  %6481 = vmatpush1.bf16.msra.mxu1 %v8604_v15  ;;  %v825_v33 = vld [vmem:[#allocation2 + $0x14a8] sm:$0xff]  ;;  %v8652_v15 = vcombine.low %v813_v1, %v817_v3  ;;  %v8692_v3 = vcombine.low %v853_v52, %v857_v16 }
 0x169   :  { %6154 = vmatprep.subr.bf16.mxu0 %v8611_v17  ;;  %6482 = vmatprep.subr.bf16.mxu1 %v8613_v19  ;;  %v8659_v17 = vcombine.high %v820_v8, %v824_v11  ;;  %v8661_v19 = vcombine.high %v821_v14, %v825_v33 }
 0x16c   :  { %6155 = vmatpush1.bf16.msra.mxu0 %v8610_v24  ;;  %6483 = vmatpush1.bf16.msra.mxu1 %v8612_v26  ;;  %v8658_v24 = vcombine.low %v820_v8, %v824_v11  ;;  %v8660_v26 = vcombine.low %v821_v14, %v825_v33  ;;  %v869_v8 = vld [vmem:[#allocation2 + $0x1608] sm:$0xff]  ;;  %v8700_v33 = vcombine.low %v861_v61, %v865_v62 }
 0x16d   :  { %6156 = vmatprep.subr.bf16.mxu0 %v8619_v27  ;;  %6484 = vmatprep.subr.bf16.mxu1 %v8621_v28  ;;  %v8667_v27 = vcombine.high %v828_v59, %v832_v20  ;;  %v8669_v28 = vcombine.high %v829_v21, %v833_v22  ;;  %v873_v11 = vld [vmem:[#allocation2 + $0x1628] sm:$0xff] }
 0x170   :  { %6157 = vmatpush1.bf16.msra.mxu0 %v8618_v35  ;;  %6485 = vmatpush1.bf16.msra.mxu1 %v8620_v63  ;;  %v8666_v35 = vcombine.low %v828_v59, %v832_v20  ;;  %v8668_v63 = vcombine.low %v829_v21, %v833_v22  ;;  %v877_v59 = vld [vmem:[#allocation2 + $0x1648] sm:$0xff]  ;;  %v8708_v22 = vcombine.low %v869_v8, %v873_v11 }
 0x171   :  { %6158 = vmatprep.subr.bf16.mxu0 %v8627_v37  ;;  %6486 = vmatprep.subr.bf16.mxu1 %v8629_v38  ;;  %v8675_v37 = vcombine.high %v836_v30, %v840_v31  ;;  %v8677_v38 = vcombine.high %v837_v32, %v841_v34  ;;  %v881_v20 = vld [vmem:[#allocation2 + $0x1668] sm:$0xff] }
 0x172   :  { %v885_v30 = vld [vmem:[#allocation2 + $0x1688] sm:$0xff] }
 0x173   :  { %v889_v31 = vld [vmem:[#allocation2 + $0x16a8] sm:$0xff] }
 0x174   :  { %6159 = vmatpush1.bf16.msra.mxu0 %v8626_v46  ;;  %6487 = vmatpush1.bf16.msra.mxu1 %v8628_v47  ;;  %v8676_v46 = vcombine.low %v837_v32, %v841_v34  ;;  %v8683_v47 = vcombine.high %v844_v40, %v848_v41  ;;  %v8716_v34 = vcombine.low %v877_v59, %v881_v20  ;;  %v893_v40 = vld [vmem:[#allocation2 + $0x16c8] sm:$0xff] }
 0x175   :  { %6160 = vmatprep.subr.bf16.mxu0 %v8635_v48  ;;  %6488 = vmatprep.subr.bf16.mxu1 %v8637_v49  ;;  %v8685_v48 = vcombine.high %v845_v55, %v849_v42  ;;  %v852_v49 = vld [vmem:[#allocation2 + $0x1580] sm:$0xff]  ;;  %v897_v41 = vld [vmem:[#allocation2 + $0x16e8] sm:$0xff] }
 0x176   :  { %v8690_v1 = vcombine.low %v852_v49, %v856_v50 }
 0x178   :  { %6161 = vmatpush1.bf16.msra.mxu0 %v8634_v57  ;;  %6489 = vmatpush1.bf16.msra.mxu1 %v8636_v10  ;;  %v8684_v57 = vcombine.low %v845_v55, %v849_v42  ;;  %v8691_v10 = vcombine.high %v852_v49, %v856_v50  ;;  %v8724_v42 = vcombine.low %v885_v30, %v889_v31  ;;  %v901_v49 = vld [vmem:[#allocation2 + $0x1708] sm:$0xff] }
 0x179   :  { %6171 = vmatprep.subr.bf16.mxu0 %v8643_v58  ;;  %6499 = vmatprep.subr.bf16.mxu1 %v8645_v23  ;;  %v8693_v58 = vcombine.high %v853_v52, %v857_v16  ;;  %v860_v23 = vld [vmem:[#allocation2 + $0x15c0] sm:$0xff]  ;;  %v905_v50 = vld [vmem:[#allocation2 + $0x1728] sm:$0xff]  ;;  %v8732_v16 = vcombine.low %v893_v40, %v897_v41 }
 0x17a   :  { %v8698_v14 = vcombine.low %v860_v23, %v864_v60 }
 0x17b   :  { %6163 = vmatmul.mubr.bf16.vlgmr.msra.gmra.mrb[0].mxu0 %v9595_v0  ;;  %6491 = vmatmul.mubr.bf16.vlgmr.msra.gmra.mrb[0].mxu1 %v9595_v0 }
 0x17c   :  { %6172 = vmatpush1.bf16.msra.mxu0 %v8642_v4  ;;  %6500 = vmatpush1.bf16.msra.mxu1 %v8644_v5  ;;  %v8699_v4 = vcombine.high %v860_v23, %v864_v60  ;;  %v8701_v5 = vcombine.high %v861_v61, %v865_v62  ;;  %v909_v23 = vld [vmem:[#allocation2 + $0x1748] sm:$0xff]  ;;  %v8740_v62 = vcombine.low %v901_v49, %v905_v50 }
 0x17d   :  { %6173 = vmatprep.subr.bf16.mxu0 %v8651_v6  ;;  %6501 = vmatprep.subr.bf16.mxu1 %v8653_v7  ;;  %v868_v6 = vld [vmem:[#allocation2 + $0x1600] sm:$0xff]  ;;  %v913_v60 = vld [vmem:[#allocation2 + $0x1768] sm:$0xff] }
 0x17e   :  { %6203 = vmatprep.mubr.bf16.mxu0 %v9597_v13  ;;  %6531 = vmatprep.mubr.bf16.mxu1 %v9597_v13  ;;  %v872_v7 = vld [vmem:[#allocation2 + $0x1620] sm:$0xff] }
 0x17f   :  { %v8706_v21 = vcombine.low %v868_v6, %v872_v7 }
 0x180   :  { %6174 = vmatpush1.bf16.msra.mxu0 %v8650_v18  ;;  %6502 = vmatpush1.bf16.msra.mxu1 %v8652_v15  ;;  %v8707_v18 = vcombine.high %v868_v6, %v872_v7  ;;  %v8709_v15 = vcombine.high %v869_v8, %v873_v11  ;;  %v917_v6 = vld [vmem:[#allocation2 + $0x1788] sm:$0xff]  ;;  %v8748_v11 = vcombine.low %v909_v23, %v913_v60 }
 0x181   :  { %6175 = vmatprep.subr.bf16.mxu0 %v8659_v17  ;;  %6503 = vmatprep.subr.bf16.mxu1 %v8661_v19  ;;  %v876_v17 = vld [vmem:[#allocation2 + $0x1640] sm:$0xff]  ;;  %v921_v7 = vld [vmem:[#allocation2 + $0x17a8] sm:$0xff] }
 0x182   :  { %v880_v19 = vld [vmem:[#allocation2 + $0x1660] sm:$0xff] }
 0x183   :  { %v8714_v32 = vcombine.low %v876_v17, %v880_v19 }
 0x184   :  { %6176 = vmatpush1.bf16.msra.mxu0 %v8658_v24  ;;  %6504 = vmatpush1.bf16.msra.mxu1 %v8660_v26  ;;  %v8715_v24 = vcombine.high %v876_v17, %v880_v19  ;;  %v8717_v26 = vcombine.high %v877_v59, %v881_v20  ;;  %v925_v17 = vld [vmem:[#allocation2 + $0x17c8] sm:$0xff]  ;;  %v9606_v59 = vld [vmem:[%s9908_s0 + $0x18] sm:$0x3f] }
 0x185   :  { %6177 = vmatprep.subr.bf16.mxu0 %v8667_v27  ;;  %6505 = vmatprep.subr.bf16.mxu1 %v8669_v28  ;;  %v884_v27 = vld [vmem:[#allocation2 + $0x1680] sm:$0xff]  ;;  %v929_v19 = vld [vmem:[#allocation2 + $0x17e8] sm:$0xff] }
 0x186   :  { %v888_v28 = vld [vmem:[#allocation2 + $0x16a0] sm:$0xff] }
 0x187   :  { %v8722_v55 = vcombine.low %v884_v27, %v888_v28 }
 0x188   :  { %6178 = vmatpush1.bf16.msra.mxu0 %v8666_v35  ;;  %6506 = vmatpush1.bf16.msra.mxu1 %v8668_v63  ;;  %v8723_v35 = vcombine.high %v884_v27, %v888_v28  ;;  %v8725_v63 = vcombine.high %v885_v30, %v889_v31  ;;  %v936_v27 = vld [vmem:[#allocation2 + $0x1820] sm:$0xff]  ;;  %v9610_v28 = vrot.slane %v9606_v59, %v9493_v53  ;;  %v933_v30 = vld [vmem:[#allocation2 + $0x1808] sm:$0xff] }
 0x189   :  { %6179 = vmatprep.subr.bf16.mxu0 %v8675_v37  ;;  %6507 = vmatprep.subr.bf16.mxu1 %v8677_v38  ;;  %v892_v37 = vld [vmem:[#allocation2 + $0x16c0] sm:$0xff]  ;;  %v937_v31 = vld [vmem:[#allocation2 + $0x1828] sm:$0xff] }
 0x18a   :  { %v896_v38 = vld [vmem:[#allocation2 + $0x16e0] sm:$0xff] }
 0x18b   :  { %v8730_v52 = vcombine.low %v892_v37, %v896_v38 }
 0x18c   :  { %6180 = vmatpush1.bf16.msra.mxu0 %v8674_v45  ;;  %6508 = vmatpush1.bf16.msra.mxu1 %v8676_v46  ;;  %v8731_v45 = vcombine.high %v892_v37, %v896_v38  ;;  %v8733_v46 = vcombine.high %v893_v40, %v897_v41  ;;  %v940_v37 = vld [vmem:[#allocation2 + $0x1840] sm:$0xff]  ;;  %v133_v40 = vcombine.high %v9610_v28, %v9610_v28 }
 0x18d   :  { %6181 = vmatprep.subr.bf16.mxu0 %v8683_v47  ;;  %6509 = vmatprep.subr.bf16.mxu1 %v8685_v48  ;;  %v900_v47 = vld [vmem:[#allocation2 + $0x1700] sm:$0xff]  ;;  %v9616_v41 = vpack.c.bf16 %v9589_v54, %v9589_v54 }
 0x18e   :  { %v904_v48 = vld [vmem:[#allocation2 + $0x1720] sm:$0xff] }
 0x18f   :  { %v8738_v61 = vcombine.low %v900_v47, %v904_v48  ;;  %v944_v38 = vld [vmem:[#allocation2 + $0x1860] sm:$0xff] }
 0x190   :  { %6182 = vmatpush1.bf16.msra.mxu0 %v8682_v56  ;;  %6510 = vmatpush1.bf16.msra.mxu1 %v8684_v57  ;;  %v8739_v56 = vcombine.high %v900_v47, %v904_v48  ;;  %v8741_v57 = vcombine.high %v901_v49, %v905_v50  ;;  %v8779_v47 = vcombine.high %v940_v37, %v944_v38  ;;  %v948_v49 = vld [vmem:[#allocation2 + $0x1880] sm:$0xff] }
 0x191   :  { %6183 = vmatprep.subr.bf16.mxu0 %v8691_v10  ;;  %6511 = vmatprep.subr.bf16.mxu1 %v8693_v58  ;;  %v908_v10 = vld [vmem:[#allocation2 + $0x1740] sm:$0xff]  ;;  %v8778_v54 = vcombine.low %v940_v37, %v944_v38 }
 0x192   :  { %v912_v58 = vld [vmem:[#allocation2 + $0x1760] sm:$0xff] }
 0x193   :  { %v8746_v8 = vcombine.low %v908_v10, %v912_v58  ;;  %v952_v50 = vld [vmem:[#allocation2 + $0x18a0] sm:$0xff] }
 0x194   :  { %6184 = vmatpush1.bf16.msra.mxu0 %v8690_v1  ;;  %6512 = vmatpush1.bf16.msra.mxu1 %v8692_v3  ;;  %v8747_v1 = vcombine.high %v908_v10, %v912_v58  ;;  %v8749_v3 = vcombine.high %v909_v23, %v913_v60  ;;  %v8787_v10 = vcombine.high %v948_v49, %v952_v50  ;;  %v956_v23 = vld [vmem:[#allocation2 + $0x18c0] sm:$0xff] }
 0x195   :  { %6185 = vmatprep.subr.bf16.mxu0 %v8699_v4  ;;  %6513 = vmatprep.subr.bf16.mxu1 %v8701_v5  ;;  %v916_v4 = vld [vmem:[#allocation2 + $0x1780] sm:$0xff] }
 0x196   :  { %v920_v5 = vld [vmem:[#allocation2 + $0x17a0] sm:$0xff] }
 0x197   :  { %v8754_v20 = vcombine.low %v916_v4, %v920_v5  ;;  %v960_v60 = vld [vmem:[#allocation2 + $0x18e0] sm:$0xff] }
 0x198   :  { %6186 = vmatpush1.bf16.msra.mxu0 %v8698_v14  ;;  %6514 = vmatpush1.bf16.msra.mxu1 %v8700_v33  ;;  %v8755_v14 = vcombine.high %v916_v4, %v920_v5  ;;  %v8757_v33 = vcombine.high %v917_v6, %v921_v7  ;;  %v8795_v4 = vcombine.high %v956_v23, %v960_v60 }
 0x199   :  { %6187 = vmatprep.subr.bf16.mxu0 %v8707_v18  ;;  %6515 = vmatprep.subr.bf16.mxu1 %v8709_v15  ;;  %v924_v18 = vld [vmem:[#allocation2 + $0x17c0] sm:$0xff] }
 0x19a   :  { %v928_v15 = vld [vmem:[#allocation2 + $0x17e0] sm:$0xff] }
 0x19c   :  { %6188 = vmatpush1.bf16.msra.mxu0 %v8706_v21  ;;  %6516 = vmatpush1.bf16.msra.mxu1 %v8708_v22  ;;  %v8756_v21 = vcombine.low %v917_v6, %v921_v7  ;;  %v8763_v22 = vcombine.high %v924_v18, %v928_v15  ;;  %v964_v6 = vld [vmem:[#allocation2 + $0x1900] sm:$0xff] }
 0x19d   :  { %6189 = vmatprep.subr.bf16.mxu0 %v8715_v24  ;;  %6517 = vmatprep.subr.bf16.mxu1 %v8717_v26  ;;  %v8765_v24 = vcombine.high %v925_v17, %v929_v19  ;;  %v932_v26 = vld [vmem:[#allocation2 + $0x1800] sm:$0xff] }
 0x19e   :  { %v968_v7 = vld [vmem:[#allocation2 + $0x1920] sm:$0xff] }
 0x1a0   :  { %6190 = vmatpush1.bf16.msra.mxu0 %v8714_v32  ;;  %6518 = vmatpush1.bf16.msra.mxu1 %v8716_v34  ;;  %v8762_v32 = vcombine.low %v924_v18, %v928_v15  ;;  %v8764_v34 = vcombine.low %v925_v17, %v929_v19  ;;  %v8803_v18 = vcombine.high %v964_v6, %v968_v7  ;;  %v972_v17 = vld [vmem:[#allocation2 + $0x1940] sm:$0xff] }
 0x1a1   :  { %6191 = vmatprep.subr.bf16.mxu0 %v8723_v35  ;;  %6519 = vmatprep.subr.bf16.mxu1 %v8725_v63  ;;  %v8771_v35 = vcombine.high %v932_v26, %v936_v27  ;;  %v8773_v63 = vcombine.high %v933_v30, %v937_v31  ;;  %v976_v19 = vld [vmem:[#allocation2 + $0x1960] sm:$0xff] }
 0x1a4   :  { %6192 = vmatpush1.bf16.msra.mxu0 %v8722_v55  ;;  %6520 = vmatpush1.bf16.msra.mxu1 %v8724_v42  ;;  %v941_v55 = vld [vmem:[#allocation2 + $0x1848] sm:$0xff] }
 0x1a5   :  { %6193 = vmatprep.subr.bf16.mxu0 %v8731_v45  ;;  %6521 = vmatprep.subr.bf16.mxu1 %v8733_v46  ;;  %v945_v42 = vld [vmem:[#allocation2 + $0x1868] sm:$0xff]  ;;  %v8770_v45 = vcombine.low %v932_v26, %v936_v27  ;;  %v8772_v46 = vcombine.low %v933_v30, %v937_v31  ;;  %v8811_v26 = vcombine.high %v972_v17, %v976_v19  ;;  %v980_v30 = vld [vmem:[#allocation2 + $0x1980] sm:$0xff] }
 0x1a6   :  { %v8781_v48 = vcombine.high %v941_v55, %v945_v42  ;;  %v984_v31 = vld [vmem:[#allocation2 + $0x19a0] sm:$0xff] }
 0x1a7   :  { %v8819_v37 = vcombine.high %v980_v30, %v984_v31 }
 0x1a8   :  { %6194 = vmatpush1.bf16.msra.mxu0 %v8730_v52  ;;  %6522 = vmatpush1.bf16.msra.mxu1 %v8732_v16  ;;  %v9618_v52 = vpack.c.bf16 %v133_v40, %v133_v40  ;;  %v949_v16 = vld [vmem:[#allocation2 + $0x1888] sm:$0xff]  ;;  %v988_v40 = vld [vmem:[#allocation2 + $0x19c0] sm:$0xff] }
 0x1a9   :  { %6195 = vmatprep.subr.bf16.mxu0 %v8739_v56  ;;  %6523 = vmatprep.subr.bf16.mxu1 %v8741_v57  ;;  %v953_v56 = vld [vmem:[#allocation2 + $0x18a8] sm:$0xff]  ;;  %v8780_v57 = vcombine.low %v941_v55, %v945_v42  ;;  %v992_v55 = vld [vmem:[#allocation2 + $0x19e0] sm:$0xff] }
 0x1aa   :  { %v8789_v58 = vcombine.high %v949_v16, %v953_v56  ;;  %v989_v42 = vld [vmem:[#allocation2 + $0x19c8] sm:$0xff] }
 0x1ac   :  { %6196 = vmatpush1.bf16.msra.mxu0 %v8738_v61  ;;  %6524 = vmatpush1.bf16.msra.mxu1 %v8740_v62  ;;  %v957_v61 = vld [vmem:[#allocation2 + $0x18c8] sm:$0xff] }
 0x1ad   :  { %6197 = vmatprep.subr.bf16.mxu0 %v8747_v1  ;;  %6525 = vmatprep.subr.bf16.mxu1 %v8749_v3  ;;  %v961_v62 = vld [vmem:[#allocation2 + $0x18e8] sm:$0xff]  ;;  %v8786_v1 = vcombine.low %v948_v49, %v952_v50  ;;  %v8788_v3 = vcombine.low %v949_v16, %v953_v56  ;;  %v996_v50 = vld [vmem:[#allocation2 + $0x1a00] sm:$0xff] }
 0x1ae   :  { %v8797_v5 = vcombine.high %v957_v61, %v961_v62  ;;  %v1000_v16 = vld [vmem:[#allocation2 + $0x1a20] sm:$0xff]  ;;  %v997_v56 = vld [vmem:[#allocation2 + $0x1a08] sm:$0xff] }
 0x1b0   :  { %6198 = vmatpush1.bf16.msra.mxu0 %v8746_v8  ;;  %6526 = vmatpush1.bf16.msra.mxu1 %v8748_v11  ;;  %v965_v8 = vld [vmem:[#allocation2 + $0x1908] sm:$0xff] }
 0x1b1   :  { %6199 = vmatprep.subr.bf16.mxu0 %v8755_v14  ;;  %6527 = vmatprep.subr.bf16.mxu1 %v8757_v33  ;;  %v969_v11 = vld [vmem:[#allocation2 + $0x1928] sm:$0xff]  ;;  %v8794_v14 = vcombine.low %v956_v23, %v960_v60  ;;  %v8796_v33 = vcombine.low %v957_v61, %v961_v62  ;;  %v1004_v60 = vld [vmem:[#allocation2 + $0x1a40] sm:$0xff] }
 0x1b2   :  { %v8805_v15 = vcombine.high %v965_v8, %v969_v11  ;;  %v1008_v61 = vld [vmem:[#allocation2 + $0x1a60] sm:$0xff]  ;;  %v1005_v62 = vld [vmem:[#allocation2 + $0x1a48] sm:$0xff] }
 0x1b4   :  { %6200 = vmatpush1.bf16.msra.mxu0 %v8754_v20  ;;  %6528 = vmatpush1.bf16.msra.mxu1 %v8756_v21  ;;  %v973_v20 = vld [vmem:[#allocation2 + $0x1948] sm:$0xff] }
 0x1b5   :  { %6201 = vmatprep.subr.bf16.mxu0 %v8763_v22  ;;  %6529 = vmatprep.subr.bf16.mxu1 %v8765_v24  ;;  %v977_v21 = vld [vmem:[#allocation2 + $0x1968] sm:$0xff]  ;;  %v8802_v22 = vcombine.low %v964_v6, %v968_v7  ;;  %v8804_v24 = vcombine.low %v965_v8, %v969_v11  ;;  %v1012_v7 = vld [vmem:[#allocation2 + $0x1a80] sm:$0xff] }
 0x1b6   :  { %v8813_v27 = vcombine.high %v973_v20, %v977_v21  ;;  %v1016_v8 = vld [vmem:[#allocation2 + $0x1aa0] sm:$0xff]  ;;  %v1013_v11 = vld [vmem:[#allocation2 + $0x1a88] sm:$0xff] }
 0x1b8   :  { %6202 = vmatpush1.bf16.msra.mxu0 %v8762_v32  ;;  %6530 = vmatpush1.bf16.msra.mxu1 %v8764_v34  ;;  %v981_v32 = vld [vmem:[#allocation2 + $0x1988] sm:$0xff] }
 0x1b9   :  { %6212 = vmatprep.subr.bf16.mxu0 %v8771_v35  ;;  %6540 = vmatprep.subr.bf16.mxu1 %v8773_v63  ;;  %v985_v34 = vld [vmem:[#allocation2 + $0x19a8] sm:$0xff]  ;;  %v8810_v35 = vcombine.low %v972_v17, %v976_v19  ;;  %v8812_v63 = vcombine.low %v973_v20, %v977_v21  ;;  %v1020_v19 = vld [vmem:[#allocation2 + $0x1ac0] sm:$0xff] }
 0x1ba   :  { %v8821_v38 = vcombine.high %v981_v32, %v985_v34  ;;  %v1024_v20 = vld [vmem:[#allocation2 + $0x1ae0] sm:$0xff]  ;;  %v1021_v21 = vld [vmem:[#allocation2 + $0x1ac8] sm:$0xff] }
 0x1bb   :  { %6204 = vmatmul.mubr.bf16.vlgmr.msra.gmra.mrb[0].mxu0 %v9616_v41  ;;  %6532 = vmatmul.mubr.bf16.vlgmr.msra.gmra.mrb[0].mxu1 %v9616_v41 }
 0x1bc   :  { %6213 = vmatpush1.bf16.msra.mxu0 %v8770_v45  ;;  %6541 = vmatpush1.bf16.msra.mxu1 %v8772_v46  ;;  %v993_v45 = vld [vmem:[#allocation2 + $0x19e8] sm:$0xff]  ;;  %v8818_v46 = vcombine.low %v980_v30, %v984_v31  ;;  %v1028_v31 = vld [vmem:[#allocation2 + $0x1b00] sm:$0xff] }
 0x1bd   :  { %6214 = vmatprep.subr.bf16.mxu0 %v8779_v47  ;;  %6542 = vmatprep.subr.bf16.mxu1 %v8781_v48  ;;  %v8820_v47 = vcombine.low %v981_v32, %v985_v34  ;;  %v8827_v48 = vcombine.high %v988_v40, %v992_v55  ;;  %v8829_v49 = vcombine.high %v989_v42, %v993_v45  ;;  %v1032_v32 = vld [vmem:[#allocation2 + $0x1b20] sm:$0xff]  ;;  %v1029_v34 = vld [vmem:[#allocation2 + $0x1b08] sm:$0xff] }
 0x1be   :  { %6244 = vmatprep.mubr.bf16.mxu0 %v9618_v52  ;;  %6572 = vmatprep.mubr.bf16.mxu1 %v9618_v52 }
 0x1c0   :  { %6215 = vmatpush1.bf16.msra.mxu0 %v8778_v54  ;;  %6543 = vmatpush1.bf16.msra.mxu1 %v8780_v57  ;;  %v1001_v54 = vld [vmem:[#allocation2 + $0x1a28] sm:$0xff]  ;;  %v8826_v57 = vcombine.low %v988_v40, %v992_v55  ;;  %v1036_v55 = vld [vmem:[#allocation2 + $0x1b40] sm:$0xff] }
 0x1c1   :  { %6216 = vmatprep.subr.bf16.mxu0 %v8787_v10  ;;  %6544 = vmatprep.subr.bf16.mxu1 %v8789_v58  ;;  %v8828_v10 = vcombine.low %v989_v42, %v993_v45  ;;  %v8835_v58 = vcombine.high %v996_v50, %v1000_v16  ;;  %v8837_v23 = vcombine.high %v997_v56, %v1001_v54  ;;  %v1040_v42 = vld [vmem:[#allocation2 + $0x1b60] sm:$0xff]  ;;  %v1037_v45 = vld [vmem:[#allocation2 + $0x1b48] sm:$0xff] }
 0x1c4   :  { %6217 = vmatpush1.bf16.msra.mxu0 %v8786_v1  ;;  %6545 = vmatpush1.bf16.msra.mxu1 %v8788_v3  ;;  %v1009_v1 = vld [vmem:[#allocation2 + $0x1a68] sm:$0xff]  ;;  %v8834_v3 = vcombine.low %v996_v50, %v1000_v16  ;;  %v1044_v16 = vld [vmem:[#allocation2 + $0x1b80] sm:$0xff] }
 0x1c5   :  { %6218 = vmatprep.subr.bf16.mxu0 %v8795_v4  ;;  %6546 = vmatprep.subr.bf16.mxu1 %v8797_v5  ;;  %v8836_v4 = vcombine.low %v997_v56, %v1001_v54  ;;  %v8843_v5 = vcombine.high %v1004_v60, %v1008_v61  ;;  %v8845_v6 = vcombine.high %v1005_v62, %v1009_v1  ;;  %v1048_v56 = vld [vmem:[#allocation2 + $0x1ba0] sm:$0xff]  ;;  %v1045_v54 = vld [vmem:[#allocation2 + $0x1b88] sm:$0xff] }
 0x1c8   :  { %6219 = vmatpush1.bf16.msra.mxu0 %v8794_v14  ;;  %6547 = vmatpush1.bf16.msra.mxu1 %v8796_v33  ;;  %v1017_v14 = vld [vmem:[#allocation2 + $0x1aa8] sm:$0xff]  ;;  %v8842_v33 = vcombine.low %v1004_v60, %v1008_v61  ;;  %v1052_v61 = vld [vmem:[#allocation2 + $0x1bc0] sm:$0xff] }
 0x1c9   :  { %6220 = vmatprep.subr.bf16.mxu0 %v8803_v18  ;;  %6548 = vmatprep.subr.bf16.mxu1 %v8805_v15  ;;  %v8844_v18 = vcombine.low %v1005_v62, %v1009_v1  ;;  %v8851_v15 = vcombine.high %v1012_v7, %v1016_v8  ;;  %v8853_v17 = vcombine.high %v1013_v11, %v1017_v14  ;;  %v1056_v62 = vld [vmem:[#allocation2 + $0x1be0] sm:$0xff]  ;;  %v1053_v1 = vld [vmem:[#allocation2 + $0x1bc8] sm:$0xff] }
 0x1cc   :  { %6221 = vmatpush1.bf16.msra.mxu0 %v8802_v22  ;;  %6549 = vmatpush1.bf16.msra.mxu1 %v8804_v24  ;;  %v1025_v22 = vld [vmem:[#allocation2 + $0x1ae8] sm:$0xff]  ;;  %v8850_v24 = vcombine.low %v1012_v7, %v1016_v8  ;;  %v1060_v8 = vld [vmem:[#allocation2 + $0x1c00] sm:$0xff] }
 0x1cd   :  { %6222 = vmatprep.subr.bf16.mxu0 %v8811_v26  ;;  %6550 = vmatprep.subr.bf16.mxu1 %v8813_v27  ;;  %v8852_v26 = vcombine.low %v1013_v11, %v1017_v14  ;;  %v8859_v27 = vcombine.high %v1020_v19, %v1024_v20  ;;  %v8861_v30 = vcombine.high %v1021_v21, %v1025_v22  ;;  %v1064_v11 = vld [vmem:[#allocation2 + $0x1c20] sm:$0xff]  ;;  %v1061_v14 = vld [vmem:[#allocation2 + $0x1c08] sm:$0xff] }
 0x1d0   :  { %6223 = vmatpush1.bf16.msra.mxu0 %v8810_v35  ;;  %6551 = vmatpush1.bf16.msra.mxu1 %v8812_v63  ;;  %v1033_v35 = vld [vmem:[#allocation2 + $0x1b28] sm:$0xff]  ;;  %v8858_v63 = vcombine.low %v1020_v19, %v1024_v20  ;;  %v1068_v20 = vld [vmem:[#allocation2 + $0x1c40] sm:$0xff] }
 0x1d1   :  { %6224 = vmatprep.subr.bf16.mxu0 %v8819_v37  ;;  %6552 = vmatprep.subr.bf16.mxu1 %v8821_v38  ;;  %v8860_v37 = vcombine.low %v1021_v21, %v1025_v22  ;;  %v8867_v38 = vcombine.high %v1028_v31, %v1032_v32  ;;  %v8869_v40 = vcombine.high %v1029_v34, %v1033_v35  ;;  %v1072_v21 = vld [vmem:[#allocation2 + $0x1c60] sm:$0xff] }
 0x1d2   :  { %v9626_v22 = vpack.c.bf16 %v9610_v28, %v9610_v28  ;;  %v8906_v28 = vcombine.low %v1068_v20, %v1072_v21 }
 0x1d4   :  { %6225 = vmatpush1.bf16.msra.mxu0 %v8818_v46  ;;  %6553 = vmatpush1.bf16.msra.mxu1 %v8820_v47  ;;  %v1041_v46 = vld [vmem:[#allocation2 + $0x1b68] sm:$0xff]  ;;  %v8866_v47 = vcombine.low %v1028_v31, %v1032_v32  ;;  %v8907_v31 = vcombine.high %v1068_v20, %v1072_v21 }
 0x1d5   :  { %6226 = vmatprep.subr.bf16.mxu0 %v8827_v48  ;;  %6554 = vmatprep.subr.bf16.mxu1 %v8829_v49  ;;  %v8868_v48 = vcombine.low %v1029_v34, %v1033_v35  ;;  %v8875_v49 = vcombine.high %v1036_v55, %v1040_v42  ;;  %v8877_v50 = vcombine.high %v1037_v45, %v1041_v46  ;;  %v1076_v34 = vld [vmem:[#allocation2 + $0x1c80] sm:$0xff] }
 0x1d6   :  { %v1080_v35 = vld [vmem:[#allocation2 + $0x1ca0] sm:$0xff] }
 0x1d8   :  { %6227 = vmatpush1.bf16.msra.mxu0 %v8826_v57  ;;  %6555 = vmatpush1.bf16.msra.mxu1 %v8828_v10  ;;  %v1049_v57 = vld [vmem:[#allocation2 + $0x1ba8] sm:$0xff]  ;;  %v8874_v10 = vcombine.low %v1036_v55, %v1040_v42  ;;  %v1084_v42 = vld [vmem:[#allocation2 + $0x1cc0] sm:$0xff] }
 0x1d9   :  { %6228 = vmatprep.subr.bf16.mxu0 %v8835_v58  ;;  %6556 = vmatprep.subr.bf16.mxu1 %v8837_v23  ;;  %v8876_v58 = vcombine.low %v1037_v45, %v1041_v46  ;;  %v8883_v23 = vcombine.high %v1044_v16, %v1048_v56  ;;  %v8885_v60 = vcombine.high %v1045_v54, %v1049_v57  ;;  %v1088_v45 = vld [vmem:[#allocation2 + $0x1ce0] sm:$0xff]  ;;  %v9415_v46 = vmov 0  }
 0x1dc   :  { %6229 = vmatpush1.bf16.msra.mxu0 %v8834_v3  ;;  %6557 = vmatpush1.bf16.msra.mxu1 %v8836_v4  ;;  %v1057_v3 = vld [vmem:[#allocation2 + $0x1be8] sm:$0xff]  ;;  %v8882_v4 = vcombine.low %v1044_v16, %v1048_v56  ;;  %v8923_v16 = vcombine.high %v1084_v42, %v1088_v45 }
 0x1dd   :  { %6230 = vmatprep.subr.bf16.mxu0 %v8843_v5  ;;  %6558 = vmatprep.subr.bf16.mxu1 %v8845_v6  ;;  %v8884_v5 = vcombine.low %v1045_v54, %v1049_v57  ;;  %v8891_v6 = vcombine.high %v1052_v61, %v1056_v62  ;;  %v8893_v7 = vcombine.high %v1053_v1, %v1057_v3  ;;  %v1092_v54 = vld [vmem:[#allocation2 + $0x1d00] sm:$0xff] }
 0x1de   :  { %v1096_v57 = vld [vmem:[#allocation2 + $0x1d20] sm:$0xff] }
 0x1e0   :  { %6231 = vmatpush1.bf16.msra.mxu0 %v8842_v33  ;;  %6559 = vmatpush1.bf16.msra.mxu1 %v8844_v18  ;;  %v1065_v33 = vld [vmem:[#allocation2 + $0x1c28] sm:$0xff]  ;;  %v8890_v18 = vcombine.low %v1052_v61, %v1056_v62  ;;  %v8931_v61 = vcombine.high %v1092_v54, %v1096_v57 }
 0x1e1   :  { %6232 = vmatprep.subr.bf16.mxu0 %v8851_v15  ;;  %6560 = vmatprep.subr.bf16.mxu1 %v8853_v17  ;;  %v8892_v15 = vcombine.low %v1053_v1, %v1057_v3  ;;  %v8899_v17 = vcombine.high %v1060_v8, %v1064_v11  ;;  %v8901_v19 = vcombine.high %v1061_v14, %v1065_v33  ;;  %v1100_v1 = vld [vmem:[#allocation2 + $0x1d40] sm:$0xff] }
 0x1e2   :  { %v1104_v3 = vld [vmem:[#allocation2 + $0x1d60] sm:$0xff] }
 0x1e4   :  { %6233 = vmatpush1.bf16.msra.mxu0 %v8850_v24  ;;  %6561 = vmatpush1.bf16.msra.mxu1 %v8852_v26  ;;  %v1069_v24 = vld [vmem:[#allocation2 + $0x1c48] sm:$0xff] }
 0x1e5   :  { %6234 = vmatprep.subr.bf16.mxu0 %v8859_v27  ;;  %6562 = vmatprep.subr.bf16.mxu1 %v8861_v30  ;;  %v1073_v26 = vld [vmem:[#allocation2 + $0x1c68] sm:$0xff]  ;;  %v8898_v27 = vcombine.low %v1060_v8, %v1064_v11  ;;  %v8900_v30 = vcombine.low %v1061_v14, %v1065_v33  ;;  %v8939_v8 = vcombine.high %v1100_v1, %v1104_v3  ;;  %v1108_v14 = vld [vmem:[#allocation2 + $0x1d80] sm:$0xff] }
 0x1e6   :  { %v8909_v32 = vcombine.high %v1069_v24, %v1073_v26  ;;  %v1112_v33 = vld [vmem:[#allocation2 + $0x1da0] sm:$0xff] }
 0x1e7   :  { %v8947_v20 = vcombine.high %v1108_v14, %v1112_v33 }
 0x1e8   :  { %6235 = vmatpush1.bf16.msra.mxu0 %v8858_v63  ;;  %6563 = vmatpush1.bf16.msra.mxu1 %v8860_v37  ;;  %v1077_v63 = vld [vmem:[#allocation2 + $0x1c88] sm:$0xff] }
 0x1e9   :  { %6236 = vmatprep.subr.bf16.mxu0 %v8867_v38  ;;  %6564 = vmatprep.subr.bf16.mxu1 %v8869_v40  ;;  %v1081_v37 = vld [vmem:[#allocation2 + $0x1ca8] sm:$0xff]  ;;  %v8908_v38 = vcombine.low %v1069_v24, %v1073_v26  ;;  %v8915_v40 = vcombine.high %v1076_v34, %v1080_v35  ;;  %v1116_v24 = vld [vmem:[#allocation2 + $0x1dc0] sm:$0xff] }
 0x1ea   :  { %v8917_v55 = vcombine.high %v1077_v63, %v1081_v37  ;;  %v1120_v26 = vld [vmem:[#allocation2 + $0x1de0] sm:$0xff] }
 0x1ec   :  { %6237 = vmatpush1.bf16.msra.mxu0 %v8866_v47  ;;  %6565 = vmatpush1.bf16.msra.mxu1 %v8868_v48  ;;  %v1085_v47 = vld [vmem:[#allocation2 + $0x1cc8] sm:$0xff] }
 0x1ed   :  { %6238 = vmatprep.subr.bf16.mxu0 %v8875_v49  ;;  %6566 = vmatprep.subr.bf16.mxu1 %v8877_v50  ;;  %v1089_v48 = vld [vmem:[#allocation2 + $0x1ce8] sm:$0xff]  ;;  %v8914_v49 = vcombine.low %v1076_v34, %v1080_v35  ;;  %v8916_v50 = vcombine.low %v1077_v63, %v1081_v37  ;;  %v8955_v35 = vcombine.high %v1116_v24, %v1120_v26  ;;  %v166_v37 = vld [vmem:[#allocation2 + $0x10] sm:$0xff] }
 0x1ee   :  { %v8925_v56 = vcombine.high %v1085_v47, %v1089_v48 }
 0x1f0   :  { %6239 = vmatpush1.bf16.msra.mxu0 %v8874_v10  ;;  %6567 = vmatpush1.bf16.msra.mxu1 %v8876_v58  ;;  %v1093_v10 = vld [vmem:[#allocation2 + $0x1d08] sm:$0xff] }
 0x1f1   :  { %6240 = vmatprep.subr.bf16.mxu0 %v8883_v23  ;;  %6568 = vmatprep.subr.bf16.mxu1 %v8885_v60  ;;  %v1097_v58 = vld [vmem:[#allocation2 + $0x1d28] sm:$0xff]  ;;  %v8922_v23 = vcombine.low %v1084_v42, %v1088_v45  ;;  %v8924_v60 = vcombine.low %v1085_v47, %v1089_v48  ;;  %v8954_v42 = vcombine.low %v1116_v24, %v1120_v26  ;;  %v174_v48 = vld [vmem:[#allocation2 + $0x50] sm:$0xff] }
 0x1f2   :  { %v8933_v62 = vcombine.high %v1093_v10, %v1097_v58 }
 0x1f4   :  { %6241 = vmatpush1.bf16.msra.mxu0 %v8882_v4  ;;  %6569 = vmatpush1.bf16.msra.mxu1 %v8884_v5  ;;  %v1101_v4 = vld [vmem:[#allocation2 + $0x1d48] sm:$0xff] }
 0x1f5   :  { %6242 = vmatprep.subr.bf16.mxu0 %v8891_v6  ;;  %6570 = vmatprep.subr.bf16.mxu1 %v8893_v7  ;;  %v1105_v5 = vld [vmem:[#allocation2 + $0x1d68] sm:$0xff]  ;;  %v8930_v6 = vcombine.low %v1092_v54, %v1096_v57  ;;  %v8932_v7 = vcombine.low %v1093_v10, %v1097_v58  ;;  %v182_v58 = vld [vmem:[#allocation2 + $0x90] sm:$0xff] }
 0x1f6   :  { %v8941_v11 = vcombine.high %v1101_v4, %v1105_v5 }
 0x1f8   :  { %6243 = vmatpush1.bf16.msra.mxu0 %v8890_v18  ;;  %6571 = vmatpush1.bf16.msra.mxu1 %v8892_v15  ;;  %v1109_v18 = vld [vmem:[#allocation2 + $0x1d88] sm:$0xff] }
 0x1f9   :  { %6253 = vmatprep.subr.bf16.mxu0 %v8899_v17  ;;  %6581 = vmatprep.subr.bf16.mxu1 %v8901_v19  ;;  %v1113_v15 = vld [vmem:[#allocation2 + $0x1da8] sm:$0xff]  ;;  %v8938_v17 = vcombine.low %v1100_v1, %v1104_v3  ;;  %v8940_v19 = vcombine.low %v1101_v4, %v1105_v5  ;;  %v190_v5 = vld [vmem:[#allocation2 + $0xd0] sm:$0xff] }
 0x1fa   :  { %v8949_v21 = vcombine.high %v1109_v18, %v1113_v15  ;;  %v8948_v34 = vcombine.low %v1109_v18, %v1113_v15  ;;  %v198_v15 = vld [vmem:[#allocation2 + $0x110] sm:$0xff] }
 0x1fb   :  { %6245 = vmatmul.mubr.bf16.vlgmr.msra.gmra.mrb[0].mxu0 %v9626_v22  ;;  %6573 = vmatmul.mubr.bf16.vlgmr.msra.gmra.mrb[0].mxu1 %v9626_v22 }
 0x1fc   :  { %6254 = vmatpush1.bf16.msra.mxu0 %v8898_v27  ;;  %6582 = vmatpush1.bf16.msra.mxu1 %v8900_v30  ;;  %v1117_v27 = vld [vmem:[#allocation2 + $0x1dc8] sm:$0xff] }
 0x1fd   :  { %6255 = vmatprep.subr.bf16.mxu0 %v8907_v31  ;;  %6583 = vmatprep.subr.bf16.mxu1 %v8909_v32  ;;  %v1121_v30 = vld [vmem:[#allocation2 + $0x1de8] sm:$0xff]  ;;  %v118_v31 = vcombine.high %v9606_v59, %v9606_v59  ;;  %v8946_v32 = vcombine.low %v1108_v14, %v1112_v33 }
 0x1fe   :  { %6285 = vmatprep.mubr.bf16.mxu0 %v9415_v46  ;;  %6613 = vmatprep.mubr.bf16.mxu1 %v9415_v46  ;;  %v8957_v63 = vcombine.high %v1117_v27, %v1121_v30  ;;  %v8956_v45 = vcombine.low %v1117_v27, %v1121_v30  ;;  %v206_v27 = vld [vmem:[#allocation2 + $0x150] sm:$0xff] }
 0x1ff   :  { %v210_v30 = vld [vmem:[#allocation2 + $0x170] sm:$0xff] }
 0x200   :  { %6256 = vmatpush1.bf16.msra.mxu0 %v8906_v28  ;;  %6584 = vmatpush1.bf16.msra.mxu1 %v8908_v38  ;;  %v170_v28 = vld [vmem:[#allocation2 + $0x30] sm:$0xff]  ;;  %v132_v38 = vrot.slane %v118_v31, %v9493_v53  ;;  %v207_v31 = vld [vmem:[#allocation2 + $0x158] sm:$0xff] }
 0x201   :  { %6257 = vmatprep.subr.bf16.mxu0 %v8915_v40  ;;  %6585 = vmatprep.subr.bf16.mxu1 %v8917_v55  ;;  %v167_v40 = vld [vmem:[#allocation2 + $0x18] sm:$0xff]  ;;  %v8007_v59 = vcombine.high %v166_v37, %v170_v28  ;;  %v8006_v54 = vcombine.low %v166_v37, %v170_v28  ;;  %v214_v28 = vld [vmem:[#allocation2 + $0x190] sm:$0xff] }
 0x202   :  { %v171_v55 = vld [vmem:[#allocation2 + $0x38] sm:$0xff] }
 0x203   :  { %v8009_v47 = vcombine.high %v167_v40, %v171_v55  ;;  %v8008_v53 = vcombine.low %v167_v40, %v171_v55  ;;  %v215_v40 = vld [vmem:[#allocation2 + $0x198] sm:$0xff] }
 0x204   :  { %6258 = vmatpush1.bf16.msra.mxu0 %v8914_v49  ;;  %6586 = vmatpush1.bf16.msra.mxu1 %v8916_v50  ;;  %v178_v49 = vld [vmem:[#allocation2 + $0x70] sm:$0xff]  ;;  %v9635_v50 = vpack.c.bf16 %v132_v38, %v132_v38  ;;  %v219_v55 = vld [vmem:[#allocation2 + $0x1b8] sm:$0xff] }
 0x205   :  { %6259 = vmatprep.subr.bf16.mxu0 %v8923_v16  ;;  %6587 = vmatprep.subr.bf16.mxu1 %v8925_v56  ;;  %v175_v16 = vld [vmem:[#allocation2 + $0x58] sm:$0xff]  ;;  %v8015_v57 = vcombine.high %v174_v48, %v178_v49  ;;  %v218_v38 = vld [vmem:[#allocation2 + $0x1b0] sm:$0xff] }
 0x206   :  { %v179_v56 = vld [vmem:[#allocation2 + $0x78] sm:$0xff] }
 0x207   :  { %v8017_v10 = vcombine.high %v175_v16, %v179_v56  ;;  %v8016_v1 = vcombine.low %v175_v16, %v179_v56  ;;  %v223_v16 = vld [vmem:[#allocation2 + $0x1d8] sm:$0xff] }
 0x208   :  { %6260 = vmatpush1.bf16.msra.mxu0 %v8922_v23  ;;  %6588 = vmatpush1.bf16.msra.mxu1 %v8924_v60  ;;  %v186_v23 = vld [vmem:[#allocation2 + $0xb0] sm:$0xff]  ;;  %v183_v60 = vld [vmem:[#allocation2 + $0x98] sm:$0xff] }
 0x209   :  { %6261 = vmatprep.subr.bf16.mxu0 %v8931_v61  ;;  %6589 = vmatprep.subr.bf16.mxu1 %v8933_v62  ;;  %v187_v61 = vld [vmem:[#allocation2 + $0xb8] sm:$0xff]  ;;  %v8014_v62 = vcombine.low %v174_v48, %v178_v49  ;;  %v8023_v3 = vcombine.high %v182_v58, %v186_v23  ;;  %v222_v48 = vld [vmem:[#allocation2 + $0x1d0] sm:$0xff] }
 0x20a   :  { %v8025_v4 = vcombine.high %v183_v60, %v187_v61  ;;  %v8024_v14 = vcombine.low %v183_v60, %v187_v61  ;;  %v226_v49 = vld [vmem:[#allocation2 + $0x1f0] sm:$0xff]  ;;  %v227_v56 = vld [vmem:[#allocation2 + $0x1f8] sm:$0xff] }
 0x20b   :  { %v231_v60 = vld [vmem:[#allocation2 + $0x218] sm:$0xff] }
 0x20c   :  { %6262 = vmatpush1.bf16.msra.mxu0 %v8930_v6  ;;  %6590 = vmatpush1.bf16.msra.mxu1 %v8932_v7  ;;  %v194_v6 = vld [vmem:[#allocation2 + $0xf0] sm:$0xff]  ;;  %v191_v7 = vld [vmem:[#allocation2 + $0xd8] sm:$0xff] }
 0x20d   :  { %6263 = vmatprep.subr.bf16.mxu0 %v8939_v8  ;;  %6591 = vmatprep.subr.bf16.mxu1 %v8941_v11  ;;  %v195_v8 = vld [vmem:[#allocation2 + $0xf8] sm:$0xff]  ;;  %v8022_v11 = vcombine.low %v182_v58, %v186_v23  ;;  %v8031_v33 = vcombine.high %v190_v5, %v194_v6  ;;  %v230_v58 = vld [vmem:[#allocation2 + $0x210] sm:$0xff] }
 0x20e   :  { %v8033_v18 = vcombine.high %v191_v7, %v195_v8  ;;  %v8032_v24 = vcombine.low %v191_v7, %v195_v8  ;;  %v234_v23 = vld [vmem:[#allocation2 + $0x230] sm:$0xff]  ;;  %v235_v61 = vld [vmem:[#allocation2 + $0x238] sm:$0xff] }
 0x20f   :  { %v239_v7 = vld [vmem:[#allocation2 + $0x258] sm:$0xff] }
 0x210   :  { %6264 = vmatpush1.bf16.msra.mxu0 %v8938_v17  ;;  %6592 = vmatpush1.bf16.msra.mxu1 %v8940_v19  ;;  %v202_v17 = vld [vmem:[#allocation2 + $0x130] sm:$0xff]  ;;  %v199_v19 = vld [vmem:[#allocation2 + $0x118] sm:$0xff] }
 0x211   :  { %6265 = vmatprep.subr.bf16.mxu0 %v8947_v20  ;;  %6593 = vmatprep.subr.bf16.mxu1 %v8949_v21  ;;  %v203_v20 = vld [vmem:[#allocation2 + $0x138] sm:$0xff]  ;;  %v8030_v21 = vcombine.low %v190_v5, %v194_v6  ;;  %v8039_v26 = vcombine.high %v198_v15, %v202_v17  ;;  %v238_v5 = vld [vmem:[#allocation2 + $0x250] sm:$0xff] }
 0x212   :  { %v242_v6 = vld [vmem:[#allocation2 + $0x270] sm:$0xff]  ;;  %v243_v8 = vld [vmem:[#allocation2 + $0x278] sm:$0xff] }
 0x214   :  { %6266 = vmatpush1.bf16.msra.mxu0 %v8946_v32  ;;  %6594 = vmatpush1.bf16.msra.mxu1 %v8948_v34  ;;  %v211_v32 = vld [vmem:[#allocation2 + $0x178] sm:$0xff]  ;;  %v8038_v34 = vcombine.low %v198_v15, %v202_v17  ;;  %v246_v15 = vld [vmem:[#allocation2 + $0x290] sm:$0xff] }
 0x215   :  { %6267 = vmatprep.subr.bf16.mxu0 %v8955_v35  ;;  %6595 = vmatprep.subr.bf16.mxu1 %v8957_v63  ;;  %v8040_v35 = vcombine.low %v199_v19, %v203_v20  ;;  %v8047_v63 = vcombine.high %v206_v27, %v210_v30  ;;  %v8049_v37 = vcombine.high %v207_v31, %v211_v32  ;;  %v250_v17 = vld [vmem:[#allocation2 + $0x2b0] sm:$0xff] }
 0x218   :  { %6268 = vmatpush1.bf16.msra.mxu0 %v8954_v42  ;;  %6596 = vmatpush1.bf16.msra.mxu1 %v8956_v45  ;;  %v8046_v42 = vcombine.low %v206_v27, %v210_v30  ;;  %v8048_v45 = vcombine.low %v207_v31, %v211_v32  ;;  %v254_v27 = vld [vmem:[#allocation2 + $0x2d0] sm:$0xff]  ;;  %v255_v31 = vld [vmem:[#allocation2 + $0x2d8] sm:$0xff] }
 0x219   :  { %6622 = vmatprep.subr.bf16.mxu0 %v8007_v59  ;;  %6950 = vmatprep.subr.bf16.mxu1 %v8009_v47  ;;  %v8055_v59 = vcombine.high %v214_v28, %v218_v38  ;;  %v8057_v47 = vcombine.high %v215_v40, %v219_v55  ;;  %v258_v30 = vld [vmem:[#allocation2 + $0x2f0] sm:$0xff]  ;;  %v259_v32 = vld [vmem:[#allocation2 + $0x2f8] sm:$0xff] }
 0x21b   :  { %6286 = vmatmul.mubr.bf16.vlgmr.msra.gmra.mrb[0].mxu0 %v9635_v50  ;;  %6614 = vmatmul.mubr.bf16.vlgmr.msra.gmra.mrb[0].mxu1 %v9635_v50 }
 0x21c   :  { %6623 = vmatpush1.bf16.msra.mxu0 %v8006_v54  ;;  %6951 = vmatpush1.bf16.msra.mxu1 %v8008_v53  ;;  %v8054_v54 = vcombine.low %v214_v28, %v218_v38  ;;  %v8056_v53 = vcombine.low %v215_v40, %v219_v55  ;;  %v262_v28 = vld [vmem:[#allocation2 + $0x310] sm:$0xff]  ;;  %v263_v40 = vld [vmem:[#allocation2 + $0x318] sm:$0xff] }
 0x21d   :  { %6624 = vmatprep.subr.bf16.mxu0 %v8015_v57  ;;  %6952 = vmatprep.subr.bf16.mxu1 %v8017_v10  ;;  %v8063_v57 = vcombine.high %v222_v48, %v226_v49  ;;  %v8065_v10 = vcombine.high %v223_v16, %v227_v56  ;;  %v266_v38 = vld [vmem:[#allocation2 + $0x330] sm:$0xff]  ;;  %v267_v55 = vld [vmem:[#allocation2 + $0x338] sm:$0xff] }
 0x21e   :  { %6654 = vmatprep.mubr.bf16.mxu0 %v9506_v9  ;;  %6982 = vmatprep.mubr.bf16.mxu1 %v9506_v9  ;;  %v8041_v9 = vcombine.high %v199_v19, %v203_v20  ;;  %v247_v19 = vld [vmem:[#allocation2 + $0x298] sm:$0xff] }
 0x21f   :  { %v251_v20 = vld [vmem:[#allocation2 + $0x2b8] sm:$0xff] }
 0x220   :  { %6625 = vmatpush1.bf16.msra.mxu0 %v8014_v62  ;;  %6953 = vmatpush1.bf16.msra.mxu1 %v8016_v1  ;;  %v8062_v62 = vcombine.low %v222_v48, %v226_v49  ;;  %v8064_v1 = vcombine.low %v223_v16, %v227_v56  ;;  %v270_v48 = vld [vmem:[#allocation2 + $0x350] sm:$0xff]  ;;  %v271_v16 = vld [vmem:[#allocation2 + $0x358] sm:$0xff] }
 0x221   :  { %6626 = vmatprep.subr.bf16.mxu0 %v8023_v3  ;;  %6954 = vmatprep.subr.bf16.mxu1 %v8025_v4  ;;  %v8071_v3 = vcombine.high %v230_v58, %v234_v23  ;;  %v8073_v4 = vcombine.high %v231_v60, %v235_v61  ;;  %v274_v49 = vld [vmem:[#allocation2 + $0x370] sm:$0xff]  ;;  %v275_v56 = vld [vmem:[#allocation2 + $0x378] sm:$0xff] }
 0x224   :  { %6627 = vmatpush1.bf16.msra.mxu0 %v8022_v11  ;;  %6955 = vmatpush1.bf16.msra.mxu1 %v8024_v14  ;;  %v8070_v11 = vcombine.low %v230_v58, %v234_v23  ;;  %v8072_v14 = vcombine.low %v231_v60, %v235_v61  ;;  %v278_v58 = vld [vmem:[#allocation2 + $0x390] sm:$0xff]  ;;  %v279_v60 = vld [vmem:[#allocation2 + $0x398] sm:$0xff] }
 0x225   :  { %6628 = vmatprep.subr.bf16.mxu0 %v8031_v33  ;;  %6956 = vmatprep.subr.bf16.mxu1 %v8033_v18  ;;  %v8079_v33 = vcombine.high %v238_v5, %v242_v6  ;;  %v8081_v18 = vcombine.high %v239_v7, %v243_v8  ;;  %v282_v23 = vld [vmem:[#allocation2 + $0x3b0] sm:$0xff]  ;;  %v283_v61 = vld [vmem:[#allocation2 + $0x3b8] sm:$0xff] }
 0x228   :  { %6629 = vmatpush1.bf16.msra.mxu0 %v8030_v21  ;;  %6957 = vmatpush1.bf16.msra.mxu1 %v8032_v24  ;;  %v8078_v21 = vcombine.low %v238_v5, %v242_v6  ;;  %v8080_v24 = vcombine.low %v239_v7, %v243_v8  ;;  %v286_v5 = vld [vmem:[#allocation2 + $0x3d0] sm:$0xff]  ;;  %v287_v7 = vld [vmem:[#allocation2 + $0x3d8] sm:$0xff] }
 0x229   :  { %6630 = vmatprep.subr.bf16.mxu0 %v8039_v26  ;;  %6958 = vmatprep.subr.bf16.mxu1 %v8041_v9  ;;  %v8087_v26 = vcombine.high %v246_v15, %v250_v17  ;;  %v8089_v9 = vcombine.high %v247_v19, %v251_v20  ;;  %v290_v6 = vld [vmem:[#allocation2 + $0x3f0] sm:$0xff]  ;;  %v291_v8 = vld [vmem:[#allocation2 + $0x3f8] sm:$0xff] }
 0x22c   :  { %6631 = vmatpush1.bf16.msra.mxu0 %v8038_v34  ;;  %6959 = vmatpush1.bf16.msra.mxu1 %v8040_v35  ;;  %v8086_v34 = vcombine.low %v246_v15, %v250_v17  ;;  %v8088_v35 = vcombine.low %v247_v19, %v251_v20  ;;  %v294_v15 = vld [vmem:[#allocation2 + $0x410] sm:$0xff]  ;;  %v295_v19 = vld [vmem:[#allocation2 + $0x418] sm:$0xff] }
 0x22d   :  { %6632 = vmatprep.subr.bf16.mxu0 %v8047_v63  ;;  %6960 = vmatprep.subr.bf16.mxu1 %v8049_v37  ;;  %v8095_v63 = vcombine.high %v254_v27, %v258_v30  ;;  %v8097_v37 = vcombine.high %v255_v31, %v259_v32  ;;  %v298_v17 = vld [vmem:[#allocation2 + $0x430] sm:$0xff]  ;;  %v299_v20 = vld [vmem:[#allocation2 + $0x438] sm:$0xff] }
 0x230   :  { %6633 = vmatpush1.bf16.msra.mxu0 %v8046_v42  ;;  %6961 = vmatpush1.bf16.msra.mxu1 %v8048_v45  ;;  %v8094_v42 = vcombine.low %v254_v27, %v258_v30  ;;  %v8096_v45 = vcombine.low %v255_v31, %v259_v32  ;;  %v302_v27 = vld [vmem:[#allocation2 + $0x450] sm:$0xff]  ;;  %v303_v31 = vld [vmem:[#allocation2 + $0x458] sm:$0xff] }
 0x231   :  { %6634 = vmatprep.subr.bf16.mxu0 %v8055_v59  ;;  %6962 = vmatprep.subr.bf16.mxu1 %v8057_v47  ;;  %v8103_v59 = vcombine.high %v262_v28, %v266_v38  ;;  %v8105_v47 = vcombine.high %v263_v40, %v267_v55  ;;  %v306_v30 = vld [vmem:[#allocation2 + $0x470] sm:$0xff]  ;;  %v307_v32 = vld [vmem:[#allocation2 + $0x478] sm:$0xff] }
 0x234   :  { %6635 = vmatpush1.bf16.msra.mxu0 %v8054_v54  ;;  %6963 = vmatpush1.bf16.msra.mxu1 %v8056_v53  ;;  %v8102_v54 = vcombine.low %v262_v28, %v266_v38  ;;  %v8104_v53 = vcombine.low %v263_v40, %v267_v55  ;;  %v310_v28 = vld [vmem:[#allocation2 + $0x490] sm:$0xff]  ;;  %v311_v40 = vld [vmem:[#allocation2 + $0x498] sm:$0xff] }
 0x235   :  { %6636 = vmatprep.subr.bf16.mxu0 %v8063_v57  ;;  %6964 = vmatprep.subr.bf16.mxu1 %v8065_v10  ;;  %v8111_v57 = vcombine.high %v270_v48, %v274_v49  ;;  %v8113_v10 = vcombine.high %v271_v16, %v275_v56  ;;  %v314_v38 = vld [vmem:[#allocation2 + $0x4b0] sm:$0xff]  ;;  %v315_v55 = vld [vmem:[#allocation2 + $0x4b8] sm:$0xff] }
 0x238   :  { %6637 = vmatpush1.bf16.msra.mxu0 %v8062_v62  ;;  %6965 = vmatpush1.bf16.msra.mxu1 %v8064_v1  ;;  %v8110_v62 = vcombine.low %v270_v48, %v274_v49  ;;  %v8112_v1 = vcombine.low %v271_v16, %v275_v56  ;;  %v318_v48 = vld [vmem:[#allocation2 + $0x4d0] sm:$0xff]  ;;  %v319_v16 = vld [vmem:[#allocation2 + $0x4d8] sm:$0xff] }
 0x239   :  { %6638 = vmatprep.subr.bf16.mxu0 %v8071_v3  ;;  %6966 = vmatprep.subr.bf16.mxu1 %v8073_v4  ;;  %v8119_v3 = vcombine.high %v278_v58, %v282_v23  ;;  %v8121_v4 = vcombine.high %v279_v60, %v283_v61  ;;  %v322_v49 = vld [vmem:[#allocation2 + $0x4f0] sm:$0xff]  ;;  %v323_v56 = vld [vmem:[#allocation2 + $0x4f8] sm:$0xff] }
 0x23c   :  { %6639 = vmatpush1.bf16.msra.mxu0 %v8070_v11  ;;  %6967 = vmatpush1.bf16.msra.mxu1 %v8072_v14  ;;  %v8118_v11 = vcombine.low %v278_v58, %v282_v23  ;;  %v8120_v14 = vcombine.low %v279_v60, %v283_v61  ;;  %v330_v58 = vld [vmem:[#allocation2 + $0x530] sm:$0xff]  ;;  %v327_v23 = vld [vmem:[#allocation2 + $0x518] sm:$0xff]  ;;  %v8158_v61 = vcombine.low %v318_v48, %v322_v49 }
 0x23d   :  { %6640 = vmatprep.subr.bf16.mxu0 %v8079_v33  ;;  %6968 = vmatprep.subr.bf16.mxu1 %v8081_v18  ;;  %v8127_v33 = vcombine.high %v286_v5, %v290_v6  ;;  %v8129_v18 = vcombine.high %v287_v7, %v291_v8  ;;  %v331_v60 = vld [vmem:[#allocation2 + $0x538] sm:$0xff] }
 0x240   :  { %6641 = vmatpush1.bf16.msra.mxu0 %v8078_v21  ;;  %6969 = vmatpush1.bf16.msra.mxu1 %v8080_v24  ;;  %v8126_v21 = vcombine.low %v286_v5, %v290_v6  ;;  %v8128_v24 = vcombine.low %v287_v7, %v291_v8  ;;  %v335_v5 = vld [vmem:[#allocation2 + $0x558] sm:$0xff]  ;;  %v8168_v8 = vcombine.low %v327_v23, %v331_v60 }
 0x241   :  { %6642 = vmatprep.subr.bf16.mxu0 %v8087_v26  ;;  %6970 = vmatprep.subr.bf16.mxu1 %v8089_v9  ;;  %v8135_v26 = vcombine.high %v294_v15, %v298_v17  ;;  %v8137_v9 = vcombine.high %v295_v19, %v299_v20  ;;  %v339_v6 = vld [vmem:[#allocation2 + $0x578] sm:$0xff] }
 0x244   :  { %6643 = vmatpush1.bf16.msra.mxu0 %v8086_v34  ;;  %6971 = vmatpush1.bf16.msra.mxu1 %v8088_v35  ;;  %v8134_v34 = vcombine.low %v294_v15, %v298_v17  ;;  %v8136_v35 = vcombine.low %v295_v19, %v299_v20  ;;  %v343_v15 = vld [vmem:[#allocation2 + $0x598] sm:$0xff]  ;;  %v8176_v20 = vcombine.low %v335_v5, %v339_v6 }
 0x245   :  { %6644 = vmatprep.subr.bf16.mxu0 %v8095_v63  ;;  %6972 = vmatprep.subr.bf16.mxu1 %v8097_v37  ;;  %v8143_v63 = vcombine.high %v302_v27, %v306_v30  ;;  %v8145_v37 = vcombine.high %v303_v31, %v307_v32  ;;  %v347_v17 = vld [vmem:[#allocation2 + $0x5b8] sm:$0xff] }
 0x248   :  { %6645 = vmatpush1.bf16.msra.mxu0 %v8094_v42  ;;  %6973 = vmatpush1.bf16.msra.mxu1 %v8096_v45  ;;  %v8142_v42 = vcombine.low %v302_v27, %v306_v30  ;;  %v8144_v45 = vcombine.low %v303_v31, %v307_v32  ;;  %v351_v27 = vld [vmem:[#allocation2 + $0x5d8] sm:$0xff]  ;;  %v8184_v32 = vcombine.low %v343_v15, %v347_v17 }
 0x249   :  { %6646 = vmatprep.subr.bf16.mxu0 %v8103_v59  ;;  %6974 = vmatprep.subr.bf16.mxu1 %v8105_v47  ;;  %v8151_v59 = vcombine.high %v310_v28, %v314_v38  ;;  %v8153_v47 = vcombine.high %v311_v40, %v315_v55  ;;  %v355_v30 = vld [vmem:[#allocation2 + $0x5f8] sm:$0xff] }
 0x24c   :  { %6647 = vmatpush1.bf16.msra.mxu0 %v8102_v54  ;;  %6975 = vmatpush1.bf16.msra.mxu1 %v8104_v53  ;;  %v8150_v54 = vcombine.low %v310_v28, %v314_v38  ;;  %v8159_v53 = vcombine.high %v318_v48, %v322_v49  ;;  %v359_v28 = vld [vmem:[#allocation2 + $0x618] sm:$0xff] }
 0x24d   :  { %6648 = vmatprep.subr.bf16.mxu0 %v8111_v57  ;;  %6976 = vmatprep.subr.bf16.mxu1 %v8113_v10  ;;  %v8161_v57 = vcombine.high %v319_v16, %v323_v56  ;;  %v326_v10 = vld [vmem:[#allocation2 + $0x510] sm:$0xff]  ;;  %v363_v38 = vld [vmem:[#allocation2 + $0x638] sm:$0xff] }
 0x24e   :  { %v8166_v7 = vcombine.low %v326_v10, %v330_v58  ;;  %v367_v48 = vld [vmem:[#allocation2 + $0x658] sm:$0xff] }
 0x24f   :  { %v371_v49 = vld [vmem:[#allocation2 + $0x678] sm:$0xff] }
 0x250   :  { %6649 = vmatpush1.bf16.msra.mxu0 %v8110_v62  ;;  %6977 = vmatpush1.bf16.msra.mxu1 %v8112_v1  ;;  %v8160_v62 = vcombine.low %v319_v16, %v323_v56  ;;  %v8167_v1 = vcombine.high %v326_v10, %v330_v58  ;;  %v8200_v56 = vcombine.low %v359_v28, %v363_v38  ;;  %v375_v10 = vld [vmem:[#allocation2 + $0x698] sm:$0xff] }
 0x251   :  { %6650 = vmatprep.subr.bf16.mxu0 %v8119_v3  ;;  %6978 = vmatprep.subr.bf16.mxu1 %v8121_v4  ;;  %v334_v3 = vld [vmem:[#allocation2 + $0x550] sm:$0xff]  ;;  %v379_v58 = vld [vmem:[#allocation2 + $0x6b8] sm:$0xff] }
 0x252   :  { %v338_v4 = vld [vmem:[#allocation2 + $0x570] sm:$0xff] }
 0x253   :  { %v8174_v19 = vcombine.low %v334_v3, %v338_v4 }
 0x254   :  { %6651 = vmatpush1.bf16.msra.mxu0 %v8118_v11  ;;  %6979 = vmatpush1.bf16.msra.mxu1 %v8120_v14  ;;  %v8175_v11 = vcombine.high %v334_v3, %v338_v4  ;;  %v8177_v14 = vcombine.high %v335_v5, %v339_v6  ;;  %v383_v3 = vld [vmem:[#allocation2 + $0x6d8] sm:$0xff]  ;;  %v8216_v6 = vcombine.low %v375_v10, %v379_v58 }
 0x255   :  { %6652 = vmatprep.subr.bf16.mxu0 %v8127_v33  ;;  %6980 = vmatprep.subr.bf16.mxu1 %v8129_v18  ;;  %v342_v33 = vld [vmem:[#allocation2 + $0x590] sm:$0xff]  ;;  %v387_v4 = vld [vmem:[#allocation2 + $0x6f8] sm:$0xff] }
 0x256   :  { %v346_v18 = vld [vmem:[#allocation2 + $0x5b0] sm:$0xff] }
 0x257   :  { %v8182_v31 = vcombine.low %v342_v33, %v346_v18 }
 0x258   :  { %6653 = vmatpush1.bf16.msra.mxu0 %v8126_v21  ;;  %6981 = vmatpush1.bf16.msra.mxu1 %v8128_v24  ;;  %v8183_v21 = vcombine.high %v342_v33, %v346_v18  ;;  %v8185_v24 = vcombine.high %v343_v15, %v347_v17  ;;  %v391_v33 = vld [vmem:[#allocation2 + $0x718] sm:$0xff]  ;;  %v8224_v17 = vcombine.low %v383_v3, %v387_v4 }
 0x259   :  { %6663 = vmatprep.subr.bf16.mxu0 %v8135_v26  ;;  %6991 = vmatprep.subr.bf16.mxu1 %v8137_v9  ;;  %v350_v26 = vld [vmem:[#allocation2 + $0x5d0] sm:$0xff]  ;;  %v395_v18 = vld [vmem:[#allocation2 + $0x738] sm:$0xff] }
 0x25a   :  { %v354_v9 = vld [vmem:[#allocation2 + $0x5f0] sm:$0xff] }
 0x25b   :  { %6655 = vmatmul.mubr.bf16.vlgmr.msra.gmra.mrb[4].mxu0 %v9519_v25  ;;  %6983 = vmatmul.mubr.bf16.vlgmr.msra.gmra.mrb[4].mxu1 %v9519_v25  ;;  %v8152_v25 = vcombine.low %v311_v40, %v315_v55  ;;  %v8190_v40 = vcombine.low %v350_v26, %v354_v9  ;;  %v8192_v55 = vcombine.low %v351_v27, %v355_v30 }
 0x25c   :  { %6664 = vmatpush1.bf16.msra.mxu0 %v8134_v34  ;;  %6992 = vmatpush1.bf16.msra.mxu1 %v8136_v35  ;;  %v8191_v34 = vcombine.high %v350_v26, %v354_v9  ;;  %v8193_v35 = vcombine.high %v351_v27, %v355_v30  ;;  %v399_v26 = vld [vmem:[#allocation2 + $0x758] sm:$0xff]  ;;  %v8232_v30 = vcombine.low %v391_v33, %v395_v18 }
 0x25d   :  { %6665 = vmatprep.subr.bf16.mxu0 %v8143_v63  ;;  %6993 = vmatprep.subr.bf16.mxu1 %v8145_v37  ;;  %v358_v63 = vld [vmem:[#allocation2 + $0x610] sm:$0xff]  ;;  %v403_v9 = vld [vmem:[#allocation2 + $0x778] sm:$0xff] }
 0x25e   :  { %6695 = vmatprep.mubr.bf16.mxu0 %v9521_v36  ;;  %7023 = vmatprep.mubr.bf16.mxu1 %v9521_v36  ;;  %v8169_v36 = vcombine.high %v327_v23, %v331_v60  ;;  %v362_v37 = vld [vmem:[#allocation2 + $0x630] sm:$0xff]  ;;  %v8208_v60 = vcombine.low %v367_v48, %v371_v49 }
 0x25f   :  { %v8198_v16 = vcombine.low %v358_v63, %v362_v37 }
 0x260   :  { %6666 = vmatpush1.bf16.msra.mxu0 %v8142_v42  ;;  %6994 = vmatpush1.bf16.msra.mxu1 %v8144_v45  ;;  %v8199_v42 = vcombine.high %v358_v63, %v362_v37  ;;  %v8201_v45 = vcombine.high %v359_v28, %v363_v38  ;;  %v407_v63 = vld [vmem:[#allocation2 + $0x798] sm:$0xff]  ;;  %v8240_v38 = vcombine.low %v399_v26, %v403_v9 }
 0x261   :  { %6667 = vmatprep.subr.bf16.mxu0 %v8151_v59  ;;  %6995 = vmatprep.subr.bf16.mxu1 %v8153_v47  ;;  %v366_v59 = vld [vmem:[#allocation2 + $0x650] sm:$0xff]  ;;  %v411_v37 = vld [vmem:[#allocation2 + $0x7b8] sm:$0xff] }
 0x262   :  { %v370_v47 = vld [vmem:[#allocation2 + $0x670] sm:$0xff] }
 0x263   :  { %v8206_v23 = vcombine.low %v366_v59, %v370_v47 }
 0x264   :  { %6668 = vmatpush1.bf16.msra.mxu0 %v8150_v54  ;;  %6996 = vmatpush1.bf16.msra.mxu1 %v8152_v25  ;;  %v8207_v54 = vcombine.high %v366_v59, %v370_v47  ;;  %v8209_v25 = vcombine.high %v367_v48, %v371_v49  ;;  %v415_v59 = vld [vmem:[#allocation2 + $0x7d8] sm:$0xff]  ;;  %v8248_v49 = vcombine.low %v407_v63, %v411_v37 }
 0x265   :  { %6669 = vmatprep.subr.bf16.mxu0 %v8159_v53  ;;  %6997 = vmatprep.subr.bf16.mxu1 %v8161_v57  ;;  %v374_v53 = vld [vmem:[#allocation2 + $0x690] sm:$0xff]  ;;  %v419_v47 = vld [vmem:[#allocation2 + $0x7f8] sm:$0xff] }
 0x266   :  { %v378_v57 = vld [vmem:[#allocation2 + $0x6b0] sm:$0xff] }
 0x267   :  { %v8214_v5 = vcombine.low %v374_v53, %v378_v57 }
 0x268   :  { %6670 = vmatpush1.bf16.msra.mxu0 %v8158_v61  ;;  %6998 = vmatpush1.bf16.msra.mxu1 %v8160_v62  ;;  %v8215_v61 = vcombine.high %v374_v53, %v378_v57  ;;  %v8217_v62 = vcombine.high %v375_v10, %v379_v58  ;;  %v423_v53 = vld [vmem:[#allocation2 + $0x818] sm:$0xff]  ;;  %v8256_v58 = vcombine.low %v415_v59, %v419_v47 }
 0x269   :  { %6671 = vmatprep.subr.bf16.mxu0 %v8167_v1  ;;  %6999 = vmatprep.subr.bf16.mxu1 %v8169_v36  ;;  %v382_v1 = vld [vmem:[#allocation2 + $0x6d0] sm:$0xff]  ;;  %v427_v57 = vld [vmem:[#allocation2 + $0x838] sm:$0xff] }
 0x26a   :  { %v386_v36 = vld [vmem:[#allocation2 + $0x6f0] sm:$0xff] }
 0x26b   :  { %v8222_v15 = vcombine.low %v382_v1, %v386_v36 }
 0x26c   :  { %6672 = vmatpush1.bf16.msra.mxu0 %v8166_v7  ;;  %7000 = vmatpush1.bf16.msra.mxu1 %v8168_v8  ;;  %v8223_v7 = vcombine.high %v382_v1, %v386_v36  ;;  %v8225_v8 = vcombine.high %v383_v3, %v387_v4  ;;  %v431_v1 = vld [vmem:[#allocation2 + $0x858] sm:$0xff]  ;;  %v8264_v4 = vcombine.low %v423_v53, %v427_v57 }
 0x26d   :  { %6673 = vmatprep.subr.bf16.mxu0 %v8175_v11  ;;  %7001 = vmatprep.subr.bf16.mxu1 %v8177_v14  ;;  %v390_v11 = vld [vmem:[#allocation2 + $0x710] sm:$0xff]  ;;  %v435_v36 = vld [vmem:[#allocation2 + $0x878] sm:$0xff] }
 0x26e   :  { %v394_v14 = vld [vmem:[#allocation2 + $0x730] sm:$0xff] }
 0x26f   :  { %v8230_v27 = vcombine.low %v390_v11, %v394_v14 }
 0x270   :  { %6674 = vmatpush1.bf16.msra.mxu0 %v8174_v19  ;;  %7002 = vmatpush1.bf16.msra.mxu1 %v8176_v20  ;;  %v8231_v19 = vcombine.high %v390_v11, %v394_v14  ;;  %v8233_v20 = vcombine.high %v391_v33, %v395_v18  ;;  %v439_v11 = vld [vmem:[#allocation2 + $0x898] sm:$0xff]  ;;  %v8272_v18 = vcombine.low %v431_v1, %v435_v36 }
 0x271   :  { %6675 = vmatprep.subr.bf16.mxu0 %v8183_v21  ;;  %7003 = vmatprep.subr.bf16.mxu1 %v8185_v24  ;;  %v398_v21 = vld [vmem:[#allocation2 + $0x750] sm:$0xff]  ;;  %v443_v14 = vld [vmem:[#allocation2 + $0x8b8] sm:$0xff] }
 0x272   :  { %v402_v24 = vld [vmem:[#allocation2 + $0x770] sm:$0xff] }
 0x273   :  { %v8238_v28 = vcombine.low %v398_v21, %v402_v24 }
 0x274   :  { %6676 = vmatpush1.bf16.msra.mxu0 %v8182_v31  ;;  %7004 = vmatpush1.bf16.msra.mxu1 %v8184_v32  ;;  %v8239_v31 = vcombine.high %v398_v21, %v402_v24  ;;  %v8241_v32 = vcombine.high %v399_v26, %v403_v9  ;;  %v447_v21 = vld [vmem:[#allocation2 + $0x8d8] sm:$0xff] }
 0x275   :  { %6677 = vmatprep.subr.bf16.mxu0 %v8191_v34  ;;  %7005 = vmatprep.subr.bf16.mxu1 %v8193_v35  ;;  %v406_v34 = vld [vmem:[#allocation2 + $0x790] sm:$0xff]  ;;  %v451_v24 = vld [vmem:[#allocation2 + $0x8f8] sm:$0xff] }
 0x276   :  { %v410_v35 = vld [vmem:[#allocation2 + $0x7b0] sm:$0xff] }
 0x277   :  { %v8246_v48 = vcombine.low %v406_v34, %v410_v35 }
 0x278   :  { %6678 = vmatpush1.bf16.msra.mxu0 %v8190_v40  ;;  %7006 = vmatpush1.bf16.msra.mxu1 %v8192_v55  ;;  %v8247_v40 = vcombine.high %v406_v34, %v410_v35  ;;  %v8249_v55 = vcombine.high %v407_v63, %v411_v37  ;;  %v459_v34 = vld [vmem:[#allocation2 + $0x938] sm:$0xff]  ;;  %v8288_v63 = vcombine.low %v447_v21, %v451_v24 }
 0x279   :  { %6679 = vmatprep.subr.bf16.mxu0 %v8199_v42  ;;  %7007 = vmatprep.subr.bf16.mxu1 %v8201_v45  ;;  %v414_v42 = vld [vmem:[#allocation2 + $0x7d0] sm:$0xff] }
 0x27a   :  { %v418_v45 = vld [vmem:[#allocation2 + $0x7f0] sm:$0xff] }
 0x27b   :  { %v8254_v10 = vcombine.low %v414_v42, %v418_v45 }
 0x27c   :  { %6680 = vmatpush1.bf16.msra.mxu0 %v8198_v16  ;;  %7008 = vmatpush1.bf16.msra.mxu1 %v8200_v56  ;;  %v8255_v16 = vcombine.high %v414_v42, %v418_v45  ;;  %v8257_v56 = vcombine.high %v415_v59, %v419_v47 }
 0x27d   :  { %6681 = vmatprep.subr.bf16.mxu0 %v8207_v54  ;;  %7009 = vmatprep.subr.bf16.mxu1 %v8209_v25  ;;  %v422_v54 = vld [vmem:[#allocation2 + $0x810] sm:$0xff] }
 0x27e   :  { %v426_v25 = vld [vmem:[#allocation2 + $0x830] sm:$0xff] }
 0x27f   :  { %v8262_v3 = vcombine.low %v422_v54, %v426_v25 }
 0x280   :  { %6682 = vmatpush1.bf16.msra.mxu0 %v8206_v23  ;;  %7010 = vmatpush1.bf16.msra.mxu1 %v8208_v60  ;;  %v8263_v23 = vcombine.high %v422_v54, %v426_v25  ;;  %v8265_v60 = vcombine.high %v423_v53, %v427_v57 }
 0x281   :  { %6683 = vmatprep.subr.bf16.mxu0 %v8215_v61  ;;  %7011 = vmatprep.subr.bf16.mxu1 %v8217_v62  ;;  %v430_v61 = vld [vmem:[#allocation2 + $0x850] sm:$0xff] }
 0x282   :  { %v434_v62 = vld [vmem:[#allocation2 + $0x870] sm:$0xff] }
 0x283   :  { %v8270_v33 = vcombine.low %v430_v61, %v434_v62 }
 0x284   :  { %6684 = vmatpush1.bf16.msra.mxu0 %v8214_v5  ;;  %7012 = vmatpush1.bf16.msra.mxu1 %v8216_v6  ;;  %v8271_v5 = vcombine.high %v430_v61, %v434_v62  ;;  %v8273_v6 = vcombine.high %v431_v1, %v435_v36 }
 0x285   :  { %6685 = vmatprep.subr.bf16.mxu0 %v8223_v7  ;;  %7013 = vmatprep.subr.bf16.mxu1 %v8225_v8  ;;  %v438_v7 = vld [vmem:[#allocation2 + $0x890] sm:$0xff] }
 0x286   :  { %v442_v8 = vld [vmem:[#allocation2 + $0x8b0] sm:$0xff] }
 0x287   :  { %v8278_v26 = vcombine.low %v438_v7, %v442_v8 }
 0x288   :  { %6686 = vmatpush1.bf16.msra.mxu0 %v8222_v15  ;;  %7014 = vmatpush1.bf16.msra.mxu1 %v8224_v17  ;;  %v8279_v15 = vcombine.high %v438_v7, %v442_v8  ;;  %v8281_v17 = vcombine.high %v439_v11, %v443_v14 }
 0x289   :  { %6687 = vmatprep.subr.bf16.mxu0 %v8231_v19  ;;  %7015 = vmatprep.subr.bf16.mxu1 %v8233_v20  ;;  %v446_v19 = vld [vmem:[#allocation2 + $0x8d0] sm:$0xff] }
 0x28a   :  { %v450_v20 = vld [vmem:[#allocation2 + $0x8f0] sm:$0xff] }
 0x28b   :  { %v8287_v9 = vcombine.high %v446_v19, %v450_v20  ;;  %v8286_v35 = vcombine.low %v446_v19, %v450_v20 }
 0x28c   :  { %6688 = vmatpush1.bf16.msra.mxu0 %v8230_v27  ;;  %7016 = vmatpush1.bf16.msra.mxu1 %v8232_v30  ;;  %v8289_v27 = vcombine.high %v447_v21, %v451_v24  ;;  %v454_v30 = vld [vmem:[#allocation2 + $0x910] sm:$0xff] }
 0x28d   :  { %6689 = vmatprep.subr.bf16.mxu0 %v8239_v31  ;;  %7017 = vmatprep.subr.bf16.mxu1 %v8241_v32  ;;  %v458_v31 = vld [vmem:[#allocation2 + $0x930] sm:$0xff]  ;;  %v455_v32 = vld [vmem:[#allocation2 + $0x918] sm:$0xff] }
 0x28e   :  { %v8295_v37 = vcombine.high %v454_v30, %v458_v31  ;;  %v8294_v42 = vcombine.low %v454_v30, %v458_v31  ;;  %v8296_v45 = vcombine.low %v455_v32, %v459_v34 }
 0x290   :  { %6690 = vmatpush1.bf16.msra.mxu0 %v8238_v28  ;;  %7018 = vmatpush1.bf16.msra.mxu1 %v8240_v38  ;;  %v462_v28 = vld [vmem:[#allocation2 + $0x950] sm:$0xff] }
 0x291   :  { %6691 = vmatprep.subr.bf16.mxu0 %v8247_v40  ;;  %7019 = vmatprep.subr.bf16.mxu1 %v8249_v55  ;;  %v466_v38 = vld [vmem:[#allocation2 + $0x970] sm:$0xff]  ;;  %v463_v40 = vld [vmem:[#allocation2 + $0x958] sm:$0xff] }
 0x292   :  { %v467_v55 = vld [vmem:[#allocation2 + $0x978] sm:$0xff]  ;;  %v8303_v59 = vcombine.high %v462_v28, %v466_v38  ;;  %v8302_v54 = vcombine.low %v462_v28, %v466_v38 }
 0x293   :  { %v8305_v47 = vcombine.high %v463_v40, %v467_v55  ;;  %v8304_v25 = vcombine.low %v463_v40, %v467_v55 }
 0x294   :  { %6692 = vmatpush1.bf16.msra.mxu0 %v8246_v48  ;;  %7020 = vmatpush1.bf16.msra.mxu1 %v8248_v49  ;;  %v470_v48 = vld [vmem:[#allocation2 + $0x990] sm:$0xff] }
 0x295   :  { %6693 = vmatprep.subr.bf16.mxu0 %v8255_v16  ;;  %7021 = vmatprep.subr.bf16.mxu1 %v8257_v56  ;;  %v474_v49 = vld [vmem:[#allocation2 + $0x9b0] sm:$0xff]  ;;  %v471_v16 = vld [vmem:[#allocation2 + $0x998] sm:$0xff] }
 0x296   :  { %v475_v56 = vld [vmem:[#allocation2 + $0x9b8] sm:$0xff]  ;;  %v8311_v53 = vcombine.high %v470_v48, %v474_v49  ;;  %v8310_v61 = vcombine.low %v470_v48, %v474_v49 }
 0x297   :  { %v8313_v57 = vcombine.high %v471_v16, %v475_v56  ;;  %v8312_v62 = vcombine.low %v471_v16, %v475_v56 }
 0x298   :  { %6694 = vmatpush1.bf16.msra.mxu0 %v8254_v10  ;;  %7022 = vmatpush1.bf16.msra.mxu1 %v8256_v58  ;;  %v478_v10 = vld [vmem:[#allocation2 + $0x9d0] sm:$0xff] }
 0x299   :  { %6704 = vmatprep.subr.bf16.mxu0 %v8263_v23  ;;  %7032 = vmatprep.subr.bf16.mxu1 %v8265_v60  ;;  %v482_v58 = vld [vmem:[#allocation2 + $0x9f0] sm:$0xff]  ;;  %v479_v23 = vld [vmem:[#allocation2 + $0x9d8] sm:$0xff] }
 0x29a   :  { %v483_v60 = vld [vmem:[#allocation2 + $0x9f8] sm:$0xff]  ;;  %v8319_v1 = vcombine.high %v478_v10, %v482_v58  ;;  %v8318_v7 = vcombine.low %v478_v10, %v482_v58 }
 0x29b   :  { %6696 = vmatmul.mubr.bf16.vlgmr.msra.gmra.mrb[4].mxu0 %v9540_v43  ;;  %7024 = vmatmul.mubr.bf16.vlgmr.msra.gmra.mrb[4].mxu1 %v9540_v43  ;;  %v8280_v43 = vcombine.low %v439_v11, %v443_v14  ;;  %v8321_v36 = vcombine.high %v479_v23, %v483_v60  ;;  %v8320_v8 = vcombine.low %v479_v23, %v483_v60 }
 0x29c   :  { %6705 = vmatpush1.bf16.msra.mxu0 %v8262_v3  ;;  %7033 = vmatpush1.bf16.msra.mxu1 %v8264_v4  ;;  %v486_v3 = vld [vmem:[#allocation2 + $0xa10] sm:$0xff] }
 0x29d   :  { %6706 = vmatprep.subr.bf16.mxu0 %v8271_v5  ;;  %7034 = vmatprep.subr.bf16.mxu1 %v8273_v6  ;;  %v490_v4 = vld [vmem:[#allocation2 + $0xa30] sm:$0xff]  ;;  %v487_v5 = vld [vmem:[#allocation2 + $0xa18] sm:$0xff] }
 0x29e   :  { %6736 = vmatprep.mubr.bf16.mxu0 %v9542_v51  ;;  %7064 = vmatprep.mubr.bf16.mxu1 %v9542_v51  ;;  %v8297_v51 = vcombine.high %v455_v32, %v459_v34  ;;  %v491_v6 = vld [vmem:[#allocation2 + $0xa38] sm:$0xff]  ;;  %v8327_v11 = vcombine.high %v486_v3, %v490_v4  ;;  %v8326_v19 = vcombine.low %v486_v3, %v490_v4 }
 0x29f   :  { %v8329_v14 = vcombine.high %v487_v5, %v491_v6  ;;  %v8328_v20 = vcombine.low %v487_v5, %v491_v6 }
 0x2a0   :  { %6707 = vmatpush1.bf16.msra.mxu0 %v8270_v33  ;;  %7035 = vmatpush1.bf16.msra.mxu1 %v8272_v18  ;;  %v494_v33 = vld [vmem:[#allocation2 + $0xa50] sm:$0xff] }
 0x2a1   :  { %6708 = vmatprep.subr.bf16.mxu0 %v8279_v15  ;;  %7036 = vmatprep.subr.bf16.mxu1 %v8281_v17  ;;  %v498_v18 = vld [vmem:[#allocation2 + $0xa70] sm:$0xff]  ;;  %v495_v15 = vld [vmem:[#allocation2 + $0xa58] sm:$0xff] }
 0x2a2   :  { %v499_v17 = vld [vmem:[#allocation2 + $0xa78] sm:$0xff]  ;;  %v8335_v21 = vcombine.high %v494_v33, %v498_v18  ;;  %v8334_v30 = vcombine.low %v494_v33, %v498_v18 }
 0x2a3   :  { %v8337_v24 = vcombine.high %v495_v15, %v499_v17  ;;  %v8336_v31 = vcombine.low %v495_v15, %v499_v17 }
 0x2a4   :  { %6709 = vmatpush1.bf16.msra.mxu0 %v8278_v26  ;;  %7037 = vmatpush1.bf16.msra.mxu1 %v8280_v43  ;;  %v502_v26 = vld [vmem:[#allocation2 + $0xa90] sm:$0xff] }
 0x2a5   :  { %6710 = vmatprep.subr.bf16.mxu0 %v8287_v9  ;;  %7038 = vmatprep.subr.bf16.mxu1 %v8289_v27  ;;  %v506_v43 = vld [vmem:[#allocation2 + $0xab0] sm:$0xff]  ;;  %v503_v9 = vld [vmem:[#allocation2 + $0xa98] sm:$0xff] }
 0x2a6   :  { %v507_v27 = vld [vmem:[#allocation2 + $0xab8] sm:$0xff]  ;;  %v8343_v32 = vcombine.high %v502_v26, %v506_v43  ;;  %v8342_v28 = vcombine.low %v502_v26, %v506_v43 }
 0x2a7   :  { %v8345_v34 = vcombine.high %v503_v9, %v507_v27  ;;  %v8344_v38 = vcombine.low %v503_v9, %v507_v27 }
 0x2a8   :  { %6711 = vmatpush1.bf16.msra.mxu0 %v8286_v35  ;;  %7039 = vmatpush1.bf16.msra.mxu1 %v8288_v63  ;;  %v510_v35 = vld [vmem:[#allocation2 + $0xad0] sm:$0xff] }
 0x2a9   :  { %6712 = vmatprep.subr.bf16.mxu0 %v8295_v37  ;;  %7040 = vmatprep.subr.bf16.mxu1 %v8297_v51  ;;  %v514_v63 = vld [vmem:[#allocation2 + $0xaf0] sm:$0xff]  ;;  %v511_v37 = vld [vmem:[#allocation2 + $0xad8] sm:$0xff] }
 0x2aa   :  { %v515_v51 = vld [vmem:[#allocation2 + $0xaf8] sm:$0xff]  ;;  %v8351_v40 = vcombine.high %v510_v35, %v514_v63  ;;  %v8350_v48 = vcombine.low %v510_v35, %v514_v63 }
 0x2ab   :  { %v8353_v55 = vcombine.high %v511_v37, %v515_v51  ;;  %v8352_v49 = vcombine.low %v511_v37, %v515_v51 }
 0x2ac   :  { %6713 = vmatpush1.bf16.msra.mxu0 %v8294_v42  ;;  %7041 = vmatpush1.bf16.msra.mxu1 %v8296_v45  ;;  %v518_v42 = vld [vmem:[#allocation2 + $0xb10] sm:$0xff] }
 0x2ad   :  { %6714 = vmatprep.subr.bf16.mxu0 %v8303_v59  ;;  %7042 = vmatprep.subr.bf16.mxu1 %v8305_v47  ;;  %v522_v45 = vld [vmem:[#allocation2 + $0xb30] sm:$0xff]  ;;  %v519_v59 = vld [vmem:[#allocation2 + $0xb18] sm:$0xff] }
 0x2ae   :  { %v523_v47 = vld [vmem:[#allocation2 + $0xb38] sm:$0xff]  ;;  %v8359_v16 = vcombine.high %v518_v42, %v522_v45  ;;  %v8358_v10 = vcombine.low %v518_v42, %v522_v45 }
 0x2af   :  { %v8361_v56 = vcombine.high %v519_v59, %v523_v47  ;;  %v8360_v58 = vcombine.low %v519_v59, %v523_v47 }
 0x2b0   :  { %6715 = vmatpush1.bf16.msra.mxu0 %v8302_v54  ;;  %7043 = vmatpush1.bf16.msra.mxu1 %v8304_v25  ;;  %v526_v54 = vld [vmem:[#allocation2 + $0xb50] sm:$0xff] }
 0x2b1   :  { %6716 = vmatprep.subr.bf16.mxu0 %v8311_v53  ;;  %7044 = vmatprep.subr.bf16.mxu1 %v8313_v57  ;;  %v530_v25 = vld [vmem:[#allocation2 + $0xb70] sm:$0xff]  ;;  %v527_v53 = vld [vmem:[#allocation2 + $0xb58] sm:$0xff] }
 0x2b2   :  { %v531_v57 = vld [vmem:[#allocation2 + $0xb78] sm:$0xff]  ;;  %v8367_v23 = vcombine.high %v526_v54, %v530_v25  ;;  %v8366_v3 = vcombine.low %v526_v54, %v530_v25 }
 0x2b3   :  { %v8369_v60 = vcombine.high %v527_v53, %v531_v57  ;;  %v8368_v4 = vcombine.low %v527_v53, %v531_v57  ;;  %v582_v57 = vld [vmem:[#allocation2 + $0xd10] sm:$0xff] }
 0x2b4   :  { %6717 = vmatpush1.bf16.msra.mxu0 %v8310_v61  ;;  %7045 = vmatpush1.bf16.msra.mxu1 %v8312_v62  ;;  %v534_v61 = vld [vmem:[#allocation2 + $0xb90] sm:$0xff] }
 0x2b5   :  { %6718 = vmatprep.subr.bf16.mxu0 %v8319_v1  ;;  %7046 = vmatprep.subr.bf16.mxu1 %v8321_v36  ;;  %v538_v62 = vld [vmem:[#allocation2 + $0xbb0] sm:$0xff]  ;;  %v535_v1 = vld [vmem:[#allocation2 + $0xb98] sm:$0xff] }
 0x2b6   :  { %v539_v36 = vld [vmem:[#allocation2 + $0xbb8] sm:$0xff]  ;;  %v8375_v5 = vcombine.high %v534_v61, %v538_v62  ;;  %v8374_v33 = vcombine.low %v534_v61, %v538_v62 }
 0x2b7   :  { %v8377_v6 = vcombine.high %v535_v1, %v539_v36  ;;  %v8376_v18 = vcombine.low %v535_v1, %v539_v36  ;;  %v590_v1 = vld [vmem:[#allocation2 + $0xd50] sm:$0xff] }
 0x2b8   :  { %6719 = vmatpush1.bf16.msra.mxu0 %v8318_v7  ;;  %7047 = vmatpush1.bf16.msra.mxu1 %v8320_v8  ;;  %v542_v7 = vld [vmem:[#allocation2 + $0xbd0] sm:$0xff] }
 0x2b9   :  { %6720 = vmatprep.subr.bf16.mxu0 %v8327_v11  ;;  %7048 = vmatprep.subr.bf16.mxu1 %v8329_v14  ;;  %v546_v8 = vld [vmem:[#allocation2 + $0xbf0] sm:$0xff]  ;;  %v543_v11 = vld [vmem:[#allocation2 + $0xbd8] sm:$0xff] }
 0x2ba   :  { %v547_v14 = vld [vmem:[#allocation2 + $0xbf8] sm:$0xff]  ;;  %v8383_v15 = vcombine.high %v542_v7, %v546_v8  ;;  %v8382_v26 = vcombine.low %v542_v7, %v546_v8  ;;  %v594_v36 = vld [vmem:[#allocation2 + $0xd70] sm:$0xff] }
 0x2bb   :  { %v8385_v17 = vcombine.high %v543_v11, %v547_v14  ;;  %v8384_v43 = vcombine.low %v543_v11, %v547_v14  ;;  %v8431_v7 = vcombine.high %v590_v1, %v594_v36  ;;  %v598_v11 = vld [vmem:[#allocation2 + $0xd90] sm:$0xff] }
 0x2bc   :  { %6721 = vmatpush1.bf16.msra.mxu0 %v8326_v19  ;;  %7049 = vmatpush1.bf16.msra.mxu1 %v8328_v20  ;;  %v550_v19 = vld [vmem:[#allocation2 + $0xc10] sm:$0xff] }
 0x2bd   :  { %6722 = vmatprep.subr.bf16.mxu0 %v8335_v21  ;;  %7050 = vmatprep.subr.bf16.mxu1 %v8337_v24  ;;  %v554_v20 = vld [vmem:[#allocation2 + $0xc30] sm:$0xff]  ;;  %v551_v21 = vld [vmem:[#allocation2 + $0xc18] sm:$0xff] }
 0x2be   :  { %v555_v24 = vld [vmem:[#allocation2 + $0xc38] sm:$0xff]  ;;  %v8391_v9 = vcombine.high %v550_v19, %v554_v20  ;;  %v8390_v35 = vcombine.low %v550_v19, %v554_v20  ;;  %v602_v14 = vld [vmem:[#allocation2 + $0xdb0] sm:$0xff] }
 0x2bf   :  { %v8393_v27 = vcombine.high %v551_v21, %v555_v24  ;;  %v8392_v63 = vcombine.low %v551_v21, %v555_v24  ;;  %v8439_v19 = vcombine.high %v598_v11, %v602_v14  ;;  %v606_v24 = vld [vmem:[#allocation2 + $0xdd0] sm:$0xff] }
 0x2c0   :  { %6723 = vmatpush1.bf16.msra.mxu0 %v8334_v30  ;;  %7051 = vmatpush1.bf16.msra.mxu1 %v8336_v31  ;;  %v558_v30 = vld [vmem:[#allocation2 + $0xc50] sm:$0xff] }
 0x2c1   :  { %6724 = vmatprep.subr.bf16.mxu0 %v8343_v32  ;;  %7052 = vmatprep.subr.bf16.mxu1 %v8345_v34  ;;  %v562_v31 = vld [vmem:[#allocation2 + $0xc70] sm:$0xff]  ;;  %v559_v32 = vld [vmem:[#allocation2 + $0xc58] sm:$0xff] }
 0x2c2   :  { %v563_v34 = vld [vmem:[#allocation2 + $0xc78] sm:$0xff]  ;;  %v8399_v37 = vcombine.high %v558_v30, %v562_v31  ;;  %v8398_v42 = vcombine.low %v558_v30, %v562_v31 }
 0x2c3   :  { %v8401_v51 = vcombine.high %v559_v32, %v563_v34  ;;  %v8400_v45 = vcombine.low %v559_v32, %v563_v34  ;;  %v611_v30 = vld [vmem:[#allocation2 + $0xdf8] sm:$0xff]  ;;  %v8438_v34 = vcombine.low %v598_v11, %v602_v14 }
 0x2c4   :  { %6725 = vmatpush1.bf16.msra.mxu0 %v8342_v28  ;;  %7053 = vmatpush1.bf16.msra.mxu1 %v8344_v38  ;;  %v566_v28 = vld [vmem:[#allocation2 + $0xc90] sm:$0xff] }
 0x2c5   :  { %6726 = vmatprep.subr.bf16.mxu0 %v8351_v40  ;;  %7054 = vmatprep.subr.bf16.mxu1 %v8353_v55  ;;  %v570_v38 = vld [vmem:[#allocation2 + $0xcb0] sm:$0xff]  ;;  %v567_v40 = vld [vmem:[#allocation2 + $0xc98] sm:$0xff] }
 0x2c6   :  { %v571_v55 = vld [vmem:[#allocation2 + $0xcb8] sm:$0xff]  ;;  %v8407_v59 = vcombine.high %v566_v28, %v570_v38  ;;  %v8406_v54 = vcombine.low %v566_v28, %v570_v38 }
 0x2c7   :  { %v8409_v47 = vcombine.high %v567_v40, %v571_v55 }
 0x2c8   :  { %6727 = vmatpush1.bf16.msra.mxu0 %v8350_v48  ;;  %7055 = vmatpush1.bf16.msra.mxu1 %v8352_v49  ;;  %v574_v48 = vld [vmem:[#allocation2 + $0xcd0] sm:$0xff] }
 0x2c9   :  { %6728 = vmatprep.subr.bf16.mxu0 %v8359_v16  ;;  %7056 = vmatprep.subr.bf16.mxu1 %v8361_v56  ;;  %v578_v49 = vld [vmem:[#allocation2 + $0xcf0] sm:$0xff]  ;;  %v575_v16 = vld [vmem:[#allocation2 + $0xcd8] sm:$0xff] }
 0x2ca   :  { %v579_v56 = vld [vmem:[#allocation2 + $0xcf8] sm:$0xff]  ;;  %v8415_v25 = vcombine.high %v574_v48, %v578_v49 }
 0x2cb   :  { %v8417_v53 = vcombine.high %v575_v16, %v579_v56  ;;  %v8416_v61 = vcombine.low %v575_v16, %v579_v56  ;;  %v622_v16 = vld [vmem:[#allocation2 + $0xe50] sm:$0xff] }
 0x2cc   :  { %6729 = vmatpush1.bf16.msra.mxu0 %v8358_v10  ;;  %7057 = vmatpush1.bf16.msra.mxu1 %v8360_v58  ;;  %v586_v10 = vld [vmem:[#allocation2 + $0xd30] sm:$0xff]  ;;  %v583_v58 = vld [vmem:[#allocation2 + $0xd18] sm:$0xff] }
 0x2cd   :  { %6730 = vmatprep.subr.bf16.mxu0 %v8367_v23  ;;  %7058 = vmatprep.subr.bf16.mxu1 %v8369_v60  ;;  %v587_v23 = vld [vmem:[#allocation2 + $0xd38] sm:$0xff]  ;;  %v8414_v60 = vcombine.low %v574_v48, %v578_v49  ;;  %v8423_v62 = vcombine.high %v582_v57, %v586_v10  ;;  %v626_v56 = vld [vmem:[#allocation2 + $0xe70] sm:$0xff] }
 0x2d0   :  { %6731 = vmatpush1.bf16.msra.mxu0 %v8366_v3  ;;  %7059 = vmatpush1.bf16.msra.mxu1 %v8368_v4  ;;  %v591_v3 = vld [vmem:[#allocation2 + $0xd58] sm:$0xff] }
 0x2d1   :  { %6732 = vmatprep.subr.bf16.mxu0 %v8375_v5  ;;  %7060 = vmatprep.subr.bf16.mxu1 %v8377_v6  ;;  %v595_v4 = vld [vmem:[#allocation2 + $0xd78] sm:$0xff]  ;;  %v8422_v5 = vcombine.low %v582_v57, %v586_v10  ;;  %v8424_v6 = vcombine.low %v583_v58, %v587_v23  ;;  %v8463_v57 = vcombine.high %v622_v16, %v626_v56 }
 0x2d2   :  { %v8433_v8 = vcombine.high %v591_v3, %v595_v4 }
 0x2d4   :  { %6733 = vmatpush1.bf16.msra.mxu0 %v8374_v33  ;;  %7061 = vmatpush1.bf16.msra.mxu1 %v8376_v18  ;;  %v599_v33 = vld [vmem:[#allocation2 + $0xd98] sm:$0xff] }
 0x2d5   :  { %6734 = vmatprep.subr.bf16.mxu0 %v8383_v15  ;;  %7062 = vmatprep.subr.bf16.mxu1 %v8385_v17  ;;  %v603_v18 = vld [vmem:[#allocation2 + $0xdb8] sm:$0xff]  ;;  %v8430_v15 = vcombine.low %v590_v1, %v594_v36  ;;  %v8432_v17 = vcombine.low %v591_v3, %v595_v4  ;;  %v638_v3 = vld [vmem:[#allocation2 + $0xed0] sm:$0xff] }
 0x2d6   :  { %v8441_v21 = vcombine.high %v599_v33, %v603_v18  ;;  %v642_v4 = vld [vmem:[#allocation2 + $0xef0] sm:$0xff] }
 0x2d7   :  { %v8479_v11 = vcombine.high %v638_v3, %v642_v4 }
 0x2d8   :  { %6735 = vmatpush1.bf16.msra.mxu0 %v8382_v26  ;;  %7063 = vmatpush1.bf16.msra.mxu1 %v8384_v43  ;;  %v610_v26 = vld [vmem:[#allocation2 + $0xdf0] sm:$0xff] }
 0x2d9   :  { %6745 = vmatprep.subr.bf16.mxu0 %v8391_v9  ;;  %7073 = vmatprep.subr.bf16.mxu1 %v8393_v27  ;;  %v607_v27 = vld [vmem:[#allocation2 + $0xdd8] sm:$0xff] }
 0x2da   :  { %v8449_v38 = vcombine.high %v607_v27, %v611_v30 }
 0x2db   :  { %6737 = vmatmul.mubr.bf16.vlgmr.msra.gmra.mrb[4].mxu0 %v9557_v2  ;;  %7065 = vmatmul.mubr.bf16.vlgmr.msra.gmra.mrb[4].mxu1 %v9557_v2  ;;  %v8408_v2 = vcombine.low %v567_v40, %v571_v55  ;;  %v614_v40 = vld [vmem:[#allocation2 + $0xe10] sm:$0xff] }
 0x2dc   :  { %6746 = vmatpush1.bf16.msra.mxu0 %v8390_v35  ;;  %7074 = vmatpush1.bf16.msra.mxu1 %v8392_v63  ;;  %v618_v55 = vld [vmem:[#allocation2 + $0xe30] sm:$0xff] }
 0x2dd   :  { %6747 = vmatprep.subr.bf16.mxu0 %v8399_v37  ;;  %7075 = vmatprep.subr.bf16.mxu1 %v8401_v51  ;;  %v8440_v37 = vcombine.low %v599_v33, %v603_v18  ;;  %v8447_v51 = vcombine.high %v606_v24, %v610_v26  ;;  %v8455_v48 = vcombine.high %v614_v40, %v618_v55  ;;  %v646_v33 = vld [vmem:[#allocation2 + $0xf10] sm:$0xff] }
 0x2de   :  { %6777 = vmatprep.mubr.bf16.mxu0 %v9559_v12  ;;  %7105 = vmatprep.mubr.bf16.mxu1 %v9559_v12  ;;  %v8425_v12 = vcombine.high %v583_v58, %v587_v23  ;;  %v630_v58 = vld [vmem:[#allocation2 + $0xe90] sm:$0xff] }
 0x2df   :  { %v634_v23 = vld [vmem:[#allocation2 + $0xeb0] sm:$0xff] }
 0x2e0   :  { %6748 = vmatpush1.bf16.msra.mxu0 %v8398_v42  ;;  %7076 = vmatpush1.bf16.msra.mxu1 %v8400_v45  ;;  %v615_v42 = vld [vmem:[#allocation2 + $0xe18] sm:$0xff]  ;;  %v8471_v1 = vcombine.high %v630_v58, %v634_v23  ;;  %v650_v18 = vld [vmem:[#allocation2 + $0xf30] sm:$0xff] }
 0x2e1   :  { %6749 = vmatprep.subr.bf16.mxu0 %v8407_v59  ;;  %7077 = vmatprep.subr.bf16.mxu1 %v8409_v47  ;;  %v619_v45 = vld [vmem:[#allocation2 + $0xe38] sm:$0xff]  ;;  %v8446_v59 = vcombine.low %v606_v24, %v610_v26  ;;  %v8448_v47 = vcombine.low %v607_v27, %v611_v30  ;;  %v8487_v24 = vcombine.high %v646_v33, %v650_v18  ;;  %v654_v27 = vld [vmem:[#allocation2 + $0xf50] sm:$0xff] }
 0x2e2   :  { %v8457_v49 = vcombine.high %v615_v42, %v619_v45  ;;  %v658_v30 = vld [vmem:[#allocation2 + $0xf70] sm:$0xff] }
 0x2e4   :  { %6750 = vmatpush1.bf16.msra.mxu0 %v8406_v54  ;;  %7078 = vmatpush1.bf16.msra.mxu1 %v8408_v2  ;;  %v623_v54 = vld [vmem:[#allocation2 + $0xe58] sm:$0xff] }
 0x2e5   :  { %6751 = vmatprep.subr.bf16.mxu0 %v8415_v25  ;;  %7079 = vmatprep.subr.bf16.mxu1 %v8417_v53  ;;  %v627_v2 = vld [vmem:[#allocation2 + $0xe78] sm:$0xff]  ;;  %v8454_v25 = vcombine.low %v614_v40, %v618_v55  ;;  %v8456_v53 = vcombine.low %v615_v42, %v619_v45  ;;  %v8494_v42 = vcombine.low %v654_v27, %v658_v30 }
 0x2e6   :  { %v8465_v10 = vcombine.high %v623_v54, %v627_v2  ;;  %v663_v40 = vld [vmem:[#allocation2 + $0xf98] sm:$0xff] }
 0x2e7   :  { %v667_v55 = vld [vmem:[#allocation2 + $0xfb8] sm:$0xff] }
 0x2e8   :  { %6752 = vmatpush1.bf16.msra.mxu0 %v8414_v60  ;;  %7080 = vmatpush1.bf16.msra.mxu1 %v8416_v61  ;;  %v631_v60 = vld [vmem:[#allocation2 + $0xe98] sm:$0xff] }
 0x2e9   :  { %6753 = vmatprep.subr.bf16.mxu0 %v8423_v62  ;;  %7081 = vmatprep.subr.bf16.mxu1 %v8425_v12  ;;  %v635_v61 = vld [vmem:[#allocation2 + $0xeb8] sm:$0xff]  ;;  %v8462_v62 = vcombine.low %v622_v16, %v626_v56  ;;  %v8464_v12 = vcombine.low %v623_v54, %v627_v2  ;;  %v8504_v2 = vcombine.low %v663_v40, %v667_v55 }
 0x2ea   :  { %v8473_v36 = vcombine.high %v631_v60, %v635_v61  ;;  %v671_v16 = vld [vmem:[#allocation2 + $0xfd8] sm:$0xff] }
 0x2eb   :  { %v675_v56 = vld [vmem:[#allocation2 + $0xff8] sm:$0xff] }
 0x2ec   :  { %6754 = vmatpush1.bf16.msra.mxu0 %v8422_v5  ;;  %7082 = vmatpush1.bf16.msra.mxu1 %v8424_v6  ;;  %v639_v5 = vld [vmem:[#allocation2 + $0xed8] sm:$0xff] }
 0x2ed   :  { %6755 = vmatprep.subr.bf16.mxu0 %v8431_v7  ;;  %7083 = vmatprep.subr.bf16.mxu1 %v8433_v8  ;;  %v643_v6 = vld [vmem:[#allocation2 + $0xef8] sm:$0xff]  ;;  %v8470_v7 = vcombine.low %v630_v58, %v634_v23  ;;  %v8472_v8 = vcombine.low %v631_v60, %v635_v61  ;;  %v8512_v61 = vcombine.low %v671_v16, %v675_v56 }
 0x2ee   :  { %v9653_v20 = vpop.f32.mrb[0].mxu0  ;;  %v9655_v43 = vpop.f32.mrb[0].mxu1  ;;  %v8481_v14 = vcombine.high %v639_v5, %v643_v6  ;;  %v679_v58 = vld [vmem:[#allocation2 + $0x1018] sm:$0xff] }
 0x2ef   :  { %v9657_v9 = vpop.f32.mrb[1].mxu0  ;;  %v9659_v31 = vpop.f32.mrb[1].mxu1  ;;  %v683_v23 = vld [vmem:[#allocation2 + $0x1038] sm:$0xff] }
 0x2f0   :  { %v6291_v32 = vpop.f32.mrb[2].mxu0  ;;  %6756 = vmatpush1.bf16.msra.mxu0 %v8430_v15  ;;  %v6619_v35 = vpop.f32.mrb[2].mxu1  ;;  %7084 = vmatpush1.bf16.msra.mxu1 %v8432_v17  ;;  %v647_v15 = vld [vmem:[#allocation2 + $0xf18] sm:$0xff] }
 0x2f1   :  { %v6292_v63 = vpop.f32.mrb[3].mxu0  ;;  %6757 = vmatprep.subr.bf16.mxu0 %v8439_v19  ;;  %v6620_v28 = vpop.f32.mrb[3].mxu1  ;;  %7085 = vmatprep.subr.bf16.mxu1 %v8441_v21  ;;  %v651_v17 = vld [vmem:[#allocation2 + $0xf38] sm:$0xff]  ;;  %v8478_v19 = vcombine.low %v638_v3, %v642_v4  ;;  %v8480_v21 = vcombine.low %v639_v5, %v643_v6  ;;  %v8486_v35 = vcombine.low %v646_v33, %v650_v18 }
 0x2f2   :  { %v8489_v26 = vcombine.high %v647_v15, %v651_v17  ;;  %v655_v32 = vld [vmem:[#allocation2 + $0xf58] sm:$0xff]  ;;  %v8488_v63 = vcombine.low %v647_v15, %v651_v17  ;;  %v662_v28 = vld [vmem:[#allocation2 + $0xf90] sm:$0xff]  ;;  %v8520_v6 = vcombine.low %v679_v58, %v683_v23 }
 0x2f3   :  { %v687_v3 = vld [vmem:[#allocation2 + $0x1058] sm:$0xff] }
 0x2f4   :  { %6758 = vmatpush1.bf16.msra.mxu0 %v8438_v34  ;;  %7086 = vmatpush1.bf16.msra.mxu1 %v8440_v37  ;;  %v659_v34 = vld [vmem:[#allocation2 + $0xf78] sm:$0xff]  ;;  %v8495_v37 = vcombine.high %v654_v27, %v658_v30 }
 0x2f5   :  { %6759 = vmatprep.subr.bf16.mxu0 %v8447_v51  ;;  %7087 = vmatprep.subr.bf16.mxu1 %v8449_v38  ;;  %v8497_v51 = vcombine.high %v655_v32, %v659_v34  ;;  %v666_v38 = vld [vmem:[#allocation2 + $0xfb0] sm:$0xff]  ;;  %v8496_v45 = vcombine.low %v655_v32, %v659_v34  ;;  %v691_v4 = vld [vmem:[#allocation2 + $0x1078] sm:$0xff] }
 0x2f6   :  { %v8502_v54 = vcombine.low %v662_v28, %v666_v38  ;;  %v695_v33 = vld [vmem:[#allocation2 + $0x1098] sm:$0xff]  ;;  %v8528_v17 = vcombine.low %v687_v3, %v691_v4 }
 0x2f7   :  { %v699_v18 = vld [vmem:[#allocation2 + $0x10b8] sm:$0xff] }
 0x2f8   :  { %6760 = vmatpush1.bf16.msra.mxu0 %v8446_v59  ;;  %7088 = vmatpush1.bf16.msra.mxu1 %v8448_v47  ;;  %v8503_v59 = vcombine.high %v662_v28, %v666_v38  ;;  %v8505_v47 = vcombine.high %v663_v40, %v667_v55  ;;  %v703_v27 = vld [vmem:[#allocation2 + $0x10d8] sm:$0xff] }
 0x2f9   :  { %6761 = vmatprep.subr.bf16.mxu0 %v8455_v48  ;;  %7089 = vmatprep.subr.bf16.mxu1 %v8457_v49  ;;  %v670_v48 = vld [vmem:[#allocation2 + $0xfd0] sm:$0xff]  ;;  %v707_v30 = vld [vmem:[#allocation2 + $0x10f8] sm:$0xff] }
 0x2fa   :  { %v674_v49 = vld [vmem:[#allocation2 + $0xff0] sm:$0xff]  ;;  %v715_v28 = vld [vmem:[#allocation2 + $0x1138] sm:$0xff]  ;;  %v8544_v40 = vcombine.low %v703_v27, %v707_v30 }
 0x2fb   :  { %v8510_v60 = vcombine.low %v670_v48, %v674_v49 }
 0x2fc   :  { %6762 = vmatpush1.bf16.msra.mxu0 %v8454_v25  ;;  %7090 = vmatpush1.bf16.msra.mxu1 %v8456_v53  ;;  %v8511_v25 = vcombine.high %v670_v48, %v674_v49  ;;  %v8513_v53 = vcombine.high %v671_v16, %v675_v56 }
 0x2fd   :  { %6763 = vmatprep.subr.bf16.mxu0 %v8463_v57  ;;  %7091 = vmatprep.subr.bf16.mxu1 %v8465_v10  ;;  %v678_v57 = vld [vmem:[#allocation2 + $0x1010] sm:$0xff] }
 0x2fe   :  { %v682_v10 = vld [vmem:[#allocation2 + $0x1030] sm:$0xff] }
 0x2ff   :  { %v8518_v5 = vcombine.low %v678_v57, %v682_v10 }
 0x300   :  { %6764 = vmatpush1.bf16.msra.mxu0 %v8462_v62  ;;  %7092 = vmatpush1.bf16.msra.mxu1 %v8464_v12  ;;  %v8519_v62 = vcombine.high %v678_v57, %v682_v10  ;;  %v8521_v12 = vcombine.high %v679_v58, %v683_v23 }
 0x301   :  { %6765 = vmatprep.subr.bf16.mxu0 %v8471_v1  ;;  %7093 = vmatprep.subr.bf16.mxu1 %v8473_v36  ;;  %v686_v1 = vld [vmem:[#allocation2 + $0x1050] sm:$0xff] }
 0x302   :  { %v690_v36 = vld [vmem:[#allocation2 + $0x1070] sm:$0xff] }
 0x303   :  { %v8526_v15 = vcombine.low %v686_v1, %v690_v36 }
 0x304   :  { %6766 = vmatpush1.bf16.msra.mxu0 %v8470_v7  ;;  %7094 = vmatpush1.bf16.msra.mxu1 %v8472_v8  ;;  %v8527_v7 = vcombine.high %v686_v1, %v690_v36  ;;  %v8529_v8 = vcombine.high %v687_v3, %v691_v4 }
 0x305   :  { %6767 = vmatprep.subr.bf16.mxu0 %v8479_v11  ;;  %7095 = vmatprep.subr.bf16.mxu1 %v8481_v14  ;;  %v694_v11 = vld [vmem:[#allocation2 + $0x1090] sm:$0xff] }
 0x306   :  { %v698_v14 = vld [vmem:[#allocation2 + $0x10b0] sm:$0xff] }
 0x307   :  { %v8534_v32 = vcombine.low %v694_v11, %v698_v14 }
 0x308   :  { %6768 = vmatpush1.bf16.msra.mxu0 %v8478_v19  ;;  %7096 = vmatpush1.bf16.msra.mxu1 %v8480_v21  ;;  %v8535_v19 = vcombine.high %v694_v11, %v698_v14  ;;  %v8537_v21 = vcombine.high %v695_v33, %v699_v18 }
 0x309   :  { %6769 = vmatprep.subr.bf16.mxu0 %v8487_v24  ;;  %7097 = vmatprep.subr.bf16.mxu1 %v8489_v26  ;;  %v702_v24 = vld [vmem:[#allocation2 + $0x10d0] sm:$0xff] }
 0x30a   :  { %v706_v26 = vld [vmem:[#allocation2 + $0x10f0] sm:$0xff] }
 0x30b   :  { %v8543_v34 = vcombine.high %v702_v24, %v706_v26  ;;  %v8542_v38 = vcombine.low %v702_v24, %v706_v26 }
 0x30c   :  { %6770 = vmatpush1.bf16.msra.mxu0 %v8486_v35  ;;  %7098 = vmatpush1.bf16.msra.mxu1 %v8488_v63  ;;  %v8545_v35 = vcombine.high %v703_v27, %v707_v30  ;;  %v710_v63 = vld [vmem:[#allocation2 + $0x1110] sm:$0xff] }
 0x30d   :  { %6771 = vmatprep.subr.bf16.mxu0 %v8495_v37  ;;  %7099 = vmatprep.subr.bf16.mxu1 %v8497_v51  ;;  %v714_v37 = vld [vmem:[#allocation2 + $0x1130] sm:$0xff]  ;;  %v711_v51 = vld [vmem:[#allocation2 + $0x1118] sm:$0xff] }
 0x30e   :  { %v8551_v55 = vcombine.high %v710_v63, %v714_v37  ;;  %v8550_v48 = vcombine.low %v710_v63, %v714_v37  ;;  %v8552_v49 = vcombine.low %v711_v51, %v715_v28 }
 0x310   :  { %6772 = vmatpush1.bf16.msra.mxu0 %v8494_v42  ;;  %7100 = vmatpush1.bf16.msra.mxu1 %v8496_v45  ;;  %v718_v42 = vld [vmem:[#allocation2 + $0x1150] sm:$0xff] }
 0x311   :  { %6773 = vmatprep.subr.bf16.mxu0 %v8503_v59  ;;  %7101 = vmatprep.subr.bf16.mxu1 %v8505_v47  ;;  %v722_v45 = vld [vmem:[#allocation2 + $0x1170] sm:$0xff]  ;;  %v719_v59 = vld [vmem:[#allocation2 + $0x1158] sm:$0xff] }
 0x312   :  { %v723_v47 = vld [vmem:[#allocation2 + $0x1178] sm:$0xff]  ;;  %v8559_v16 = vcombine.high %v718_v42, %v722_v45  ;;  %v8558_v57 = vcombine.low %v718_v42, %v722_v45 }
 0x313   :  { %v8561_v56 = vcombine.high %v719_v59, %v723_v47  ;;  %v8560_v10 = vcombine.low %v719_v59, %v723_v47 }
 0x314   :  { %6774 = vmatpush1.bf16.msra.mxu0 %v8502_v54  ;;  %7102 = vmatpush1.bf16.msra.mxu1 %v8504_v2  ;;  %v726_v54 = vld [vmem:[#allocation2 + $0x1190] sm:$0xff] }
 0x315   :  { %6775 = vmatprep.subr.bf16.mxu0 %v8511_v25  ;;  %7103 = vmatprep.subr.bf16.mxu1 %v8513_v53  ;;  %v730_v2 = vld [vmem:[#allocation2 + $0x11b0] sm:$0xff]  ;;  %v727_v25 = vld [vmem:[#allocation2 + $0x1198] sm:$0xff] }
 0x316   :  { %v731_v53 = vld [vmem:[#allocation2 + $0x11b8] sm:$0xff]  ;;  %v8567_v58 = vcombine.high %v726_v54, %v730_v2  ;;  %v8566_v1 = vcombine.low %v726_v54, %v730_v2 }
 0x317   :  { %v8569_v23 = vcombine.high %v727_v25, %v731_v53  ;;  %v8568_v36 = vcombine.low %v727_v25, %v731_v53 }
 0x318   :  { %6776 = vmatpush1.bf16.msra.mxu0 %v8510_v60  ;;  %7104 = vmatpush1.bf16.msra.mxu1 %v8512_v61  ;;  %v734_v60 = vld [vmem:[#allocation2 + $0x11d0] sm:$0xff] }
 0x319   :  { %6786 = vmatprep.subr.bf16.mxu0 %v8519_v62  ;;  %7114 = vmatprep.subr.bf16.mxu1 %v8521_v12  ;;  %v738_v61 = vld [vmem:[#allocation2 + $0x11f0] sm:$0xff]  ;;  %v735_v62 = vld [vmem:[#allocation2 + $0x11d8] sm:$0xff] }
 0x31a   :  { %v739_v12 = vld [vmem:[#allocation2 + $0x11f8] sm:$0xff]  ;;  %v8575_v3 = vcombine.high %v734_v60, %v738_v61  ;;  %v8574_v11 = vcombine.low %v734_v60, %v738_v61 }
 0x31b   :  { %6778 = vmatmul.mubr.bf16.vlgmr.msra.gmra.mrb[4].mxu0 %v9578_v29  ;;  %7106 = vmatmul.mubr.bf16.vlgmr.msra.gmra.mrb[4].mxu1 %v9578_v29  ;;  %v8536_v29 = vcombine.low %v695_v33, %v699_v18  ;;  %v8577_v4 = vcombine.high %v735_v62, %v739_v12  ;;  %v8576_v14 = vcombine.low %v735_v62, %v739_v12 }
 0x31c   :  { %6787 = vmatpush1.bf16.msra.mxu0 %v8518_v5  ;;  %7115 = vmatpush1.bf16.msra.mxu1 %v8520_v6  ;;  %v742_v5 = vld [vmem:[#allocation2 + $0x1210] sm:$0xff] }
 0x31d   :  { %6788 = vmatprep.subr.bf16.mxu0 %v8527_v7  ;;  %7116 = vmatprep.subr.bf16.mxu1 %v8529_v8  ;;  %v746_v6 = vld [vmem:[#allocation2 + $0x1230] sm:$0xff]  ;;  %v743_v7 = vld [vmem:[#allocation2 + $0x1218] sm:$0xff] }
 0x31e   :  { %6818 = vmatprep.mubr.bf16.mxu0 %v9580_v39  ;;  %7146 = vmatprep.mubr.bf16.mxu1 %v9580_v39  ;;  %v8553_v39 = vcombine.high %v711_v51, %v715_v28  ;;  %v747_v8 = vld [vmem:[#allocation2 + $0x1238] sm:$0xff]  ;;  %v8583_v33 = vcombine.high %v742_v5, %v746_v6  ;;  %v8582_v24 = vcombine.low %v742_v5, %v746_v6 }
 0x31f   :  { %v8585_v18 = vcombine.high %v743_v7, %v747_v8  ;;  %v8584_v26 = vcombine.low %v743_v7, %v747_v8 }
 0x320   :  { %6789 = vmatpush1.bf16.msra.mxu0 %v8526_v15  ;;  %7117 = vmatpush1.bf16.msra.mxu1 %v8528_v17  ;;  %v750_v15 = vld [vmem:[#allocation2 + $0x1250] sm:$0xff] }
 0x321   :  { %6790 = vmatprep.subr.bf16.mxu0 %v8535_v19  ;;  %7118 = vmatprep.subr.bf16.mxu1 %v8537_v21  ;;  %v754_v17 = vld [vmem:[#allocation2 + $0x1270] sm:$0xff]  ;;  %v751_v19 = vld [vmem:[#allocation2 + $0x1258] sm:$0xff] }
 0x322   :  { %v755_v21 = vld [vmem:[#allocation2 + $0x1278] sm:$0xff]  ;;  %v8591_v27 = vcombine.high %v750_v15, %v754_v17  ;;  %v8590_v63 = vcombine.low %v750_v15, %v754_v17 }
 0x323   :  { %v8593_v30 = vcombine.high %v751_v19, %v755_v21  ;;  %v8592_v37 = vcombine.low %v751_v19, %v755_v21 }
 0x324   :  { %6791 = vmatpush1.bf16.msra.mxu0 %v8534_v32  ;;  %7119 = vmatpush1.bf16.msra.mxu1 %v8536_v29  ;;  %v758_v32 = vld [vmem:[#allocation2 + $0x1290] sm:$0xff] }
 0x325   :  { %6792 = vmatprep.subr.bf16.mxu0 %v8543_v34  ;;  %7120 = vmatprep.subr.bf16.mxu1 %v8545_v35  ;;  %v762_v29 = vld [vmem:[#allocation2 + $0x12b0] sm:$0xff]  ;;  %v759_v34 = vld [vmem:[#allocation2 + $0x1298] sm:$0xff] }
 0x326   :  { %v763_v35 = vld [vmem:[#allocation2 + $0x12b8] sm:$0xff]  ;;  %v8599_v51 = vcombine.high %v758_v32, %v762_v29  ;;  %v8598_v42 = vcombine.low %v758_v32, %v762_v29 }
 0x327   :  { %v8601_v28 = vcombine.high %v759_v34, %v763_v35  ;;  %v8600_v45 = vcombine.low %v759_v34, %v763_v35 }
 0x328   :  { %6793 = vmatpush1.bf16.msra.mxu0 %v8542_v38  ;;  %7121 = vmatpush1.bf16.msra.mxu1 %v8544_v40  ;;  %v766_v38 = vld [vmem:[#allocation2 + $0x12d0] sm:$0xff] }
 0x329   :  { %6794 = vmatprep.subr.bf16.mxu0 %v8551_v55  ;;  %7122 = vmatprep.subr.bf16.mxu1 %v8553_v39  ;;  %v770_v40 = vld [vmem:[#allocation2 + $0x12f0] sm:$0xff]  ;;  %v767_v55 = vld [vmem:[#allocation2 + $0x12d8] sm:$0xff] }
 0x32a   :  { %v771_v39 = vld [vmem:[#allocation2 + $0x12f8] sm:$0xff]  ;;  %v8607_v59 = vcombine.high %v766_v38, %v770_v40  ;;  %v8606_v54 = vcombine.low %v766_v38, %v770_v40 }
 0x32b   :  { %v8609_v47 = vcombine.high %v767_v55, %v771_v39  ;;  %v8608_v2 = vcombine.low %v767_v55, %v771_v39 }
 0x32c   :  { %6795 = vmatpush1.bf16.msra.mxu0 %v8550_v48  ;;  %7123 = vmatpush1.bf16.msra.mxu1 %v8552_v49  ;;  %v774_v48 = vld [vmem:[#allocation2 + $0x1310] sm:$0xff] }
 0x32d   :  { %6796 = vmatprep.subr.bf16.mxu0 %v8559_v16  ;;  %7124 = vmatprep.subr.bf16.mxu1 %v8561_v56  ;;  %v778_v49 = vld [vmem:[#allocation2 + $0x1330] sm:$0xff]  ;;  %v775_v16 = vld [vmem:[#allocation2 + $0x1318] sm:$0xff] }
 0x32e   :  { %v779_v56 = vld [vmem:[#allocation2 + $0x1338] sm:$0xff]  ;;  %v8615_v25 = vcombine.high %v774_v48, %v778_v49  ;;  %v8614_v60 = vcombine.low %v774_v48, %v778_v49 }
 0x32f   :  { %v8617_v53 = vcombine.high %v775_v16, %v779_v56  ;;  %v8616_v61 = vcombine.low %v775_v16, %v779_v56 }
 0x330   :  { %6797 = vmatpush1.bf16.msra.mxu0 %v8558_v57  ;;  %7125 = vmatpush1.bf16.msra.mxu1 %v8560_v10  ;;  %v782_v57 = vld [vmem:[#allocation2 + $0x1350] sm:$0xff] }
 0x331   :  { %6798 = vmatprep.subr.bf16.mxu0 %v8567_v58  ;;  %7126 = vmatprep.subr.bf16.mxu1 %v8569_v23  ;;  %v786_v10 = vld [vmem:[#allocation2 + $0x1370] sm:$0xff]  ;;  %v783_v58 = vld [vmem:[#allocation2 + $0x1358] sm:$0xff] }
 0x332   :  { %v787_v23 = vld [vmem:[#allocation2 + $0x1378] sm:$0xff]  ;;  %v8623_v62 = vcombine.high %v782_v57, %v786_v10  ;;  %v8622_v5 = vcombine.low %v782_v57, %v786_v10 }
 0x333   :  { %v8625_v12 = vcombine.high %v783_v58, %v787_v23  ;;  %v8624_v6 = vcombine.low %v783_v58, %v787_v23  ;;  %v838_v23 = vld [vmem:[#allocation2 + $0x1510] sm:$0xff] }
 0x334   :  { %6799 = vmatpush1.bf16.msra.mxu0 %v8566_v1  ;;  %7127 = vmatpush1.bf16.msra.mxu1 %v8568_v36  ;;  %v790_v1 = vld [vmem:[#allocation2 + $0x1390] sm:$0xff] }
 0x335   :  { %6800 = vmatprep.subr.bf16.mxu0 %v8575_v3  ;;  %7128 = vmatprep.subr.bf16.mxu1 %v8577_v4  ;;  %v794_v36 = vld [vmem:[#allocation2 + $0x13b0] sm:$0xff]  ;;  %v791_v3 = vld [vmem:[#allocation2 + $0x1398] sm:$0xff] }
 0x336   :  { %v795_v4 = vld [vmem:[#allocation2 + $0x13b8] sm:$0xff]  ;;  %v8631_v7 = vcombine.high %v790_v1, %v794_v36  ;;  %v8630_v15 = vcombine.low %v790_v1, %v794_v36 }
 0x337   :  { %v8633_v8 = vcombine.high %v791_v3, %v795_v4  ;;  %v8632_v17 = vcombine.low %v791_v3, %v795_v4  ;;  %v846_v3 = vld [vmem:[#allocation2 + $0x1550] sm:$0xff] }
 0x338   :  { %6801 = vmatpush1.bf16.msra.mxu0 %v8574_v11  ;;  %7129 = vmatpush1.bf16.msra.mxu1 %v8576_v14  ;;  %v798_v11 = vld [vmem:[#allocation2 + $0x13d0] sm:$0xff] }
 0x339   :  { %6802 = vmatprep.subr.bf16.mxu0 %v8583_v33  ;;  %7130 = vmatprep.subr.bf16.mxu1 %v8585_v18  ;;  %v802_v14 = vld [vmem:[#allocation2 + $0x13f0] sm:$0xff]  ;;  %v799_v33 = vld [vmem:[#allocation2 + $0x13d8] sm:$0xff] }
 0x33a   :  { %v803_v18 = vld [vmem:[#allocation2 + $0x13f8] sm:$0xff]  ;;  %v8639_v19 = vcombine.high %v798_v11, %v802_v14  ;;  %v8638_v32 = vcombine.low %v798_v11, %v802_v14  ;;  %v850_v4 = vld [vmem:[#allocation2 + $0x1570] sm:$0xff] }
 0x33b   :  { %v8641_v21 = vcombine.high %v799_v33, %v803_v18  ;;  %v8640_v29 = vcombine.low %v799_v33, %v803_v18  ;;  %v8687_v11 = vcombine.high %v846_v3, %v850_v4  ;;  %v854_v33 = vld [vmem:[#allocation2 + $0x1590] sm:$0xff] }
 0x33c   :  { %6803 = vmatpush1.bf16.msra.mxu0 %v8582_v24  ;;  %7131 = vmatpush1.bf16.msra.mxu1 %v8584_v26  ;;  %v806_v24 = vld [vmem:[#allocation2 + $0x1410] sm:$0xff] }
 0x33d   :  { %6804 = vmatprep.subr.bf16.mxu0 %v8591_v27  ;;  %7132 = vmatprep.subr.bf16.mxu1 %v8593_v30  ;;  %v810_v26 = vld [vmem:[#allocation2 + $0x1430] sm:$0xff]  ;;  %v807_v27 = vld [vmem:[#allocation2 + $0x1418] sm:$0xff] }
 0x33e   :  { %v811_v30 = vld [vmem:[#allocation2 + $0x1438] sm:$0xff]  ;;  %v8647_v34 = vcombine.high %v806_v24, %v810_v26  ;;  %v8646_v38 = vcombine.low %v806_v24, %v810_v26  ;;  %v858_v18 = vld [vmem:[#allocation2 + $0x15b0] sm:$0xff] }
 0x33f   :  { %v8649_v35 = vcombine.high %v807_v27, %v811_v30  ;;  %v8648_v40 = vcombine.low %v807_v27, %v811_v30  ;;  %v8695_v24 = vcombine.high %v854_v33, %v858_v18  ;;  %v862_v27 = vld [vmem:[#allocation2 + $0x15d0] sm:$0xff] }
 0x340   :  { %6805 = vmatpush1.bf16.msra.mxu0 %v8590_v63  ;;  %7133 = vmatpush1.bf16.msra.mxu1 %v8592_v37  ;;  %v814_v63 = vld [vmem:[#allocation2 + $0x1450] sm:$0xff] }
 0x341   :  { %6806 = vmatprep.subr.bf16.mxu0 %v8599_v51  ;;  %7134 = vmatprep.subr.bf16.mxu1 %v8601_v28  ;;  %v818_v37 = vld [vmem:[#allocation2 + $0x1470] sm:$0xff]  ;;  %v815_v51 = vld [vmem:[#allocation2 + $0x1458] sm:$0xff] }
 0x342   :  { %v819_v28 = vld [vmem:[#allocation2 + $0x1478] sm:$0xff]  ;;  %v8655_v55 = vcombine.high %v814_v63, %v818_v37  ;;  %v8654_v48 = vcombine.low %v814_v63, %v818_v37  ;;  %v866_v30 = vld [vmem:[#allocation2 + $0x15f0] sm:$0xff] }
 0x343   :  { %v8657_v39 = vcombine.high %v815_v51, %v819_v28  ;;  %v8656_v49 = vcombine.low %v815_v51, %v819_v28  ;;  %v8703_v63 = vcombine.high %v862_v27, %v866_v30  ;;  %v870_v51 = vld [vmem:[#allocation2 + $0x1610] sm:$0xff] }
 0x344   :  { %6807 = vmatpush1.bf16.msra.mxu0 %v8598_v42  ;;  %7135 = vmatpush1.bf16.msra.mxu1 %v8600_v45  ;;  %v822_v42 = vld [vmem:[#allocation2 + $0x1490] sm:$0xff] }
 0x345   :  { %6808 = vmatprep.subr.bf16.mxu0 %v8607_v59  ;;  %7136 = vmatprep.subr.bf16.mxu1 %v8609_v47  ;;  %v826_v45 = vld [vmem:[#allocation2 + $0x14b0] sm:$0xff]  ;;  %v823_v59 = vld [vmem:[#allocation2 + $0x1498] sm:$0xff] }
 0x346   :  { %v827_v47 = vld [vmem:[#allocation2 + $0x14b8] sm:$0xff]  ;;  %v8663_v16 = vcombine.high %v822_v42, %v826_v45  ;;  %v8662_v57 = vcombine.low %v822_v42, %v826_v45  ;;  %v874_v28 = vld [vmem:[#allocation2 + $0x1630] sm:$0xff] }
 0x347   :  { %v8665_v56 = vcombine.high %v823_v59, %v827_v47  ;;  %v8711_v42 = vcombine.high %v870_v51, %v874_v28 }
 0x348   :  { %6809 = vmatpush1.bf16.msra.mxu0 %v8606_v54  ;;  %7137 = vmatpush1.bf16.msra.mxu1 %v8608_v2  ;;  %v830_v54 = vld [vmem:[#allocation2 + $0x14d0] sm:$0xff] }
 0x349   :  { %6810 = vmatprep.subr.bf16.mxu0 %v8615_v25  ;;  %7138 = vmatprep.subr.bf16.mxu1 %v8617_v53  ;;  %v834_v2 = vld [vmem:[#allocation2 + $0x14f0] sm:$0xff]  ;;  %v831_v25 = vld [vmem:[#allocation2 + $0x14d8] sm:$0xff] }
 0x34a   :  { %v835_v53 = vld [vmem:[#allocation2 + $0x14f8] sm:$0xff]  ;;  %v8671_v10 = vcombine.high %v830_v54, %v834_v2 }
 0x34b   :  { %v8673_v58 = vcombine.high %v831_v25, %v835_v53  ;;  %v8672_v1 = vcombine.low %v831_v25, %v835_v53  ;;  %v886_v25 = vld [vmem:[#allocation2 + $0x1690] sm:$0xff] }
 0x34c   :  { %6811 = vmatpush1.bf16.msra.mxu0 %v8614_v60  ;;  %7139 = vmatpush1.bf16.msra.mxu1 %v8616_v61  ;;  %v842_v60 = vld [vmem:[#allocation2 + $0x1530] sm:$0xff]  ;;  %v839_v61 = vld [vmem:[#allocation2 + $0x1518] sm:$0xff] }
 0x34d   :  { %6812 = vmatprep.subr.bf16.mxu0 %v8623_v62  ;;  %7140 = vmatprep.subr.bf16.mxu1 %v8625_v12  ;;  %v843_v62 = vld [vmem:[#allocation2 + $0x1538] sm:$0xff]  ;;  %v8670_v12 = vcombine.low %v830_v54, %v834_v2  ;;  %v8679_v36 = vcombine.high %v838_v23, %v842_v60  ;;  %v890_v53 = vld [vmem:[#allocation2 + $0x16b0] sm:$0xff] }
 0x350   :  { %6813 = vmatpush1.bf16.msra.mxu0 %v8622_v5  ;;  %7141 = vmatpush1.bf16.msra.mxu1 %v8624_v6  ;;  %v847_v5 = vld [vmem:[#allocation2 + $0x1558] sm:$0xff] }
 0x351   :  { %6814 = vmatprep.subr.bf16.mxu0 %v8631_v7  ;;  %7142 = vmatprep.subr.bf16.mxu1 %v8633_v8  ;;  %v851_v6 = vld [vmem:[#allocation2 + $0x1578] sm:$0xff]  ;;  %v8678_v7 = vcombine.low %v838_v23, %v842_v60  ;;  %v8680_v8 = vcombine.low %v839_v61, %v843_v62  ;;  %v8727_v23 = vcombine.high %v886_v25, %v890_v53 }
 0x352   :  { %v8689_v14 = vcombine.high %v847_v5, %v851_v6 }
 0x354   :  { %6815 = vmatpush1.bf16.msra.mxu0 %v8630_v15  ;;  %7143 = vmatpush1.bf16.msra.mxu1 %v8632_v17  ;;  %v855_v15 = vld [vmem:[#allocation2 + $0x1598] sm:$0xff] }
 0x355   :  { %6816 = vmatprep.subr.bf16.mxu0 %v8639_v19  ;;  %7144 = vmatprep.subr.bf16.mxu1 %v8641_v21  ;;  %v859_v17 = vld [vmem:[#allocation2 + $0x15b8] sm:$0xff]  ;;  %v8686_v19 = vcombine.low %v846_v3, %v850_v4  ;;  %v8688_v21 = vcombine.low %v847_v5, %v851_v6  ;;  %v902_v5 = vld [vmem:[#allocation2 + $0x1710] sm:$0xff] }
 0x356   :  { %v8697_v26 = vcombine.high %v855_v15, %v859_v17  ;;  %v906_v6 = vld [vmem:[#allocation2 + $0x1730] sm:$0xff] }
 0x358   :  { %6817 = vmatpush1.bf16.msra.mxu0 %v8638_v32  ;;  %7145 = vmatpush1.bf16.msra.mxu1 %v8640_v29  ;;  %v863_v32 = vld [vmem:[#allocation2 + $0x15d8] sm:$0xff] }
 0x359   :  { %6827 = vmatprep.subr.bf16.mxu0 %v8647_v34  ;;  %7155 = vmatprep.subr.bf16.mxu1 %v8649_v35  ;;  %v867_v29 = vld [vmem:[#allocation2 + $0x15f8] sm:$0xff]  ;;  %v8694_v34 = vcombine.low %v854_v33, %v858_v18  ;;  %v8696_v35 = vcombine.low %v855_v15, %v859_v17  ;;  %v8743_v33 = vcombine.high %v902_v5, %v906_v6  ;;  %v910_v15 = vld [vmem:[#allocation2 + $0x1750] sm:$0xff] }
 0x35a   :  { %v8705_v37 = vcombine.high %v863_v32, %v867_v29  ;;  %v914_v17 = vld [vmem:[#allocation2 + $0x1770] sm:$0xff] }
 0x35b   :  { %6819 = vmatmul.mubr.bf16.vlgmr.msra.gmra.mrb[4].mxu0 %v9595_v0  ;;  %7147 = vmatmul.mubr.bf16.vlgmr.msra.gmra.mrb[4].mxu1 %v9595_v0  ;;  %v8664_v0 = vcombine.low %v823_v59, %v827_v47  ;;  %v878_v59 = vld [vmem:[#allocation2 + $0x1650] sm:$0xff] }
 0x35c   :  { %6828 = vmatpush1.bf16.msra.mxu0 %v8646_v38  ;;  %7156 = vmatpush1.bf16.msra.mxu1 %v8648_v40  ;;  %v871_v38 = vld [vmem:[#allocation2 + $0x1618] sm:$0xff]  ;;  %v882_v47 = vld [vmem:[#allocation2 + $0x1670] sm:$0xff] }
 0x35d   :  { %6829 = vmatprep.subr.bf16.mxu0 %v8655_v55  ;;  %7157 = vmatprep.subr.bf16.mxu1 %v8657_v39  ;;  %v875_v40 = vld [vmem:[#allocation2 + $0x1638] sm:$0xff]  ;;  %v8702_v55 = vcombine.low %v862_v27, %v866_v30  ;;  %v8704_v39 = vcombine.low %v863_v32, %v867_v29  ;;  %v8719_v54 = vcombine.high %v878_v59, %v882_v47  ;;  %v918_v32 = vld [vmem:[#allocation2 + $0x1790] sm:$0xff] }
 0x35e   :  { %6859 = vmatprep.mubr.bf16.mxu0 %v9597_v13  ;;  %7187 = vmatprep.mubr.bf16.mxu1 %v9597_v13  ;;  %v8681_v13 = vcombine.high %v839_v61, %v843_v62  ;;  %v8713_v45 = vcombine.high %v871_v38, %v875_v40  ;;  %v894_v61 = vld [vmem:[#allocation2 + $0x16d0] sm:$0xff]  ;;  %v8751_v27 = vcombine.high %v910_v15, %v914_v17 }
 0x35f   :  { %v898_v62 = vld [vmem:[#allocation2 + $0x16f0] sm:$0xff] }
 0x360   :  { %6830 = vmatpush1.bf16.msra.mxu0 %v8654_v48  ;;  %7158 = vmatpush1.bf16.msra.mxu1 %v8656_v49  ;;  %v879_v48 = vld [vmem:[#allocation2 + $0x1658] sm:$0xff]  ;;  %v8735_v3 = vcombine.high %v894_v61, %v898_v62  ;;  %v922_v29 = vld [vmem:[#allocation2 + $0x17b0] sm:$0xff] }
 0x361   :  { %6831 = vmatprep.subr.bf16.mxu0 %v8663_v16  ;;  %7159 = vmatprep.subr.bf16.mxu1 %v8665_v56  ;;  %v883_v49 = vld [vmem:[#allocation2 + $0x1678] sm:$0xff]  ;;  %v8710_v16 = vcombine.low %v870_v51, %v874_v28  ;;  %v8712_v56 = vcombine.low %v871_v38, %v875_v40  ;;  %v8759_v51 = vcombine.high %v918_v32, %v922_v29  ;;  %v926_v38 = vld [vmem:[#allocation2 + $0x17d0] sm:$0xff] }
 0x362   :  { %v8721_v2 = vcombine.high %v879_v48, %v883_v49  ;;  %v930_v40 = vld [vmem:[#allocation2 + $0x17f0] sm:$0xff] }
 0x364   :  { %6832 = vmatpush1.bf16.msra.mxu0 %v8662_v57  ;;  %7160 = vmatpush1.bf16.msra.mxu1 %v8664_v0  ;;  %v887_v57 = vld [vmem:[#allocation2 + $0x1698] sm:$0xff] }
 0x365   :  { %6833 = vmatprep.subr.bf16.mxu0 %v8671_v10  ;;  %7161 = vmatprep.subr.bf16.mxu1 %v8673_v58  ;;  %v891_v0 = vld [vmem:[#allocation2 + $0x16b8] sm:$0xff]  ;;  %v8718_v10 = vcombine.low %v878_v59, %v882_v47  ;;  %v8720_v58 = vcombine.low %v879_v48, %v883_v49  ;;  %v8767_v59 = vcombine.high %v926_v38, %v930_v40  ;;  %v934_v48 = vld [vmem:[#allocation2 + $0x1810] sm:$0xff] }
 0x366   :  { %v8729_v60 = vcombine.high %v887_v57, %v891_v0  ;;  %v938_v49 = vld [vmem:[#allocation2 + $0x1830] sm:$0xff] }
 0x368   :  { %6834 = vmatpush1.bf16.msra.mxu0 %v8670_v12  ;;  %7162 = vmatpush1.bf16.msra.mxu1 %v8672_v1  ;;  %v895_v12 = vld [vmem:[#allocation2 + $0x16d8] sm:$0xff] }
 0x369   :  { %6835 = vmatprep.subr.bf16.mxu0 %v8679_v36  ;;  %7163 = vmatprep.subr.bf16.mxu1 %v8681_v13  ;;  %v899_v1 = vld [vmem:[#allocation2 + $0x16f8] sm:$0xff]  ;;  %v8726_v36 = vcombine.low %v886_v25, %v890_v53  ;;  %v8728_v13 = vcombine.low %v887_v57, %v891_v0  ;;  %v8775_v25 = vcombine.high %v934_v48, %v938_v49  ;;  %v942_v57 = vld [vmem:[#allocation2 + $0x1850] sm:$0xff] }
 0x36a   :  { %v8737_v4 = vcombine.high %v895_v12, %v899_v1  ;;  %v946_v0 = vld [vmem:[#allocation2 + $0x1870] sm:$0xff] }
 0x36c   :  { %6836 = vmatpush1.bf16.msra.mxu0 %v8678_v7  ;;  %7164 = vmatpush1.bf16.msra.mxu1 %v8680_v8  ;;  %v903_v7 = vld [vmem:[#allocation2 + $0x1718] sm:$0xff] }
 0x36d   :  { %6837 = vmatprep.subr.bf16.mxu0 %v8687_v11  ;;  %7165 = vmatprep.subr.bf16.mxu1 %v8689_v14  ;;  %v907_v8 = vld [vmem:[#allocation2 + $0x1738] sm:$0xff]  ;;  %v8734_v11 = vcombine.low %v894_v61, %v898_v62  ;;  %v8736_v14 = vcombine.low %v895_v12, %v899_v1  ;;  %v8783_v61 = vcombine.high %v942_v57, %v946_v0  ;;  %v950_v12 = vld [vmem:[#allocation2 + $0x1890] sm:$0xff] }
 0x36e   :  { %v8745_v18 = vcombine.high %v903_v7, %v907_v8  ;;  %v954_v1 = vld [vmem:[#allocation2 + $0x18b0] sm:$0xff] }
 0x370   :  { %6838 = vmatpush1.bf16.msra.mxu0 %v8686_v19  ;;  %7166 = vmatpush1.bf16.msra.mxu1 %v8688_v21  ;;  %v911_v19 = vld [vmem:[#allocation2 + $0x1758] sm:$0xff] }
 0x371   :  { %6839 = vmatprep.subr.bf16.mxu0 %v8695_v24  ;;  %7167 = vmatprep.subr.bf16.mxu1 %v8697_v26  ;;  %v915_v21 = vld [vmem:[#allocation2 + $0x1778] sm:$0xff]  ;;  %v8742_v24 = vcombine.low %v902_v5, %v906_v6  ;;  %v8744_v26 = vcombine.low %v903_v7, %v907_v8  ;;  %v8791_v5 = vcombine.high %v950_v12, %v954_v1  ;;  %v958_v7 = vld [vmem:[#allocation2 + $0x18d0] sm:$0xff] }
 0x372   :  { %v8753_v30 = vcombine.high %v911_v19, %v915_v21  ;;  %v962_v8 = vld [vmem:[#allocation2 + $0x18f0] sm:$0xff] }
 0x374   :  { %6840 = vmatpush1.bf16.msra.mxu0 %v8694_v34  ;;  %7168 = vmatpush1.bf16.msra.mxu1 %v8696_v35  ;;  %v919_v34 = vld [vmem:[#allocation2 + $0x1798] sm:$0xff] }
 0x375   :  { %6841 = vmatprep.subr.bf16.mxu0 %v8703_v63  ;;  %7169 = vmatprep.subr.bf16.mxu1 %v8705_v37  ;;  %v923_v35 = vld [vmem:[#allocation2 + $0x17b8] sm:$0xff]  ;;  %v8750_v63 = vcombine.low %v910_v15, %v914_v17  ;;  %v8752_v37 = vcombine.low %v911_v19, %v915_v21  ;;  %v966_v17 = vld [vmem:[#allocation2 + $0x1910] sm:$0xff] }
 0x376   :  { %v8761_v28 = vcombine.high %v919_v34, %v923_v35  ;;  %v970_v19 = vld [vmem:[#allocation2 + $0x1930] sm:$0xff]  ;;  %v967_v21 = vld [vmem:[#allocation2 + $0x1918] sm:$0xff] }
 0x378   :  { %6842 = vmatpush1.bf16.msra.mxu0 %v8702_v55  ;;  %7170 = vmatpush1.bf16.msra.mxu1 %v8704_v39  ;;  %v927_v55 = vld [vmem:[#allocation2 + $0x17d8] sm:$0xff] }
 0x379   :  { %6843 = vmatprep.subr.bf16.mxu0 %v8711_v42  ;;  %7171 = vmatprep.subr.bf16.mxu1 %v8713_v45  ;;  %v931_v39 = vld [vmem:[#allocation2 + $0x17f8] sm:$0xff]  ;;  %v8758_v42 = vcombine.low %v918_v32, %v922_v29  ;;  %v8760_v45 = vcombine.low %v919_v34, %v923_v35  ;;  %v974_v32 = vld [vmem:[#allocation2 + $0x1950] sm:$0xff] }
 0x37a   :  { %v8769_v47 = vcombine.high %v927_v55, %v931_v39  ;;  %v978_v29 = vld [vmem:[#allocation2 + $0x1970] sm:$0xff]  ;;  %v975_v34 = vld [vmem:[#allocation2 + $0x1958] sm:$0xff] }
 0x37b   :  { %v979_v35 = vld [vmem:[#allocation2 + $0x1978] sm:$0xff] }
 0x37c   :  { %6844 = vmatpush1.bf16.msra.mxu0 %v8710_v16  ;;  %7172 = vmatpush1.bf16.msra.mxu1 %v8712_v56  ;;  %v935_v16 = vld [vmem:[#allocation2 + $0x1818] sm:$0xff] }
 0x37d   :  { %6845 = vmatprep.subr.bf16.mxu0 %v8719_v54  ;;  %7173 = vmatprep.subr.bf16.mxu1 %v8721_v2  ;;  %v939_v56 = vld [vmem:[#allocation2 + $0x1838] sm:$0xff]  ;;  %v8766_v54 = vcombine.low %v926_v38, %v930_v40  ;;  %v8768_v2 = vcombine.low %v927_v55, %v931_v39  ;;  %v982_v38 = vld [vmem:[#allocation2 + $0x1990] sm:$0xff] }
 0x37e   :  { %v8777_v53 = vcombine.high %v935_v16, %v939_v56  ;;  %v986_v40 = vld [vmem:[#allocation2 + $0x19b0] sm:$0xff]  ;;  %v983_v55 = vld [vmem:[#allocation2 + $0x1998] sm:$0xff] }
 0x37f   :  { %v987_v39 = vld [vmem:[#allocation2 + $0x19b8] sm:$0xff] }
 0x380   :  { %6846 = vmatpush1.bf16.msra.mxu0 %v8718_v10  ;;  %7174 = vmatpush1.bf16.msra.mxu1 %v8720_v58  ;;  %v943_v10 = vld [vmem:[#allocation2 + $0x1858] sm:$0xff] }
 0x381   :  { %6847 = vmatprep.subr.bf16.mxu0 %v8727_v23  ;;  %7175 = vmatprep.subr.bf16.mxu1 %v8729_v60  ;;  %v947_v58 = vld [vmem:[#allocation2 + $0x1878] sm:$0xff]  ;;  %v8774_v23 = vcombine.low %v934_v48, %v938_v49  ;;  %v8776_v60 = vcombine.low %v935_v16, %v939_v56  ;;  %v990_v48 = vld [vmem:[#allocation2 + $0x19d0] sm:$0xff] }
 0x382   :  { %v8785_v62 = vcombine.high %v943_v10, %v947_v58  ;;  %v994_v49 = vld [vmem:[#allocation2 + $0x19f0] sm:$0xff]  ;;  %v991_v16 = vld [vmem:[#allocation2 + $0x19d8] sm:$0xff] }
 0x383   :  { %v995_v56 = vld [vmem:[#allocation2 + $0x19f8] sm:$0xff] }
 0x384   :  { %6848 = vmatpush1.bf16.msra.mxu0 %v8726_v36  ;;  %7176 = vmatpush1.bf16.msra.mxu1 %v8728_v13  ;;  %v951_v36 = vld [vmem:[#allocation2 + $0x1898] sm:$0xff] }
 0x385   :  { %6849 = vmatprep.subr.bf16.mxu0 %v8735_v3  ;;  %7177 = vmatprep.subr.bf16.mxu1 %v8737_v4  ;;  %v955_v13 = vld [vmem:[#allocation2 + $0x18b8] sm:$0xff]  ;;  %v8782_v3 = vcombine.low %v942_v57, %v946_v0  ;;  %v8784_v4 = vcombine.low %v943_v10, %v947_v58  ;;  %v998_v57 = vld [vmem:[#allocation2 + $0x1a10] sm:$0xff] }
 0x386   :  { %v8793_v6 = vcombine.high %v951_v36, %v955_v13  ;;  %v1002_v0 = vld [vmem:[#allocation2 + $0x1a30] sm:$0xff]  ;;  %v999_v10 = vld [vmem:[#allocation2 + $0x1a18] sm:$0xff] }
 0x387   :  { %v1003_v58 = vld [vmem:[#allocation2 + $0x1a38] sm:$0xff] }
 0x388   :  { %6850 = vmatpush1.bf16.msra.mxu0 %v8734_v11  ;;  %7178 = vmatpush1.bf16.msra.mxu1 %v8736_v14  ;;  %v959_v11 = vld [vmem:[#allocation2 + $0x18d8] sm:$0xff] }
 0x389   :  { %6851 = vmatprep.subr.bf16.mxu0 %v8743_v33  ;;  %7179 = vmatprep.subr.bf16.mxu1 %v8745_v18  ;;  %v963_v14 = vld [vmem:[#allocation2 + $0x18f8] sm:$0xff]  ;;  %v8790_v33 = vcombine.low %v950_v12, %v954_v1  ;;  %v8799_v18 = vcombine.high %v958_v7, %v962_v8  ;;  %v1006_v12 = vld [vmem:[#allocation2 + $0x1a50] sm:$0xff] }
 0x38a   :  { %v8801_v15 = vcombine.high %v959_v11, %v963_v14  ;;  %v1010_v1 = vld [vmem:[#allocation2 + $0x1a70] sm:$0xff] }
 0x38c   :  { %6852 = vmatpush1.bf16.msra.mxu0 %v8742_v24  ;;  %7180 = vmatpush1.bf16.msra.mxu1 %v8744_v26  ;;  %v971_v24 = vld [vmem:[#allocation2 + $0x1938] sm:$0xff]  ;;  %v8798_v26 = vcombine.low %v958_v7, %v962_v8  ;;  %v1014_v7 = vld [vmem:[#allocation2 + $0x1a90] sm:$0xff] }
 0x38d   :  { %6853 = vmatprep.subr.bf16.mxu0 %v8751_v27  ;;  %7181 = vmatprep.subr.bf16.mxu1 %v8753_v30  ;;  %v8800_v27 = vcombine.low %v959_v11, %v963_v14  ;;  %v8807_v30 = vcombine.high %v966_v17, %v970_v19  ;;  %v1018_v8 = vld [vmem:[#allocation2 + $0x1ab0] sm:$0xff]  ;;  %v1015_v11 = vld [vmem:[#allocation2 + $0x1a98] sm:$0xff] }
 0x38e   :  { %v1019_v14 = vld [vmem:[#allocation2 + $0x1ab8] sm:$0xff] }
 0x390   :  { %6854 = vmatpush1.bf16.msra.mxu0 %v8750_v63  ;;  %7182 = vmatpush1.bf16.msra.mxu1 %v8752_v37  ;;  %v8806_v63 = vcombine.low %v966_v17, %v970_v19  ;;  %v8808_v37 = vcombine.low %v967_v21, %v971_v24  ;;  %v1022_v17 = vld [vmem:[#allocation2 + $0x1ad0] sm:$0xff] }
 0x391   :  { %6855 = vmatprep.subr.bf16.mxu0 %v8759_v51  ;;  %7183 = vmatprep.subr.bf16.mxu1 %v8761_v28  ;;  %v8815_v51 = vcombine.high %v974_v32, %v978_v29  ;;  %v8817_v28 = vcombine.high %v975_v34, %v979_v35  ;;  %v1026_v19 = vld [vmem:[#allocation2 + $0x1af0] sm:$0xff] }
 0x394   :  { %6856 = vmatpush1.bf16.msra.mxu0 %v8758_v42  ;;  %7184 = vmatpush1.bf16.msra.mxu1 %v8760_v45  ;;  %v8814_v42 = vcombine.low %v974_v32, %v978_v29  ;;  %v8816_v45 = vcombine.low %v975_v34, %v979_v35  ;;  %v1030_v32 = vld [vmem:[#allocation2 + $0x1b10] sm:$0xff]  ;;  %v1031_v34 = vld [vmem:[#allocation2 + $0x1b18] sm:$0xff] }
 0x395   :  { %6857 = vmatprep.subr.bf16.mxu0 %v8767_v59  ;;  %7185 = vmatprep.subr.bf16.mxu1 %v8769_v47  ;;  %v8823_v59 = vcombine.high %v982_v38, %v986_v40  ;;  %v8825_v47 = vcombine.high %v983_v55, %v987_v39  ;;  %v1034_v29 = vld [vmem:[#allocation2 + $0x1b30] sm:$0xff]  ;;  %v1035_v35 = vld [vmem:[#allocation2 + $0x1b38] sm:$0xff] }
 0x398   :  { %6858 = vmatpush1.bf16.msra.mxu0 %v8766_v54  ;;  %7186 = vmatpush1.bf16.msra.mxu1 %v8768_v2  ;;  %v8822_v54 = vcombine.low %v982_v38, %v986_v40  ;;  %v8824_v2 = vcombine.low %v983_v55, %v987_v39  ;;  %v1038_v38 = vld [vmem:[#allocation2 + $0x1b50] sm:$0xff]  ;;  %v1039_v55 = vld [vmem:[#allocation2 + $0x1b58] sm:$0xff] }
 0x399   :  { %6868 = vmatprep.subr.bf16.mxu0 %v8775_v25  ;;  %7196 = vmatprep.subr.bf16.mxu1 %v8777_v53  ;;  %v8831_v25 = vcombine.high %v990_v48, %v994_v49  ;;  %v8833_v53 = vcombine.high %v991_v16, %v995_v56  ;;  %v1042_v40 = vld [vmem:[#allocation2 + $0x1b70] sm:$0xff]  ;;  %v1043_v39 = vld [vmem:[#allocation2 + $0x1b78] sm:$0xff] }
 0x39b   :  { %6860 = vmatmul.mubr.bf16.vlgmr.msra.gmra.mrb[4].mxu0 %v9616_v41  ;;  %7188 = vmatmul.mubr.bf16.vlgmr.msra.gmra.mrb[4].mxu1 %v9616_v41  ;;  %v8792_v41 = vcombine.low %v951_v36, %v955_v13  ;;  %v1007_v36 = vld [vmem:[#allocation2 + $0x1a58] sm:$0xff] }
 0x39c   :  { %6869 = vmatpush1.bf16.msra.mxu0 %v8774_v23  ;;  %7197 = vmatpush1.bf16.msra.mxu1 %v8776_v60  ;;  %v8830_v23 = vcombine.low %v990_v48, %v994_v49  ;;  %v8832_v60 = vcombine.low %v991_v16, %v995_v56  ;;  %v1011_v13 = vld [vmem:[#allocation2 + $0x1a78] sm:$0xff]  ;;  %v1046_v48 = vld [vmem:[#allocation2 + $0x1b90] sm:$0xff] }
 0x39d   :  { %6870 = vmatprep.subr.bf16.mxu0 %v8783_v61  ;;  %7198 = vmatprep.subr.bf16.mxu1 %v8785_v62  ;;  %v8839_v61 = vcombine.high %v998_v57, %v1002_v0  ;;  %v8841_v62 = vcombine.high %v999_v10, %v1003_v58  ;;  %v1050_v49 = vld [vmem:[#allocation2 + $0x1bb0] sm:$0xff]  ;;  %v1047_v16 = vld [vmem:[#allocation2 + $0x1b98] sm:$0xff] }
 0x39e   :  { %6900 = vmatprep.mubr.bf16.mxu0 %v9618_v52  ;;  %7228 = vmatprep.mubr.bf16.mxu1 %v9618_v52  ;;  %v8809_v52 = vcombine.high %v967_v21, %v971_v24  ;;  %v1023_v21 = vld [vmem:[#allocation2 + $0x1ad8] sm:$0xff] }
 0x39f   :  { %v1027_v24 = vld [vmem:[#allocation2 + $0x1af8] sm:$0xff] }
 0x3a0   :  { %6871 = vmatpush1.bf16.msra.mxu0 %v8782_v3  ;;  %7199 = vmatpush1.bf16.msra.mxu1 %v8784_v4  ;;  %v8838_v3 = vcombine.low %v998_v57, %v1002_v0  ;;  %v8840_v4 = vcombine.low %v999_v10, %v1003_v58  ;;  %v1051_v56 = vld [vmem:[#allocation2 + $0x1bb8] sm:$0xff]  ;;  %v1054_v57 = vld [vmem:[#allocation2 + $0x1bd0] sm:$0xff] }
 0x3a1   :  { %6872 = vmatprep.subr.bf16.mxu0 %v8791_v5  ;;  %7200 = vmatprep.subr.bf16.mxu1 %v8793_v6  ;;  %v8847_v5 = vcombine.high %v1006_v12, %v1010_v1  ;;  %v8849_v6 = vcombine.high %v1007_v36, %v1011_v13  ;;  %v1058_v0 = vld [vmem:[#allocation2 + $0x1bf0] sm:$0xff]  ;;  %v1055_v10 = vld [vmem:[#allocation2 + $0x1bd8] sm:$0xff] }
 0x3a2   :  { %v1059_v58 = vld [vmem:[#allocation2 + $0x1bf8] sm:$0xff] }
 0x3a4   :  { %6873 = vmatpush1.bf16.msra.mxu0 %v8790_v33  ;;  %7201 = vmatpush1.bf16.msra.mxu1 %v8792_v41  ;;  %v8846_v33 = vcombine.low %v1006_v12, %v1010_v1  ;;  %v8848_v41 = vcombine.low %v1007_v36, %v1011_v13  ;;  %v1062_v12 = vld [vmem:[#allocation2 + $0x1c10] sm:$0xff]  ;;  %v1063_v36 = vld [vmem:[#allocation2 + $0x1c18] sm:$0xff] }
 0x3a5   :  { %6874 = vmatprep.subr.bf16.mxu0 %v8799_v18  ;;  %7202 = vmatprep.subr.bf16.mxu1 %v8801_v15  ;;  %v8855_v18 = vcombine.high %v1014_v7, %v1018_v8  ;;  %v8857_v15 = vcombine.high %v1015_v11, %v1019_v14  ;;  %v1066_v1 = vld [vmem:[#allocation2 + $0x1c30] sm:$0xff]  ;;  %v1067_v13 = vld [vmem:[#allocation2 + $0x1c38] sm:$0xff] }
 0x3a8   :  { %6875 = vmatpush1.bf16.msra.mxu0 %v8798_v26  ;;  %7203 = vmatpush1.bf16.msra.mxu1 %v8800_v27  ;;  %v8854_v26 = vcombine.low %v1014_v7, %v1018_v8  ;;  %v8856_v27 = vcombine.low %v1015_v11, %v1019_v14  ;;  %v1070_v7 = vld [vmem:[#allocation2 + $0x1c50] sm:$0xff]  ;;  %v1071_v11 = vld [vmem:[#allocation2 + $0x1c58] sm:$0xff] }
 0x3a9   :  { %6876 = vmatprep.subr.bf16.mxu0 %v8807_v30  ;;  %7204 = vmatprep.subr.bf16.mxu1 %v8809_v52  ;;  %v8863_v30 = vcombine.high %v1022_v17, %v1026_v19  ;;  %v8865_v52 = vcombine.high %v1023_v21, %v1027_v24  ;;  %v1074_v8 = vld [vmem:[#allocation2 + $0x1c70] sm:$0xff]  ;;  %v1075_v14 = vld [vmem:[#allocation2 + $0x1c78] sm:$0xff] }
 0x3ac   :  { %6877 = vmatpush1.bf16.msra.mxu0 %v8806_v63  ;;  %7205 = vmatpush1.bf16.msra.mxu1 %v8808_v37  ;;  %v8862_v63 = vcombine.low %v1022_v17, %v1026_v19  ;;  %v8864_v37 = vcombine.low %v1023_v21, %v1027_v24  ;;  %v1078_v17 = vld [vmem:[#allocation2 + $0x1c90] sm:$0xff]  ;;  %v1079_v21 = vld [vmem:[#allocation2 + $0x1c98] sm:$0xff] }
 0x3ad   :  { %6878 = vmatprep.subr.bf16.mxu0 %v8815_v51  ;;  %7206 = vmatprep.subr.bf16.mxu1 %v8817_v28  ;;  %v8871_v51 = vcombine.high %v1030_v32, %v1034_v29  ;;  %v8873_v28 = vcombine.high %v1031_v34, %v1035_v35  ;;  %v1082_v19 = vld [vmem:[#allocation2 + $0x1cb0] sm:$0xff]  ;;  %v1083_v24 = vld [vmem:[#allocation2 + $0x1cb8] sm:$0xff] }
 0x3b0   :  { %6879 = vmatpush1.bf16.msra.mxu0 %v8814_v42  ;;  %7207 = vmatpush1.bf16.msra.mxu1 %v8816_v45  ;;  %v8870_v42 = vcombine.low %v1030_v32, %v1034_v29  ;;  %v8872_v45 = vcombine.low %v1031_v34, %v1035_v35  ;;  %v1086_v32 = vld [vmem:[#allocation2 + $0x1cd0] sm:$0xff]  ;;  %v1087_v34 = vld [vmem:[#allocation2 + $0x1cd8] sm:$0xff] }
 0x3b1   :  { %6880 = vmatprep.subr.bf16.mxu0 %v8823_v59  ;;  %7208 = vmatprep.subr.bf16.mxu1 %v8825_v47  ;;  %v8879_v59 = vcombine.high %v1038_v38, %v1042_v40  ;;  %v8881_v47 = vcombine.high %v1039_v55, %v1043_v39  ;;  %v1090_v29 = vld [vmem:[#allocation2 + $0x1cf0] sm:$0xff]  ;;  %v1091_v35 = vld [vmem:[#allocation2 + $0x1cf8] sm:$0xff] }
 0x3b4   :  { %6881 = vmatpush1.bf16.msra.mxu0 %v8822_v54  ;;  %7209 = vmatpush1.bf16.msra.mxu1 %v8824_v2  ;;  %v8878_v54 = vcombine.low %v1038_v38, %v1042_v40  ;;  %v8880_v2 = vcombine.low %v1039_v55, %v1043_v39  ;;  %v1098_v38 = vld [vmem:[#allocation2 + $0x1d30] sm:$0xff]  ;;  %v1095_v40 = vld [vmem:[#allocation2 + $0x1d18] sm:$0xff]  ;;  %v8926_v39 = vcombine.low %v1086_v32, %v1090_v29 }
 0x3b5   :  { %6882 = vmatprep.subr.bf16.mxu0 %v8831_v25  ;;  %7210 = vmatprep.subr.bf16.mxu1 %v8833_v53  ;;  %v8887_v25 = vcombine.high %v1046_v48, %v1050_v49  ;;  %v8889_v53 = vcombine.high %v1047_v16, %v1051_v56  ;;  %v1099_v55 = vld [vmem:[#allocation2 + $0x1d38] sm:$0xff] }
 0x3b8   :  { %6883 = vmatpush1.bf16.msra.mxu0 %v8830_v23  ;;  %7211 = vmatpush1.bf16.msra.mxu1 %v8832_v60  ;;  %v8886_v23 = vcombine.low %v1046_v48, %v1050_v49  ;;  %v8888_v60 = vcombine.low %v1047_v16, %v1051_v56  ;;  %v1103_v48 = vld [vmem:[#allocation2 + $0x1d58] sm:$0xff]  ;;  %v8936_v56 = vcombine.low %v1095_v40, %v1099_v55 }
 0x3b9   :  { %6884 = vmatprep.subr.bf16.mxu0 %v8839_v61  ;;  %7212 = vmatprep.subr.bf16.mxu1 %v8841_v62  ;;  %v8895_v61 = vcombine.high %v1054_v57, %v1058_v0  ;;  %v8897_v62 = vcombine.high %v1055_v10, %v1059_v58  ;;  %v1107_v49 = vld [vmem:[#allocation2 + $0x1d78] sm:$0xff] }
 0x3bc   :  { %6885 = vmatpush1.bf16.msra.mxu0 %v8838_v3  ;;  %7213 = vmatpush1.bf16.msra.mxu1 %v8840_v4  ;;  %v8894_v3 = vcombine.low %v1054_v57, %v1058_v0  ;;  %v8896_v4 = vcombine.low %v1055_v10, %v1059_v58  ;;  %v1132_v57 = vsub.s32 1, %v9490_v44  ;;  %v1111_v0 = vld [vmem:[#allocation2 + $0x1d98] sm:$0xff]  ;;  %v9678_v58 = vld [vmem:[#allocation5] sm:$0xff] }
 0x3bd   :  { %6886 = vmatprep.subr.bf16.mxu0 %v8847_v5  ;;  %7214 = vmatprep.subr.bf16.mxu1 %v8849_v6  ;;  %v8903_v5 = vcombine.high %v1062_v12, %v1066_v1  ;;  %v8905_v6 = vcombine.high %v1063_v36, %v1067_v13  ;;  %v1115_v10 = vld [vmem:[#allocation2 + $0x1db8] sm:$0xff] }
 0x3c0   :  { %6887 = vmatpush1.bf16.msra.mxu0 %v8846_v33  ;;  %7215 = vmatpush1.bf16.msra.mxu1 %v8848_v41  ;;  %v8902_v33 = vcombine.low %v1062_v12, %v1066_v1  ;;  %v8904_v41 = vcombine.low %v1063_v36, %v1067_v13  ;;  %v8953_v12 = vcombine.high %v1111_v0, %v1115_v10  ;;  %v1118_v1 = vld [vmem:[#allocation2 + $0x1dd0] sm:$0xff] }
 0x3c1   :  { %6888 = vmatprep.subr.bf16.mxu0 %v8855_v18  ;;  %7216 = vmatprep.subr.bf16.mxu1 %v8857_v15  ;;  %v8911_v18 = vcombine.high %v1070_v7, %v1074_v8  ;;  %v8913_v15 = vcombine.high %v1071_v11, %v1075_v14  ;;  %v1122_v36 = vld [vmem:[#allocation2 + $0x1df0] sm:$0xff]  ;;  %v1133_v13 = vrot.slane %v9678_v58, %v1132_v57 }
 0x3c4   :  { %6889 = vmatpush1.bf16.msra.mxu0 %v8854_v26  ;;  %7217 = vmatpush1.bf16.msra.mxu1 %v8856_v27  ;;  %v8910_v26 = vcombine.low %v1070_v7, %v1074_v8  ;;  %v8912_v27 = vcombine.low %v1071_v11, %v1075_v14  ;;  %v8952_v7 = vcombine.low %v1111_v0, %v1115_v10  ;;  %v9276_v0 = vld [vmem:[%s9911_s3 + $0xf8] sm:$0xff]  }
 0x3c5   :  { %6890 = vmatprep.subr.bf16.mxu0 %v8863_v30  ;;  %7218 = vmatprep.subr.bf16.mxu1 %v8865_v52  ;;  %v8919_v30 = vcombine.high %v1078_v17, %v1082_v19  ;;  %v8921_v52 = vcombine.high %v1079_v21, %v1083_v24  ;;  %v8959_v8 = vcombine.high %v1118_v1, %v1122_v36 }
 0x3c6   :  { %v9116_v14 = vadd.f32 %v9657_v9, %v1133_v13  ;;  %v9249_v9 = vld [vmem:[%s9911_s3] sm:$0xff]  }
 0x3c8   :  { %6891 = vmatpush1.bf16.msra.mxu0 %v8862_v63  ;;  %7219 = vmatpush1.bf16.msra.mxu1 %v8864_v37  ;;  %v8918_v63 = vcombine.low %v1078_v17, %v1082_v19  ;;  %v8927_v37 = vcombine.high %v1086_v32, %v1090_v29  ;;  %v9248_v17 = vld [vmem:[%s9911_s3 + $0xc0] sm:$0xff]   ;;  %v7279_v19 = vmax.f32 %v9116_v14, 0.0  ;;  %v9254_v32 = vld [vmem:[%s9911_s3 + $0x88] sm:$0xff]   ;;  %v9255_v29 = vld [vmem:[%s9911_s3 + $0x50] sm:$0xff]  }
 0x3c9   :  { %6892 = vmatprep.subr.bf16.mxu0 %v8871_v51  ;;  %7220 = vmatprep.subr.bf16.mxu1 %v8873_v28  ;;  %v8929_v51 = vcombine.high %v1087_v34, %v1091_v35  ;;  %v1094_v28 = vld [vmem:[#allocation2 + $0x1d10] sm:$0xff]  ;;  %v9291_v14 = vld [vmem:[%s9911_s3 + $0x158] sm:$0xff]  }
 0x3ca   :  { %v8934_v16 = vcombine.low %v1094_v28, %v1098_v38 }
 0x3cc   :  { %6893 = vmatpush1.bf16.msra.mxu0 %v8870_v42  ;;  %7221 = vmatpush1.bf16.msra.mxu1 %v8872_v45  ;;  %v8928_v42 = vcombine.low %v1087_v34, %v1091_v35  ;;  %v8935_v45 = vcombine.high %v1094_v28, %v1098_v38  ;;  %v9257_v34 = vld [vmem:[%s9911_s3 + $0x10] sm:$0xff]   ;;  %v9263_v28 = vld [vmem:[%s9911_s3 + $0x60] sm:$0xff]  }
 0x3cd   :  { %6894 = vmatprep.subr.bf16.mxu0 %v8879_v59  ;;  %7222 = vmatprep.subr.bf16.mxu1 %v8881_v47  ;;  %v1102_v59 = vld [vmem:[#allocation2 + $0x1d50] sm:$0xff]  ;;  %v9264_v38 = vld [vmem:[%s9911_s3 + $0xe0] sm:$0xff]  }
 0x3ce   :  { %v1106_v47 = vld [vmem:[#allocation2 + $0x1d70] sm:$0xff] }
 0x3cf   :  { %v9258_v35 = vld [vmem:[%s9911_s3 + $0x90] sm:$0xff]  }
 0x3d0   :  { %6895 = vmatpush1.bf16.msra.mxu0 %v8878_v54  ;;  %7223 = vmatpush1.bf16.msra.mxu1 %v8880_v2  ;;  %v8943_v54 = vcombine.high %v1102_v59, %v1106_v47  ;;  %v8945_v2 = vcombine.high %v1103_v48, %v1107_v49 }
 0x3d1   :  { %6896 = vmatprep.subr.bf16.mxu0 %v8887_v25  ;;  %7224 = vmatprep.subr.bf16.mxu1 %v8889_v53  ;;  %v1110_v25 = vld [vmem:[#allocation2 + $0x1d90] sm:$0xff] }
 0x3d2   :  { %v1114_v53 = vld [vmem:[#allocation2 + $0x1db0] sm:$0xff] }
 0x3d4   :  { %6897 = vmatpush1.bf16.msra.mxu0 %v8886_v23  ;;  %7225 = vmatpush1.bf16.msra.mxu1 %v8888_v60  ;;  %v1140_v23 = vsub.s32 3, %v9490_v44  ;;  %v8942_v60 = vcombine.low %v1102_v59, %v1106_v47  ;;  %v9269_v59 = vld [vmem:[%s9911_s3 + $0x28] sm:$0xff]  }
 0x3d5   :  { %6898 = vmatprep.subr.bf16.mxu0 %v8895_v61  ;;  %7226 = vmatprep.subr.bf16.mxu1 %v8897_v62  ;;  %v8944_v61 = vcombine.low %v1103_v48, %v1107_v49  ;;  %v8951_v62 = vcombine.high %v1110_v25, %v1114_v53  ;;  %v9270_v48 = vld [vmem:[%s9911_s3 + $0xa8] sm:$0xff]   ;;  %v9271_v49 = vld [vmem:[%s9911_s3 + $0x70] sm:$0xff]  }
 0x3d8   :  { %6899 = vmatpush1.bf16.msra.mxu0 %v8894_v3  ;;  %7227 = vmatpush1.bf16.msra.mxu1 %v8896_v4  ;;  %v1119_v3 = vld [vmem:[#allocation2 + $0x1dd8] sm:$0xff] }
 0x3d9   :  { %6909 = vmatprep.subr.bf16.mxu0 %v8903_v5  ;;  %7237 = vmatprep.subr.bf16.mxu1 %v8905_v6  ;;  %v1123_v4 = vld [vmem:[#allocation2 + $0x1df8] sm:$0xff]  ;;  %v1141_v5 = vrot.slane %v9678_v58, %v1140_v23  ;;  %v8950_v6 = vcombine.low %v1110_v25, %v1114_v53  ;;  %v9274_v25 = vld [vmem:[%s9911_s3 + $0xb0] sm:$0xff]  }
 0x3da   :  { %v8961_v11 = vcombine.high %v1119_v3, %v1123_v4  ;;  %v9275_v53 = vld [vmem:[%s9911_s3 + $0x78] sm:$0xff]  }
 0x3db   :  { %6901 = vmatmul.mubr.bf16.vlgmr.msra.gmra.mrb[4].mxu0 %v9626_v22  ;;  %7229 = vmatmul.mubr.bf16.vlgmr.msra.gmra.mrb[4].mxu1 %v9626_v22  ;;  %v8920_v22 = vcombine.low %v1079_v21, %v1083_v24  ;;  %v9251_v24 = vld [vmem:[%s9911_s3 + $0x48] sm:$0xff]   ;;  %v9278_v23 = vld [vmem:[%s9911_s3 + $0xb8] sm:$0xff]  }
 0x3dc   :  { %6910 = vmatpush1.bf16.msra.mxu0 %v8902_v33  ;;  %7238 = vmatpush1.bf16.msra.mxu1 %v8904_v41  ;;  %v9118_v33 = vadd.f32 %v9659_v31, %v1141_v5  ;;  %v8958_v41 = vcombine.low %v1118_v1, %v1122_v36  ;;  %v9250_v31 = vld [vmem:[%s9911_s3 + $0x80] sm:$0xff]   ;;  %v9283_v36 = vld [vmem:[%s9911_s3 + $0x148] sm:$0xff]  }
 0x3dd   :  { %6911 = vmatprep.subr.bf16.mxu0 %v8911_v18  ;;  %7239 = vmatprep.subr.bf16.mxu1 %v8913_v15  ;;  %v8960_v18 = vcombine.low %v1119_v3, %v1123_v4  ;;  %v9247_v15 = vld [vmem:[%s9911_s3 + $0x40] sm:$0xff]   ;;  %v9284_v3 = vld [vmem:[%s9911_s3 + $0x1c8] sm:$0xff]  }
 0x3de   :  { %6941 = vmatprep.mubr.bf16.mxu0 %v9415_v46  ;;  %7269 = vmatprep.mubr.bf16.mxu1 %v9415_v46  ;;  %v8937_v46 = vcombine.high %v1095_v40, %v1099_v55  ;;  %v7281_v21 = vmax.f32 %v9118_v33, 0.0  ;;  %v9265_v40 = vld [vmem:[%s9911_s3 + $0x20] sm:$0xff]   ;;  %v1128_v55 = vsub.s32 0, %v9490_v44  ;;  %v9285_v4 = vld [vmem:[%s9911_s3 + $0x108] sm:$0xff]   ;;  %v9292_v33 = vld [vmem:[%s9911_s3 + $0x1d8] sm:$0xff]  }
 0x3df   :  { %v9282_v1 = vld [vmem:[%s9911_s3 + $0x180] sm:$0xff]   ;;  %v9286_v5 = vld [vmem:[%s9911_s3 + $0x188] sm:$0xff]  }
 0x3e0   :  { %6912 = vmatpush1.bf16.msra.mxu0 %v8910_v26  ;;  %7240 = vmatpush1.bf16.msra.mxu1 %v8912_v27  ;;  %v7287_v26 = vpack.c.bf16 %v7279_v19, %v7279_v19  ;;  %v9252_v27 = vld [vmem:[%s9911_s3 + $0xc8] sm:$0xff]   ;;  %v1129_v47 = vrot.slane %v9678_v58, %v1128_v55  ;;  %v9297_v19 = vld [vmem:[%s9911_s3 + $0x120] sm:$0xff]  }
 0x3e1   :  { %6913 = vmatprep.subr.bf16.mxu0 %v8919_v30  ;;  %7241 = vmatprep.subr.bf16.mxu1 %v8921_v52  ;;  %v7289_v30 = vpack.c.bf16 %v7281_v21, %v7281_v21  ;;  %v9253_v52 = vld [vmem:[%s9911_s3 + $0x8] sm:$0xff]   ;;  %v9298_v21 = vld [vmem:[%s9911_s3 + $0x1a0] sm:$0xff]  }
 0x3e4   :  { %6914 = vmatpush1.bf16.msra.mxu0 %v8918_v63  ;;  %7242 = vmatpush1.bf16.msra.mxu1 %v8920_v22  ;;  %v9259_v63 = vld [vmem:[%s9911_s3 + $0x58] sm:$0xff]  }
 0x3e5   :  { %6915 = vmatprep.subr.bf16.mxu0 %v8927_v37  ;;  %7243 = vmatprep.subr.bf16.mxu1 %v8929_v51  ;;  %v9260_v22 = vld [vmem:[%s9911_s3 + $0xd8] sm:$0xff]  }
 0x3e6   :  { %v9261_v37 = vld [vmem:[%s9911_s3 + $0x18] sm:$0xff]  }
 0x3e7   :  { %v9262_v51 = vld [vmem:[%s9911_s3 + $0x98] sm:$0xff]  }
 0x3e8   :  { %6916 = vmatpush1.bf16.msra.mxu0 %v8926_v39  ;;  %7244 = vmatpush1.bf16.msra.mxu1 %v8928_v42  ;;  %v9266_v39 = vld [vmem:[%s9911_s3 + $0xa0] sm:$0xff]   ;;  %v9267_v42 = vld [vmem:[%s9911_s3 + $0x68] sm:$0xff]  }
 0x3e9   :  { %6917 = vmatprep.subr.bf16.mxu0 %v8935_v45  ;;  %7245 = vmatprep.subr.bf16.mxu1 %v8937_v46  ;;  %v1136_v45 = vsub.s32 2, %v9490_v44  ;;  %v9268_v46 = vld [vmem:[%s9911_s3 + $0xe8] sm:$0xff]  }
 0x3ec   :  { %6918 = vmatpush1.bf16.msra.mxu0 %v8934_v16  ;;  %7246 = vmatpush1.bf16.msra.mxu1 %v8936_v56  ;;  %v1137_v16 = vrot.slane %v9678_v58, %v1136_v45  ;;  %v9272_v56 = vld [vmem:[%s9911_s3 + $0xf0] sm:$0xff]  }
 0x3ed   :  { %6919 = vmatprep.subr.bf16.mxu0 %v8943_v54  ;;  %7247 = vmatprep.subr.bf16.mxu1 %v8945_v2  ;;  %v9273_v54 = vld [vmem:[%s9911_s3 + $0x30] sm:$0xff]   ;;  %v9115_v2 = vadd.f32 %v9653_v20, %v1129_v47  ;;  %v9277_v20 = vld [vmem:[%s9911_s3 + $0x38] sm:$0xff]  }
 0x3ee   :  { %v9117_v57 = vadd.f32 %v9655_v43, %v1137_v16  ;;  %v9279_v43 = vld [vmem:[%s9911_s3 + $0x140] sm:$0xff]  }
 0x3ef   :  { %v7278_v10 = vmax.f32 %v9115_v2, 0.0 }
 0x3f0   :  { %6920 = vmatpush1.bf16.msra.mxu0 %v8942_v60  ;;  %7248 = vmatpush1.bf16.msra.mxu1 %v8944_v61  ;;  %v7280_v60 = vmax.f32 %v9117_v57, 0.0  ;;  %v9280_v61 = vld [vmem:[%s9911_s3 + $0x1c0] sm:$0xff]  }
 0x3f1   :  { %6921 = vmatprep.subr.bf16.mxu0 %v8951_v62  ;;  %7249 = vmatprep.subr.bf16.mxu1 %v8953_v12  ;;  %v9281_v62 = vld [vmem:[%s9911_s3 + $0x100] sm:$0xff]   ;;  %v7286_v12 = vpack.c.bf16 %v7278_v10, %v7278_v10 }
 0x3f2   :  { %v7288_v13 = vpack.c.bf16 %v7280_v60, %v7280_v60  ;;  %v8962_v60 = vld [vmem:[#allocation7] ss:$0 sm:$0xff] }
 0x3f4   :  { %6922 = vmatpush1.bf16.msra.mxu0 %v8950_v6  ;;  %7250 = vmatpush1.bf16.msra.mxu1 %v8952_v7  ;;  %v9287_v6 = vld [vmem:[%s9911_s3 + $0x150] sm:$0xff]  }
 0x3f5   :  { %6923 = vmatprep.subr.bf16.mxu0 %v8959_v8  ;;  %7251 = vmatprep.subr.bf16.mxu1 %v8961_v11  ;;  %v9288_v7 = vld [vmem:[%s9911_s3 + $0x1d0] sm:$0xff]  }
 0x3f6   :  { %v9289_v8 = vld [vmem:[%s9911_s3 + $0x110] sm:$0xff]  }
 0x3f7   :  { %v9290_v11 = vld [vmem:[%s9911_s3 + $0x190] sm:$0xff]  }
 0x3f8   :  { %6924 = vmatpush1.bf16.msra.mxu0 %v8958_v41  ;;  %7252 = vmatpush1.bf16.msra.mxu1 %v8960_v18  ;;  %v9293_v41 = vld [vmem:[%s9911_s3 + $0x118] sm:$0xff]  }
 0x3f9   :  { %9027 = vmatprep.subr.bf16.mxu0 %v9247_v15  ;;  %9049 = vmatprep.subr.bf16.mxu1 %v9248_v17  ;;  %v9294_v18 = vld [vmem:[%s9911_s3 + $0x198] sm:$0xff]   ;;  %v9295_v15 = vld [vmem:[%s9911_s3 + $0x160] sm:$0xff]  }
 0x3fa   :  { %v9296_v17 = vld [vmem:[%s9911_s3 + $0x1e0] sm:$0xff]  }
 0x3fb   :  { %6942 = vmatmul.mubr.bf16.vlgmr.msra.gmra.mrb[4].mxu0 %v9635_v50  ;;  %7270 = vmatmul.mubr.bf16.vlgmr.msra.gmra.mrb[4].mxu1 %v9635_v50  ;;  %v9256_v50 = vld [vmem:[%s9911_s3 + $0xd0] sm:$0xff]  }
 0x3fc   :  { %9028 = vmatpush3.bf16.msra.mxu0 %v9249_v9  ;;  %7845 = vmatprep.mubr.bf16.mxu0 %v7287_v26  ;;  %v9299_v9 = vld [vmem:[%s9911_s3 + $0x168] sm:$0xff]  }
 0x3fd   :  { %9050 = vmatpush3.bf16.msra.mxu1 %v9250_v31  ;;  %7885 = vmatprep.mubr.bf16.mxu1 %v7289_v30  ;;  %v9300_v31 = vld [vmem:[%s9911_s3 + $0x1e8] sm:$0xff]   ;;  %v9304_v30 = vld [vmem:[%s9911_s3 + $0x1f0] sm:$0xff]  }
 0x3fe   :  { %9029 = vmatprep.subr.bf16.mxu0 %v9251_v24  ;;  %9051 = vmatprep.subr.bf16.mxu1 %v9252_v27  ;;  %v9301_v24 = vld [vmem:[%s9911_s3 + $0x128] sm:$0xff]   ;;  %v9303_v27 = vld [vmem:[%s9911_s3 + $0x170] sm:$0xff]  }
 0x3ff   :  { %v9302_v26 = vld [vmem:[%s9911_s3 + $0x1a8] sm:$0xff]  }
 0x400   :  { %9030 = vmatpush3.bf16.msra.mxu0 %v9253_v52  ;;  %v9305_v52 = vld [vmem:[%s9911_s3 + $0x130] sm:$0xff]  }
 0x401   :  { %9052 = vmatpush3.bf16.msra.mxu1 %v9254_v32  ;;  %9031 = vmatprep.subr.bf16.mxu0 %v9255_v29  ;;  %v9306_v32 = vld [vmem:[%s9911_s3 + $0x1b0] sm:$0xff]   ;;  %v9307_v29 = vld [vmem:[%s9911_s3 + $0x178] sm:$0xff]  }
 0x402   :  { %9053 = vmatprep.subr.bf16.mxu1 %v9256_v50  ;;  %v9308_v50 = vld [vmem:[%s9911_s3 + $0x1f8] sm:$0xff]  }
 0x404   :  { %9032 = vmatpush3.bf16.msra.mxu0 %v9257_v34  ;;  %v9309_v34 = vld [vmem:[%s9911_s3 + $0x138] sm:$0xff]  }
 0x405   :  { %9054 = vmatpush3.bf16.msra.mxu1 %v9258_v35  ;;  %9033 = vmatprep.subr.bf16.mxu0 %v9259_v63  ;;  %v9310_v35 = vld [vmem:[%s9911_s3 + $0x1b8] sm:$0xff]   ;;  %v1144_v63 = vsub.s32 4, %v9490_v44  ;;  %s9416_s3 = smov [#allocation8]  }
 0x406   :  { %9055 = vmatprep.subr.bf16.mxu1 %v9260_v22  ;;  %v1152_v22 = vsub.s32 6, %v9490_v44  ;;  %s7992_s23 = sshll.u32 %s9416_s3, 4  ;;  %s7993_s23 = int_to_ptr.vmem [resolvable:$true] %s7992_s23 }
 0x407   :  { %s9381_s24 = scalar_lea.vmem %s7993_s23, 32  ;;  %p9386_p11 = scmp.lt.s32.totalorder %s7993_s23, %s7993_s23 }
 0x408   :  { %9034 = vmatpush3.bf16.msra.mxu0 %v9261_v37  ;;  %v1148_v37 = vsub.s32 5, %v9490_v44  ;;  %p9382_p10 = scmp.ne.s32.totalorder %s7993_s23, %s9381_s24  ;;  %p9387_p12 = scmp.lt.s32.totalorder %s9381_s24, %s9381_s24 }
 0x409   :  { %9056 = vmatpush3.bf16.msra.mxu1 %v9262_v51  ;;  %9035 = vmatprep.subr.bf16.mxu0 %v9263_v28  ;;  %v1156_v51 = vsub.s32 7, %v9490_v44  ;;  %v1145_v28 = vrot.slane %v9678_v58, %v1144_v63 }
 0x40a   :  { %9057 = vmatprep.subr.bf16.mxu1 %v9264_v38  ;;  %v1153_v38 = vrot.slane %v9678_v58, %v1152_v22  ;;  %p9388_p13 = por %p9387_p12, %p9386_p11 }
 0x40b   :  { %v1157_v55 = vrot.slane %v9678_v58, %v1156_v51 }
 0x40c   :  { %9036 = vmatpush3.bf16.msra.mxu0 %v9265_v40  ;;  %v1149_v40 = vrot.slane %v9678_v58, %v1148_v37  ;;  %p9389_p0 = pnand %p9388_p13, %p9382_p10 }
 0x40d   :  { %9058 = vmatpush3.bf16.msra.mxu1 %v9266_v39  ;;  %9037 = vmatprep.subr.bf16.mxu0 %v9267_v42 }
 0x40e   :  { %9059 = vmatprep.subr.bf16.mxu1 %v9268_v46 }
 0x410   :  { %9038 = vmatpush3.bf16.msra.mxu0 %v9269_v59 }
 0x411   :  { %9060 = vmatpush3.bf16.msra.mxu1 %v9270_v48  ;;  %9039 = vmatprep.subr.bf16.mxu0 %v9271_v49 }
 0x412   :  { %9061 = vmatprep.subr.bf16.mxu1 %v9272_v56 }
 0x414   :  { %9040 = vmatpush3.bf16.msra.mxu0 %v9273_v54 }
 0x415   :  { %9062 = vmatpush3.bf16.msra.mxu1 %v9274_v25  ;;  %9041 = vmatprep.subr.bf16.mxu0 %v9275_v53 }
 0x416   :  { %9063 = vmatprep.subr.bf16.mxu1 %v9276_v0 }
 0x418   :  { %9042 = vmatpush3.bf16.msra.mxu0 %v9277_v20 }
 0x419   :  { %9064 = vmatpush3.bf16.msra.mxu1 %v9278_v23  ;;  %9071 = vmatprep.subr.bf16.mxu0 %v9279_v43 }
 0x41a   :  { %9093 = vmatprep.subr.bf16.mxu1 %v9280_v61 }
 0x41b   :  { %7846 = vmatmul.mubr.bf16.vlgmr.msra.gmra.mrb[8].mxu0 %v7286_v12 }
 0x41c   :  { %7886 = vmatmul.mubr.bf16.vlgmr.msra.gmra.mrb[8].mxu1 %v7288_v13  ;;  %9072 = vmatpush3.bf16.msra.mxu0 %v9281_v62 }
 0x41d   :  { %9094 = vmatpush3.bf16.msra.mxu1 %v9282_v1  ;;  %9073 = vmatprep.subr.bf16.mxu0 %v9283_v36 }
 0x41e   :  { %9095 = vmatprep.subr.bf16.mxu1 %v9284_v3 }
 0x420   :  { %9074 = vmatpush3.bf16.msra.mxu0 %v9285_v4 }
 0x421   :  { %9096 = vmatpush3.bf16.msra.mxu1 %v9286_v5  ;;  %9075 = vmatprep.subr.bf16.mxu0 %v9287_v6 }
 0x422   :  { %9097 = vmatprep.subr.bf16.mxu1 %v9288_v7 }
 0x424   :  { %9076 = vmatpush3.bf16.msra.mxu0 %v9289_v8 }
 0x425   :  { %9098 = vmatpush3.bf16.msra.mxu1 %v9290_v11  ;;  %9077 = vmatprep.subr.bf16.mxu0 %v9291_v14 }
 0x426   :  { %9099 = vmatprep.subr.bf16.mxu1 %v9292_v33 }
 0x428   :  { %9078 = vmatpush3.bf16.msra.mxu0 %v9293_v41 }
 0x429   :  { %9100 = vmatpush3.bf16.msra.mxu1 %v9294_v18  ;;  %9079 = vmatprep.subr.bf16.mxu0 %v9295_v15 }
 0x42a   :  { %9101 = vmatprep.subr.bf16.mxu1 %v9296_v17 }
 0x42c   :  { %9080 = vmatpush3.bf16.msra.mxu0 %v9297_v19 }
 0x42d   :  { %9102 = vmatpush3.bf16.msra.mxu1 %v9298_v21  ;;  %9081 = vmatprep.subr.bf16.mxu0 %v9299_v9 }
 0x42e   :  { %9103 = vmatprep.subr.bf16.mxu1 %v9300_v31 }
 0x430   :  { %9082 = vmatpush3.bf16.msra.mxu0 %v9301_v24 }
 0x431   :  { %9104 = vmatpush3.bf16.msra.mxu1 %v9302_v26  ;;  %9083 = vmatprep.subr.bf16.mxu0 %v9303_v27 }
 0x432   :  { %9105 = vmatprep.subr.bf16.mxu1 %v9304_v30 }
 0x434   :  { %9084 = vmatpush3.bf16.msra.mxu0 %v9305_v52 }
 0x435   :  { %9106 = vmatpush3.bf16.msra.mxu1 %v9306_v32  ;;  %9085 = vmatprep.subr.bf16.mxu0 %v9307_v29 }
 0x436   :  { %9107 = vmatprep.subr.bf16.mxu1 %v9308_v50 }
 0x438   :  { %9086 = vmatpush3.bf16.msra.mxu0 %v9309_v34 }
 0x439   :  { %9108 = vmatpush3.bf16.msra.mxu1 %v9310_v35 }
 0x4ce   :  { %v6943_v39 = vpop.f32.mrb[4].mxu0  ;;  %v7271_v45 = vpop.f32.mrb[4].mxu1 }
 0x4cf   :  { %v9119_v42 = vadd.f32 %v6943_v39, %v1145_v28  ;;  %v6945_v46 = vpop.f32.mrb[5].mxu0  ;;  %v9121_v59 = vadd.f32 %v7271_v45, %v1153_v38  ;;  %v7273_v48 = vpop.f32.mrb[5].mxu1 }
 0x4d0   :  { %v9120_v47 = vadd.f32 %v6945_v46, %v1149_v40  ;;  %v6947_v49 = vpop.f32.mrb[6].mxu0  ;;  %v9122_v56 = vadd.f32 %v7273_v48, %v1157_v55  ;;  %v7275_v54 = vpop.f32.mrb[6].mxu1 }
 0x4d1   :  { %v7282_v16 = vmax.f32 %v9119_v42, 0.0  ;;  %v6948_v44 = vpop.f32.mrb[7].mxu0  ;;  %v7284_v2 = vmax.f32 %v9121_v59, 0.0  ;;  %v7276_v53 = vpop.f32.mrb[7].mxu1 }
 0x4d2   :  { %v7283_v25 = vmax.f32 %v9120_v47, 0.0  ;;  %v7285_v57 = vmax.f32 %v9122_v56, 0.0 }
 0x4d3   :  { %v7290_v20 = vpack.c.bf16 %v7282_v16, %v7282_v16  ;;  %v7292_v58 = vpack.c.bf16 %v7284_v2, %v7284_v2 }
 0x4d4   :  { %v7291_v0 = vpack.c.bf16 %v7283_v25, %v7283_v25  ;;  %v7293_v10 = vpack.c.bf16 %v7285_v57, %v7285_v57 }
 0x4d6   :  { %7925 = vmatprep.mubr.bf16.mxu0 %v7291_v0  ;;  %7965 = vmatprep.mubr.bf16.mxu1 %v7293_v10 }
 0x4d7   :  { %7926 = vmatmul.mubr.bf16.vlgmr.msra.gmra.mrb[12].mxu0 %v7290_v20  ;;  %7966 = vmatmul.mubr.bf16.vlgmr.msra.gmra.mrb[12].mxu1 %v7292_v58 }
 0x4ee   :  { %v9043_v23 = vpop.f32.mrb[8].mxu0 }
 0x4ef   :  { %v9065_v43 = vpop.f32.mrb[8].mxu1  ;;  %v9044_v61 = vpop.f32.mrb[9].mxu0 }
 0x4f0   :  { %v9045_v62 = vadd.f32 %v9044_v61, %v9043_v23  ;;  %v9066_v12 = vpop.f32.mrb[9].mxu1  ;;  %v9046_v1 = vpop.f32.mrb[10].mxu0 }
 0x4f1   :  { %v9067_v36 = vadd.f32 %v9066_v12, %v9065_v43  ;;  %v9068_v13 = vpop.f32.mrb[10].mxu1  ;;  %v9047_v3 = vpop.f32.mrb[11].mxu0 }
 0x4f2   :  { %v7848_v4 = vadd.f32 %v9045_v62, %v8962_v60  ;;  %v9069_v5 = vpop.f32.mrb[11].mxu1 }
 0x4f4   :  { %v7888_v6 = vadd.f32 %v9067_v36, %v7848_v4 }
 0x5aa   :  { %v9087_v7 = vpop.f32.mrb[12].mxu0  ;;  %v9109_v8 = vpop.f32.mrb[12].mxu1 }
 0x5ab   :  { %v9088_v11 = vpop.f32.mrb[13].mxu0  ;;  %v9110_v33 = vpop.f32.mrb[13].mxu1 }
 0x5ac   :  { %v9089_v14 = vadd.f32 %v9088_v11, %v9087_v7  ;;  %v9090_v41 = vpop.f32.mrb[14].mxu0  ;;  %v9111_v18 = vadd.f32 %v9110_v33, %v9109_v8  ;;  %v9112_v15 = vpop.f32.mrb[14].mxu1 }
 0x5ad   :  { %v9091_v17 = vpop.f32.mrb[15].mxu0  ;;  %v9113_v21 = vpop.f32.mrb[15].mxu1 }
 0x5ae   :  { %v7928_v19 = vadd.f32 %v9089_v14, %v7888_v6 }
 0x5b0   :  { %v7968_v9 = vadd.f32 %v9111_v18, %v7928_v19 }
 0x5b2   :  { %v7974_v31 = vsel %vm7973_vm0, %v7968_v9, -inf }
 0x5b3   :  { %7975 = vmax.xlane.f32.xlu0 %v7974_v31 }
 0x640   :  { %v7976_v24 = vpop.xlane.xlu0 %7975 }
 0x641   :  { %v7977_v26 = vsub.f32 %v7968_v9, %v7976_v24 }
 0x643   :  { %v7978_v27 = vmul.f32 1.442695, %v7977_v26 }
 0x645   :  { %9311 = vpow2.f32 %v7978_v27 }
 0x64f   :  { %v9312_v30 = vpop.eup %9311 }
 0x650   :  { %v7980_v52 = vsel %vm7973_vm0, %v9312_v30, 0.0 }
 0x651   :  { %7981 = vadd.xlane.f32.xlu0 %v7980_v52 }
 0x6de   :  { %v7982_v32 = vpop.xlane.xlu0 %7981 }
 0x6df   :  { %9313 = vrcp.f32 %v7982_v32 }
 0x6e9   :  { %v9314_v29 = vpop.eup %9313 }
 0x6ea   :  { %v7984_v50 = vmul.f32 %v9314_v29, %v9312_v30 }
 0x6ec   :  { %7985 = vst.msk [vmem:[#allocation8] sm:$0x3] %vm7973_vm0, %v7984_v50 }
 0x6ed   :  { %9392 = shalt.err (!%p9389_p0)
}
 0x6ee   :  { %s9393_s27 = scalar_lea.hbm %s9913_s5, 32 }
 0x6ef   :  { %p9394_p1 = scmp.ne.s32.totalorder %s9913_s5, %s9393_s27  ;;  %p9397_p2 = scmp.lt.u32.totalorder %s9393_s27, %s9913_s5 }
 0x6f1   :  { %p9399_p3 = pnand %p9397_p2, %p9394_p1 }
 0x6f3   :  { %9402 = shalt.err (!%p9399_p3)
}
 0x6f4   :  { %7995 = dma.vmem_to_hbm [thread:$0]  %s7993_s23, 32, %s9913_s5, [#allocation4]  }
 0x6f5   :  { %9407 = dma.done.wait [#allocation4], 32  }
 0x6f6   :  { %9408 = vsyncadd [#allocation4], 4294967264 }
 0x6f7   :  { %7999 = vsyncpa [#allocation3], 1 }
 0x6f8   :  { %8000 = vsyncpa [#allocation6], 1 }
 0x6f9   :  { %8001 = vsyncpa [#allocation4], 1 }

</bundles_post_ra>
